<compile_context>
chip_gen: v6e
topology: v6e:2x2x1
jax: 0.10.0
libtpu: 0.0.40
codegen_flags: <defaults>
</compile_context>

<pallas_src>
import math
import functools

import jax
import jax.numpy as jnp
from jax.experimental import pallas as pl
from jax.experimental.pallas import tpu as pltpu


PIXEL_MEAN = jnp.array([123.675, 116.28, 103.53], dtype=jnp.float32)
PIXEL_STD = jnp.array([58.395, 57.12, 57.375], dtype=jnp.float32)

ENC_LAYER_KEYS = ("sa_wqkv", "sa_bqkv", "sa_wo", "sa_bo", "n1_g", "n1_b",
                  "w1", "b1", "w2", "b2", "n2_g", "n2_b")
DEC_LAYER_KEYS = ("sa_wqkv", "sa_bqkv", "sa_wo", "sa_bo", "n1_g", "n1_b",
                  "ca_wqkv", "ca_bqkv", "ca_wo", "ca_bo", "n2_g", "n2_b",
                  "w1", "b1", "w2", "b2", "n3_g", "n3_b")


# ----------------------------- BlockSpec helpers -----------------------------

def _bspec(shape):
    """Block over the leading (batch) grid axis; full extent elsewhere."""
    r = len(shape)
    return pl.BlockSpec((1,) + tuple(shape[1:]),
                        lambda b, _r=r: (b,) + (0,) * (_r - 1))


def _wspec(shape):
    """Whole-array block (weights); same (tiny) block for every grid step."""
    r = len(shape)
    return pl.BlockSpec(tuple(shape), lambda b, _r=r: (0,) * _r)


def _compiler_params():
    # Batch axis is genuinely parallel -> lets the 2 TensorCores on v7x split it.
    return pltpu.CompilerParams(dimension_semantics=("parallel",))


# --------------------------- in-kernel math helpers ---------------------------

def _linear(x, w, b, act=None):
    y = jnp.dot(x, w, preferred_element_type=jnp.float32) + b
    if act == "relu":
        y = jnp.maximum(y, 0.0)
    return y


def _layernorm(x, g, b, eps=1e-5):
    mu = jnp.mean(x, axis=-1, keepdims=True)
    var = jnp.mean(jnp.square(x - mu), axis=-1, keepdims=True)
    return (x - mu) * jax.lax.rsqrt(var + eps) * g + b


def _sigmoid(x):
    return 1.0 / (1.0 + jnp.exp(-x))


def _inverse_sigmoid(x, eps=1e-3):
    x = jnp.clip(x, 0.0, 1.0)
    x1 = jnp.maximum(x, eps)
    x2 = jnp.maximum(1.0 - x, eps)
    return jnp.log(x1 / x2)


def _mha(q_in, k_in, v_in, wqkv_ref, bqkv_ref, wo_ref, bo_ref, num_heads):
    """Multi-head attention fully inside the kernel.

    wqkv_ref: [3, H, D, dh], bqkv_ref: [3, H, 1, dh], wo_ref: [H, dh, D], bo_ref: [1, D].
    Head split/merge is done via leading-dim ref indexing and per-head output-proj
    accumulation (sum_h o_h @ wo_h == concat_h(o_h) @ wo), so no lane slicing.
    """
    dh = wqkv_ref.shape[-1]
    scale = 1.0 / math.sqrt(dh)
    out = None
    for h in range(num_heads):
        qh = jnp.dot(q_in, wqkv_ref[0, h], preferred_element_type=jnp.float32) + bqkv_ref[0, h]
        kh = jnp.dot(k_in, wqkv_ref[1, h], preferred_element_type=jnp.float32) + bqkv_ref[1, h]
        vh = jnp.dot(v_in, wqkv_ref[2, h], preferred_element_type=jnp.float32) + bqkv_ref[2, h]
        # scores: Lk sits on the lane axis
        s = jnp.dot(qh, kh.T, preferred_element_type=jnp.float32) * scale
        s = s - jnp.max(s, axis=-1, keepdims=True)
        p = jnp.exp(s)
        p = p * pl.reciprocal(jnp.sum(p, axis=-1, keepdims=True), approx=True)
        oh = jnp.dot(p, vh, preferred_element_type=jnp.float32)
        c = jnp.dot(oh, wo_ref[h], preferred_element_type=jnp.float32)
        out = c if out is None else out + c
    return out + bo_ref[...]


# ------------------------------- fused kernels --------------------------------

def _encoder_kernel(*refs, num_layers, num_heads):
    """Backbone 1x1 convs + input_proj + full encoder stack for one batch element."""
    feat_ref, pos_ref, bb_w, bb_b, pj_w, pj_b = refs[:6]
    out_ref = refs[-1]
    lrefs = refs[6:-1]

    pos = pos_ref[0]                                          # [N, D]
    h = _linear(feat_ref[0], bb_w[...], bb_b[...], "relu")    # backbone head (1x1 conv)
    src = _linear(h, pj_w[...], pj_b[...])                    # input_proj (1x1 conv)

    for l in range(num_layers):
        (sa_wqkv, sa_bqkv, sa_wo, sa_bo, n1_g, n1_b,
         w1, b1, w2, b2, n2_g, n2_b) = lrefs[12 * l:12 * (l + 1)]
        q = src + pos
        att = _mha(q, q, src, sa_wqkv, sa_bqkv, sa_wo, sa_bo, num_heads)
        src = _layernorm(src + att, n1_g[...], n1_b[...])
        f = _linear(_linear(src, w1[...], b1[...], "relu"), w2[...], b2[...])
        src = _layernorm(src + f, n2_g[...], n2_b[...])

    out_ref[0] = src


def _decoder_layer_kernel(tgt_ref, refb_ref, mem_ref, pos_ref, sine_ref,
                          rph_w1, rph_b1, rph_w2, rph_b2,
                          sa_wqkv, sa_bqkv, sa_wo, sa_bo, n1_g, n1_b,
                          ca_wqkv, ca_bqkv, ca_wo, ca_bo, n2_g, n2_b,
                          f_w1, f_b1, f_w2, f_b2, n3_g, n3_b,
                          bx_w1, bx_b1, bx_w2, bx_b2, bx_w3, bx_b3,
                          tgt_out, ref_out, *, num_heads):
    """One DAB/DN-style decoder layer + anchor refinement for one batch element."""
    x = tgt_ref[0]          # [Q, D]
    refb = refb_ref[0]      # [Q, 4] (sigmoid space)
    mem = mem_ref[0]        # [N, D]
    pos = pos_ref[0]        # [N, D]
    sine = sine_ref[0]      # [Q, D] precomputed query sine embedding

    # ref_point_head MLP -> query positional embedding (fused matmuls)
    qpos = _linear(_linear(sine, rph_w1[...], rph_b1[...], "relu"), rph_w2[...], rph_b2[...])

    # query self-attention
    q = x + qpos
    x = _layernorm(x + _mha(q, q, x, sa_wqkv, sa_bqkv, sa_wo, sa_bo, num_heads),
                   n1_g[...], n1_b[...])
    # cross-attention to encoder memory
    x = _layernorm(x + _mha(x + qpos, mem + pos, mem, ca_wqkv, ca_bqkv, ca_wo, ca_bo, num_heads),
                   n2_g[...], n2_b[...])
    # FFN
    x = _layernorm(x + _linear(_linear(x, f_w1[...], f_b1[...], "relu"), f_w2[...], f_b2[...]),
                   n3_g[...], n3_b[...])

    # iterative anchor-box refinement (shared bbox_embed MLP)
    h = _linear(x, bx_w1[...], bx_b1[...], "relu")
    h = _linear(h, bx_w2[...], bx_b2[...], "relu")
    delta = _linear(h, bx_w3[...], bx_b3[...])                # [Q, 4]

    tgt_out[0] = x
    ref_out[0] = _sigmoid(delta + _inverse_sigmoid(refb))


def _head_kernel(hs_ref, refb_ref,
                 bx_w1, bx_b1, bx_w2, bx_b2, bx_w3, bx_b3,
                 cls_w, cls_b, place_cls, place_box, out_ref):
    """Fused class + bbox heads; writes a single lane-dense [Q, 128] slab:
    columns [0:C) = sigmoid(class logits), [C:C+4) = xyxy box, rest = 0."""
    hs = hs_ref[0]          # [Q, D]
    refb = refb_ref[0]      # [Q, 4]

    h = _linear(hs, bx_w1[...], bx_b1[...], "relu")
    h = _linear(h, bx_w2[...], bx_b2[...], "relu")
    off = _linear(h, bx_w3[...], bx_b3[...])                          # [Q, 4]
    coord = _sigmoid(off + _inverse_sigmoid(refb))                    # cxcywh in (0, 1)

    cls = _sigmoid(_linear(hs, cls_w[...], cls_b[...]))               # [Q, C]

    # place_cls puts class probs in columns [0:C); place_box folds the cxcywh->xyxy
    # conversion matrix and places the result in columns [C:C+4). Lane-dense store.
    out_ref[0] = (jnp.dot(cls, place_cls[...], preferred_element_type=jnp.float32)
                  + jnp.dot(coord, place_box[...], preferred_element_type=jnp.float32))


# ------------------------------ pallas wrappers --------------------------------

def encoder_forward(params, feat3, pos, num_heads):
    B, N, _ = feat3.shape
    D = pos.shape[-1]
    args = [feat3, pos, params["bb_w"], params["bb_b"], params["proj_w"], params["proj_b"]]
    for lyr in params["enc_layers"]:
        args += [lyr[k] for k in ENC_LAYER_KEYS]
    in_specs = [_bspec(feat3.shape), _bspec(pos.shape)] + [_wspec(a.shape) for a in args[2:]]
    kernel = functools.partial(_encoder_kernel,
                               num_layers=len(params["enc_layers"]),
                               num_heads=num_heads)
    return pl.pallas_call(
        kernel,
        out_shape=jax.ShapeDtypeStruct((B, N, D), jnp.float32),
        grid=(B,),
        in_specs=in_specs,
        out_specs=_bspec((B, N, D)),
        compiler_params=_compiler_params(),
    )(*args)


def decoder_layer_forward(params, lyr, tgt, refb, memory, pos, sine, num_heads):
    B, Q, D = tgt.shape
    data = [tgt, refb, memory, pos, sine]
    weights = [params["rph_w1"], params["rph_b1"], params["rph_w2"], params["rph_b2"]]
    weights += [lyr[k] for k in DEC_LAYER_KEYS]
    weights += [params[k] for k in ("bbox_w1", "bbox_b1", "bbox_w2",
                                    "bbox_b2", "bbox_w3", "bbox_b3")]
    in_specs = [_bspec(a.shape) for a in data] + [_wspec(w.shape) for w in weights]
    kernel = functools.partial(_decoder_layer_kernel, num_heads=num_heads)
    return pl.pallas_call(
        kernel,
        out_shape=(jax.ShapeDtypeStruct((B, Q, D), jnp.float32),
                   jax.ShapeDtypeStruct((B, Q, 4), jnp.float32)),
        grid=(B,),
        in_specs=in_specs,
        out_specs=(_bspec((B, Q, D)), _bspec((B, Q, 4))),
        compiler_params=_compiler_params(),
    )(*data, *weights)


def head_forward(params, hs, refb):
    B, Q, _ = hs.shape
    weights = [params[k] for k in ("bbox_w1", "bbox_b1", "bbox_w2", "bbox_b2",
                                   "bbox_w3", "bbox_b3", "cls_w", "cls_b",
                                   "place_cls", "place_box")]
    in_specs = [_bspec(hs.shape), _bspec(refb.shape)] + [_wspec(w.shape) for w in weights]
    return pl.pallas_call(
        _head_kernel,
        out_shape=jax.ShapeDtypeStruct((B, Q, 128), jnp.float32),
        grid=(B,),
        in_specs=in_specs,
        out_specs=_bspec((B, Q, 128)),
        compiler_params=_compiler_params(),
    )(hs, refb, *weights)


# -------------------------------- XLA-side glue --------------------------------

def inverse_sigmoid(x, eps=1e-3):
    x = jnp.clip(x, 0.0, 1.0)
    x1 = jnp.clip(x, eps, None)
    x2 = jnp.clip(1.0 - x, eps, None)
    return jnp.log(x1 / x2)


def _interleave_sin_cos(p):
    s = jnp.sin(p[..., 0::2])
    c = jnp.cos(p[..., 1::2])
    return jnp.stack([s, c], axis=-1).reshape(*p.shape[:-1], -1)


def position_embedding_sine(mask, num_pos_feats, temperature=10000.0):
    # mask [B, H, W] bool (True = padded); returns [B, H, W, 2*num_pos_feats]
    not_mask = (~mask).astype(jnp.float32)
    y_embed = jnp.cumsum(not_mask, axis=1)
    x_embed = jnp.cumsum(not_mask, axis=2)
    eps = 1e-6
    scale = 2.0 * math.pi
    y_embed = y_embed / (y_embed[:, -1:, :] + eps) * scale
    x_embed = x_embed / (x_embed[:, :, -1:] + eps) * scale
    dim_t = temperature ** (2.0 * (jnp.arange(num_pos_feats) // 2) / num_pos_feats)
    pos_x = x_embed[..., None] / dim_t
    pos_y = y_embed[..., None] / dim_t
    return jnp.concatenate(
        [_interleave_sin_cos(pos_y), _interleave_sin_cos(pos_x)], axis=-1)


# -------------------------------- DN-DETR forward -------------------------------

def dn_detr_forward(params, images_nchw, cfg):
    D, Q, C = cfg["embed_dim"], cfg["num_queries"], cfg["num_classes"]
    H = cfg["num_heads"]
    # image normalization (NCHW, PyTorch convention)
    images = (images_nchw - PIXEL_MEAN.reshape(1, 3, 1, 1)) / PIXEL_STD.reshape(1, 3, 1, 1)
    B, _, Hi, Wi = images.shape
    # synthetic backbone stem: 4x4 average pool, channels-last
    x = images.transpose(0, 2, 3, 1)
    x = x.reshape(B, Hi // 4, 4, Wi // 4, 4, 3).mean(axis=(2, 4))      # [B, Hf, Wf, 3]
    Hf, Wf = x.shape[1], x.shape[2]
    N = Hf * Wf
    feat3 = x.reshape(B, N, 3)
    # padding mask (all valid) + sine position embedding
    mask = jnp.zeros((B, Hf, Wf), dtype=bool)
    pos = position_embedding_sine(mask, D // 2).reshape(B, N, D)

    # fused: backbone head + input_proj + encoder stack
    memory = encoder_forward(params, feat3, pos, H)                    # [B, N, D]

    # matching queries (inference path: targets is None, no attention mask)
    label_q = params["label_emb"][C]                                   # [D-1]
    label_q = jnp.concatenate([jnp.tile(label_q[None, :], (Q, 1)),
                               jnp.zeros((Q, 1), jnp.float32)], axis=1)  # [Q, D]
    tgt = jnp.broadcast_to(label_q[None], (B, Q, D))
    refb = jnp.broadcast_to(jax.nn.sigmoid(params["anchor"])[None], (B, Q, 4))

    for lyr in params["dec_layers"]:
        # Query sine embedding: sin/cos computed in the XLA wrapper (cheap, and avoids
        # relying on Mosaic sin/cos lowering). sine_proj folds the column selection and
        # the 1/dim_t scaling into one [4, D/2] matmul; the dimension permutation vs.
        # the interleaved PyTorch layout is absorbed by the learned ref_point_head.
        arg = jnp.einsum("bqf,fd->bqd", refb, params["sine_proj"])     # [B, Q, D/2]
        sine = jnp.concatenate([jnp.sin(arg), jnp.cos(arg)], axis=-1)  # [B, Q, D]
        tgt, refb = decoder_layer_forward(params, lyr, tgt, refb, memory, pos, sine, H)

    # fused prediction heads -> lane-dense [B, Q, 128] slab, sliced here
    out = head_forward(params, tgt, refb)
    out_cls = out[0, :, :C]                                            # [Q, num_classes]
    out_box = out[0, :, C:C + 4]                                       # [Q, 4] xyxy
    return out_cls, out_box


# --------------------------------- parameter init --------------------------------

def init_params(key, cfg):
    D, Q, C = cfg["embed_dim"], cfg["num_queries"], cfg["num_classes"]
    Cin, F, H = cfg["in_channels"], cfg["ffn_dim"], cfg["num_heads"]
    dh = D // H
    keys = iter(jax.random.split(key, 512))

    def w(shape, scale=0.02):
        return scale * jax.random.normal(next(keys), shape, dtype=jnp.float32)

    def zeros(shape):
        return jnp.zeros(shape, jnp.float32)

    def ones(shape):
        return jnp.ones(shape, jnp.float32)

    def attn():
        return {"wqkv": w((3, H, D, dh)), "bqkv": zeros((3, H, 1, dh)),
                "wo": w((H, dh, D)), "bo": zeros((1, D))}

    def enc_layer():
        a = attn()
        return {"sa_wqkv": a["wqkv"], "sa_bqkv": a["bqkv"], "sa_wo": a["wo"], "sa_bo": a["bo"],
                "n1_g": ones((1, D)), "n1_b": zeros((1, D)),
                "w1": w((D, F)), "b1": zeros((1, F)), "w2": w((F, D)), "b2": zeros((1, D)),
                "n2_g": ones((1, D)), "n2_b": zeros((1, D))}

    def dec_layer():
        sa, ca = attn(), attn()
        return {"sa_wqkv": sa["wqkv"], "sa_bqkv": sa["bqkv"], "sa_wo": sa["wo"], "sa_bo": sa["bo"],
                "n1_g": ones((1, D)), "n1_b": zeros((1, D)),
                "ca_wqkv": ca["wqkv"], "ca_bqkv": ca["bqkv"], "ca_wo": ca["wo"], "ca_bo": ca["bo"],
                "n2_g": ones((1, D)), "n2_b": zeros((1, D)),
                "w1": w((D, F)), "b1": zeros((1, F)), "w2": w((F, D)), "b2": zeros((1, D)),
                "n3_g": ones((1, D)), "n3_b": zeros((1, D))}

    # init_weights(): frozen anchor centers uniform(0,1)->inverse_sigmoid, (w,h)~N(0,1)
    centers = inverse_sigmoid(jax.random.uniform(next(keys), (Q, 2), jnp.float32))
    wh = jax.random.normal(next(keys), (Q, 2), jnp.float32)
    prior_prob = 0.01
    bias_value = -math.log((1.0 - prior_prob) / prior_prob)

    # constant matrices used by the fused kernels / wrapper
    hp = D // 4
    inv_dimt = (2.0 * math.pi) / (10000.0 ** (2.0 * jnp.arange(hp, dtype=jnp.float32) / (D // 2)))
    sine_proj = jnp.zeros((4, D // 2), jnp.float32)
    sine_proj = sine_proj.at[1, :hp].set(inv_dimt)   # y-coordinate -> first half
    sine_proj = sine_proj.at[0, hp:].set(inv_dimt)   # x-coordinate -> second half
    m_xyxy = jnp.array([[1.0, 0.0, 1.0, 0.0],
                        [0.0, 1.0, 0.0, 1.0],
                        [-0.5, 0.0, 0.5, 0.0],
                        [0.0, -0.5, 0.0, 0.5]], jnp.float32)   # cxcywh -> xyxy
    place_cls = jnp.zeros((C, 128), jnp.float32).at[:, :C].set(jnp.eye(C, dtype=jnp.float32))
    place_box = jnp.zeros((4, 128), jnp.float32).at[:, C:C + 4].set(m_xyxy)

    return {
        "bb_w": w((3, Cin)), "bb_b": zeros((1, Cin)),
        "proj_w": w((Cin, D)), "proj_b": zeros((1, D)),
        # GenerateDNQueries.label_encoder: Embedding(num_classes+1, embed_dim-1)
        "label_emb": w((C + 1, D - 1), scale=1.0),
        "anchor": jnp.concatenate([centers, wh], axis=1),               # [Q, 4]
        "cls_w": w((D, C)),
        "cls_b": jnp.full((1, C), bias_value, jnp.float32),             # class_embed bias
        # ref_point_head MLP
        "rph_w1": w((D, D)), "rph_b1": zeros((1, D)),
        "rph_w2": w((D, D)), "rph_b2": zeros((1, D)),
        # bbox_embed: 3-layer MLP, last layer zero-init per init_weights(); shared by
        # transformer.decoder.bbox_embed and the final head (weight tying).
        "bbox_w1": w((D, D)), "bbox_b1": zeros((1, D)),
        "bbox_w2": w((D, D)), "bbox_b2": zeros((1, D)),
        "bbox_w3": zeros((D, 4)), "bbox_b3": zeros((1, 4)),
        "sine_proj": sine_proj, "place_cls": place_cls, "place_box": place_box,
        "enc_layers": [enc_layer() for _ in range(cfg["num_enc_layers"])],
        "dec_layers": [dec_layer() for _ in range(cfg["num_dec_layers"])],
    }


# --------------------------------------- main ------------------------------------

if __name__ == "__main__":
    cfg = dict(embed_dim=32, num_queries=10, num_classes=6, in_channels=8,
               ffn_dim=64, num_enc_layers=1, num_dec_layers=2, num_heads=4)
    key = jax.random.PRNGKey(0)
    pkey, xkey = jax.random.split(key)
    params = init_params(pkey, cfg)
    images = jax.random.uniform(xkey, (2, 3, 32, 32), jnp.float32) * 255.0

    fwd = jax.jit(functools.partial(dn_detr_forward, cfg=cfg))
    out_cls, out_box = fwd(params, images)
    jax.block_until_ready((out_cls, out_box))

    assert out_cls.shape == (cfg["num_queries"], cfg["num_classes"])
    assert out_box.shape == (cfg["num_queries"], 4)
    assert bool(jnp.all(jnp.isfinite(out_cls))) and bool(jnp.all(jnp.isfinite(out_box)))
    print("KERNEL_OK")
</pallas_src>

<mosaic_0001>
module attributes {stable_mosaic.version = 11 : i64} {
  func.func @_encoder_kernel(%arg0: i32, %arg1: memref<1x64x3xf32, #tpu.memory_space<vmem>>, %arg2: memref<1x64x32xf32, #tpu.memory_space<vmem>>, %arg3: memref<3x8xf32, #tpu.memory_space<vmem>>, %arg4: memref<1x8xf32, #tpu.memory_space<vmem>>, %arg5: memref<8x32xf32, #tpu.memory_space<vmem>>, %arg6: memref<1x32xf32, #tpu.memory_space<vmem>>, %arg7: memref<3x4x32x8xf32, #tpu.memory_space<vmem>>, %arg8: memref<3x4x1x8xf32, #tpu.memory_space<vmem>>, %arg9: memref<4x8x32xf32, #tpu.memory_space<vmem>>, %arg10: memref<1x32xf32, #tpu.memory_space<vmem>>, %arg11: memref<1x32xf32, #tpu.memory_space<vmem>>, %arg12: memref<1x32xf32, #tpu.memory_space<vmem>>, %arg13: memref<32x64xf32, #tpu.memory_space<vmem>>, %arg14: memref<1x64xf32, #tpu.memory_space<vmem>>, %arg15: memref<64x32xf32, #tpu.memory_space<vmem>>, %arg16: memref<1x32xf32, #tpu.memory_space<vmem>>, %arg17: memref<1x32xf32, #tpu.memory_space<vmem>>, %arg18: memref<1x32xf32, #tpu.memory_space<vmem>>, %arg19: memref<1x64x32xf32, #tpu.memory_space<vmem>>) attributes {dimension_semantics = [#tpu.dimension_semantics<parallel>], iteration_bounds = array<i64: 2>, scalar_prefetch = 0 : i64, scratch_operands = 0 : i64, tpu.core_type = #tpu.core_type<tc>, window_params = [{transform_indices = @transform_0, window_bounds = array<i64: 1, 64, 3>}, {transform_indices = @transform_1, window_bounds = array<i64: 1, 64, 32>}, {pipeline_mode = #tpu.pipeline_mode<synchronous>, transform_indices = @transform_2, window_bounds = array<i64: 3, 8>}, {pipeline_mode = #tpu.pipeline_mode<synchronous>, transform_indices = @transform_3, window_bounds = array<i64: 1, 8>}, {pipeline_mode = #tpu.pipeline_mode<synchronous>, transform_indices = @transform_4, window_bounds = array<i64: 8, 32>}, {pipeline_mode = #tpu.pipeline_mode<synchronous>, transform_indices = @transform_5, window_bounds = array<i64: 1, 32>}, {pipeline_mode = #tpu.pipeline_mode<synchronous>, transform_indices = @transform_6, window_bounds = array<i64: 3, 4, 32, 8>}, {pipeline_mode = #tpu.pipeline_mode<synchronous>, transform_indices = @transform_7, window_bounds = array<i64: 3, 4, 1, 8>}, {pipeline_mode = #tpu.pipeline_mode<synchronous>, transform_indices = @transform_8, window_bounds = array<i64: 4, 8, 32>}, {pipeline_mode = #tpu.pipeline_mode<synchronous>, transform_indices = @transform_9, window_bounds = array<i64: 1, 32>}, {pipeline_mode = #tpu.pipeline_mode<synchronous>, transform_indices = @transform_10, window_bounds = array<i64: 1, 32>}, {pipeline_mode = #tpu.pipeline_mode<synchronous>, transform_indices = @transform_11, window_bounds = array<i64: 1, 32>}, {pipeline_mode = #tpu.pipeline_mode<synchronous>, transform_indices = @transform_12, window_bounds = array<i64: 32, 64>}, {pipeline_mode = #tpu.pipeline_mode<synchronous>, transform_indices = @transform_13, window_bounds = array<i64: 1, 64>}, {pipeline_mode = #tpu.pipeline_mode<synchronous>, transform_indices = @transform_14, window_bounds = array<i64: 64, 32>}, {pipeline_mode = #tpu.pipeline_mode<synchronous>, transform_indices = @transform_15, window_bounds = array<i64: 1, 32>}, {pipeline_mode = #tpu.pipeline_mode<synchronous>, transform_indices = @transform_16, window_bounds = array<i64: 1, 32>}, {pipeline_mode = #tpu.pipeline_mode<synchronous>, transform_indices = @transform_17, window_bounds = array<i64: 1, 32>}, {transform_indices = @transform_18, window_bounds = array<i64: 1, 64, 32>}]} {
    %c0 = arith.constant 0 : index
    %c0_0 = arith.constant 0 : index
    %c0_1 = arith.constant 0 : index
    %0 = vector.load %arg2[%c0, %c0_0, %c0_1] : memref<1x64x32xf32, #tpu.memory_space<vmem>>, vector<1x64x32xf32>
    %1 = vector.shape_cast %0 : vector<1x64x32xf32> to vector<64x32xf32>
    %c0_2 = arith.constant 0 : index
    %c0_3 = arith.constant 0 : index
    %c0_4 = arith.constant 0 : index
    %2 = vector.load %arg1[%c0_2, %c0_3, %c0_4] : memref<1x64x3xf32, #tpu.memory_space<vmem>>, vector<1x64x3xf32>
    %3 = vector.shape_cast %2 : vector<1x64x3xf32> to vector<64x3xf32>
    %c0_5 = arith.constant 0 : index
    %c0_6 = arith.constant 0 : index
    %4 = vector.load %arg3[%c0_5, %c0_6] : memref<3x8xf32, #tpu.memory_space<vmem>>, vector<3x8xf32>
    %c0_7 = arith.constant 0 : index
    %c0_8 = arith.constant 0 : index
    %5 = vector.load %arg4[%c0_7, %c0_8] : memref<1x8xf32, #tpu.memory_space<vmem>>, vector<1x8xf32>
    %cst = arith.constant dense<0.000000e+00> : vector<64x8xf32>
    %6 = tpu.matmul %3, %4, %cst {dimension_numbers = #tpu.dot_dimension_numbers<[1], [0], [0], [1], [0, 0, 1, 1], [], []>} : vector<64x3xf32>, vector<3x8xf32>, vector<64x8xf32> -> vector<64x8xf32>
    %7 = vector.broadcast %5 : vector<1x8xf32> to vector<64x8xf32>
    %8 = arith.addf %6, %7 : vector<64x8xf32>
    %cst_9 = arith.constant 0.000000e+00 : f32
    %9 = vector.broadcast %cst_9 : f32 to vector<64x8xf32>
    %10 = arith.maximumf %8, %9 : vector<64x8xf32>
    %c0_10 = arith.constant 0 : index
    %c0_11 = arith.constant 0 : index
    %11 = vector.load %arg5[%c0_10, %c0_11] : memref<8x32xf32, #tpu.memory_space<vmem>>, vector<8x32xf32>
    %c0_12 = arith.constant 0 : index
    %c0_13 = arith.constant 0 : index
    %12 = vector.load %arg6[%c0_12, %c0_13] : memref<1x32xf32, #tpu.memory_space<vmem>>, vector<1x32xf32>
    %cst_14 = arith.constant dense<0.000000e+00> : vector<64x32xf32>
    %13 = tpu.matmul %10, %11, %cst_14 {dimension_numbers = #tpu.dot_dimension_numbers<[1], [0], [0], [1], [0, 0, 1, 1], [], []>} : vector<64x8xf32>, vector<8x32xf32>, vector<64x32xf32> -> vector<64x32xf32>
    %14 = vector.broadcast %12 : vector<1x32xf32> to vector<64x32xf32>
    %15 = arith.addf %13, %14 : vector<64x32xf32>
    %16 = arith.addf %15, %1 : vector<64x32xf32>
    %c0_15 = arith.constant 0 : index
    %c0_16 = arith.constant 0 : index
    %c0_17 = arith.constant 0 : index
    %c0_18 = arith.constant 0 : index
    %17 = vector.load %arg7[%c0_15, %c0_16, %c0_17, %c0_18] : memref<3x4x32x8xf32, #tpu.memory_space<vmem>>, vector<1x1x32x8xf32>
    %18 = vector.shape_cast %17 : vector<1x1x32x8xf32> to vector<32x8xf32>
    %cst_19 = arith.constant dense<0.000000e+00> : vector<64x8xf32>
    %19 = tpu.matmul %16, %18, %cst_19 {dimension_numbers = #tpu.dot_dimension_numbers<[1], [0], [0], [1], [0, 0, 1, 1], [], []>} : vector<64x32xf32>, vector<32x8xf32>, vector<64x8xf32> -> vector<64x8xf32>
    %c0_20 = arith.constant 0 : index
    %c0_21 = arith.constant 0 : index
    %c0_22 = arith.constant 0 : index
    %c0_23 = arith.constant 0 : index
    %20 = vector.load %arg8[%c0_20, %c0_21, %c0_22, %c0_23] : memref<3x4x1x8xf32, #tpu.memory_space<vmem>>, vector<1x1x1x8xf32>
    %21 = vector.shape_cast %20 : vector<1x1x1x8xf32> to vector<1x8xf32>
    %22 = vector.broadcast %21 : vector<1x8xf32> to vector<64x8xf32>
    %23 = arith.addf %19, %22 : vector<64x8xf32>
    %c1 = arith.constant 1 : index
    %c0_24 = arith.constant 0 : index
    %c0_25 = arith.constant 0 : index
    %c0_26 = arith.constant 0 : index
    %24 = vector.load %arg7[%c1, %c0_24, %c0_25, %c0_26] : memref<3x4x32x8xf32, #tpu.memory_space<vmem>>, vector<1x1x32x8xf32>
    %25 = vector.shape_cast %24 : vector<1x1x32x8xf32> to vector<32x8xf32>
    %cst_27 = arith.constant dense<0.000000e+00> : vector<64x8xf32>
    %26 = tpu.matmul %16, %25, %cst_27 {dimension_numbers = #tpu.dot_dimension_numbers<[1], [0], [0], [1], [0, 0, 1, 1], [], []>} : vector<64x32xf32>, vector<32x8xf32>, vector<64x8xf32> -> vector<64x8xf32>
    %c1_28 = arith.constant 1 : index
    %c0_29 = arith.constant 0 : index
    %c0_30 = arith.constant 0 : index
    %c0_31 = arith.constant 0 : index
    %27 = vector.load %arg8[%c1_28, %c0_29, %c0_30, %c0_31] : memref<3x4x1x8xf32, #tpu.memory_space<vmem>>, vector<1x1x1x8xf32>
    %28 = vector.shape_cast %27 : vector<1x1x1x8xf32> to vector<1x8xf32>
    %29 = vector.broadcast %28 : vector<1x8xf32> to vector<64x8xf32>
    %30 = arith.addf %26, %29 : vector<64x8xf32>
    %c2 = arith.constant 2 : index
    %c0_32 = arith.constant 0 : index
    %c0_33 = arith.constant 0 : index
    %c0_34 = arith.constant 0 : index
    %31 = vector.load %arg7[%c2, %c0_32, %c0_33, %c0_34] : memref<3x4x32x8xf32, #tpu.memory_space<vmem>>, vector<1x1x32x8xf32>
    %32 = vector.shape_cast %31 : vector<1x1x32x8xf32> to vector<32x8xf32>
    %cst_35 = arith.constant dense<0.000000e+00> : vector<64x8xf32>
    %33 = tpu.matmul %15, %32, %cst_35 {dimension_numbers = #tpu.dot_dimension_numbers<[1], [0], [0], [1], [0, 0, 1, 1], [], []>} : vector<64x32xf32>, vector<32x8xf32>, vector<64x8xf32> -> vector<64x8xf32>
    %c2_36 = arith.constant 2 : index
    %c0_37 = arith.constant 0 : index
    %c0_38 = arith.constant 0 : index
    %c0_39 = arith.constant 0 : index
    %34 = vector.load %arg8[%c2_36, %c0_37, %c0_38, %c0_39] : memref<3x4x1x8xf32, #tpu.memory_space<vmem>>, vector<1x1x1x8xf32>
    %35 = vector.shape_cast %34 : vector<1x1x1x8xf32> to vector<1x8xf32>
    %36 = vector.broadcast %35 : vector<1x8xf32> to vector<64x8xf32>
    %37 = arith.addf %33, %36 : vector<64x8xf32>
    %38 = tpu.transpose %30, [1, 0] : vector<64x8xf32> -> vector<8x64xf32>
    %cst_40 = arith.constant dense<0.000000e+00> : vector<64x64xf32>
    %39 = tpu.matmul %23, %38, %cst_40 {dimension_numbers = #tpu.dot_dimension_numbers<[1], [0], [0], [1], [0, 0, 1, 1], [], []>} : vector<64x8xf32>, vector<8x64xf32>, vector<64x64xf32> -> vector<64x64xf32>
    %cst_41 = arith.constant 0.353553385 : f32
    %40 = vector.broadcast %cst_41 : f32 to vector<64x64xf32>
    %41 = arith.mulf %39, %40 : vector<64x64xf32>
    %cst_42 = arith.constant dense<0xFF800000> : vector<64xf32>
    %42 = vector.multi_reduction <maximumf>, %41, %cst_42 [1] : vector<64x64xf32> to vector<64xf32>
    %43 = vector.shape_cast %42 : vector<64xf32> to vector<64x1xf32>
    %44 = vector.broadcast %43 : vector<64x1xf32> to vector<64x64xf32>
    %45 = arith.subf %41, %44 : vector<64x64xf32>
    %46 = math.exp %45 : vector<64x64xf32>
    %cst_43 = arith.constant dense<0.000000e+00> : vector<64xf32>
    %47 = vector.multi_reduction <add>, %46, %cst_43 [1] : vector<64x64xf32> to vector<64xf32>
    %48 = vector.shape_cast %47 : vector<64xf32> to vector<64x1xf32>
    %49 = tpu.reciprocal %48 {approx = true} : vector<64x1xf32> -> vector<64x1xf32>
    %50 = vector.broadcast %49 : vector<64x1xf32> to vector<64x64xf32>
    %51 = arith.mulf %46, %50 : vector<64x64xf32>
    %cst_44 = arith.constant dense<0.000000e+00> : vector<64x8xf32>
    %52 = tpu.matmul %51, %37, %cst_44 {dimension_numbers = #tpu.dot_dimension_numbers<[1], [0], [0], [1], [0, 0, 1, 1], [], []>} : vector<64x64xf32>, vector<64x8xf32>, vector<64x8xf32> -> vector<64x8xf32>
    %c0_45 = arith.constant 0 : index
    %c0_46 = arith.constant 0 : index
    %c0_47 = arith.constant 0 : index
    %53 = vector.load %arg9[%c0_45, %c0_46, %c0_47] : memref<4x8x32xf32, #tpu.memory_space<vmem>>, vector<1x8x32xf32>
    %54 = vector.shape_cast %53 : vector<1x8x32xf32> to vector<8x32xf32>
    %cst_48 = arith.constant dense<0.000000e+00> : vector<64x32xf32>
    %55 = tpu.matmul %52, %54, %cst_48 {dimension_numbers = #tpu.dot_dimension_numbers<[1], [0], [0], [1], [0, 0, 1, 1], [], []>} : vector<64x8xf32>, vector<8x32xf32>, vector<64x32xf32> -> vector<64x32xf32>
    %c0_49 = arith.constant 0 : index
    %c1_50 = arith.constant 1 : index
    %c0_51 = arith.constant 0 : index
    %c0_52 = arith.constant 0 : index
    %56 = vector.load %arg7[%c0_49, %c1_50, %c0_51, %c0_52] : memref<3x4x32x8xf32, #tpu.memory_space<vmem>>, vector<1x1x32x8xf32>
    %57 = vector.shape_cast %56 : vector<1x1x32x8xf32> to vector<32x8xf32>
    %cst_53 = arith.constant dense<0.000000e+00> : vector<64x8xf32>
    %58 = tpu.matmul %16, %57, %cst_53 {dimension_numbers = #tpu.dot_dimension_numbers<[1], [0], [0], [1], [0, 0, 1, 1], [], []>} : vector<64x32xf32>, vector<32x8xf32>, vector<64x8xf32> -> vector<64x8xf32>
    %c0_54 = arith.constant 0 : index
    %c1_55 = arith.constant 1 : index
    %c0_56 = arith.constant 0 : index
    %c0_57 = arith.constant 0 : index
    %59 = vector.load %arg8[%c0_54, %c1_55, %c0_56, %c0_57] : memref<3x4x1x8xf32, #tpu.memory_space<vmem>>, vector<1x1x1x8xf32>
    %60 = vector.shape_cast %59 : vector<1x1x1x8xf32> to vector<1x8xf32>
    %61 = vector.broadcast %60 : vector<1x8xf32> to vector<64x8xf32>
    %62 = arith.addf %58, %61 : vector<64x8xf32>
    %c1_58 = arith.constant 1 : index
    %c1_59 = arith.constant 1 : index
    %c0_60 = arith.constant 0 : index
    %c0_61 = arith.constant 0 : index
    %63 = vector.load %arg7[%c1_58, %c1_59, %c0_60, %c0_61] : memref<3x4x32x8xf32, #tpu.memory_space<vmem>>, vector<1x1x32x8xf32>
    %64 = vector.shape_cast %63 : vector<1x1x32x8xf32> to vector<32x8xf32>
    %cst_62 = arith.constant dense<0.000000e+00> : vector<64x8xf32>
    %65 = tpu.matmul %16, %64, %cst_62 {dimension_numbers = #tpu.dot_dimension_numbers<[1], [0], [0], [1], [0, 0, 1, 1], [], []>} : vector<64x32xf32>, vector<32x8xf32>, vector<64x8xf32> -> vector<64x8xf32>
    %c1_63 = arith.constant 1 : index
    %c1_64 = arith.constant 1 : index
    %c0_65 = arith.constant 0 : index
    %c0_66 = arith.constant 0 : index
    %66 = vector.load %arg8[%c1_63, %c1_64, %c0_65, %c0_66] : memref<3x4x1x8xf32, #tpu.memory_space<vmem>>, vector<1x1x1x8xf32>
    %67 = vector.shape_cast %66 : vector<1x1x1x8xf32> to vector<1x8xf32>
    %68 = vector.broadcast %67 : vector<1x8xf32> to vector<64x8xf32>
    %69 = arith.addf %65, %68 : vector<64x8xf32>
    %c2_67 = arith.constant 2 : index
    %c1_68 = arith.constant 1 : index
    %c0_69 = arith.constant 0 : index
    %c0_70 = arith.constant 0 : index
    %70 = vector.load %arg7[%c2_67, %c1_68, %c0_69, %c0_70] : memref<3x4x32x8xf32, #tpu.memory_space<vmem>>, vector<1x1x32x8xf32>
    %71 = vector.shape_cast %70 : vector<1x1x32x8xf32> to vector<32x8xf32>
    %cst_71 = arith.constant dense<0.000000e+00> : vector<64x8xf32>
    %72 = tpu.matmul %15, %71, %cst_71 {dimension_numbers = #tpu.dot_dimension_numbers<[1], [0], [0], [1], [0, 0, 1, 1], [], []>} : vector<64x32xf32>, vector<32x8xf32>, vector<64x8xf32> -> vector<64x8xf32>
    %c2_72 = arith.constant 2 : index
    %c1_73 = arith.constant 1 : index
    %c0_74 = arith.constant 0 : index
    %c0_75 = arith.constant 0 : index
    %73 = vector.load %arg8[%c2_72, %c1_73, %c0_74, %c0_75] : memref<3x4x1x8xf32, #tpu.memory_space<vmem>>, vector<1x1x1x8xf32>
    %74 = vector.shape_cast %73 : vector<1x1x1x8xf32> to vector<1x8xf32>
    %75 = vector.broadcast %74 : vector<1x8xf32> to vector<64x8xf32>
    %76 = arith.addf %72, %75 : vector<64x8xf32>
    %77 = tpu.transpose %69, [1, 0] : vector<64x8xf32> -> vector<8x64xf32>
    %cst_76 = arith.constant dense<0.000000e+00> : vector<64x64xf32>
    %78 = tpu.matmul %62, %77, %cst_76 {dimension_numbers = #tpu.dot_dimension_numbers<[1], [0], [0], [1], [0, 0, 1, 1], [], []>} : vector<64x8xf32>, vector<8x64xf32>, vector<64x64xf32> -> vector<64x64xf32>
    %cst_77 = arith.constant 0.353553385 : f32
    %79 = vector.broadcast %cst_77 : f32 to vector<64x64xf32>
    %80 = arith.mulf %78, %79 : vector<64x64xf32>
    %cst_78 = arith.constant dense<0xFF800000> : vector<64xf32>
    %81 = vector.multi_reduction <maximumf>, %80, %cst_78 [1] : vector<64x64xf32> to vector<64xf32>
    %82 = vector.shape_cast %81 : vector<64xf32> to vector<64x1xf32>
    %83 = vector.broadcast %82 : vector<64x1xf32> to vector<64x64xf32>
    %84 = arith.subf %80, %83 : vector<64x64xf32>
    %85 = math.exp %84 : vector<64x64xf32>
    %cst_79 = arith.constant dense<0.000000e+00> : vector<64xf32>
    %86 = vector.multi_reduction <add>, %85, %cst_79 [1] : vector<64x64xf32> to vector<64xf32>
    %87 = vector.shape_cast %86 : vector<64xf32> to vector<64x1xf32>
    %88 = tpu.reciprocal %87 {approx = true} : vector<64x1xf32> -> vector<64x1xf32>
    %89 = vector.broadcast %88 : vector<64x1xf32> to vector<64x64xf32>
    %90 = arith.mulf %85, %89 : vector<64x64xf32>
    %cst_80 = arith.constant dense<0.000000e+00> : vector<64x8xf32>
    %91 = tpu.matmul %90, %76, %cst_80 {dimension_numbers = #tpu.dot_dimension_numbers<[1], [0], [0], [1], [0, 0, 1, 1], [], []>} : vector<64x64xf32>, vector<64x8xf32>, vector<64x8xf32> -> vector<64x8xf32>
    %c1_81 = arith.constant 1 : index
    %c0_82 = arith.constant 0 : index
    %c0_83 = arith.constant 0 : index
    %92 = vector.load %arg9[%c1_81, %c0_82, %c0_83] : memref<4x8x32xf32, #tpu.memory_space<vmem>>, vector<1x8x32xf32>
    %93 = vector.shape_cast %92 : vector<1x8x32xf32> to vector<8x32xf32>
    %cst_84 = arith.constant dense<0.000000e+00> : vector<64x32xf32>
    %94 = tpu.matmul %91, %93, %cst_84 {dimension_numbers = #tpu.dot_dimension_numbers<[1], [0], [0], [1], [0, 0, 1, 1], [], []>} : vector<64x8xf32>, vector<8x32xf32>, vector<64x32xf32> -> vector<64x32xf32>
    %95 = arith.addf %55, %94 : vector<64x32xf32>
    %c0_85 = arith.constant 0 : index
    %c2_86 = arith.constant 2 : index
    %c0_87 = arith.constant 0 : index
    %c0_88 = arith.constant 0 : index
    %96 = vector.load %arg7[%c0_85, %c2_86, %c0_87, %c0_88] : memref<3x4x32x8xf32, #tpu.memory_space<vmem>>, vector<1x1x32x8xf32>
    %97 = vector.shape_cast %96 : vector<1x1x32x8xf32> to vector<32x8xf32>
    %cst_89 = arith.constant dense<0.000000e+00> : vector<64x8xf32>
    %98 = tpu.matmul %16, %97, %cst_89 {dimension_numbers = #tpu.dot_dimension_numbers<[1], [0], [0], [1], [0, 0, 1, 1], [], []>} : vector<64x32xf32>, vector<32x8xf32>, vector<64x8xf32> -> vector<64x8xf32>
    %c0_90 = arith.constant 0 : index
    %c2_91 = arith.constant 2 : index
    %c0_92 = arith.constant 0 : index
    %c0_93 = arith.constant 0 : index
    %99 = vector.load %arg8[%c0_90, %c2_91, %c0_92, %c0_93] : memref<3x4x1x8xf32, #tpu.memory_space<vmem>>, vector<1x1x1x8xf32>
    %100 = vector.shape_cast %99 : vector<1x1x1x8xf32> to vector<1x8xf32>
    %101 = vector.broadcast %100 : vector<1x8xf32> to vector<64x8xf32>
    %102 = arith.addf %98, %101 : vector<64x8xf32>
    %c1_94 = arith.constant 1 : index
    %c2_95 = arith.constant 2 : index
    %c0_96 = arith.constant 0 : index
    %c0_97 = arith.constant 0 : index
    %103 = vector.load %arg7[%c1_94, %c2_95, %c0_96, %c0_97] : memref<3x4x32x8xf32, #tpu.memory_space<vmem>>, vector<1x1x32x8xf32>
    %104 = vector.shape_cast %103 : vector<1x1x32x8xf32> to vector<32x8xf32>
    %cst_98 = arith.constant dense<0.000000e+00> : vector<64x8xf32>
    %105 = tpu.matmul %16, %104, %cst_98 {dimension_numbers = #tpu.dot_dimension_numbers<[1], [0], [0], [1], [0, 0, 1, 1], [], []>} : vector<64x32xf32>, vector<32x8xf32>, vector<64x8xf32> -> vector<64x8xf32>
    %c1_99 = arith.constant 1 : index
    %c2_100 = arith.constant 2 : index
    %c0_101 = arith.constant 0 : index
    %c0_102 = arith.constant 0 : index
    %106 = vector.load %arg8[%c1_99, %c2_100, %c0_101, %c0_102] : memref<3x4x1x8xf32, #tpu.memory_space<vmem>>, vector<1x1x1x8xf32>
    %107 = vector.shape_cast %106 : vector<1x1x1x8xf32> to vector<1x8xf32>
    %108 = vector.broadcast %107 : vector<1x8xf32> to vector<64x8xf32>
    %109 = arith.addf %105, %108 : vector<64x8xf32>
    %c2_103 = arith.constant 2 : index
    %c2_104 = arith.constant 2 : index
    %c0_105 = arith.constant 0 : index
    %c0_106 = arith.constant 0 : index
    %110 = vector.load %arg7[%c2_103, %c2_104, %c0_105, %c0_106] : memref<3x4x32x8xf32, #tpu.memory_space<vmem>>, vector<1x1x32x8xf32>
    %111 = vector.shape_cast %110 : vector<1x1x32x8xf32> to vector<32x8xf32>
    %cst_107 = arith.constant dense<0.000000e+00> : vector<64x8xf32>
    %112 = tpu.matmul %15, %111, %cst_107 {dimension_numbers = #tpu.dot_dimension_numbers<[1], [0], [0], [1], [0, 0, 1, 1], [], []>} : vector<64x32xf32>, vector<32x8xf32>, vector<64x8xf32> -> vector<64x8xf32>
    %c2_108 = arith.constant 2 : index
    %c2_109 = arith.constant 2 : index
    %c0_110 = arith.constant 0 : index
    %c0_111 = arith.constant 0 : index
    %113 = vector.load %arg8[%c2_108, %c2_109, %c0_110, %c0_111] : memref<3x4x1x8xf32, #tpu.memory_space<vmem>>, vector<1x1x1x8xf32>
    %114 = vector.shape_cast %113 : vector<1x1x1x8xf32> to vector<1x8xf32>
    %115 = vector.broadcast %114 : vector<1x8xf32> to vector<64x8xf32>
    %116 = arith.addf %112, %115 : vector<64x8xf32>
    %117 = tpu.transpose %109, [1, 0] : vector<64x8xf32> -> vector<8x64xf32>
    %cst_112 = arith.constant dense<0.000000e+00> : vector<64x64xf32>
    %118 = tpu.matmul %102, %117, %cst_112 {dimension_numbers = #tpu.dot_dimension_numbers<[1], [0], [0], [1], [0, 0, 1, 1], [], []>} : vector<64x8xf32>, vector<8x64xf32>, vector<64x64xf32> -> vector<64x64xf32>
    %cst_113 = arith.constant 0.353553385 : f32
    %119 = vector.broadcast %cst_113 : f32 to vector<64x64xf32>
    %120 = arith.mulf %118, %119 : vector<64x64xf32>
    %cst_114 = arith.constant dense<0xFF800000> : vector<64xf32>
    %121 = vector.multi_reduction <maximumf>, %120, %cst_114 [1] : vector<64x64xf32> to vector<64xf32>
    %122 = vector.shape_cast %121 : vector<64xf32> to vector<64x1xf32>
    %123 = vector.broadcast %122 : vector<64x1xf32> to vector<64x64xf32>
    %124 = arith.subf %120, %123 : vector<64x64xf32>
    %125 = math.exp %124 : vector<64x64xf32>
    %cst_115 = arith.constant dense<0.000000e+00> : vector<64xf32>
    %126 = vector.multi_reduction <add>, %125, %cst_115 [1] : vector<64x64xf32> to vector<64xf32>
    %127 = vector.shape_cast %126 : vector<64xf32> to vector<64x1xf32>
    %128 = tpu.reciprocal %127 {approx = true} : vector<64x1xf32> -> vector<64x1xf32>
    %129 = vector.broadcast %128 : vector<64x1xf32> to vector<64x64xf32>
    %130 = arith.mulf %125, %129 : vector<64x64xf32>
    %cst_116 = arith.constant dense<0.000000e+00> : vector<64x8xf32>
    %131 = tpu.matmul %130, %116, %cst_116 {dimension_numbers = #tpu.dot_dimension_numbers<[1], [0], [0], [1], [0, 0, 1, 1], [], []>} : vector<64x64xf32>, vector<64x8xf32>, vector<64x8xf32> -> vector<64x8xf32>
    %c2_117 = arith.constant 2 : index
    %c0_118 = arith.constant 0 : index
    %c0_119 = arith.constant 0 : index
    %132 = vector.load %arg9[%c2_117, %c0_118, %c0_119] : memref<4x8x32xf32, #tpu.memory_space<vmem>>, vector<1x8x32xf32>
    %133 = vector.shape_cast %132 : vector<1x8x32xf32> to vector<8x32xf32>
    %cst_120 = arith.constant dense<0.000000e+00> : vector<64x32xf32>
    %134 = tpu.matmul %131, %133, %cst_120 {dimension_numbers = #tpu.dot_dimension_numbers<[1], [0], [0], [1], [0, 0, 1, 1], [], []>} : vector<64x8xf32>, vector<8x32xf32>, vector<64x32xf32> -> vector<64x32xf32>
    %135 = arith.addf %95, %134 : vector<64x32xf32>
    %c0_121 = arith.constant 0 : index
    %c3 = arith.constant 3 : index
    %c0_122 = arith.constant 0 : index
    %c0_123 = arith.constant 0 : index
    %136 = vector.load %arg7[%c0_121, %c3, %c0_122, %c0_123] : memref<3x4x32x8xf32, #tpu.memory_space<vmem>>, vector<1x1x32x8xf32>
    %137 = vector.shape_cast %136 : vector<1x1x32x8xf32> to vector<32x8xf32>
    %cst_124 = arith.constant dense<0.000000e+00> : vector<64x8xf32>
    %138 = tpu.matmul %16, %137, %cst_124 {dimension_numbers = #tpu.dot_dimension_numbers<[1], [0], [0], [1], [0, 0, 1, 1], [], []>} : vector<64x32xf32>, vector<32x8xf32>, vector<64x8xf32> -> vector<64x8xf32>
    %c0_125 = arith.constant 0 : index
    %c3_126 = arith.constant 3 : index
    %c0_127 = arith.constant 0 : index
    %c0_128 = arith.constant 0 : index
    %139 = vector.load %arg8[%c0_125, %c3_126, %c0_127, %c0_128] : memref<3x4x1x8xf32, #tpu.memory_space<vmem>>, vector<1x1x1x8xf32>
    %140 = vector.shape_cast %139 : vector<1x1x1x8xf32> to vector<1x8xf32>
    %141 = vector.broadcast %140 : vector<1x8xf32> to vector<64x8xf32>
    %142 = arith.addf %138, %141 : vector<64x8xf32>
    %c1_129 = arith.constant 1 : index
    %c3_130 = arith.constant 3 : index
    %c0_131 = arith.constant 0 : index
    %c0_132 = arith.constant 0 : index
    %143 = vector.load %arg7[%c1_129, %c3_130, %c0_131, %c0_132] : memref<3x4x32x8xf32, #tpu.memory_space<vmem>>, vector<1x1x32x8xf32>
    %144 = vector.shape_cast %143 : vector<1x1x32x8xf32> to vector<32x8xf32>
    %cst_133 = arith.constant dense<0.000000e+00> : vector<64x8xf32>
    %145 = tpu.matmul %16, %144, %cst_133 {dimension_numbers = #tpu.dot_dimension_numbers<[1], [0], [0], [1], [0, 0, 1, 1], [], []>} : vector<64x32xf32>, vector<32x8xf32>, vector<64x8xf32> -> vector<64x8xf32>
    %c1_134 = arith.constant 1 : index
    %c3_135 = arith.constant 3 : index
    %c0_136 = arith.constant 0 : index
    %c0_137 = arith.constant 0 : index
    %146 = vector.load %arg8[%c1_134, %c3_135, %c0_136, %c0_137] : memref<3x4x1x8xf32, #tpu.memory_space<vmem>>, vector<1x1x1x8xf32>
    %147 = vector.shape_cast %146 : vector<1x1x1x8xf32> to vector<1x8xf32>
    %148 = vector.broadcast %147 : vector<1x8xf32> to vector<64x8xf32>
    %149 = arith.addf %145, %148 : vector<64x8xf32>
    %c2_138 = arith.constant 2 : index
    %c3_139 = arith.constant 3 : index
    %c0_140 = arith.constant 0 : index
    %c0_141 = arith.constant 0 : index
    %150 = vector.load %arg7[%c2_138, %c3_139, %c0_140, %c0_141] : memref<3x4x32x8xf32, #tpu.memory_space<vmem>>, vector<1x1x32x8xf32>
    %151 = vector.shape_cast %150 : vector<1x1x32x8xf32> to vector<32x8xf32>
    %cst_142 = arith.constant dense<0.000000e+00> : vector<64x8xf32>
    %152 = tpu.matmul %15, %151, %cst_142 {dimension_numbers = #tpu.dot_dimension_numbers<[1], [0], [0], [1], [0, 0, 1, 1], [], []>} : vector<64x32xf32>, vector<32x8xf32>, vector<64x8xf32> -> vector<64x8xf32>
    %c2_143 = arith.constant 2 : index
    %c3_144 = arith.constant 3 : index
    %c0_145 = arith.constant 0 : index
    %c0_146 = arith.constant 0 : index
    %153 = vector.load %arg8[%c2_143, %c3_144, %c0_145, %c0_146] : memref<3x4x1x8xf32, #tpu.memory_space<vmem>>, vector<1x1x1x8xf32>
    %154 = vector.shape_cast %153 : vector<1x1x1x8xf32> to vector<1x8xf32>
    %155 = vector.broadcast %154 : vector<1x8xf32> to vector<64x8xf32>
    %156 = arith.addf %152, %155 : vector<64x8xf32>
    %157 = tpu.transpose %149, [1, 0] : vector<64x8xf32> -> vector<8x64xf32>
    %cst_147 = arith.constant dense<0.000000e+00> : vector<64x64xf32>
    %158 = tpu.matmul %142, %157, %cst_147 {dimension_numbers = #tpu.dot_dimension_numbers<[1], [0], [0], [1], [0, 0, 1, 1], [], []>} : vector<64x8xf32>, vector<8x64xf32>, vector<64x64xf32> -> vector<64x64xf32>
    %cst_148 = arith.constant 0.353553385 : f32
    %159 = vector.broadcast %cst_148 : f32 to vector<64x64xf32>
    %160 = arith.mulf %158, %159 : vector<64x64xf32>
    %cst_149 = arith.constant dense<0xFF800000> : vector<64xf32>
    %161 = vector.multi_reduction <maximumf>, %160, %cst_149 [1] : vector<64x64xf32> to vector<64xf32>
    %162 = vector.shape_cast %161 : vector<64xf32> to vector<64x1xf32>
    %163 = vector.broadcast %162 : vector<64x1xf32> to vector<64x64xf32>
    %164 = arith.subf %160, %163 : vector<64x64xf32>
    %165 = math.exp %164 : vector<64x64xf32>
    %cst_150 = arith.constant dense<0.000000e+00> : vector<64xf32>
    %166 = vector.multi_reduction <add>, %165, %cst_150 [1] : vector<64x64xf32> to vector<64xf32>
    %167 = vector.shape_cast %166 : vector<64xf32> to vector<64x1xf32>
    %168 = tpu.reciprocal %167 {approx = true} : vector<64x1xf32> -> vector<64x1xf32>
    %169 = vector.broadcast %168 : vector<64x1xf32> to vector<64x64xf32>
    %170 = arith.mulf %165, %169 : vector<64x64xf32>
    %cst_151 = arith.constant dense<0.000000e+00> : vector<64x8xf32>
    %171 = tpu.matmul %170, %156, %cst_151 {dimension_numbers = #tpu.dot_dimension_numbers<[1], [0], [0], [1], [0, 0, 1, 1], [], []>} : vector<64x64xf32>, vector<64x8xf32>, vector<64x8xf32> -> vector<64x8xf32>
    %c3_152 = arith.constant 3 : index
    %c0_153 = arith.constant 0 : index
    %c0_154 = arith.constant 0 : index
    %172 = vector.load %arg9[%c3_152, %c0_153, %c0_154] : memref<4x8x32xf32, #tpu.memory_space<vmem>>, vector<1x8x32xf32>
    %173 = vector.shape_cast %172 : vector<1x8x32xf32> to vector<8x32xf32>
    %cst_155 = arith.constant dense<0.000000e+00> : vector<64x32xf32>
    %174 = tpu.matmul %171, %173, %cst_155 {dimension_numbers = #tpu.dot_dimension_numbers<[1], [0], [0], [1], [0, 0, 1, 1], [], []>} : vector<64x8xf32>, vector<8x32xf32>, vector<64x32xf32> -> vector<64x32xf32>
    %175 = arith.addf %135, %174 : vector<64x32xf32>
    %c0_156 = arith.constant 0 : index
    %c0_157 = arith.constant 0 : index
    %176 = vector.load %arg10[%c0_156, %c0_157] : memref<1x32xf32, #tpu.memory_space<vmem>>, vector<1x32xf32>
    %177 = vector.broadcast %176 : vector<1x32xf32> to vector<64x32xf32>
    %178 = arith.addf %175, %177 : vector<64x32xf32>
    %179 = arith.addf %15, %178 : vector<64x32xf32>
    %c0_158 = arith.constant 0 : index
    %c0_159 = arith.constant 0 : index
    %180 = vector.load %arg11[%c0_158, %c0_159] : memref<1x32xf32, #tpu.memory_space<vmem>>, vector<1x32xf32>
    %c0_160 = arith.constant 0 : index
    %c0_161 = arith.constant 0 : index
    %181 = vector.load %arg12[%c0_160, %c0_161] : memref<1x32xf32, #tpu.memory_space<vmem>>, vector<1x32xf32>
    %cst_162 = arith.constant dense<0.000000e+00> : vector<64xf32>
    %182 = vector.multi_reduction <add>, %179, %cst_162 [1] : vector<64x32xf32> to vector<64xf32>
    %183 = vector.shape_cast %182 : vector<64xf32> to vector<64x1xf32>
    %cst_163 = arith.constant 3.200000e+01 : f32
    %184 = vector.broadcast %cst_163 : f32 to vector<64x1xf32>
    %185 = arith.divf %183, %184 : vector<64x1xf32>
    %186 = vector.broadcast %185 : vector<64x1xf32> to vector<64x32xf32>
    %187 = arith.subf %179, %186 : vector<64x32xf32>
    %188 = arith.mulf %187, %187 : vector<64x32xf32>
    %cst_164 = arith.constant dense<0.000000e+00> : vector<64xf32>
    %189 = vector.multi_reduction <add>, %188, %cst_164 [1] : vector<64x32xf32> to vector<64xf32>
    %190 = vector.shape_cast %189 : vector<64xf32> to vector<64x1xf32>
    %cst_165 = arith.constant 3.200000e+01 : f32
    %191 = vector.broadcast %cst_165 : f32 to vector<64x1xf32>
    %192 = arith.divf %190, %191 : vector<64x1xf32>
    %193 = vector.broadcast %185 : vector<64x1xf32> to vector<64x32xf32>
    %194 = arith.subf %179, %193 : vector<64x32xf32>
    %cst_166 = arith.constant 9.99999974E-6 : f32
    %195 = vector.broadcast %cst_166 : f32 to vector<64x1xf32>
    %196 = arith.addf %192, %195 : vector<64x1xf32>
    %197 = math.rsqrt %196 : vector<64x1xf32>
    %198 = vector.broadcast %197 : vector<64x1xf32> to vector<64x32xf32>
    %199 = arith.mulf %194, %198 : vector<64x32xf32>
    %200 = vector.broadcast %180 : vector<1x32xf32> to vector<64x32xf32>
    %201 = arith.mulf %199, %200 : vector<64x32xf32>
    %202 = vector.broadcast %181 : vector<1x32xf32> to vector<64x32xf32>
    %203 = arith.addf %201, %202 : vector<64x32xf32>
    %c0_167 = arith.constant 0 : index
    %c0_168 = arith.constant 0 : index
    %204 = vector.load %arg13[%c0_167, %c0_168] : memref<32x64xf32, #tpu.memory_space<vmem>>, vector<32x64xf32>
    %c0_169 = arith.constant 0 : index
    %c0_170 = arith.constant 0 : index
    %205 = vector.load %arg14[%c0_169, %c0_170] : memref<1x64xf32, #tpu.memory_space<vmem>>, vector<1x64xf32>
    %cst_171 = arith.constant dense<0.000000e+00> : vector<64x64xf32>
    %206 = tpu.matmul %203, %204, %cst_171 {dimension_numbers = #tpu.dot_dimension_numbers<[1], [0], [0], [1], [0, 0, 1, 1], [], []>} : vector<64x32xf32>, vector<32x64xf32>, vector<64x64xf32> -> vector<64x64xf32>
    %207 = vector.broadcast %205 : vector<1x64xf32> to vector<64x64xf32>
    %208 = arith.addf %206, %207 : vector<64x64xf32>
    %cst_172 = arith.constant 0.000000e+00 : f32
    %209 = vector.broadcast %cst_172 : f32 to vector<64x64xf32>
    %210 = arith.maximumf %208, %209 : vector<64x64xf32>
    %c0_173 = arith.constant 0 : index
    %c0_174 = arith.constant 0 : index
    %211 = vector.load %arg15[%c0_173, %c0_174] : memref<64x32xf32, #tpu.memory_space<vmem>>, vector<64x32xf32>
    %c0_175 = arith.constant 0 : index
    %c0_176 = arith.constant 0 : index
    %212 = vector.load %arg16[%c0_175, %c0_176] : memref<1x32xf32, #tpu.memory_space<vmem>>, vector<1x32xf32>
    %cst_177 = arith.constant dense<0.000000e+00> : vector<64x32xf32>
    %213 = tpu.matmul %210, %211, %cst_177 {dimension_numbers = #tpu.dot_dimension_numbers<[1], [0], [0], [1], [0, 0, 1, 1], [], []>} : vector<64x64xf32>, vector<64x32xf32>, vector<64x32xf32> -> vector<64x32xf32>
    %214 = vector.broadcast %212 : vector<1x32xf32> to vector<64x32xf32>
    %215 = arith.addf %213, %214 : vector<64x32xf32>
    %216 = arith.addf %203, %215 : vector<64x32xf32>
    %c0_178 = arith.constant 0 : index
    %c0_179 = arith.constant 0 : index
    %217 = vector.load %arg17[%c0_178, %c0_179] : memref<1x32xf32, #tpu.memory_space<vmem>>, vector<1x32xf32>
    %c0_180 = arith.constant 0 : index
    %c0_181 = arith.constant 0 : index
    %218 = vector.load %arg18[%c0_180, %c0_181] : memref<1x32xf32, #tpu.memory_space<vmem>>, vector<1x32xf32>
    %cst_182 = arith.constant dense<0.000000e+00> : vector<64xf32>
    %219 = vector.multi_reduction <add>, %216, %cst_182 [1] : vector<64x32xf32> to vector<64xf32>
    %220 = vector.shape_cast %219 : vector<64xf32> to vector<64x1xf32>
    %cst_183 = arith.constant 3.200000e+01 : f32
    %221 = vector.broadcast %cst_183 : f32 to vector<64x1xf32>
    %222 = arith.divf %220, %221 : vector<64x1xf32>
    %223 = vector.broadcast %222 : vector<64x1xf32> to vector<64x32xf32>
    %224 = arith.subf %216, %223 : vector<64x32xf32>
    %225 = arith.mulf %224, %224 : vector<64x32xf32>
    %cst_184 = arith.constant dense<0.000000e+00> : vector<64xf32>
    %226 = vector.multi_reduction <add>, %225, %cst_184 [1] : vector<64x32xf32> to vector<64xf32>
    %227 = vector.shape_cast %226 : vector<64xf32> to vector<64x1xf32>
    %cst_185 = arith.constant 3.200000e+01 : f32
    %228 = vector.broadcast %cst_185 : f32 to vector<64x1xf32>
    %229 = arith.divf %227, %228 : vector<64x1xf32>
    %230 = vector.broadcast %222 : vector<64x1xf32> to vector<64x32xf32>
    %231 = arith.subf %216, %230 : vector<64x32xf32>
    %cst_186 = arith.constant 9.99999974E-6 : f32
    %232 = vector.broadcast %cst_186 : f32 to vector<64x1xf32>
    %233 = arith.addf %229, %232 : vector<64x1xf32>
    %234 = math.rsqrt %233 : vector<64x1xf32>
    %235 = vector.broadcast %234 : vector<64x1xf32> to vector<64x32xf32>
    %236 = arith.mulf %231, %235 : vector<64x32xf32>
    %237 = vector.broadcast %217 : vector<1x32xf32> to vector<64x32xf32>
    %238 = arith.mulf %236, %237 : vector<64x32xf32>
    %239 = vector.broadcast %218 : vector<1x32xf32> to vector<64x32xf32>
    %240 = arith.addf %238, %239 : vector<64x32xf32>
    %c0_187 = arith.constant 0 : index
    %c0_188 = arith.constant 0 : index
    %c0_189 = arith.constant 0 : index
    %241 = vector.load %arg19[%c0_187, %c0_188, %c0_189] : memref<1x64x32xf32, #tpu.memory_space<vmem>>, vector<1x64x32xf32>
    %242 = vector.shape_cast %241 : vector<1x64x32xf32> to vector<64x32xf32>
    %243 = vector.shape_cast %240 : vector<64x32xf32> to vector<1x64x32xf32>
    tpu.vector_store %arg19[%c0_187, %c0_188, %c0_189], %243 {strides = array<i32>} : memref<1x64x32xf32, #tpu.memory_space<vmem>>, vector<1x64x32xf32>,
    return
  }
  func.func @transform_0(%arg0: i32) -> (i32, i32, i32) {
    %c0_i32 = arith.constant 0 : i32
    %c0_i32_0 = arith.constant 0 : i32
    %c0_i32_1 = arith.constant 0 : i32
    return %arg0, %c0_i32, %c0_i32_0 : i32, i32, i32
  }
  func.func @transform_1(%arg0: i32) -> (i32, i32, i32) {
    %c0_i32 = arith.constant 0 : i32
    %c0_i32_0 = arith.constant 0 : i32
    %c0_i32_1 = arith.constant 0 : i32
    return %arg0, %c0_i32, %c0_i32_0 : i32, i32, i32
  }
  func.func @transform_2(%arg0: i32) -> (i32, i32) {
    %c0_i32 = arith.constant 0 : i32
    %c0_i32_0 = arith.constant 0 : i32
    %c0_i32_1 = arith.constant 0 : i32
    return %c0_i32, %c0_i32_0 : i32, i32
  }
  func.func @transform_3(%arg0: i32) -> (i32, i32) {
    %c0_i32 = arith.constant 0 : i32
    %c0_i32_0 = arith.constant 0 : i32
    %c0_i32_1 = arith.constant 0 : i32
    return %c0_i32, %c0_i32_0 : i32, i32
  }
  func.func @transform_4(%arg0: i32) -> (i32, i32) {
    %c0_i32 = arith.constant 0 : i32
    %c0_i32_0 = arith.constant 0 : i32
    %c0_i32_1 = arith.constant 0 : i32
    return %c0_i32, %c0_i32_0 : i32, i32
  }
  func.func @transform_5(%arg0: i32) -> (i32, i32) {
    %c0_i32 = arith.constant 0 : i32
    %c0_i32_0 = arith.constant 0 : i32
    %c0_i32_1 = arith.constant 0 : i32
    return %c0_i32, %c0_i32_0 : i32, i32
  }
  func.func @transform_6(%arg0: i32) -> (i32, i32, i32, i32) {
    %c0_i32 = arith.constant 0 : i32
    %c0_i32_0 = arith.constant 0 : i32
    %c0_i32_1 = arith.constant 0 : i32
    %c0_i32_2 = arith.constant 0 : i32
    %c0_i32_3 = arith.constant 0 : i32
    return %c0_i32, %c0_i32_0, %c0_i32_1, %c0_i32_2 : i32, i32, i32, i32
  }
  func.func @transform_7(%arg0: i32) -> (i32, i32, i32, i32) {
    %c0_i32 = arith.constant 0 : i32
    %c0_i32_0 = arith.constant 0 : i32
    %c0_i32_1 = arith.constant 0 : i32
    %c0_i32_2 = arith.constant 0 : i32
    %c0_i32_3 = arith.constant 0 : i32
    return %c0_i32, %c0_i32_0, %c0_i32_1, %c0_i32_2 : i32, i32, i32, i32
  }
  func.func @transform_8(%arg0: i32) -> (i32, i32, i32) {
    %c0_i32 = arith.constant 0 : i32
    %c0_i32_0 = arith.constant 0 : i32
    %c0_i32_1 = arith.constant 0 : i32
    %c0_i32_2 = arith.constant 0 : i32
    return %c0_i32, %c0_i32_0, %c0_i32_1 : i32, i32, i32
  }
  func.func @transform_9(%arg0: i32) -> (i32, i32) {
    %c0_i32 = arith.constant 0 : i32
    %c0_i32_0 = arith.constant 0 : i32
    %c0_i32_1 = arith.constant 0 : i32
    return %c0_i32, %c0_i32_0 : i32, i32
  }
  func.func @transform_10(%arg0: i32) -> (i32, i32) {
    %c0_i32 = arith.constant 0 : i32
    %c0_i32_0 = arith.constant 0 : i32
    %c0_i32_1 = arith.constant 0 : i32
    return %c0_i32, %c0_i32_0 : i32, i32
  }
  func.func @transform_11(%arg0: i32) -> (i32, i32) {
    %c0_i32 = arith.constant 0 : i32
    %c0_i32_0 = arith.constant 0 : i32
    %c0_i32_1 = arith.constant 0 : i32
    return %c0_i32, %c0_i32_0 : i32, i32
  }
  func.func @transform_12(%arg0: i32) -> (i32, i32) {
    %c0_i32 = arith.constant 0 : i32
    %c0_i32_0 = arith.constant 0 : i32
    %c0_i32_1 = arith.constant 0 : i32
    return %c0_i32, %c0_i32_0 : i32, i32
  }
  func.func @transform_13(%arg0: i32) -> (i32, i32) {
    %c0_i32 = arith.constant 0 : i32
    %c0_i32_0 = arith.constant 0 : i32
    %c0_i32_1 = arith.constant 0 : i32
    return %c0_i32, %c0_i32_0 : i32, i32
  }
  func.func @transform_14(%arg0: i32) -> (i32, i32) {
    %c0_i32 = arith.constant 0 : i32
    %c0_i32_0 = arith.constant 0 : i32
    %c0_i32_1 = arith.constant 0 : i32
    return %c0_i32, %c0_i32_0 : i32, i32
  }
  func.func @transform_15(%arg0: i32) -> (i32, i32) {
    %c0_i32 = arith.constant 0 : i32
    %c0_i32_0 = arith.constant 0 : i32
    %c0_i32_1 = arith.constant 0 : i32
    return %c0_i32, %c0_i32_0 : i32, i32
  }
  func.func @transform_16(%arg0: i32) -> (i32, i32) {
    %c0_i32 = arith.constant 0 : i32
    %c0_i32_0 = arith.constant 0 : i32
    %c0_i32_1 = arith.constant 0 : i32
    return %c0_i32, %c0_i32_0 : i32, i32
  }
  func.func @transform_17(%arg0: i32) -> (i32, i32) {
    %c0_i32 = arith.constant 0 : i32
    %c0_i32_0 = arith.constant 0 : i32
    %c0_i32_1 = arith.constant 0 : i32
    return %c0_i32, %c0_i32_0 : i32, i32
  }
  func.func @transform_18(%arg0: i32) -> (i32, i32, i32) {
    %c0_i32 = arith.constant 0 : i32
    %c0_i32_0 = arith.constant 0 : i32
    %c0_i32_1 = arith.constant 0 : i32
    return %arg0, %c0_i32, %c0_i32_0 : i32, i32, i32
  }
}

module attributes {stable_mosaic.version = 11 : i64} {
  func.func @_decoder_layer_kernel(%arg0: i32, %arg1: memref<1x10x32xf32, #tpu.memory_space<vmem>>, %arg2: memref<1x10x4xf32, #tpu.memory_space<vmem>>, %arg3: memref<1x64x32xf32, #tpu.memory_space<vmem>>, %arg4: memref<1x64x32xf32, #tpu.memory_space<vmem>>, %arg5: memref<1x10x32xf32, #tpu.memory_space<vmem>>, %arg6: memref<32x32xf32, #tpu.memory_space<vmem>>, %arg7: memref<1x32xf32, #tpu.memory_space<vmem>>, %arg8: memref<32x32xf32, #tpu.memory_space<vmem>>, %arg9: memref<1x32xf32, #tpu.memory_space<vmem>>, %arg10: memref<3x4x32x8xf32, #tpu.memory_space<vmem>>, %arg11: memref<3x4x1x8xf32, #tpu.memory_space<vmem>>, %arg12: memref<4x8x32xf32, #tpu.memory_space<vmem>>, %arg13: memref<1x32xf32, #tpu.memory_space<vmem>>, %arg14: memref<1x32xf32, #tpu.memory_space<vmem>>, %arg15: memref<1x32xf32, #tpu.memory_space<vmem>>, %arg16: memref<3x4x32x8xf32, #tpu.memory_space<vmem>>, %arg17: memref<3x4x1x8xf32, #tpu.memory_space<vmem>>, %arg18: memref<4x8x32xf32, #tpu.memory_space<vmem>>, %arg19: memref<1x32xf32, #tpu.memory_space<vmem>>, %arg20: memref<1x32xf32, #tpu.memory_space<vmem>>, %arg21: memref<1x32xf32, #tpu.memory_space<vmem>>, %arg22: memref<32x64xf32, #tpu.memory_space<vmem>>, %arg23: memref<1x64xf32, #tpu.memory_space<vmem>>, %arg24: memref<64x32xf32, #tpu.memory_space<vmem>>, %arg25: memref<1x32xf32, #tpu.memory_space<vmem>>, %arg26: memref<1x32xf32, #tpu.memory_space<vmem>>, %arg27: memref<1x32xf32, #tpu.memory_space<vmem>>, %arg28: memref<32x32xf32, #tpu.memory_space<vmem>>, %arg29: memref<1x32xf32, #tpu.memory_space<vmem>>, %arg30: memref<32x32xf32, #tpu.memory_space<vmem>>, %arg31: memref<1x32xf32, #tpu.memory_space<vmem>>, %arg32: memref<32x4xf32, #tpu.memory_space<vmem>>, %arg33: memref<1x4xf32, #tpu.memory_space<vmem>>, %arg34: memref<1x10x32xf32, #tpu.memory_space<vmem>>, %arg35: memref<1x10x4xf32, #tpu.memory_space<vmem>>) attributes {dimension_semantics = [#tpu.dimension_semantics<parallel>], iteration_bounds = array<i64: 2>, scalar_prefetch = 0 : i64, scratch_operands = 0 : i64, tpu.core_type = #tpu.core_type<tc>, window_params = [{transform_indices = @transform_0, window_bounds = array<i64: 1, 10, 32>}, {transform_indices = @transform_1, window_bounds = array<i64: 1, 10, 4>}, {transform_indices = @transform_2, window_bounds = array<i64: 1, 64, 32>}, {transform_indices = @transform_3, window_bounds = array<i64: 1, 64, 32>}, {transform_indices = @transform_4, window_bounds = array<i64: 1, 10, 32>}, {pipeline_mode = #tpu.pipeline_mode<synchronous>, transform_indices = @transform_5, window_bounds = array<i64: 32, 32>}, {pipeline_mode = #tpu.pipeline_mode<synchronous>, transform_indices = @transform_6, window_bounds = array<i64: 1, 32>}, {pipeline_mode = #tpu.pipeline_mode<synchronous>, transform_indices = @transform_7, window_bounds = array<i64: 32, 32>}, {pipeline_mode = #tpu.pipeline_mode<synchronous>, transform_indices = @transform_8, window_bounds = array<i64: 1, 32>}, {pipeline_mode = #tpu.pipeline_mode<synchronous>, transform_indices = @transform_9, window_bounds = array<i64: 3, 4, 32, 8>}, {pipeline_mode = #tpu.pipeline_mode<synchronous>, transform_indices = @transform_10, window_bounds = array<i64: 3, 4, 1, 8>}, {pipeline_mode = #tpu.pipeline_mode<synchronous>, transform_indices = @transform_11, window_bounds = array<i64: 4, 8, 32>}, {pipeline_mode = #tpu.pipeline_mode<synchronous>, transform_indices = @transform_12, window_bounds = array<i64: 1, 32>}, {pipeline_mode = #tpu.pipeline_mode<synchronous>, transform_indices = @transform_13, window_bounds = array<i64: 1, 32>}, {pipeline_mode = #tpu.pipeline_mode<synchronous>, transform_indices = @transform_14, window_bounds = array<i64: 1, 32>}, {pipeline_mode = #tpu.pipeline_mode<synchronous>, transform_indices = @transform_15, window_bounds = array<i64: 3, 4, 32, 8>}, {pipeline_mode = #tpu.pipeline_mode<synchronous>, transform_indices = @transform_16, window_bounds = array<i64: 3, 4, 1, 8>}, {pipeline_mode = #tpu.pipeline_mode<synchronous>, transform_indices = @transform_17, window_bounds = array<i64: 4, 8, 32>}, {pipeline_mode = #tpu.pipeline_mode<synchronous>, transform_indices = @transform_18, window_bounds = array<i64: 1, 32>}, {pipeline_mode = #tpu.pipeline_mode<synchronous>, transform_indices = @transform_19, window_bounds = array<i64: 1, 32>}, {pipeline_mode = #tpu.pipeline_mode<synchronous>, transform_indices = @transform_20, window_bounds = array<i64: 1, 32>}, {pipeline_mode = #tpu.pipeline_mode<synchronous>, transform_indices = @transform_21, window_bounds = array<i64: 32, 64>}, {pipeline_mode = #tpu.pipeline_mode<synchronous>, transform_indices = @transform_22, window_bounds = array<i64: 1, 64>}, {pipeline_mode = #tpu.pipeline_mode<synchronous>, transform_indices = @transform_23, window_bounds = array<i64: 64, 32>}, {pipeline_mode = #tpu.pipeline_mode<synchronous>, transform_indices = @transform_24, window_bounds = array<i64: 1, 32>}, {pipeline_mode = #tpu.pipeline_mode<synchronous>, transform_indices = @transform_25, window_bounds = array<i64: 1, 32>}, {pipeline_mode = #tpu.pipeline_mode<synchronous>, transform_indices = @transform_26, window_bounds = array<i64: 1, 32>}, {pipeline_mode = #tpu.pipeline_mode<synchronous>, transform_indices = @transform_27, window_bounds = array<i64: 32, 32>}, {pipeline_mode = #tpu.pipeline_mode<synchronous>, transform_indices = @transform_28, window_bounds = array<i64: 1, 32>}, {pipeline_mode = #tpu.pipeline_mode<synchronous>, transform_indices = @transform_29, window_bounds = array<i64: 32, 32>}, {pipeline_mode = #tpu.pipeline_mode<synchronous>, transform_indices = @transform_30, window_bounds = array<i64: 1, 32>}, {pipeline_mode = #tpu.pipeline_mode<synchronous>, transform_indices = @transform_31, window_bounds = array<i64: 32, 4>}, {pipeline_mode = #tpu.pipeline_mode<synchronous>, transform_indices = @transform_32, window_bounds = array<i64: 1, 4>}, {transform_indices = @transform_33, window_bounds = array<i64: 1, 10, 32>}, {transform_indices = @transform_34, window_bounds = array<i64: 1, 10, 4>}]} {
    %c0 = arith.constant 0 : index
    %c0_0 = arith.constant 0 : index
    %c0_1 = arith.constant 0 : index
    %0 = vector.load %arg1[%c0, %c0_0, %c0_1] : memref<1x10x32xf32, #tpu.memory_space<vmem>>, vector<1x10x32xf32>
    %1 = vector.shape_cast %0 : vector<1x10x32xf32> to vector<10x32xf32>
    %c0_2 = arith.constant 0 : index
    %c0_3 = arith.constant 0 : index
    %c0_4 = arith.constant 0 : index
    %2 = vector.load %arg2[%c0_2, %c0_3, %c0_4] : memref<1x10x4xf32, #tpu.memory_space<vmem>>, vector<1x10x4xf32>
    %3 = vector.shape_cast %2 : vector<1x10x4xf32> to vector<10x4xf32>
    %c0_5 = arith.constant 0 : index
    %c0_6 = arith.constant 0 : index
    %c0_7 = arith.constant 0 : index
    %4 = vector.load %arg3[%c0_5, %c0_6, %c0_7] : memref<1x64x32xf32, #tpu.memory_space<vmem>>, vector<1x64x32xf32>
    %5 = vector.shape_cast %4 : vector<1x64x32xf32> to vector<64x32xf32>
    %c0_8 = arith.constant 0 : index
    %c0_9 = arith.constant 0 : index
    %c0_10 = arith.constant 0 : index
    %6 = vector.load %arg4[%c0_8, %c0_9, %c0_10] : memref<1x64x32xf32, #tpu.memory_space<vmem>>, vector<1x64x32xf32>
    %7 = vector.shape_cast %6 : vector<1x64x32xf32> to vector<64x32xf32>
    %c0_11 = arith.constant 0 : index
    %c0_12 = arith.constant 0 : index
    %c0_13 = arith.constant 0 : index
    %8 = vector.load %arg5[%c0_11, %c0_12, %c0_13] : memref<1x10x32xf32, #tpu.memory_space<vmem>>, vector<1x10x32xf32>
    %9 = vector.shape_cast %8 : vector<1x10x32xf32> to vector<10x32xf32>
    %c0_14 = arith.constant 0 : index
    %c0_15 = arith.constant 0 : index
    %10 = vector.load %arg6[%c0_14, %c0_15] : memref<32x32xf32, #tpu.memory_space<vmem>>, vector<32x32xf32>
    %c0_16 = arith.constant 0 : index
    %c0_17 = arith.constant 0 : index
    %11 = vector.load %arg7[%c0_16, %c0_17] : memref<1x32xf32, #tpu.memory_space<vmem>>, vector<1x32xf32>
    %cst = arith.constant dense<0.000000e+00> : vector<10x32xf32>
    %12 = tpu.matmul %9, %10, %cst {dimension_numbers = #tpu.dot_dimension_numbers<[1], [0], [0], [1], [0, 0, 1, 1], [], []>} : vector<10x32xf32>, vector<32x32xf32>, vector<10x32xf32> -> vector<10x32xf32>
    %13 = vector.broadcast %11 : vector<1x32xf32> to vector<10x32xf32>
    %14 = arith.addf %12, %13 : vector<10x32xf32>
    %cst_18 = arith.constant 0.000000e+00 : f32
    %15 = vector.broadcast %cst_18 : f32 to vector<10x32xf32>
    %16 = arith.maximumf %14, %15 : vector<10x32xf32>
    %c0_19 = arith.constant 0 : index
    %c0_20 = arith.constant 0 : index
    %17 = vector.load %arg8[%c0_19, %c0_20] : memref<32x32xf32, #tpu.memory_space<vmem>>, vector<32x32xf32>
    %c0_21 = arith.constant 0 : index
    %c0_22 = arith.constant 0 : index
    %18 = vector.load %arg9[%c0_21, %c0_22] : memref<1x32xf32, #tpu.memory_space<vmem>>, vector<1x32xf32>
    %cst_23 = arith.constant dense<0.000000e+00> : vector<10x32xf32>
    %19 = tpu.matmul %16, %17, %cst_23 {dimension_numbers = #tpu.dot_dimension_numbers<[1], [0], [0], [1], [0, 0, 1, 1], [], []>} : vector<10x32xf32>, vector<32x32xf32>, vector<10x32xf32> -> vector<10x32xf32>
    %20 = vector.broadcast %18 : vector<1x32xf32> to vector<10x32xf32>
    %21 = arith.addf %19, %20 : vector<10x32xf32>
    %22 = arith.addf %1, %21 : vector<10x32xf32>
    %c0_24 = arith.constant 0 : index
    %c0_25 = arith.constant 0 : index
    %c0_26 = arith.constant 0 : index
    %c0_27 = arith.constant 0 : index
    %23 = vector.load %arg10[%c0_24, %c0_25, %c0_26, %c0_27] : memref<3x4x32x8xf32, #tpu.memory_space<vmem>>, vector<1x1x32x8xf32>
    %24 = vector.shape_cast %23 : vector<1x1x32x8xf32> to vector<32x8xf32>
    %cst_28 = arith.constant dense<0.000000e+00> : vector<10x8xf32>
    %25 = tpu.matmul %22, %24, %cst_28 {dimension_numbers = #tpu.dot_dimension_numbers<[1], [0], [0], [1], [0, 0, 1, 1], [], []>} : vector<10x32xf32>, vector<32x8xf32>, vector<10x8xf32> -> vector<10x8xf32>
    %c0_29 = arith.constant 0 : index
    %c0_30 = arith.constant 0 : index
    %c0_31 = arith.constant 0 : index
    %c0_32 = arith.constant 0 : index
    %26 = vector.load %arg11[%c0_29, %c0_30, %c0_31, %c0_32] : memref<3x4x1x8xf32, #tpu.memory_space<vmem>>, vector<1x1x1x8xf32>
    %27 = vector.shape_cast %26 : vector<1x1x1x8xf32> to vector<1x8xf32>
    %28 = vector.broadcast %27 : vector<1x8xf32> to vector<10x8xf32>
    %29 = arith.addf %25, %28 : vector<10x8xf32>
    %c1 = arith.constant 1 : index
    %c0_33 = arith.constant 0 : index
    %c0_34 = arith.constant 0 : index
    %c0_35 = arith.constant 0 : index
    %30 = vector.load %arg10[%c1, %c0_33, %c0_34, %c0_35] : memref<3x4x32x8xf32, #tpu.memory_space<vmem>>, vector<1x1x32x8xf32>
    %31 = vector.shape_cast %30 : vector<1x1x32x8xf32> to vector<32x8xf32>
    %cst_36 = arith.constant dense<0.000000e+00> : vector<10x8xf32>
    %32 = tpu.matmul %22, %31, %cst_36 {dimension_numbers = #tpu.dot_dimension_numbers<[1], [0], [0], [1], [0, 0, 1, 1], [], []>} : vector<10x32xf32>, vector<32x8xf32>, vector<10x8xf32> -> vector<10x8xf32>
    %c1_37 = arith.constant 1 : index
    %c0_38 = arith.constant 0 : index
    %c0_39 = arith.constant 0 : index
    %c0_40 = arith.constant 0 : index
    %33 = vector.load %arg11[%c1_37, %c0_38, %c0_39, %c0_40] : memref<3x4x1x8xf32, #tpu.memory_space<vmem>>, vector<1x1x1x8xf32>
    %34 = vector.shape_cast %33 : vector<1x1x1x8xf32> to vector<1x8xf32>
    %35 = vector.broadcast %34 : vector<1x8xf32> to vector<10x8xf32>
    %36 = arith.addf %32, %35 : vector<10x8xf32>
    %c2 = arith.constant 2 : index
    %c0_41 = arith.constant 0 : index
    %c0_42 = arith.constant 0 : index
    %c0_43 = arith.constant 0 : index
    %37 = vector.load %arg10[%c2, %c0_41, %c0_42, %c0_43] : memref<3x4x32x8xf32, #tpu.memory_space<vmem>>, vector<1x1x32x8xf32>
    %38 = vector.shape_cast %37 : vector<1x1x32x8xf32> to vector<32x8xf32>
    %cst_44 = arith.constant dense<0.000000e+00> : vector<10x8xf32>
    %39 = tpu.matmul %1, %38, %cst_44 {dimension_numbers = #tpu.dot_dimension_numbers<[1], [0], [0], [1], [0, 0, 1, 1], [], []>} : vector<10x32xf32>, vector<32x8xf32>, vector<10x8xf32> -> vector<10x8xf32>
    %c2_45 = arith.constant 2 : index
    %c0_46 = arith.constant 0 : index
    %c0_47 = arith.constant 0 : index
    %c0_48 = arith.constant 0 : index
    %40 = vector.load %arg11[%c2_45, %c0_46, %c0_47, %c0_48] : memref<3x4x1x8xf32, #tpu.memory_space<vmem>>, vector<1x1x1x8xf32>
    %41 = vector.shape_cast %40 : vector<1x1x1x8xf32> to vector<1x8xf32>
    %42 = vector.broadcast %41 : vector<1x8xf32> to vector<10x8xf32>
    %43 = arith.addf %39, %42 : vector<10x8xf32>
    %44 = tpu.transpose %36, [1, 0] : vector<10x8xf32> -> vector<8x10xf32>
    %cst_49 = arith.constant dense<0.000000e+00> : vector<10x10xf32>
    %45 = tpu.matmul %29, %44, %cst_49 {dimension_numbers = #tpu.dot_dimension_numbers<[1], [0], [0], [1], [0, 0, 1, 1], [], []>} : vector<10x8xf32>, vector<8x10xf32>, vector<10x10xf32> -> vector<10x10xf32>
    %cst_50 = arith.constant 0.353553385 : f32
    %46 = vector.broadcast %cst_50 : f32 to vector<10x10xf32>
    %47 = arith.mulf %45, %46 : vector<10x10xf32>
    %cst_51 = arith.constant dense<0xFF800000> : vector<10xf32>
    %48 = vector.multi_reduction <maximumf>, %47, %cst_51 [1] : vector<10x10xf32> to vector<10xf32>
    %49 = vector.shape_cast %48 : vector<10xf32> to vector<10x1xf32>
    %50 = vector.broadcast %49 : vector<10x1xf32> to vector<10x10xf32>
    %51 = arith.subf %47, %50 : vector<10x10xf32>
    %52 = math.exp %51 : vector<10x10xf32>
    %cst_52 = arith.constant dense<0.000000e+00> : vector<10xf32>
    %53 = vector.multi_reduction <add>, %52, %cst_52 [1] : vector<10x10xf32> to vector<10xf32>
    %54 = vector.shape_cast %53 : vector<10xf32> to vector<10x1xf32>
    %55 = tpu.reciprocal %54 {approx = true} : vector<10x1xf32> -> vector<10x1xf32>
    %56 = vector.broadcast %55 : vector<10x1xf32> to vector<10x10xf32>
    %57 = arith.mulf %52, %56 : vector<10x10xf32>
    %cst_53 = arith.constant dense<0.000000e+00> : vector<10x8xf32>
    %58 = tpu.matmul %57, %43, %cst_53 {dimension_numbers = #tpu.dot_dimension_numbers<[1], [0], [0], [1], [0, 0, 1, 1], [], []>} : vector<10x10xf32>, vector<10x8xf32>, vector<10x8xf32> -> vector<10x8xf32>
    %c0_54 = arith.constant 0 : index
    %c0_55 = arith.constant 0 : index
    %c0_56 = arith.constant 0 : index
    %59 = vector.load %arg12[%c0_54, %c0_55, %c0_56] : memref<4x8x32xf32, #tpu.memory_space<vmem>>, vector<1x8x32xf32>
    %60 = vector.shape_cast %59 : vector<1x8x32xf32> to vector<8x32xf32>
    %cst_57 = arith.constant dense<0.000000e+00> : vector<10x32xf32>
    %61 = tpu.matmul %58, %60, %cst_57 {dimension_numbers = #tpu.dot_dimension_numbers<[1], [0], [0], [1], [0, 0, 1, 1], [], []>} : vector<10x8xf32>, vector<8x32xf32>, vector<10x32xf32> -> vector<10x32xf32>
    %c0_58 = arith.constant 0 : index
    %c1_59 = arith.constant 1 : index
    %c0_60 = arith.constant 0 : index
    %c0_61 = arith.constant 0 : index
    %62 = vector.load %arg10[%c0_58, %c1_59, %c0_60, %c0_61] : memref<3x4x32x8xf32, #tpu.memory_space<vmem>>, vector<1x1x32x8xf32>
    %63 = vector.shape_cast %62 : vector<1x1x32x8xf32> to vector<32x8xf32>
    %cst_62 = arith.constant dense<0.000000e+00> : vector<10x8xf32>
    %64 = tpu.matmul %22, %63, %cst_62 {dimension_numbers = #tpu.dot_dimension_numbers<[1], [0], [0], [1], [0, 0, 1, 1], [], []>} : vector<10x32xf32>, vector<32x8xf32>, vector<10x8xf32> -> vector<10x8xf32>
    %c0_63 = arith.constant 0 : index
    %c1_64 = arith.constant 1 : index
    %c0_65 = arith.constant 0 : index
    %c0_66 = arith.constant 0 : index
    %65 = vector.load %arg11[%c0_63, %c1_64, %c0_65, %c0_66] : memref<3x4x1x8xf32, #tpu.memory_space<vmem>>, vector<1x1x1x8xf32>
    %66 = vector.shape_cast %65 : vector<1x1x1x8xf32> to vector<1x8xf32>
    %67 = vector.broadcast %66 : vector<1x8xf32> to vector<10x8xf32>
    %68 = arith.addf %64, %67 : vector<10x8xf32>
    %c1_67 = arith.constant 1 : index
    %c1_68 = arith.constant 1 : index
    %c0_69 = arith.constant 0 : index
    %c0_70 = arith.constant 0 : index
    %69 = vector.load %arg10[%c1_67, %c1_68, %c0_69, %c0_70] : memref<3x4x32x8xf32, #tpu.memory_space<vmem>>, vector<1x1x32x8xf32>
    %70 = vector.shape_cast %69 : vector<1x1x32x8xf32> to vector<32x8xf32>
    %cst_71 = arith.constant dense<0.000000e+00> : vector<10x8xf32>
    %71 = tpu.matmul %22, %70, %cst_71 {dimension_numbers = #tpu.dot_dimension_numbers<[1], [0], [0], [1], [0, 0, 1, 1], [], []>} : vector<10x32xf32>, vector<32x8xf32>, vector<10x8xf32> -> vector<10x8xf32>
    %c1_72 = arith.constant 1 : index
    %c1_73 = arith.constant 1 : index
    %c0_74 = arith.constant 0 : index
    %c0_75 = arith.constant 0 : index
    %72 = vector.load %arg11[%c1_72, %c1_73, %c0_74, %c0_75] : memref<3x4x1x8xf32, #tpu.memory_space<vmem>>, vector<1x1x1x8xf32>
    %73 = vector.shape_cast %72 : vector<1x1x1x8xf32> to vector<1x8xf32>
    %74 = vector.broadcast %73 : vector<1x8xf32> to vector<10x8xf32>
    %75 = arith.addf %71, %74 : vector<10x8xf32>
    %c2_76 = arith.constant 2 : index
    %c1_77 = arith.constant 1 : index
    %c0_78 = arith.constant 0 : index
    %c0_79 = arith.constant 0 : index
    %76 = vector.load %arg10[%c2_76, %c1_77, %c0_78, %c0_79] : memref<3x4x32x8xf32, #tpu.memory_space<vmem>>, vector<1x1x32x8xf32>
    %77 = vector.shape_cast %76 : vector<1x1x32x8xf32> to vector<32x8xf32>
    %cst_80 = arith.constant dense<0.000000e+00> : vector<10x8xf32>
    %78 = tpu.matmul %1, %77, %cst_80 {dimension_numbers = #tpu.dot_dimension_numbers<[1], [0], [0], [1], [0, 0, 1, 1], [], []>} : vector<10x32xf32>, vector<32x8xf32>, vector<10x8xf32> -> vector<10x8xf32>
    %c2_81 = arith.constant 2 : index
    %c1_82 = arith.constant 1 : index
    %c0_83 = arith.constant 0 : index
    %c0_84 = arith.constant 0 : index
    %79 = vector.load %arg11[%c2_81, %c1_82, %c0_83, %c0_84] : memref<3x4x1x8xf32, #tpu.memory_space<vmem>>, vector<1x1x1x8xf32>
    %80 = vector.shape_cast %79 : vector<1x1x1x8xf32> to vector<1x8xf32>
    %81 = vector.broadcast %80 : vector<1x8xf32> to vector<10x8xf32>
    %82 = arith.addf %78, %81 : vector<10x8xf32>
    %83 = tpu.transpose %75, [1, 0] : vector<10x8xf32> -> vector<8x10xf32>
    %cst_85 = arith.constant dense<0.000000e+00> : vector<10x10xf32>
    %84 = tpu.matmul %68, %83, %cst_85 {dimension_numbers = #tpu.dot_dimension_numbers<[1], [0], [0], [1], [0, 0, 1, 1], [], []>} : vector<10x8xf32>, vector<8x10xf32>, vector<10x10xf32> -> vector<10x10xf32>
    %cst_86 = arith.constant 0.353553385 : f32
    %85 = vector.broadcast %cst_86 : f32 to vector<10x10xf32>
    %86 = arith.mulf %84, %85 : vector<10x10xf32>
    %cst_87 = arith.constant dense<0xFF800000> : vector<10xf32>
    %87 = vector.multi_reduction <maximumf>, %86, %cst_87 [1] : vector<10x10xf32> to vector<10xf32>
    %88 = vector.shape_cast %87 : vector<10xf32> to vector<10x1xf32>
    %89 = vector.broadcast %88 : vector<10x1xf32> to vector<10x10xf32>
    %90 = arith.subf %86, %89 : vector<10x10xf32>
    %91 = math.exp %90 : vector<10x10xf32>
    %cst_88 = arith.constant dense<0.000000e+00> : vector<10xf32>
    %92 = vector.multi_reduction <add>, %91, %cst_88 [1] : vector<10x10xf32> to vector<10xf32>
    %93 = vector.shape_cast %92 : vector<10xf32> to vector<10x1xf32>
    %94 = tpu.reciprocal %93 {approx = true} : vector<10x1xf32> -> vector<10x1xf32>
    %95 = vector.broadcast %94 : vector<10x1xf32> to vector<10x10xf32>
    %96 = arith.mulf %91, %95 : vector<10x10xf32>
    %cst_89 = arith.constant dense<0.000000e+00> : vector<10x8xf32>
    %97 = tpu.matmul %96, %82, %cst_89 {dimension_numbers = #tpu.dot_dimension_numbers<[1], [0], [0], [1], [0, 0, 1, 1], [], []>} : vector<10x10xf32>, vector<10x8xf32>, vector<10x8xf32> -> vector<10x8xf32>
    %c1_90 = arith.constant 1 : index
    %c0_91 = arith.constant 0 : index
    %c0_92 = arith.constant 0 : index
    %98 = vector.load %arg12[%c1_90, %c0_91, %c0_92] : memref<4x8x32xf32, #tpu.memory_space<vmem>>, vector<1x8x32xf32>
    %99 = vector.shape_cast %98 : vector<1x8x32xf32> to vector<8x32xf32>
    %cst_93 = arith.constant dense<0.000000e+00> : vector<10x32xf32>
    %100 = tpu.matmul %97, %99, %cst_93 {dimension_numbers = #tpu.dot_dimension_numbers<[1], [0], [0], [1], [0, 0, 1, 1], [], []>} : vector<10x8xf32>, vector<8x32xf32>, vector<10x32xf32> -> vector<10x32xf32>
    %101 = arith.addf %61, %100 : vector<10x32xf32>
    %c0_94 = arith.constant 0 : index
    %c2_95 = arith.constant 2 : index
    %c0_96 = arith.constant 0 : index
    %c0_97 = arith.constant 0 : index
    %102 = vector.load %arg10[%c0_94, %c2_95, %c0_96, %c0_97] : memref<3x4x32x8xf32, #tpu.memory_space<vmem>>, vector<1x1x32x8xf32>
    %103 = vector.shape_cast %102 : vector<1x1x32x8xf32> to vector<32x8xf32>
    %cst_98 = arith.constant dense<0.000000e+00> : vector<10x8xf32>
    %104 = tpu.matmul %22, %103, %cst_98 {dimension_numbers = #tpu.dot_dimension_numbers<[1], [0], [0], [1], [0, 0, 1, 1], [], []>} : vector<10x32xf32>, vector<32x8xf32>, vector<10x8xf32> -> vector<10x8xf32>
    %c0_99 = arith.constant 0 : index
    %c2_100 = arith.constant 2 : index
    %c0_101 = arith.constant 0 : index
    %c0_102 = arith.constant 0 : index
    %105 = vector.load %arg11[%c0_99, %c2_100, %c0_101, %c0_102] : memref<3x4x1x8xf32, #tpu.memory_space<vmem>>, vector<1x1x1x8xf32>
    %106 = vector.shape_cast %105 : vector<1x1x1x8xf32> to vector<1x8xf32>
    %107 = vector.broadcast %106 : vector<1x8xf32> to vector<10x8xf32>
    %108 = arith.addf %104, %107 : vector<10x8xf32>
    %c1_103 = arith.constant 1 : index
    %c2_104 = arith.constant 2 : index
    %c0_105 = arith.constant 0 : index
    %c0_106 = arith.constant 0 : index
    %109 = vector.load %arg10[%c1_103, %c2_104, %c0_105, %c0_106] : memref<3x4x32x8xf32, #tpu.memory_space<vmem>>, vector<1x1x32x8xf32>
    %110 = vector.shape_cast %109 : vector<1x1x32x8xf32> to vector<32x8xf32>
    %cst_107 = arith.constant dense<0.000000e+00> : vector<10x8xf32>
    %111 = tpu.matmul %22, %110, %cst_107 {dimension_numbers = #tpu.dot_dimension_numbers<[1], [0], [0], [1], [0, 0, 1, 1], [], []>} : vector<10x32xf32>, vector<32x8xf32>, vector<10x8xf32> -> vector<10x8xf32>
    %c1_108 = arith.constant 1 : index
    %c2_109 = arith.constant 2 : index
    %c0_110 = arith.constant 0 : index
    %c0_111 = arith.constant 0 : index
    %112 = vector.load %arg11[%c1_108, %c2_109, %c0_110, %c0_111] : memref<3x4x1x8xf32, #tpu.memory_space<vmem>>, vector<1x1x1x8xf32>
    %113 = vector.shape_cast %112 : vector<1x1x1x8xf32> to vector<1x8xf32>
    %114 = vector.broadcast %113 : vector<1x8xf32> to vector<10x8xf32>
    %115 = arith.addf %111, %114 : vector<10x8xf32>
    %c2_112 = arith.constant 2 : index
    %c2_113 = arith.constant 2 : index
    %c0_114 = arith.constant 0 : index
    %c0_115 = arith.constant 0 : index
    %116 = vector.load %arg10[%c2_112, %c2_113, %c0_114, %c0_115] : memref<3x4x32x8xf32, #tpu.memory_space<vmem>>, vector<1x1x32x8xf32>
    %117 = vector.shape_cast %116 : vector<1x1x32x8xf32> to vector<32x8xf32>
    %cst_116 = arith.constant dense<0.000000e+00> : vector<10x8xf32>
    %118 = tpu.matmul %1, %117, %cst_116 {dimension_numbers = #tpu.dot_dimension_numbers<[1], [0], [0], [1], [0, 0, 1, 1], [], []>} : vector<10x32xf32>, vector<32x8xf32>, vector<10x8xf32> -> vector<10x8xf32>
    %c2_117 = arith.constant 2 : index
    %c2_118 = arith.constant 2 : index
    %c0_119 = arith.constant 0 : index
    %c0_120 = arith.constant 0 : index
    %119 = vector.load %arg11[%c2_117, %c2_118, %c0_119, %c0_120] : memref<3x4x1x8xf32, #tpu.memory_space<vmem>>, vector<1x1x1x8xf32>
    %120 = vector.shape_cast %119 : vector<1x1x1x8xf32> to vector<1x8xf32>
    %121 = vector.broadcast %120 : vector<1x8xf32> to vector<10x8xf32>
    %122 = arith.addf %118, %121 : vector<10x8xf32>
    %123 = tpu.transpose %115, [1, 0] : vector<10x8xf32> -> vector<8x10xf32>
    %cst_121 = arith.constant dense<0.000000e+00> : vector<10x10xf32>
    %124 = tpu.matmul %108, %123, %cst_121 {dimension_numbers = #tpu.dot_dimension_numbers<[1], [0], [0], [1], [0, 0, 1, 1], [], []>} : vector<10x8xf32>, vector<8x10xf32>, vector<10x10xf32> -> vector<10x10xf32>
    %cst_122 = arith.constant 0.353553385 : f32
    %125 = vector.broadcast %cst_122 : f32 to vector<10x10xf32>
    %126 = arith.mulf %124, %125 : vector<10x10xf32>
    %cst_123 = arith.constant dense<0xFF800000> : vector<10xf32>
    %127 = vector.multi_reduction <maximumf>, %126, %cst_123 [1] : vector<10x10xf32> to vector<10xf32>
    %128 = vector.shape_cast %127 : vector<10xf32> to vector<10x1xf32>
    %129 = vector.broadcast %128 : vector<10x1xf32> to vector<10x10xf32>
    %130 = arith.subf %126, %129 : vector<10x10xf32>
    %131 = math.exp %130 : vector<10x10xf32>
    %cst_124 = arith.constant dense<0.000000e+00> : vector<10xf32>
    %132 = vector.multi_reduction <add>, %131, %cst_124 [1] : vector<10x10xf32> to vector<10xf32>
    %133 = vector.shape_cast %132 : vector<10xf32> to vector<10x1xf32>
    %134 = tpu.reciprocal %133 {approx = true} : vector<10x1xf32> -> vector<10x1xf32>
    %135 = vector.broadcast %134 : vector<10x1xf32> to vector<10x10xf32>
    %136 = arith.mulf %131, %135 : vector<10x10xf32>
    %cst_125 = arith.constant dense<0.000000e+00> : vector<10x8xf32>
    %137 = tpu.matmul %136, %122, %cst_125 {dimension_numbers = #tpu.dot_dimension_numbers<[1], [0], [0], [1], [0, 0, 1, 1], [], []>} : vector<10x10xf32>, vector<10x8xf32>, vector<10x8xf32> -> vector<10x8xf32>
    %c2_126 = arith.constant 2 : index
    %c0_127 = arith.constant 0 : index
    %c0_128 = arith.constant 0 : index
    %138 = vector.load %arg12[%c2_126, %c0_127, %c0_128] : memref<4x8x32xf32, #tpu.memory_space<vmem>>, vector<1x8x32xf32>
    %139 = vector.shape_cast %138 : vector<1x8x32xf32> to vector<8x32xf32>
    %cst_129 = arith.constant dense<0.000000e+00> : vector<10x32xf32>
    %140 = tpu.matmul %137, %139, %cst_129 {dimension_numbers = #tpu.dot_dimension_numbers<[1], [0], [0], [1], [0, 0, 1, 1], [], []>} : vector<10x8xf32>, vector<8x32xf32>, vector<10x32xf32> -> vector<10x32xf32>
    %141 = arith.addf %101, %140 : vector<10x32xf32>
    %c0_130 = arith.constant 0 : index
    %c3 = arith.constant 3 : index
    %c0_131 = arith.constant 0 : index
    %c0_132 = arith.constant 0 : index
    %142 = vector.load %arg10[%c0_130, %c3, %c0_131, %c0_132] : memref<3x4x32x8xf32, #tpu.memory_space<vmem>>, vector<1x1x32x8xf32>
    %143 = vector.shape_cast %142 : vector<1x1x32x8xf32> to vector<32x8xf32>
    %cst_133 = arith.constant dense<0.000000e+00> : vector<10x8xf32>
    %144 = tpu.matmul %22, %143, %cst_133 {dimension_numbers = #tpu.dot_dimension_numbers<[1], [0], [0], [1], [0, 0, 1, 1], [], []>} : vector<10x32xf32>, vector<32x8xf32>, vector<10x8xf32> -> vector<10x8xf32>
    %c0_134 = arith.constant 0 : index
    %c3_135 = arith.constant 3 : index
    %c0_136 = arith.constant 0 : index
    %c0_137 = arith.constant 0 : index
    %145 = vector.load %arg11[%c0_134, %c3_135, %c0_136, %c0_137] : memref<3x4x1x8xf32, #tpu.memory_space<vmem>>, vector<1x1x1x8xf32>
    %146 = vector.shape_cast %145 : vector<1x1x1x8xf32> to vector<1x8xf32>
    %147 = vector.broadcast %146 : vector<1x8xf32> to vector<10x8xf32>
    %148 = arith.addf %144, %147 : vector<10x8xf32>
    %c1_138 = arith.constant 1 : index
    %c3_139 = arith.constant 3 : index
    %c0_140 = arith.constant 0 : index
    %c0_141 = arith.constant 0 : index
    %149 = vector.load %arg10[%c1_138, %c3_139, %c0_140, %c0_141] : memref<3x4x32x8xf32, #tpu.memory_space<vmem>>, vector<1x1x32x8xf32>
    %150 = vector.shape_cast %149 : vector<1x1x32x8xf32> to vector<32x8xf32>
    %cst_142 = arith.constant dense<0.000000e+00> : vector<10x8xf32>
    %151 = tpu.matmul %22, %150, %cst_142 {dimension_numbers = #tpu.dot_dimension_numbers<[1], [0], [0], [1], [0, 0, 1, 1], [], []>} : vector<10x32xf32>, vector<32x8xf32>, vector<10x8xf32> -> vector<10x8xf32>
    %c1_143 = arith.constant 1 : index
    %c3_144 = arith.constant 3 : index
    %c0_145 = arith.constant 0 : index
    %c0_146 = arith.constant 0 : index
    %152 = vector.load %arg11[%c1_143, %c3_144, %c0_145, %c0_146] : memref<3x4x1x8xf32, #tpu.memory_space<vmem>>, vector<1x1x1x8xf32>
    %153 = vector.shape_cast %152 : vector<1x1x1x8xf32> to vector<1x8xf32>
    %154 = vector.broadcast %153 : vector<1x8xf32> to vector<10x8xf32>
    %155 = arith.addf %151, %154 : vector<10x8xf32>
    %c2_147 = arith.constant 2 : index
    %c3_148 = arith.constant 3 : index
    %c0_149 = arith.constant 0 : index
    %c0_150 = arith.constant 0 : index
    %156 = vector.load %arg10[%c2_147, %c3_148, %c0_149, %c0_150] : memref<3x4x32x8xf32, #tpu.memory_space<vmem>>, vector<1x1x32x8xf32>
    %157 = vector.shape_cast %156 : vector<1x1x32x8xf32> to vector<32x8xf32>
    %cst_151 = arith.constant dense<0.000000e+00> : vector<10x8xf32>
    %158 = tpu.matmul %1, %157, %cst_151 {dimension_numbers = #tpu.dot_dimension_numbers<[1], [0], [0], [1], [0, 0, 1, 1], [], []>} : vector<10x32xf32>, vector<32x8xf32>, vector<10x8xf32> -> vector<10x8xf32>
    %c2_152 = arith.constant 2 : index
    %c3_153 = arith.constant 3 : index
    %c0_154 = arith.constant 0 : index
    %c0_155 = arith.constant 0 : index
    %159 = vector.load %arg11[%c2_152, %c3_153, %c0_154, %c0_155] : memref<3x4x1x8xf32, #tpu.memory_space<vmem>>, vector<1x1x1x8xf32>
    %160 = vector.shape_cast %159 : vector<1x1x1x8xf32> to vector<1x8xf32>
    %161 = vector.broadcast %160 : vector<1x8xf32> to vector<10x8xf32>
    %162 = arith.addf %158, %161 : vector<10x8xf32>
    %163 = tpu.transpose %155, [1, 0] : vector<10x8xf32> -> vector<8x10xf32>
    %cst_156 = arith.constant dense<0.000000e+00> : vector<10x10xf32>
    %164 = tpu.matmul %148, %163, %cst_156 {dimension_numbers = #tpu.dot_dimension_numbers<[1], [0], [0], [1], [0, 0, 1, 1], [], []>} : vector<10x8xf32>, vector<8x10xf32>, vector<10x10xf32> -> vector<10x10xf32>
    %cst_157 = arith.constant 0.353553385 : f32
    %165 = vector.broadcast %cst_157 : f32 to vector<10x10xf32>
    %166 = arith.mulf %164, %165 : vector<10x10xf32>
    %cst_158 = arith.constant dense<0xFF800000> : vector<10xf32>
    %167 = vector.multi_reduction <maximumf>, %166, %cst_158 [1] : vector<10x10xf32> to vector<10xf32>
    %168 = vector.shape_cast %167 : vector<10xf32> to vector<10x1xf32>
    %169 = vector.broadcast %168 : vector<10x1xf32> to vector<10x10xf32>
    %170 = arith.subf %166, %169 : vector<10x10xf32>
    %171 = math.exp %170 : vector<10x10xf32>
    %cst_159 = arith.constant dense<0.000000e+00> : vector<10xf32>
    %172 = vector.multi_reduction <add>, %171, %cst_159 [1] : vector<10x10xf32> to vector<10xf32>
    %173 = vector.shape_cast %172 : vector<10xf32> to vector<10x1xf32>
    %174 = tpu.reciprocal %173 {approx = true} : vector<10x1xf32> -> vector<10x1xf32>
    %175 = vector.broadcast %174 : vector<10x1xf32> to vector<10x10xf32>
    %176 = arith.mulf %171, %175 : vector<10x10xf32>
    %cst_160 = arith.constant dense<0.000000e+00> : vector<10x8xf32>
    %177 = tpu.matmul %176, %162, %cst_160 {dimension_numbers = #tpu.dot_dimension_numbers<[1], [0], [0], [1], [0, 0, 1, 1], [], []>} : vector<10x10xf32>, vector<10x8xf32>, vector<10x8xf32> -> vector<10x8xf32>
    %c3_161 = arith.constant 3 : index
    %c0_162 = arith.constant 0 : index
    %c0_163 = arith.constant 0 : index
    %178 = vector.load %arg12[%c3_161, %c0_162, %c0_163] : memref<4x8x32xf32, #tpu.memory_space<vmem>>, vector<1x8x32xf32>
    %179 = vector.shape_cast %178 : vector<1x8x32xf32> to vector<8x32xf32>
    %cst_164 = arith.constant dense<0.000000e+00> : vector<10x32xf32>
    %180 = tpu.matmul %177, %179, %cst_164 {dimension_numbers = #tpu.dot_dimension_numbers<[1], [0], [0], [1], [0, 0, 1, 1], [], []>} : vector<10x8xf32>, vector<8x32xf32>, vector<10x32xf32> -> vector<10x32xf32>
    %181 = arith.addf %141, %180 : vector<10x32xf32>
    %c0_165 = arith.constant 0 : index
    %c0_166 = arith.constant 0 : index
    %182 = vector.load %arg13[%c0_165, %c0_166] : memref<1x32xf32, #tpu.memory_space<vmem>>, vector<1x32xf32>
    %183 = vector.broadcast %182 : vector<1x32xf32> to vector<10x32xf32>
    %184 = arith.addf %181, %183 : vector<10x32xf32>
    %185 = arith.addf %1, %184 : vector<10x32xf32>
    %c0_167 = arith.constant 0 : index
    %c0_168 = arith.constant 0 : index
    %186 = vector.load %arg14[%c0_167, %c0_168] : memref<1x32xf32, #tpu.memory_space<vmem>>, vector<1x32xf32>
    %c0_169 = arith.constant 0 : index
    %c0_170 = arith.constant 0 : index
    %187 = vector.load %arg15[%c0_169, %c0_170] : memref<1x32xf32, #tpu.memory_space<vmem>>, vector<1x32xf32>
    %cst_171 = arith.constant dense<0.000000e+00> : vector<10xf32>
    %188 = vector.multi_reduction <add>, %185, %cst_171 [1] : vector<10x32xf32> to vector<10xf32>
    %189 = vector.shape_cast %188 : vector<10xf32> to vector<10x1xf32>
    %cst_172 = arith.constant 3.200000e+01 : f32
    %190 = vector.broadcast %cst_172 : f32 to vector<10x1xf32>
    %191 = arith.divf %189, %190 : vector<10x1xf32>
    %192 = vector.broadcast %191 : vector<10x1xf32> to vector<10x32xf32>
    %193 = arith.subf %185, %192 : vector<10x32xf32>
    %194 = arith.mulf %193, %193 : vector<10x32xf32>
    %cst_173 = arith.constant dense<0.000000e+00> : vector<10xf32>
    %195 = vector.multi_reduction <add>, %194, %cst_173 [1] : vector<10x32xf32> to vector<10xf32>
    %196 = vector.shape_cast %195 : vector<10xf32> to vector<10x1xf32>
    %cst_174 = arith.constant 3.200000e+01 : f32
    %197 = vector.broadcast %cst_174 : f32 to vector<10x1xf32>
    %198 = arith.divf %196, %197 : vector<10x1xf32>
    %199 = vector.broadcast %191 : vector<10x1xf32> to vector<10x32xf32>
    %200 = arith.subf %185, %199 : vector<10x32xf32>
    %cst_175 = arith.constant 9.99999974E-6 : f32
    %201 = vector.broadcast %cst_175 : f32 to vector<10x1xf32>
    %202 = arith.addf %198, %201 : vector<10x1xf32>
    %203 = math.rsqrt %202 : vector<10x1xf32>
    %204 = vector.broadcast %203 : vector<10x1xf32> to vector<10x32xf32>
    %205 = arith.mulf %200, %204 : vector<10x32xf32>
    %206 = vector.broadcast %186 : vector<1x32xf32> to vector<10x32xf32>
    %207 = arith.mulf %205, %206 : vector<10x32xf32>
    %208 = vector.broadcast %187 : vector<1x32xf32> to vector<10x32xf32>
    %209 = arith.addf %207, %208 : vector<10x32xf32>
    %210 = arith.addf %209, %21 : vector<10x32xf32>
    %211 = arith.addf %5, %7 : vector<64x32xf32>
    %c0_176 = arith.constant 0 : index
    %c0_177 = arith.constant 0 : index
    %c0_178 = arith.constant 0 : index
    %c0_179 = arith.constant 0 : index
    %212 = vector.load %arg16[%c0_176, %c0_177, %c0_178, %c0_179] : memref<3x4x32x8xf32, #tpu.memory_space<vmem>>, vector<1x1x32x8xf32>
    %213 = vector.shape_cast %212 : vector<1x1x32x8xf32> to vector<32x8xf32>
    %cst_180 = arith.constant dense<0.000000e+00> : vector<10x8xf32>
    %214 = tpu.matmul %210, %213, %cst_180 {dimension_numbers = #tpu.dot_dimension_numbers<[1], [0], [0], [1], [0, 0, 1, 1], [], []>} : vector<10x32xf32>, vector<32x8xf32>, vector<10x8xf32> -> vector<10x8xf32>
    %c0_181 = arith.constant 0 : index
    %c0_182 = arith.constant 0 : index
    %c0_183 = arith.constant 0 : index
    %c0_184 = arith.constant 0 : index
    %215 = vector.load %arg17[%c0_181, %c0_182, %c0_183, %c0_184] : memref<3x4x1x8xf32, #tpu.memory_space<vmem>>, vector<1x1x1x8xf32>
    %216 = vector.shape_cast %215 : vector<1x1x1x8xf32> to vector<1x8xf32>
    %217 = vector.broadcast %216 : vector<1x8xf32> to vector<10x8xf32>
    %218 = arith.addf %214, %217 : vector<10x8xf32>
    %c1_185 = arith.constant 1 : index
    %c0_186 = arith.constant 0 : index
    %c0_187 = arith.constant 0 : index
    %c0_188 = arith.constant 0 : index
    %219 = vector.load %arg16[%c1_185, %c0_186, %c0_187, %c0_188] : memref<3x4x32x8xf32, #tpu.memory_space<vmem>>, vector<1x1x32x8xf32>
    %220 = vector.shape_cast %219 : vector<1x1x32x8xf32> to vector<32x8xf32>
    %cst_189 = arith.constant dense<0.000000e+00> : vector<64x8xf32>
    %221 = tpu.matmul %211, %220, %cst_189 {dimension_numbers = #tpu.dot_dimension_numbers<[1], [0], [0], [1], [0, 0, 1, 1], [], []>} : vector<64x32xf32>, vector<32x8xf32>, vector<64x8xf32> -> vector<64x8xf32>
    %c1_190 = arith.constant 1 : index
    %c0_191 = arith.constant 0 : index
    %c0_192 = arith.constant 0 : index
    %c0_193 = arith.constant 0 : index
    %222 = vector.load %arg17[%c1_190, %c0_191, %c0_192, %c0_193] : memref<3x4x1x8xf32, #tpu.memory_space<vmem>>, vector<1x1x1x8xf32>
    %223 = vector.shape_cast %222 : vector<1x1x1x8xf32> to vector<1x8xf32>
    %224 = vector.broadcast %223 : vector<1x8xf32> to vector<64x8xf32>
    %225 = arith.addf %221, %224 : vector<64x8xf32>
    %c2_194 = arith.constant 2 : index
    %c0_195 = arith.constant 0 : index
    %c0_196 = arith.constant 0 : index
    %c0_197 = arith.constant 0 : index
    %226 = vector.load %arg16[%c2_194, %c0_195, %c0_196, %c0_197] : memref<3x4x32x8xf32, #tpu.memory_space<vmem>>, vector<1x1x32x8xf32>
    %227 = vector.shape_cast %226 : vector<1x1x32x8xf32> to vector<32x8xf32>
    %cst_198 = arith.constant dense<0.000000e+00> : vector<64x8xf32>
    %228 = tpu.matmul %5, %227, %cst_198 {dimension_numbers = #tpu.dot_dimension_numbers<[1], [0], [0], [1], [0, 0, 1, 1], [], []>} : vector<64x32xf32>, vector<32x8xf32>, vector<64x8xf32> -> vector<64x8xf32>
    %c2_199 = arith.constant 2 : index
    %c0_200 = arith.constant 0 : index
    %c0_201 = arith.constant 0 : index
    %c0_202 = arith.constant 0 : index
    %229 = vector.load %arg17[%c2_199, %c0_200, %c0_201, %c0_202] : memref<3x4x1x8xf32, #tpu.memory_space<vmem>>, vector<1x1x1x8xf32>
    %230 = vector.shape_cast %229 : vector<1x1x1x8xf32> to vector<1x8xf32>
    %231 = vector.broadcast %230 : vector<1x8xf32> to vector<64x8xf32>
    %232 = arith.addf %228, %231 : vector<64x8xf32>
    %233 = tpu.transpose %225, [1, 0] : vector<64x8xf32> -> vector<8x64xf32>
    %cst_203 = arith.constant dense<0.000000e+00> : vector<10x64xf32>
    %234 = tpu.matmul %218, %233, %cst_203 {dimension_numbers = #tpu.dot_dimension_numbers<[1], [0], [0], [1], [0, 0, 1, 1], [], []>} : vector<10x8xf32>, vector<8x64xf32>, vector<10x64xf32> -> vector<10x64xf32>
    %cst_204 = arith.constant 0.353553385 : f32
    %235 = vector.broadcast %cst_204 : f32 to vector<10x64xf32>
    %236 = arith.mulf %234, %235 : vector<10x64xf32>
    %cst_205 = arith.constant dense<0xFF800000> : vector<10xf32>
    %237 = vector.multi_reduction <maximumf>, %236, %cst_205 [1] : vector<10x64xf32> to vector<10xf32>
    %238 = vector.shape_cast %237 : vector<10xf32> to vector<10x1xf32>
    %239 = vector.broadcast %238 : vector<10x1xf32> to vector<10x64xf32>
    %240 = arith.subf %236, %239 : vector<10x64xf32>
    %241 = math.exp %240 : vector<10x64xf32>
    %cst_206 = arith.constant dense<0.000000e+00> : vector<10xf32>
    %242 = vector.multi_reduction <add>, %241, %cst_206 [1] : vector<10x64xf32> to vector<10xf32>
    %243 = vector.shape_cast %242 : vector<10xf32> to vector<10x1xf32>
    %244 = tpu.reciprocal %243 {approx = true} : vector<10x1xf32> -> vector<10x1xf32>
    %245 = vector.broadcast %244 : vector<10x1xf32> to vector<10x64xf32>
    %246 = arith.mulf %241, %245 : vector<10x64xf32>
    %cst_207 = arith.constant dense<0.000000e+00> : vector<10x8xf32>
    %247 = tpu.matmul %246, %232, %cst_207 {dimension_numbers = #tpu.dot_dimension_numbers<[1], [0], [0], [1], [0, 0, 1, 1], [], []>} : vector<10x64xf32>, vector<64x8xf32>, vector<10x8xf32> -> vector<10x8xf32>
    %c0_208 = arith.constant 0 : index
    %c0_209 = arith.constant 0 : index
    %c0_210 = arith.constant 0 : index
    %248 = vector.load %arg18[%c0_208, %c0_209, %c0_210] : memref<4x8x32xf32, #tpu.memory_space<vmem>>, vector<1x8x32xf32>
    %249 = vector.shape_cast %248 : vector<1x8x32xf32> to vector<8x32xf32>
    %cst_211 = arith.constant dense<0.000000e+00> : vector<10x32xf32>
    %250 = tpu.matmul %247, %249, %cst_211 {dimension_numbers = #tpu.dot_dimension_numbers<[1], [0], [0], [1], [0, 0, 1, 1], [], []>} : vector<10x8xf32>, vector<8x32xf32>, vector<10x32xf32> -> vector<10x32xf32>
    %c0_212 = arith.constant 0 : index
    %c1_213 = arith.constant 1 : index
    %c0_214 = arith.constant 0 : index
    %c0_215 = arith.constant 0 : index
    %251 = vector.load %arg16[%c0_212, %c1_213, %c0_214, %c0_215] : memref<3x4x32x8xf32, #tpu.memory_space<vmem>>, vector<1x1x32x8xf32>
    %252 = vector.shape_cast %251 : vector<1x1x32x8xf32> to vector<32x8xf32>
    %cst_216 = arith.constant dense<0.000000e+00> : vector<10x8xf32>
    %253 = tpu.matmul %210, %252, %cst_216 {dimension_numbers = #tpu.dot_dimension_numbers<[1], [0], [0], [1], [0, 0, 1, 1], [], []>} : vector<10x32xf32>, vector<32x8xf32>, vector<10x8xf32> -> vector<10x8xf32>
    %c0_217 = arith.constant 0 : index
    %c1_218 = arith.constant 1 : index
    %c0_219 = arith.constant 0 : index
    %c0_220 = arith.constant 0 : index
    %254 = vector.load %arg17[%c0_217, %c1_218, %c0_219, %c0_220] : memref<3x4x1x8xf32, #tpu.memory_space<vmem>>, vector<1x1x1x8xf32>
    %255 = vector.shape_cast %254 : vector<1x1x1x8xf32> to vector<1x8xf32>
    %256 = vector.broadcast %255 : vector<1x8xf32> to vector<10x8xf32>
    %257 = arith.addf %253, %256 : vector<10x8xf32>
    %c1_221 = arith.constant 1 : index
    %c1_222 = arith.constant 1 : index
    %c0_223 = arith.constant 0 : index
    %c0_224 = arith.constant 0 : index
    %258 = vector.load %arg16[%c1_221, %c1_222, %c0_223, %c0_224] : memref<3x4x32x8xf32, #tpu.memory_space<vmem>>, vector<1x1x32x8xf32>
    %259 = vector.shape_cast %258 : vector<1x1x32x8xf32> to vector<32x8xf32>
    %cst_225 = arith.constant dense<0.000000e+00> : vector<64x8xf32>
    %260 = tpu.matmul %211, %259, %cst_225 {dimension_numbers = #tpu.dot_dimension_numbers<[1], [0], [0], [1], [0, 0, 1, 1], [], []>} : vector<64x32xf32>, vector<32x8xf32>, vector<64x8xf32> -> vector<64x8xf32>
    %c1_226 = arith.constant 1 : index
    %c1_227 = arith.constant 1 : index
    %c0_228 = arith.constant 0 : index
    %c0_229 = arith.constant 0 : index
    %261 = vector.load %arg17[%c1_226, %c1_227, %c0_228, %c0_229] : memref<3x4x1x8xf32, #tpu.memory_space<vmem>>, vector<1x1x1x8xf32>
    %262 = vector.shape_cast %261 : vector<1x1x1x8xf32> to vector<1x8xf32>
    %263 = vector.broadcast %262 : vector<1x8xf32> to vector<64x8xf32>
    %264 = arith.addf %260, %263 : vector<64x8xf32>
    %c2_230 = arith.constant 2 : index
    %c1_231 = arith.constant 1 : index
    %c0_232 = arith.constant 0 : index
    %c0_233 = arith.constant 0 : index
    %265 = vector.load %arg16[%c2_230, %c1_231, %c0_232, %c0_233] : memref<3x4x32x8xf32, #tpu.memory_space<vmem>>, vector<1x1x32x8xf32>
    %266 = vector.shape_cast %265 : vector<1x1x32x8xf32> to vector<32x8xf32>
    %cst_234 = arith.constant dense<0.000000e+00> : vector<64x8xf32>
    %267 = tpu.matmul %5, %266, %cst_234 {dimension_numbers = #tpu.dot_dimension_numbers<[1], [0], [0], [1], [0, 0, 1, 1], [], []>} : vector<64x32xf32>, vector<32x8xf32>, vector<64x8xf32> -> vector<64x8xf32>
    %c2_235 = arith.constant 2 : index
    %c1_236 = arith.constant 1 : index
    %c0_237 = arith.constant 0 : index
    %c0_238 = arith.constant 0 : index
    %268 = vector.load %arg17[%c2_235, %c1_236, %c0_237, %c0_238] : memref<3x4x1x8xf32, #tpu.memory_space<vmem>>, vector<1x1x1x8xf32>
    %269 = vector.shape_cast %268 : vector<1x1x1x8xf32> to vector<1x8xf32>
    %270 = vector.broadcast %269 : vector<1x8xf32> to vector<64x8xf32>
    %271 = arith.addf %267, %270 : vector<64x8xf32>
    %272 = tpu.transpose %264, [1, 0] : vector<64x8xf32> -> vector<8x64xf32>
    %cst_239 = arith.constant dense<0.000000e+00> : vector<10x64xf32>
    %273 = tpu.matmul %257, %272, %cst_239 {dimension_numbers = #tpu.dot_dimension_numbers<[1], [0], [0], [1], [0, 0, 1, 1], [], []>} : vector<10x8xf32>, vector<8x64xf32>, vector<10x64xf32> -> vector<10x64xf32>
    %cst_240 = arith.constant 0.353553385 : f32
    %274 = vector.broadcast %cst_240 : f32 to vector<10x64xf32>
    %275 = arith.mulf %273, %274 : vector<10x64xf32>
    %cst_241 = arith.constant dense<0xFF800000> : vector<10xf32>
    %276 = vector.multi_reduction <maximumf>, %275, %cst_241 [1] : vector<10x64xf32> to vector<10xf32>
    %277 = vector.shape_cast %276 : vector<10xf32> to vector<10x1xf32>
    %278 = vector.broadcast %277 : vector<10x1xf32> to vector<10x64xf32>
    %279 = arith.subf %275, %278 : vector<10x64xf32>
    %280 = math.exp %279 : vector<10x64xf32>
    %cst_242 = arith.constant dense<0.000000e+00> : vector<10xf32>
    %281 = vector.multi_reduction <add>, %280, %cst_242 [1] : vector<10x64xf32> to vector<10xf32>
    %282 = vector.shape_cast %281 : vector<10xf32> to vector<10x1xf32>
    %283 = tpu.reciprocal %282 {approx = true} : vector<10x1xf32> -> vector<10x1xf32>
    %284 = vector.broadcast %283 : vector<10x1xf32> to vector<10x64xf32>
    %285 = arith.mulf %280, %284 : vector<10x64xf32>
    %cst_243 = arith.constant dense<0.000000e+00> : vector<10x8xf32>
    %286 = tpu.matmul %285, %271, %cst_243 {dimension_numbers = #tpu.dot_dimension_numbers<[1], [0], [0], [1], [0, 0, 1, 1], [], []>} : vector<10x64xf32>, vector<64x8xf32>, vector<10x8xf32> -> vector<10x8xf32>
    %c1_244 = arith.constant 1 : index
    %c0_245 = arith.constant 0 : index
    %c0_246 = arith.constant 0 : index
    %287 = vector.load %arg18[%c1_244, %c0_245, %c0_246] : memref<4x8x32xf32, #tpu.memory_space<vmem>>, vector<1x8x32xf32>
    %288 = vector.shape_cast %287 : vector<1x8x32xf32> to vector<8x32xf32>
    %cst_247 = arith.constant dense<0.000000e+00> : vector<10x32xf32>
    %289 = tpu.matmul %286, %288, %cst_247 {dimension_numbers = #tpu.dot_dimension_numbers<[1], [0], [0], [1], [0, 0, 1, 1], [], []>} : vector<10x8xf32>, vector<8x32xf32>, vector<10x32xf32> -> vector<10x32xf32>
    %290 = arith.addf %250, %289 : vector<10x32xf32>
    %c0_248 = arith.constant 0 : index
    %c2_249 = arith.constant 2 : index
    %c0_250 = arith.constant 0 : index
    %c0_251 = arith.constant 0 : index
    %291 = vector.load %arg16[%c0_248, %c2_249, %c0_250, %c0_251] : memref<3x4x32x8xf32, #tpu.memory_space<vmem>>, vector<1x1x32x8xf32>
    %292 = vector.shape_cast %291 : vector<1x1x32x8xf32> to vector<32x8xf32>
    %cst_252 = arith.constant dense<0.000000e+00> : vector<10x8xf32>
    %293 = tpu.matmul %210, %292, %cst_252 {dimension_numbers = #tpu.dot_dimension_numbers<[1], [0], [0], [1], [0, 0, 1, 1], [], []>} : vector<10x32xf32>, vector<32x8xf32>, vector<10x8xf32> -> vector<10x8xf32>
    %c0_253 = arith.constant 0 : index
    %c2_254 = arith.constant 2 : index
    %c0_255 = arith.constant 0 : index
    %c0_256 = arith.constant 0 : index
    %294 = vector.load %arg17[%c0_253, %c2_254, %c0_255, %c0_256] : memref<3x4x1x8xf32, #tpu.memory_space<vmem>>, vector<1x1x1x8xf32>
    %295 = vector.shape_cast %294 : vector<1x1x1x8xf32> to vector<1x8xf32>
    %296 = vector.broadcast %295 : vector<1x8xf32> to vector<10x8xf32>
    %297 = arith.addf %293, %296 : vector<10x8xf32>
    %c1_257 = arith.constant 1 : index
    %c2_258 = arith.constant 2 : index
    %c0_259 = arith.constant 0 : index
    %c0_260 = arith.constant 0 : index
    %298 = vector.load %arg16[%c1_257, %c2_258, %c0_259, %c0_260] : memref<3x4x32x8xf32, #tpu.memory_space<vmem>>, vector<1x1x32x8xf32>
    %299 = vector.shape_cast %298 : vector<1x1x32x8xf32> to vector<32x8xf32>
    %cst_261 = arith.constant dense<0.000000e+00> : vector<64x8xf32>
    %300 = tpu.matmul %211, %299, %cst_261 {dimension_numbers = #tpu.dot_dimension_numbers<[1], [0], [0], [1], [0, 0, 1, 1], [], []>} : vector<64x32xf32>, vector<32x8xf32>, vector<64x8xf32> -> vector<64x8xf32>
    %c1_262 = arith.constant 1 : index
    %c2_263 = arith.constant 2 : index
    %c0_264 = arith.constant 0 : index
    %c0_265 = arith.constant 0 : index
    %301 = vector.load %arg17[%c1_262, %c2_263, %c0_264, %c0_265] : memref<3x4x1x8xf32, #tpu.memory_space<vmem>>, vector<1x1x1x8xf32>
    %302 = vector.shape_cast %301 : vector<1x1x1x8xf32> to vector<1x8xf32>
    %303 = vector.broadcast %302 : vector<1x8xf32> to vector<64x8xf32>
    %304 = arith.addf %300, %303 : vector<64x8xf32>
    %c2_266 = arith.constant 2 : index
    %c2_267 = arith.constant 2 : index
    %c0_268 = arith.constant 0 : index
    %c0_269 = arith.constant 0 : index
    %305 = vector.load %arg16[%c2_266, %c2_267, %c0_268, %c0_269] : memref<3x4x32x8xf32, #tpu.memory_space<vmem>>, vector<1x1x32x8xf32>
    %306 = vector.shape_cast %305 : vector<1x1x32x8xf32> to vector<32x8xf32>
    %cst_270 = arith.constant dense<0.000000e+00> : vector<64x8xf32>
    %307 = tpu.matmul %5, %306, %cst_270 {dimension_numbers = #tpu.dot_dimension_numbers<[1], [0], [0], [1], [0, 0, 1, 1], [], []>} : vector<64x32xf32>, vector<32x8xf32>, vector<64x8xf32> -> vector<64x8xf32>
    %c2_271 = arith.constant 2 : index
    %c2_272 = arith.constant 2 : index
    %c0_273 = arith.constant 0 : index
    %c0_274 = arith.constant 0 : index
    %308 = vector.load %arg17[%c2_271, %c2_272, %c0_273, %c0_274] : memref<3x4x1x8xf32, #tpu.memory_space<vmem>>, vector<1x1x1x8xf32>
    %309 = vector.shape_cast %308 : vector<1x1x1x8xf32> to vector<1x8xf32>
    %310 = vector.broadcast %309 : vector<1x8xf32> to vector<64x8xf32>
    %311 = arith.addf %307, %310 : vector<64x8xf32>
    %312 = tpu.transpose %304, [1, 0] : vector<64x8xf32> -> vector<8x64xf32>
    %cst_275 = arith.constant dense<0.000000e+00> : vector<10x64xf32>
    %313 = tpu.matmul %297, %312, %cst_275 {dimension_numbers = #tpu.dot_dimension_numbers<[1], [0], [0], [1], [0, 0, 1, 1], [], []>} : vector<10x8xf32>, vector<8x64xf32>, vector<10x64xf32> -> vector<10x64xf32>
    %cst_276 = arith.constant 0.353553385 : f32
    %314 = vector.broadcast %cst_276 : f32 to vector<10x64xf32>
    %315 = arith.mulf %313, %314 : vector<10x64xf32>
    %cst_277 = arith.constant dense<0xFF800000> : vector<10xf32>
    %316 = vector.multi_reduction <maximumf>, %315, %cst_277 [1] : vector<10x64xf32> to vector<10xf32>
    %317 = vector.shape_cast %316 : vector<10xf32> to vector<10x1xf32>
    %318 = vector.broadcast %317 : vector<10x1xf32> to vector<10x64xf32>
    %319 = arith.subf %315, %318 : vector<10x64xf32>
    %320 = math.exp %319 : vector<10x64xf32>
    %cst_278 = arith.constant dense<0.000000e+00> : vector<10xf32>
    %321 = vector.multi_reduction <add>, %320, %cst_278 [1] : vector<10x64xf32> to vector<10xf32>
    %322 = vector.shape_cast %321 : vector<10xf32> to vector<10x1xf32>
    %323 = tpu.reciprocal %322 {approx = true} : vector<10x1xf32> -> vector<10x1xf32>
    %324 = vector.broadcast %323 : vector<10x1xf32> to vector<10x64xf32>
    %325 = arith.mulf %320, %324 : vector<10x64xf32>
    %cst_279 = arith.constant dense<0.000000e+00> : vector<10x8xf32>
    %326 = tpu.matmul %325, %311, %cst_279 {dimension_numbers = #tpu.dot_dimension_numbers<[1], [0], [0], [1], [0, 0, 1, 1], [], []>} : vector<10x64xf32>, vector<64x8xf32>, vector<10x8xf32> -> vector<10x8xf32>
    %c2_280 = arith.constant 2 : index
    %c0_281 = arith.constant 0 : index
    %c0_282 = arith.constant 0 : index
    %327 = vector.load %arg18[%c2_280, %c0_281, %c0_282] : memref<4x8x32xf32, #tpu.memory_space<vmem>>, vector<1x8x32xf32>
    %328 = vector.shape_cast %327 : vector<1x8x32xf32> to vector<8x32xf32>
    %cst_283 = arith.constant dense<0.000000e+00> : vector<10x32xf32>
    %329 = tpu.matmul %326, %328, %cst_283 {dimension_numbers = #tpu.dot_dimension_numbers<[1], [0], [0], [1], [0, 0, 1, 1], [], []>} : vector<10x8xf32>, vector<8x32xf32>, vector<10x32xf32> -> vector<10x32xf32>
    %330 = arith.addf %290, %329 : vector<10x32xf32>
    %c0_284 = arith.constant 0 : index
    %c3_285 = arith.constant 3 : index
    %c0_286 = arith.constant 0 : index
    %c0_287 = arith.constant 0 : index
    %331 = vector.load %arg16[%c0_284, %c3_285, %c0_286, %c0_287] : memref<3x4x32x8xf32, #tpu.memory_space<vmem>>, vector<1x1x32x8xf32>
    %332 = vector.shape_cast %331 : vector<1x1x32x8xf32> to vector<32x8xf32>
    %cst_288 = arith.constant dense<0.000000e+00> : vector<10x8xf32>
    %333 = tpu.matmul %210, %332, %cst_288 {dimension_numbers = #tpu.dot_dimension_numbers<[1], [0], [0], [1], [0, 0, 1, 1], [], []>} : vector<10x32xf32>, vector<32x8xf32>, vector<10x8xf32> -> vector<10x8xf32>
    %c0_289 = arith.constant 0 : index
    %c3_290 = arith.constant 3 : index
    %c0_291 = arith.constant 0 : index
    %c0_292 = arith.constant 0 : index
    %334 = vector.load %arg17[%c0_289, %c3_290, %c0_291, %c0_292] : memref<3x4x1x8xf32, #tpu.memory_space<vmem>>, vector<1x1x1x8xf32>
    %335 = vector.shape_cast %334 : vector<1x1x1x8xf32> to vector<1x8xf32>
    %336 = vector.broadcast %335 : vector<1x8xf32> to vector<10x8xf32>
    %337 = arith.addf %333, %336 : vector<10x8xf32>
    %c1_293 = arith.constant 1 : index
    %c3_294 = arith.constant 3 : index
    %c0_295 = arith.constant 0 : index
    %c0_296 = arith.constant 0 : index
    %338 = vector.load %arg16[%c1_293, %c3_294, %c0_295, %c0_296] : memref<3x4x32x8xf32, #tpu.memory_space<vmem>>, vector<1x1x32x8xf32>
    %339 = vector.shape_cast %338 : vector<1x1x32x8xf32> to vector<32x8xf32>
    %cst_297 = arith.constant dense<0.000000e+00> : vector<64x8xf32>
    %340 = tpu.matmul %211, %339, %cst_297 {dimension_numbers = #tpu.dot_dimension_numbers<[1], [0], [0], [1], [0, 0, 1, 1], [], []>} : vector<64x32xf32>, vector<32x8xf32>, vector<64x8xf32> -> vector<64x8xf32>
    %c1_298 = arith.constant 1 : index
    %c3_299 = arith.constant 3 : index
    %c0_300 = arith.constant 0 : index
    %c0_301 = arith.constant 0 : index
    %341 = vector.load %arg17[%c1_298, %c3_299, %c0_300, %c0_301] : memref<3x4x1x8xf32, #tpu.memory_space<vmem>>, vector<1x1x1x8xf32>
    %342 = vector.shape_cast %341 : vector<1x1x1x8xf32> to vector<1x8xf32>
    %343 = vector.broadcast %342 : vector<1x8xf32> to vector<64x8xf32>
    %344 = arith.addf %340, %343 : vector<64x8xf32>
    %c2_302 = arith.constant 2 : index
    %c3_303 = arith.constant 3 : index
    %c0_304 = arith.constant 0 : index
    %c0_305 = arith.constant 0 : index
    %345 = vector.load %arg16[%c2_302, %c3_303, %c0_304, %c0_305] : memref<3x4x32x8xf32, #tpu.memory_space<vmem>>, vector<1x1x32x8xf32>
    %346 = vector.shape_cast %345 : vector<1x1x32x8xf32> to vector<32x8xf32>
    %cst_306 = arith.constant dense<0.000000e+00> : vector<64x8xf32>
    %347 = tpu.matmul %5, %346, %cst_306 {dimension_numbers = #tpu.dot_dimension_numbers<[1], [0], [0], [1], [0, 0, 1, 1], [], []>} : vector<64x32xf32>, vector<32x8xf32>, vector<64x8xf32> -> vector<64x8xf32>
    %c2_307 = arith.constant 2 : index
    %c3_308 = arith.constant 3 : index
    %c0_309 = arith.constant 0 : index
    %c0_310 = arith.constant 0 : index
    %348 = vector.load %arg17[%c2_307, %c3_308, %c0_309, %c0_310] : memref<3x4x1x8xf32, #tpu.memory_space<vmem>>, vector<1x1x1x8xf32>
    %349 = vector.shape_cast %348 : vector<1x1x1x8xf32> to vector<1x8xf32>
    %350 = vector.broadcast %349 : vector<1x8xf32> to vector<64x8xf32>
    %351 = arith.addf %347, %350 : vector<64x8xf32>
    %352 = tpu.transpose %344, [1, 0] : vector<64x8xf32> -> vector<8x64xf32>
    %cst_311 = arith.constant dense<0.000000e+00> : vector<10x64xf32>
    %353 = tpu.matmul %337, %352, %cst_311 {dimension_numbers = #tpu.dot_dimension_numbers<[1], [0], [0], [1], [0, 0, 1, 1], [], []>} : vector<10x8xf32>, vector<8x64xf32>, vector<10x64xf32> -> vector<10x64xf32>
    %cst_312 = arith.constant 0.353553385 : f32
    %354 = vector.broadcast %cst_312 : f32 to vector<10x64xf32>
    %355 = arith.mulf %353, %354 : vector<10x64xf32>
    %cst_313 = arith.constant dense<0xFF800000> : vector<10xf32>
    %356 = vector.multi_reduction <maximumf>, %355, %cst_313 [1] : vector<10x64xf32> to vector<10xf32>
    %357 = vector.shape_cast %356 : vector<10xf32> to vector<10x1xf32>
    %358 = vector.broadcast %357 : vector<10x1xf32> to vector<10x64xf32>
    %359 = arith.subf %355, %358 : vector<10x64xf32>
    %360 = math.exp %359 : vector<10x64xf32>
    %cst_314 = arith.constant dense<0.000000e+00> : vector<10xf32>
    %361 = vector.multi_reduction <add>, %360, %cst_314 [1] : vector<10x64xf32> to vector<10xf32>
    %362 = vector.shape_cast %361 : vector<10xf32> to vector<10x1xf32>
    %363 = tpu.reciprocal %362 {approx = true} : vector<10x1xf32> -> vector<10x1xf32>
    %364 = vector.broadcast %363 : vector<10x1xf32> to vector<10x64xf32>
    %365 = arith.mulf %360, %364 : vector<10x64xf32>
    %cst_315 = arith.constant dense<0.000000e+00> : vector<10x8xf32>
    %366 = tpu.matmul %365, %351, %cst_315 {dimension_numbers = #tpu.dot_dimension_numbers<[1], [0], [0], [1], [0, 0, 1, 1], [], []>} : vector<10x64xf32>, vector<64x8xf32>, vector<10x8xf32> -> vector<10x8xf32>
    %c3_316 = arith.constant 3 : index
    %c0_317 = arith.constant 0 : index
    %c0_318 = arith.constant 0 : index
    %367 = vector.load %arg18[%c3_316, %c0_317, %c0_318] : memref<4x8x32xf32, #tpu.memory_space<vmem>>, vector<1x8x32xf32>
    %368 = vector.shape_cast %367 : vector<1x8x32xf32> to vector<8x32xf32>
    %cst_319 = arith.constant dense<0.000000e+00> : vector<10x32xf32>
    %369 = tpu.matmul %366, %368, %cst_319 {dimension_numbers = #tpu.dot_dimension_numbers<[1], [0], [0], [1], [0, 0, 1, 1], [], []>} : vector<10x8xf32>, vector<8x32xf32>, vector<10x32xf32> -> vector<10x32xf32>
    %370 = arith.addf %330, %369 : vector<10x32xf32>
    %c0_320 = arith.constant 0 : index
    %c0_321 = arith.constant 0 : index
    %371 = vector.load %arg19[%c0_320, %c0_321] : memref<1x32xf32, #tpu.memory_space<vmem>>, vector<1x32xf32>
    %372 = vector.broadcast %371 : vector<1x32xf32> to vector<10x32xf32>
    %373 = arith.addf %370, %372 : vector<10x32xf32>
    %374 = arith.addf %209, %373 : vector<10x32xf32>
    %c0_322 = arith.constant 0 : index
    %c0_323 = arith.constant 0 : index
    %375 = vector.load %arg20[%c0_322, %c0_323] : memref<1x32xf32, #tpu.memory_space<vmem>>, vector<1x32xf32>
    %c0_324 = arith.constant 0 : index
    %c0_325 = arith.constant 0 : index
    %376 = vector.load %arg21[%c0_324, %c0_325] : memref<1x32xf32, #tpu.memory_space<vmem>>, vector<1x32xf32>
    %cst_326 = arith.constant dense<0.000000e+00> : vector<10xf32>
    %377 = vector.multi_reduction <add>, %374, %cst_326 [1] : vector<10x32xf32> to vector<10xf32>
    %378 = vector.shape_cast %377 : vector<10xf32> to vector<10x1xf32>
    %cst_327 = arith.constant 3.200000e+01 : f32
    %379 = vector.broadcast %cst_327 : f32 to vector<10x1xf32>
    %380 = arith.divf %378, %379 : vector<10x1xf32>
    %381 = vector.broadcast %380 : vector<10x1xf32> to vector<10x32xf32>
    %382 = arith.subf %374, %381 : vector<10x32xf32>
    %383 = arith.mulf %382, %382 : vector<10x32xf32>
    %cst_328 = arith.constant dense<0.000000e+00> : vector<10xf32>
    %384 = vector.multi_reduction <add>, %383, %cst_328 [1] : vector<10x32xf32> to vector<10xf32>
    %385 = vector.shape_cast %384 : vector<10xf32> to vector<10x1xf32>
    %cst_329 = arith.constant 3.200000e+01 : f32
    %386 = vector.broadcast %cst_329 : f32 to vector<10x1xf32>
    %387 = arith.divf %385, %386 : vector<10x1xf32>
    %388 = vector.broadcast %380 : vector<10x1xf32> to vector<10x32xf32>
    %389 = arith.subf %374, %388 : vector<10x32xf32>
    %cst_330 = arith.constant 9.99999974E-6 : f32
    %390 = vector.broadcast %cst_330 : f32 to vector<10x1xf32>
    %391 = arith.addf %387, %390 : vector<10x1xf32>
    %392 = math.rsqrt %391 : vector<10x1xf32>
    %393 = vector.broadcast %392 : vector<10x1xf32> to vector<10x32xf32>
    %394 = arith.mulf %389, %393 : vector<10x32xf32>
    %395 = vector.broadcast %375 : vector<1x32xf32> to vector<10x32xf32>
    %396 = arith.mulf %394, %395 : vector<10x32xf32>
    %397 = vector.broadcast %376 : vector<1x32xf32> to vector<10x32xf32>
    %398 = arith.addf %396, %397 : vector<10x32xf32>
    %c0_331 = arith.constant 0 : index
    %c0_332 = arith.constant 0 : index
    %399 = vector.load %arg22[%c0_331, %c0_332] : memref<32x64xf32, #tpu.memory_space<vmem>>, vector<32x64xf32>
    %c0_333 = arith.constant 0 : index
    %c0_334 = arith.constant 0 : index
    %400 = vector.load %arg23[%c0_333, %c0_334] : memref<1x64xf32, #tpu.memory_space<vmem>>, vector<1x64xf32>
    %cst_335 = arith.constant dense<0.000000e+00> : vector<10x64xf32>
    %401 = tpu.matmul %398, %399, %cst_335 {dimension_numbers = #tpu.dot_dimension_numbers<[1], [0], [0], [1], [0, 0, 1, 1], [], []>} : vector<10x32xf32>, vector<32x64xf32>, vector<10x64xf32> -> vector<10x64xf32>
    %402 = vector.broadcast %400 : vector<1x64xf32> to vector<10x64xf32>
    %403 = arith.addf %401, %402 : vector<10x64xf32>
    %cst_336 = arith.constant 0.000000e+00 : f32
    %404 = vector.broadcast %cst_336 : f32 to vector<10x64xf32>
    %405 = arith.maximumf %403, %404 : vector<10x64xf32>
    %c0_337 = arith.constant 0 : index
    %c0_338 = arith.constant 0 : index
    %406 = vector.load %arg24[%c0_337, %c0_338] : memref<64x32xf32, #tpu.memory_space<vmem>>, vector<64x32xf32>
    %c0_339 = arith.constant 0 : index
    %c0_340 = arith.constant 0 : index
    %407 = vector.load %arg25[%c0_339, %c0_340] : memref<1x32xf32, #tpu.memory_space<vmem>>, vector<1x32xf32>
    %cst_341 = arith.constant dense<0.000000e+00> : vector<10x32xf32>
    %408 = tpu.matmul %405, %406, %cst_341 {dimension_numbers = #tpu.dot_dimension_numbers<[1], [0], [0], [1], [0, 0, 1, 1], [], []>} : vector<10x64xf32>, vector<64x32xf32>, vector<10x32xf32> -> vector<10x32xf32>
    %409 = vector.broadcast %407 : vector<1x32xf32> to vector<10x32xf32>
    %410 = arith.addf %408, %409 : vector<10x32xf32>
    %411 = arith.addf %398, %410 : vector<10x32xf32>
    %c0_342 = arith.constant 0 : index
    %c0_343 = arith.constant 0 : index
    %412 = vector.load %arg26[%c0_342, %c0_343] : memref<1x32xf32, #tpu.memory_space<vmem>>, vector<1x32xf32>
    %c0_344 = arith.constant 0 : index
    %c0_345 = arith.constant 0 : index
    %413 = vector.load %arg27[%c0_344, %c0_345] : memref<1x32xf32, #tpu.memory_space<vmem>>, vector<1x32xf32>
    %cst_346 = arith.constant dense<0.000000e+00> : vector<10xf32>
    %414 = vector.multi_reduction <add>, %411, %cst_346 [1] : vector<10x32xf32> to vector<10xf32>
    %415 = vector.shape_cast %414 : vector<10xf32> to vector<10x1xf32>
    %cst_347 = arith.constant 3.200000e+01 : f32
    %416 = vector.broadcast %cst_347 : f32 to vector<10x1xf32>
    %417 = arith.divf %415, %416 : vector<10x1xf32>
    %418 = vector.broadcast %417 : vector<10x1xf32> to vector<10x32xf32>
    %419 = arith.subf %411, %418 : vector<10x32xf32>
    %420 = arith.mulf %419, %419 : vector<10x32xf32>
    %cst_348 = arith.constant dense<0.000000e+00> : vector<10xf32>
    %421 = vector.multi_reduction <add>, %420, %cst_348 [1] : vector<10x32xf32> to vector<10xf32>
    %422 = vector.shape_cast %421 : vector<10xf32> to vector<10x1xf32>
    %cst_349 = arith.constant 3.200000e+01 : f32
    %423 = vector.broadcast %cst_349 : f32 to vector<10x1xf32>
    %424 = arith.divf %422, %423 : vector<10x1xf32>
    %425 = vector.broadcast %417 : vector<10x1xf32> to vector<10x32xf32>
    %426 = arith.subf %411, %425 : vector<10x32xf32>
    %cst_350 = arith.constant 9.99999974E-6 : f32
    %427 = vector.broadcast %cst_350 : f32 to vector<10x1xf32>
    %428 = arith.addf %424, %427 : vector<10x1xf32>
    %429 = math.rsqrt %428 : vector<10x1xf32>
    %430 = vector.broadcast %429 : vector<10x1xf32> to vector<10x32xf32>
    %431 = arith.mulf %426, %430 : vector<10x32xf32>
    %432 = vector.broadcast %412 : vector<1x32xf32> to vector<10x32xf32>
    %433 = arith.mulf %431, %432 : vector<10x32xf32>
    %434 = vector.broadcast %413 : vector<1x32xf32> to vector<10x32xf32>
    %435 = arith.addf %433, %434 : vector<10x32xf32>
    %c0_351 = arith.constant 0 : index
    %c0_352 = arith.constant 0 : index
    %436 = vector.load %arg28[%c0_351, %c0_352] : memref<32x32xf32, #tpu.memory_space<vmem>>, vector<32x32xf32>
    %c0_353 = arith.constant 0 : index
    %c0_354 = arith.constant 0 : index
    %437 = vector.load %arg29[%c0_353, %c0_354] : memref<1x32xf32, #tpu.memory_space<vmem>>, vector<1x32xf32>
    %cst_355 = arith.constant dense<0.000000e+00> : vector<10x32xf32>
    %438 = tpu.matmul %435, %436, %cst_355 {dimension_numbers = #tpu.dot_dimension_numbers<[1], [0], [0], [1], [0, 0, 1, 1], [], []>} : vector<10x32xf32>, vector<32x32xf32>, vector<10x32xf32> -> vector<10x32xf32>
    %439 = vector.broadcast %437 : vector<1x32xf32> to vector<10x32xf32>
    %440 = arith.addf %438, %439 : vector<10x32xf32>
    %cst_356 = arith.constant 0.000000e+00 : f32
    %441 = vector.broadcast %cst_356 : f32 to vector<10x32xf32>
    %442 = arith.maximumf %440, %441 : vector<10x32xf32>
    %c0_357 = arith.constant 0 : index
    %c0_358 = arith.constant 0 : index
    %443 = vector.load %arg30[%c0_357, %c0_358] : memref<32x32xf32, #tpu.memory_space<vmem>>, vector<32x32xf32>
    %c0_359 = arith.constant 0 : index
    %c0_360 = arith.constant 0 : index
    %444 = vector.load %arg31[%c0_359, %c0_360] : memref<1x32xf32, #tpu.memory_space<vmem>>, vector<1x32xf32>
    %cst_361 = arith.constant dense<0.000000e+00> : vector<10x32xf32>
    %445 = tpu.matmul %442, %443, %cst_361 {dimension_numbers = #tpu.dot_dimension_numbers<[1], [0], [0], [1], [0, 0, 1, 1], [], []>} : vector<10x32xf32>, vector<32x32xf32>, vector<10x32xf32> -> vector<10x32xf32>
    %446 = vector.broadcast %444 : vector<1x32xf32> to vector<10x32xf32>
    %447 = arith.addf %445, %446 : vector<10x32xf32>
    %cst_362 = arith.constant 0.000000e+00 : f32
    %448 = vector.broadcast %cst_362 : f32 to vector<10x32xf32>
    %449 = arith.maximumf %447, %448 : vector<10x32xf32>
    %c0_363 = arith.constant 0 : index
    %c0_364 = arith.constant 0 : index
    %450 = vector.load %arg32[%c0_363, %c0_364] : memref<32x4xf32, #tpu.memory_space<vmem>>, vector<32x4xf32>
    %c0_365 = arith.constant 0 : index
    %c0_366 = arith.constant 0 : index
    %451 = vector.load %arg33[%c0_365, %c0_366] : memref<1x4xf32, #tpu.memory_space<vmem>>, vector<1x4xf32>
    %cst_367 = arith.constant dense<0.000000e+00> : vector<10x4xf32>
    %452 = tpu.matmul %449, %450, %cst_367 {dimension_numbers = #tpu.dot_dimension_numbers<[1], [0], [0], [1], [0, 0, 1, 1], [], []>} : vector<10x32xf32>, vector<32x4xf32>, vector<10x4xf32> -> vector<10x4xf32>
    %453 = vector.broadcast %451 : vector<1x4xf32> to vector<10x4xf32>
    %454 = arith.addf %452, %453 : vector<10x4xf32>
    %c0_368 = arith.constant 0 : index
    %c0_369 = arith.constant 0 : index
    %c0_370 = arith.constant 0 : index
    %455 = vector.load %arg34[%c0_368, %c0_369, %c0_370] : memref<1x10x32xf32, #tpu.memory_space<vmem>>, vector<1x10x32xf32>
    %456 = vector.shape_cast %455 : vector<1x10x32xf32> to vector<10x32xf32>
    %457 = vector.shape_cast %435 : vector<10x32xf32> to vector<1x10x32xf32>
    tpu.vector_store %arg34[%c0_368, %c0_369, %c0_370], %457 {strides = array<i32>} : memref<1x10x32xf32, #tpu.memory_space<vmem>>, vector<1x10x32xf32>,
    %cst_371 = arith.constant 0.000000e+00 : f32
    %cst_372 = arith.constant 1.000000e+00 : f32
    %458 = vector.broadcast %cst_371 : f32 to vector<10x4xf32>
    %459 = arith.maximumf %458, %3 : vector<10x4xf32>
    %460 = vector.broadcast %cst_372 : f32 to vector<10x4xf32>
    %461 = arith.minimumf %460, %459 : vector<10x4xf32>
    %cst_373 = arith.constant 1.000000e-03 : f32
    %462 = vector.broadcast %cst_373 : f32 to vector<10x4xf32>
    %463 = arith.maximumf %461, %462 : vector<10x4xf32>
    %cst_374 = arith.constant 1.000000e+00 : f32
    %464 = vector.broadcast %cst_374 : f32 to vector<10x4xf32>
    %465 = arith.subf %464, %461 : vector<10x4xf32>
    %cst_375 = arith.constant 1.000000e-03 : f32
    %466 = vector.broadcast %cst_375 : f32 to vector<10x4xf32>
    %467 = arith.maximumf %465, %466 : vector<10x4xf32>
    %468 = arith.divf %463, %467 : vector<10x4xf32>
    %469 = math.log %468 : vector<10x4xf32>
    %470 = arith.addf %454, %469 : vector<10x4xf32>
    %cst_376 = arith.constant 0.000000e+00 : f32
    %471 = vector.broadcast %cst_376 : f32 to vector<10x4xf32>
    %472 = arith.subf %471, %470 : vector<10x4xf32>
    %473 = math.exp %472 : vector<10x4xf32>
    %cst_377 = arith.constant 1.000000e+00 : f32
    %474 = vector.broadcast %cst_377 : f32 to vector<10x4xf32>
    %475 = arith.addf %474, %473 : vector<10x4xf32>
    %cst_378 = arith.constant 1.000000e+00 : f32
    %476 = vector.broadcast %cst_378 : f32 to vector<10x4xf32>
    %477 = arith.divf %476, %475 : vector<10x4xf32>
    %c0_379 = arith.constant 0 : index
    %c0_380 = arith.constant 0 : index
    %c0_381 = arith.constant 0 : index
    %478 = vector.load %arg35[%c0_379, %c0_380, %c0_381] : memref<1x10x4xf32, #tpu.memory_space<vmem>>, vector<1x10x4xf32>
    %479 = vector.shape_cast %478 : vector<1x10x4xf32> to vector<10x4xf32>
    %480 = vector.shape_cast %477 : vector<10x4xf32> to vector<1x10x4xf32>
    tpu.vector_store %arg35[%c0_379, %c0_380, %c0_381], %480 {strides = array<i32>} : memref<1x10x4xf32, #tpu.memory_space<vmem>>, vector<1x10x4xf32>,
    return
  }
  func.func @transform_0(%arg0: i32) -> (i32, i32, i32) {
    %c0_i32 = arith.constant 0 : i32
    %c0_i32_0 = arith.constant 0 : i32
    %c0_i32_1 = arith.constant 0 : i32
    return %arg0, %c0_i32, %c0_i32_0 : i32, i32, i32
  }
  func.func @transform_1(%arg0: i32) -> (i32, i32, i32) {
    %c0_i32 = arith.constant 0 : i32
    %c0_i32_0 = arith.constant 0 : i32
    %c0_i32_1 = arith.constant 0 : i32
    return %arg0, %c0_i32, %c0_i32_0 : i32, i32, i32
  }
  func.func @transform_2(%arg0: i32) -> (i32, i32, i32) {
    %c0_i32 = arith.constant 0 : i32
    %c0_i32_0 = arith.constant 0 : i32
    %c0_i32_1 = arith.constant 0 : i32
    return %arg0, %c0_i32, %c0_i32_0 : i32, i32, i32
  }
  func.func @transform_3(%arg0: i32) -> (i32, i32, i32) {
    %c0_i32 = arith.constant 0 : i32
    %c0_i32_0 = arith.constant 0 : i32
    %c0_i32_1 = arith.constant 0 : i32
    return %arg0, %c0_i32, %c0_i32_0 : i32, i32, i32
  }
  func.func @transform_4(%arg0: i32) -> (i32, i32, i32) {
    %c0_i32 = arith.constant 0 : i32
    %c0_i32_0 = arith.constant 0 : i32
    %c0_i32_1 = arith.constant 0 : i32
    return %arg0, %c0_i32, %c0_i32_0 : i32, i32, i32
  }
  func.func @transform_5(%arg0: i32) -> (i32, i32) {
    %c0_i32 = arith.constant 0 : i32
    %c0_i32_0 = arith.constant 0 : i32
    %c0_i32_1 = arith.constant 0 : i32
    return %c0_i32, %c0_i32_0 : i32, i32
  }
  func.func @transform_6(%arg0: i32) -> (i32, i32) {
    %c0_i32 = arith.constant 0 : i32
    %c0_i32_0 = arith.constant 0 : i32
    %c0_i32_1 = arith.constant 0 : i32
    return %c0_i32, %c0_i32_0 : i32, i32
  }
  func.func @transform_7(%arg0: i32) -> (i32, i32) {
    %c0_i32 = arith.constant 0 : i32
    %c0_i32_0 = arith.constant 0 : i32
    %c0_i32_1 = arith.constant 0 : i32
    return %c0_i32, %c0_i32_0 : i32, i32
  }
  func.func @transform_8(%arg0: i32) -> (i32, i32) {
    %c0_i32 = arith.constant 0 : i32
    %c0_i32_0 = arith.constant 0 : i32
    %c0_i32_1 = arith.constant 0 : i32
    return %c0_i32, %c0_i32_0 : i32, i32
  }
  func.func @transform_9(%arg0: i32) -> (i32, i32, i32, i32) {
    %c0_i32 = arith.constant 0 : i32
    %c0_i32_0 = arith.constant 0 : i32
    %c0_i32_1 = arith.constant 0 : i32
    %c0_i32_2 = arith.constant 0 : i32
    %c0_i32_3 = arith.constant 0 : i32
    return %c0_i32, %c0_i32_0, %c0_i32_1, %c0_i32_2 : i32, i32, i32, i32
  }
  func.func @transform_10(%arg0: i32) -> (i32, i32, i32, i32) {
    %c0_i32 = arith.constant 0 : i32
    %c0_i32_0 = arith.constant 0 : i32
    %c0_i32_1 = arith.constant 0 : i32
    %c0_i32_2 = arith.constant 0 : i32
    %c0_i32_3 = arith.constant 0 : i32
    return %c0_i32, %c0_i32_0, %c0_i32_1, %c0_i32_2 : i32, i32, i32, i32
  }
  func.func @transform_11(%arg0: i32) -> (i32, i32, i32) {
    %c0_i32 = arith.constant 0 : i32
    %c0_i32_0 = arith.constant 0 : i32
    %c0_i32_1 = arith.constant 0 : i32
    %c0_i32_2 = arith.constant 0 : i32
    return %c0_i32, %c0_i32_0, %c0_i32_1 : i32, i32, i32
  }
  func.func @transform_12(%arg0: i32) -> (i32, i32) {
    %c0_i32 = arith.constant 0 : i32
    %c0_i32_0 = arith.constant 0 : i32
    %c0_i32_1 = arith.constant 0 : i32
    return %c0_i32, %c0_i32_0 : i32, i32
  }
  func.func @transform_13(%arg0: i32) -> (i32, i32) {
    %c0_i32 = arith.constant 0 : i32
    %c0_i32_0 = arith.constant 0 : i32
    %c0_i32_1 = arith.constant 0 : i32
    return %c0_i32, %c0_i32_0 : i32, i32
  }
  func.func @transform_14(%arg0: i32) -> (i32, i32) {
    %c0_i32 = arith.constant 0 : i32
    %c0_i32_0 = arith.constant 0 : i32
    %c0_i32_1 = arith.constant 0 : i32
    return %c0_i32, %c0_i32_0 : i32, i32
  }
  func.func @transform_15(%arg0: i32) -> (i32, i32, i32, i32) {
    %c0_i32 = arith.constant 0 : i32
    %c0_i32_0 = arith.constant 0 : i32
    %c0_i32_1 = arith.constant 0 : i32
    %c0_i32_2 = arith.constant 0 : i32
    %c0_i32_3 = arith.constant 0 : i32
    return %c0_i32, %c0_i32_0, %c0_i32_1, %c0_i32_2 : i32, i32, i32, i32
  }
  func.func @transform_16(%arg0: i32) -> (i32, i32, i32, i32) {
    %c0_i32 = arith.constant 0 : i32
    %c0_i32_0 = arith.constant 0 : i32
    %c0_i32_1 = arith.constant 0 : i32
    %c0_i32_2 = arith.constant 0 : i32
    %c0_i32_3 = arith.constant 0 : i32
    return %c0_i32, %c0_i32_0, %c0_i32_1, %c0_i32_2 : i32, i32, i32, i32
  }
  func.func @transform_17(%arg0: i32) -> (i32, i32, i32) {
    %c0_i32 = arith.constant 0 : i32
    %c0_i32_0 = arith.constant 0 : i32
    %c0_i32_1 = arith.constant 0 : i32
    %c0_i32_2 = arith.constant 0 : i32
    return %c0_i32, %c0_i32_0, %c0_i32_1 : i32, i32, i32
  }
  func.func @transform_18(%arg0: i32) -> (i32, i32) {
    %c0_i32 = arith.constant 0 : i32
    %c0_i32_0 = arith.constant 0 : i32
    %c0_i32_1 = arith.constant 0 : i32
    return %c0_i32, %c0_i32_0 : i32, i32
  }
  func.func @transform_19(%arg0: i32) -> (i32, i32) {
    %c0_i32 = arith.constant 0 : i32
    %c0_i32_0 = arith.constant 0 : i32
    %c0_i32_1 = arith.constant 0 : i32
    return %c0_i32, %c0_i32_0 : i32, i32
  }
  func.func @transform_20(%arg0: i32) -> (i32, i32) {
    %c0_i32 = arith.constant 0 : i32
    %c0_i32_0 = arith.constant 0 : i32
    %c0_i32_1 = arith.constant 0 : i32
    return %c0_i32, %c0_i32_0 : i32, i32
  }
  func.func @transform_21(%arg0: i32) -> (i32, i32) {
    %c0_i32 = arith.constant 0 : i32
    %c0_i32_0 = arith.constant 0 : i32
    %c0_i32_1 = arith.constant 0 : i32
    return %c0_i32, %c0_i32_0 : i32, i32
  }
  func.func @transform_22(%arg0: i32) -> (i32, i32) {
    %c0_i32 = arith.constant 0 : i32
    %c0_i32_0 = arith.constant 0 : i32
    %c0_i32_1 = arith.constant 0 : i32
    return %c0_i32, %c0_i32_0 : i32, i32
  }
  func.func @transform_23(%arg0: i32) -> (i32, i32) {
    %c0_i32 = arith.constant 0 : i32
    %c0_i32_0 = arith.constant 0 : i32
    %c0_i32_1 = arith.constant 0 : i32
    return %c0_i32, %c0_i32_0 : i32, i32
  }
  func.func @transform_24(%arg0: i32) -> (i32, i32) {
    %c0_i32 = arith.constant 0 : i32
    %c0_i32_0 = arith.constant 0 : i32
    %c0_i32_1 = arith.constant 0 : i32
    return %c0_i32, %c0_i32_0 : i32, i32
  }
  func.func @transform_25(%arg0: i32) -> (i32, i32) {
    %c0_i32 = arith.constant 0 : i32
    %c0_i32_0 = arith.constant 0 : i32
    %c0_i32_1 = arith.constant 0 : i32
    return %c0_i32, %c0_i32_0 : i32, i32
  }
  func.func @transform_26(%arg0: i32) -> (i32, i32) {
    %c0_i32 = arith.constant 0 : i32
    %c0_i32_0 = arith.constant 0 : i32
    %c0_i32_1 = arith.constant 0 : i32
    return %c0_i32, %c0_i32_0 : i32, i32
  }
  func.func @transform_27(%arg0: i32) -> (i32, i32) {
    %c0_i32 = arith.constant 0 : i32
    %c0_i32_0 = arith.constant 0 : i32
    %c0_i32_1 = arith.constant 0 : i32
    return %c0_i32, %c0_i32_0 : i32, i32
  }
  func.func @transform_28(%arg0: i32) -> (i32, i32) {
    %c0_i32 = arith.constant 0 : i32
    %c0_i32_0 = arith.constant 0 : i32
    %c0_i32_1 = arith.constant 0 : i32
    return %c0_i32, %c0_i32_0 : i32, i32
  }
  func.func @transform_29(%arg0: i32) -> (i32, i32) {
    %c0_i32 = arith.constant 0 : i32
    %c0_i32_0 = arith.constant 0 : i32
    %c0_i32_1 = arith.constant 0 : i32
    return %c0_i32, %c0_i32_0 : i32, i32
  }
  func.func @transform_30(%arg0: i32) -> (i32, i32) {
    %c0_i32 = arith.constant 0 : i32
    %c0_i32_0 = arith.constant 0 : i32
    %c0_i32_1 = arith.constant 0 : i32
    return %c0_i32, %c0_i32_0 : i32, i32
  }
  func.func @transform_31(%arg0: i32) -> (i32, i32) {
    %c0_i32 = arith.constant 0 : i32
    %c0_i32_0 = arith.constant 0 : i32
    %c0_i32_1 = arith.constant 0 : i32
    return %c0_i32, %c0_i32_0 : i32, i32
  }
  func.func @transform_32(%arg0: i32) -> (i32, i32) {
    %c0_i32 = arith.constant 0 : i32
    %c0_i32_0 = arith.constant 0 : i32
    %c0_i32_1 = arith.constant 0 : i32
    return %c0_i32, %c0_i32_0 : i32, i32
  }
  func.func @transform_33(%arg0: i32) -> (i32, i32, i32) {
    %c0_i32 = arith.constant 0 : i32
    %c0_i32_0 = arith.constant 0 : i32
    %c0_i32_1 = arith.constant 0 : i32
    return %arg0, %c0_i32, %c0_i32_0 : i32, i32, i32
  }
  func.func @transform_34(%arg0: i32) -> (i32, i32, i32) {
    %c0_i32 = arith.constant 0 : i32
    %c0_i32_0 = arith.constant 0 : i32
    %c0_i32_1 = arith.constant 0 : i32
    return %arg0, %c0_i32, %c0_i32_0 : i32, i32, i32
  }
}

module attributes {stable_mosaic.version = 11 : i64} {
  func.func @_head_kernel(%arg0: i32, %arg1: memref<1x10x32xf32, #tpu.memory_space<vmem>>, %arg2: memref<1x10x4xf32, #tpu.memory_space<vmem>>, %arg3: memref<32x32xf32, #tpu.memory_space<vmem>>, %arg4: memref<1x32xf32, #tpu.memory_space<vmem>>, %arg5: memref<32x32xf32, #tpu.memory_space<vmem>>, %arg6: memref<1x32xf32, #tpu.memory_space<vmem>>, %arg7: memref<32x4xf32, #tpu.memory_space<vmem>>, %arg8: memref<1x4xf32, #tpu.memory_space<vmem>>, %arg9: memref<32x6xf32, #tpu.memory_space<vmem>>, %arg10: memref<1x6xf32, #tpu.memory_space<vmem>>, %arg11: memref<6x128xf32, #tpu.memory_space<vmem>>, %arg12: memref<4x128xf32, #tpu.memory_space<vmem>>, %arg13: memref<1x10x128xf32, #tpu.memory_space<vmem>>) attributes {dimension_semantics = [#tpu.dimension_semantics<parallel>], iteration_bounds = array<i64: 2>, scalar_prefetch = 0 : i64, scratch_operands = 0 : i64, tpu.core_type = #tpu.core_type<tc>, window_params = [{transform_indices = @transform_0, window_bounds = array<i64: 1, 10, 32>}, {transform_indices = @transform_1, window_bounds = array<i64: 1, 10, 4>}, {pipeline_mode = #tpu.pipeline_mode<synchronous>, transform_indices = @transform_2, window_bounds = array<i64: 32, 32>}, {pipeline_mode = #tpu.pipeline_mode<synchronous>, transform_indices = @transform_3, window_bounds = array<i64: 1, 32>}, {pipeline_mode = #tpu.pipeline_mode<synchronous>, transform_indices = @transform_4, window_bounds = array<i64: 32, 32>}, {pipeline_mode = #tpu.pipeline_mode<synchronous>, transform_indices = @transform_5, window_bounds = array<i64: 1, 32>}, {pipeline_mode = #tpu.pipeline_mode<synchronous>, transform_indices = @transform_6, window_bounds = array<i64: 32, 4>}, {pipeline_mode = #tpu.pipeline_mode<synchronous>, transform_indices = @transform_7, window_bounds = array<i64: 1, 4>}, {pipeline_mode = #tpu.pipeline_mode<synchronous>, transform_indices = @transform_8, window_bounds = array<i64: 32, 6>}, {pipeline_mode = #tpu.pipeline_mode<synchronous>, transform_indices = @transform_9, window_bounds = array<i64: 1, 6>}, {pipeline_mode = #tpu.pipeline_mode<synchronous>, transform_indices = @transform_10, window_bounds = array<i64: 6, 128>}, {pipeline_mode = #tpu.pipeline_mode<synchronous>, transform_indices = @transform_11, window_bounds = array<i64: 4, 128>}, {transform_indices = @transform_12, window_bounds = array<i64: 1, 10, 128>}]} {
    %c0 = arith.constant 0 : index
    %c0_0 = arith.constant 0 : index
    %c0_1 = arith.constant 0 : index
    %0 = vector.load %arg1[%c0, %c0_0, %c0_1] : memref<1x10x32xf32, #tpu.memory_space<vmem>>, vector<1x10x32xf32>
    %1 = vector.shape_cast %0 : vector<1x10x32xf32> to vector<10x32xf32>
    %c0_2 = arith.constant 0 : index
    %c0_3 = arith.constant 0 : index
    %c0_4 = arith.constant 0 : index
    %2 = vector.load %arg2[%c0_2, %c0_3, %c0_4] : memref<1x10x4xf32, #tpu.memory_space<vmem>>, vector<1x10x4xf32>
    %3 = vector.shape_cast %2 : vector<1x10x4xf32> to vector<10x4xf32>
    %c0_5 = arith.constant 0 : index
    %c0_6 = arith.constant 0 : index
    %4 = vector.load %arg3[%c0_5, %c0_6] : memref<32x32xf32, #tpu.memory_space<vmem>>, vector<32x32xf32>
    %c0_7 = arith.constant 0 : index
    %c0_8 = arith.constant 0 : index
    %5 = vector.load %arg4[%c0_7, %c0_8] : memref<1x32xf32, #tpu.memory_space<vmem>>, vector<1x32xf32>
    %cst = arith.constant dense<0.000000e+00> : vector<10x32xf32>
    %6 = tpu.matmul %1, %4, %cst {dimension_numbers = #tpu.dot_dimension_numbers<[1], [0], [0], [1], [0, 0, 1, 1], [], []>} : vector<10x32xf32>, vector<32x32xf32>, vector<10x32xf32> -> vector<10x32xf32>
    %7 = vector.broadcast %5 : vector<1x32xf32> to vector<10x32xf32>
    %8 = arith.addf %6, %7 : vector<10x32xf32>
    %cst_9 = arith.constant 0.000000e+00 : f32
    %9 = vector.broadcast %cst_9 : f32 to vector<10x32xf32>
    %10 = arith.maximumf %8, %9 : vector<10x32xf32>
    %c0_10 = arith.constant 0 : index
    %c0_11 = arith.constant 0 : index
    %11 = vector.load %arg5[%c0_10, %c0_11] : memref<32x32xf32, #tpu.memory_space<vmem>>, vector<32x32xf32>
    %c0_12 = arith.constant 0 : index
    %c0_13 = arith.constant 0 : index
    %12 = vector.load %arg6[%c0_12, %c0_13] : memref<1x32xf32, #tpu.memory_space<vmem>>, vector<1x32xf32>
    %cst_14 = arith.constant dense<0.000000e+00> : vector<10x32xf32>
    %13 = tpu.matmul %10, %11, %cst_14 {dimension_numbers = #tpu.dot_dimension_numbers<[1], [0], [0], [1], [0, 0, 1, 1], [], []>} : vector<10x32xf32>, vector<32x32xf32>, vector<10x32xf32> -> vector<10x32xf32>
    %14 = vector.broadcast %12 : vector<1x32xf32> to vector<10x32xf32>
    %15 = arith.addf %13, %14 : vector<10x32xf32>
    %cst_15 = arith.constant 0.000000e+00 : f32
    %16 = vector.broadcast %cst_15 : f32 to vector<10x32xf32>
    %17 = arith.maximumf %15, %16 : vector<10x32xf32>
    %c0_16 = arith.constant 0 : index
    %c0_17 = arith.constant 0 : index
    %18 = vector.load %arg7[%c0_16, %c0_17] : memref<32x4xf32, #tpu.memory_space<vmem>>, vector<32x4xf32>
    %c0_18 = arith.constant 0 : index
    %c0_19 = arith.constant 0 : index
    %19 = vector.load %arg8[%c0_18, %c0_19] : memref<1x4xf32, #tpu.memory_space<vmem>>, vector<1x4xf32>
    %cst_20 = arith.constant dense<0.000000e+00> : vector<10x4xf32>
    %20 = tpu.matmul %17, %18, %cst_20 {dimension_numbers = #tpu.dot_dimension_numbers<[1], [0], [0], [1], [0, 0, 1, 1], [], []>} : vector<10x32xf32>, vector<32x4xf32>, vector<10x4xf32> -> vector<10x4xf32>
    %21 = vector.broadcast %19 : vector<1x4xf32> to vector<10x4xf32>
    %22 = arith.addf %20, %21 : vector<10x4xf32>
    %cst_21 = arith.constant 0.000000e+00 : f32
    %cst_22 = arith.constant 1.000000e+00 : f32
    %23 = vector.broadcast %cst_21 : f32 to vector<10x4xf32>
    %24 = arith.maximumf %23, %3 : vector<10x4xf32>
    %25 = vector.broadcast %cst_22 : f32 to vector<10x4xf32>
    %26 = arith.minimumf %25, %24 : vector<10x4xf32>
    %cst_23 = arith.constant 1.000000e-03 : f32
    %27 = vector.broadcast %cst_23 : f32 to vector<10x4xf32>
    %28 = arith.maximumf %26, %27 : vector<10x4xf32>
    %cst_24 = arith.constant 1.000000e+00 : f32
    %29 = vector.broadcast %cst_24 : f32 to vector<10x4xf32>
    %30 = arith.subf %29, %26 : vector<10x4xf32>
    %cst_25 = arith.constant 1.000000e-03 : f32
    %31 = vector.broadcast %cst_25 : f32 to vector<10x4xf32>
    %32 = arith.maximumf %30, %31 : vector<10x4xf32>
    %33 = arith.divf %28, %32 : vector<10x4xf32>
    %34 = math.log %33 : vector<10x4xf32>
    %35 = arith.addf %22, %34 : vector<10x4xf32>
    %cst_26 = arith.constant 0.000000e+00 : f32
    %36 = vector.broadcast %cst_26 : f32 to vector<10x4xf32>
    %37 = arith.subf %36, %35 : vector<10x4xf32>
    %38 = math.exp %37 : vector<10x4xf32>
    %cst_27 = arith.constant 1.000000e+00 : f32
    %39 = vector.broadcast %cst_27 : f32 to vector<10x4xf32>
    %40 = arith.addf %39, %38 : vector<10x4xf32>
    %cst_28 = arith.constant 1.000000e+00 : f32
    %41 = vector.broadcast %cst_28 : f32 to vector<10x4xf32>
    %42 = arith.divf %41, %40 : vector<10x4xf32>
    %c0_29 = arith.constant 0 : index
    %c0_30 = arith.constant 0 : index
    %43 = vector.load %arg9[%c0_29, %c0_30] : memref<32x6xf32, #tpu.memory_space<vmem>>, vector<32x6xf32>
    %c0_31 = arith.constant 0 : index
    %c0_32 = arith.constant 0 : index
    %44 = vector.load %arg10[%c0_31, %c0_32] : memref<1x6xf32, #tpu.memory_space<vmem>>, vector<1x6xf32>
    %cst_33 = arith.constant dense<0.000000e+00> : vector<10x6xf32>
    %45 = tpu.matmul %1, %43, %cst_33 {dimension_numbers = #tpu.dot_dimension_numbers<[1], [0], [0], [1], [0, 0, 1, 1], [], []>} : vector<10x32xf32>, vector<32x6xf32>, vector<10x6xf32> -> vector<10x6xf32>
    %46 = vector.broadcast %44 : vector<1x6xf32> to vector<10x6xf32>
    %47 = arith.addf %45, %46 : vector<10x6xf32>
    %cst_34 = arith.constant 0.000000e+00 : f32
    %48 = vector.broadcast %cst_34 : f32 to vector<10x6xf32>
    %49 = arith.subf %48, %47 : vector<10x6xf32>
    %50 = math.exp %49 : vector<10x6xf32>
    %cst_35 = arith.constant 1.000000e+00 : f32
    %51 = vector.broadcast %cst_35 : f32 to vector<10x6xf32>
    %52 = arith.addf %51, %50 : vector<10x6xf32>
    %cst_36 = arith.constant 1.000000e+00 : f32
    %53 = vector.broadcast %cst_36 : f32 to vector<10x6xf32>
    %54 = arith.divf %53, %52 : vector<10x6xf32>
    %c0_37 = arith.constant 0 : index
    %c0_38 = arith.constant 0 : index
    %55 = vector.load %arg11[%c0_37, %c0_38] : memref<6x128xf32, #tpu.memory_space<vmem>>, vector<6x128xf32>
    %cst_39 = arith.constant dense<0.000000e+00> : vector<10x128xf32>
    %56 = tpu.matmul %54, %55, %cst_39 {dimension_numbers = #tpu.dot_dimension_numbers<[1], [0], [0], [1], [0, 0, 1, 1], [], []>} : vector<10x6xf32>, vector<6x128xf32>, vector<10x128xf32> -> vector<10x128xf32>
    %c0_40 = arith.constant 0 : index
    %c0_41 = arith.constant 0 : index
    %57 = vector.load %arg12[%c0_40, %c0_41] : memref<4x128xf32, #tpu.memory_space<vmem>>, vector<4x128xf32>
    %cst_42 = arith.constant dense<0.000000e+00> : vector<10x128xf32>
    %58 = tpu.matmul %42, %57, %cst_42 {dimension_numbers = #tpu.dot_dimension_numbers<[1], [0], [0], [1], [0, 0, 1, 1], [], []>} : vector<10x4xf32>, vector<4x128xf32>, vector<10x128xf32> -> vector<10x128xf32>
    %59 = arith.addf %56, %58 : vector<10x128xf32>
    %c0_43 = arith.constant 0 : index
    %c0_44 = arith.constant 0 : index
    %c0_45 = arith.constant 0 : index
    %60 = vector.load %arg13[%c0_43, %c0_44, %c0_45] : memref<1x10x128xf32, #tpu.memory_space<vmem>>, vector<1x10x128xf32>
    %61 = vector.shape_cast %60 : vector<1x10x128xf32> to vector<10x128xf32>
    %62 = vector.shape_cast %59 : vector<10x128xf32> to vector<1x10x128xf32>
    tpu.vector_store %arg13[%c0_43, %c0_44, %c0_45], %62 {strides = array<i32>} : memref<1x10x128xf32, #tpu.memory_space<vmem>>, vector<1x10x128xf32>,
    return
  }
  func.func @transform_0(%arg0: i32) -> (i32, i32, i32) {
    %c0_i32 = arith.constant 0 : i32
    %c0_i32_0 = arith.constant 0 : i32
    %c0_i32_1 = arith.constant 0 : i32
    return %arg0, %c0_i32, %c0_i32_0 : i32, i32, i32
  }
  func.func @transform_1(%arg0: i32) -> (i32, i32, i32) {
    %c0_i32 = arith.constant 0 : i32
    %c0_i32_0 = arith.constant 0 : i32
    %c0_i32_1 = arith.constant 0 : i32
    return %arg0, %c0_i32, %c0_i32_0 : i32, i32, i32
  }
  func.func @transform_2(%arg0: i32) -> (i32, i32) {
    %c0_i32 = arith.constant 0 : i32
    %c0_i32_0 = arith.constant 0 : i32
    %c0_i32_1 = arith.constant 0 : i32
    return %c0_i32, %c0_i32_0 : i32, i32
  }
  func.func @transform_3(%arg0: i32) -> (i32, i32) {
    %c0_i32 = arith.constant 0 : i32
    %c0_i32_0 = arith.constant 0 : i32
    %c0_i32_1 = arith.constant 0 : i32
    return %c0_i32, %c0_i32_0 : i32, i32
  }
  func.func @transform_4(%arg0: i32) -> (i32, i32) {
    %c0_i32 = arith.constant 0 : i32
    %c0_i32_0 = arith.constant 0 : i32
    %c0_i32_1 = arith.constant 0 : i32
    return %c0_i32, %c0_i32_0 : i32, i32
  }
  func.func @transform_5(%arg0: i32) -> (i32, i32) {
    %c0_i32 = arith.constant 0 : i32
    %c0_i32_0 = arith.constant 0 : i32
    %c0_i32_1 = arith.constant 0 : i32
    return %c0_i32, %c0_i32_0 : i32, i32
  }
  func.func @transform_6(%arg0: i32) -> (i32, i32) {
    %c0_i32 = arith.constant 0 : i32
    %c0_i32_0 = arith.constant 0 : i32
    %c0_i32_1 = arith.constant 0 : i32
    return %c0_i32, %c0_i32_0 : i32, i32
  }
  func.func @transform_7(%arg0: i32) -> (i32, i32) {
    %c0_i32 = arith.constant 0 : i32
    %c0_i32_0 = arith.constant 0 : i32
    %c0_i32_1 = arith.constant 0 : i32
    return %c0_i32, %c0_i32_0 : i32, i32
  }
  func.func @transform_8(%arg0: i32) -> (i32, i32) {
    %c0_i32 = arith.constant 0 : i32
    %c0_i32_0 = arith.constant 0 : i32
    %c0_i32_1 = arith.constant 0 : i32
    return %c0_i32, %c0_i32_0 : i32, i32
  }
  func.func @transform_9(%arg0: i32) -> (i32, i32) {
    %c0_i32 = arith.constant 0 : i32
    %c0_i32_0 = arith.constant 0 : i32
    %c0_i32_1 = arith.constant 0 : i32
    return %c0_i32, %c0_i32_0 : i32, i32
  }
  func.func @transform_10(%arg0: i32) -> (i32, i32) {
    %c0_i32 = arith.constant 0 : i32
    %c0_i32_0 = arith.constant 0 : i32
    %c0_i32_1 = arith.constant 0 : i32
    return %c0_i32, %c0_i32_0 : i32, i32
  }
  func.func @transform_11(%arg0: i32) -> (i32, i32) {
    %c0_i32 = arith.constant 0 : i32
    %c0_i32_0 = arith.constant 0 : i32
    %c0_i32_1 = arith.constant 0 : i32
    return %c0_i32, %c0_i32_0 : i32, i32
  }
  func.func @transform_12(%arg0: i32) -> (i32, i32, i32) {
    %c0_i32 = arith.constant 0 : i32
    %c0_i32_0 = arith.constant 0 : i32
    %c0_i32_1 = arith.constant 0 : i32
    return %arg0, %c0_i32, %c0_i32_0 : i32, i32, i32
  }
}

</mosaic_0001>

<bundles_post_ra>
// kernel: dn_detr_forward.7
= control target key start
LH: loop header
LB: loop body
LE: loop exit
PB: predicated region body
PF: predicated region fallthrough
CT: control target
= control target key end

     0   :  { %s1315_s21 = smov 0   ;;  %s1414_s0 = inlined_call_operand.vmem [shape: f32[2,10,32], index: 0, kind: input, shape index: {}]   ;;  %s1415_s1 = inlined_call_operand.vmem [shape: f32[2,10,4], index: 1, kind: input, shape index: {}]   ;;  %s1416_s2 = inlined_call_operand.vmem [shape: f32[32,32], index: 2, kind: input, shape index: {}]   ;;  %s1417_s3 = inlined_call_operand.vmem [shape: f32[1,32], index: 3, kind: input, shape index: {}]   ;;  %s1418_s4 = inlined_call_operand.vmem [shape: f32[32,32], index: 4, kind: input, shape index: {}]   ;;  %s1419_s5 = inlined_call_operand.vmem [shape: f32[1,32], index: 5, kind: input, shape index: {}]   ;;  %s1420_s6 = inlined_call_operand.vmem [shape: f32[32,4], index: 6, kind: input, shape index: {}]   ;;  %s1421_s7 = inlined_call_operand.vmem [shape: f32[1,4], index: 7, kind: input, shape index: {}]   ;;  %s1422_s8 = inlined_call_operand.vmem [shape: f32[32,6], index: 8, kind: input, shape index: {}]   ;;  %s1423_s9 = inlined_call_operand.vmem [shape: f32[1,6], index: 9, kind: input, shape index: {}]   ;;  %s1424_s10 = inlined_call_operand.vmem [shape: f32[6,128], index: 10, kind: input, shape index: {}]   ;;  %s1425_s11 = inlined_call_operand.vmem [shape: f32[4,128], index: 11, kind: input, shape index: {}]   ;;  %s1426_s12 = inlined_call_operand.vmem [shape: f32[2,10,128], index: 12, kind: output, shape index: {}]  }
   0x1 LB: > { %s1092_s22 = sadd.s32 4294967295, %s1248_s21   ;;  %p1096_p0 = scmp.ge.s32.totalorder %s1248_s21, 1  ;;  %s1248_s21 = sphi %s1315_s21, %s22_s21  }
   0x2   : > { %p372_p1 = scmp.lt.s32.totalorder %s1248_s21, 3 }
   0x4   : > { %p373_p2 = pnand %p1096_p0, %p372_p1 }
   0x5   : > { %p419_p3 = scmp.lt.s32.totalorder (!%p373_p2), %s1092_s22, 1 }
   0x6   : > { %376 = sbr.rel (%p373_p2) target bundleno = 852 (0x354), region = 68 }
   0xb   : > { %v441_v0 = vld [vmem:[%s1416_s2 + $0x18] sm:$0xff]  ;;  %v440_v1 = vld [vmem:[%s1416_s2 + $0x10] sm:$0xff]  ;;  %v439_v2 = vld [vmem:[%s1416_s2 + $0x8] sm:$0xff]  ;;  %s1428_s22 = smov (!%p419_p3, %s1092_s22), 1  ;;  %vm449_vm0 = vcmask 261120   ;;  %vm944_vm1 = vcmask 1045504  }
   0xc   : > { %1156 = vmatprep.subr.mxu0 %v441_v0  ;;  %v438_v3 = vld [vmem:[%s1416_s2] sm:$0xff]  ;;  %s1335_s13 = sshll.u32 %s1428_s22, 4  ;;  %v536_v6 = vld [vmem:[%s1418_s4 + $0x18] sm:$0xff]  ;;  %v535_v7 = vld [vmem:[%s1418_s4 + $0x10] sm:$0xff]  ;;  %vm858_vm2 = vcmask 1043456   ;;  %vm937_vm3 = vcmask 48128  }
   0xd   : > { %1157 = vmatpush3.msra.mxu0 %v441_v0  ;;  %s423_s16 = scalar_lea.vmem %s1414_s0, %s1335_s13  ;;  %1167 = vmatprep.subr.mxu1 %v536_v6  ;;  %v534_v8 = vld [vmem:[%s1418_s4 + $0x8] sm:$0xff]  ;;  %v533_v9 = vld [vmem:[%s1418_s4] sm:$0xff]  ;;  %v754_v10 = vld [vmem:[%s1422_s8 + $0x18] sm:$0xff]  ;;  %s428_s22 = scalar_lea.vmem %s1415_s1, %s1335_s13  ;;  %vm851_vm4 = vcmask 31744  }
   0xe   : > { %1158 = vmatprep.subr.mxu0 %v440_v1  ;;  %v434_v4 = vld [vmem:[%s423_s16] sm:$0xff]  ;;  %v435_v5 = vld [vmem:[%s423_s16 + $0x8] sm:$0x3]  ;;  %1168 = vmatpush3.msra.mxu1 %v536_v6  ;;  %v753_v18 = vld [vmem:[%s1422_s8 + $0x10] sm:$0xff]  ;;  %s433_s27 = scalar_lea.vmem %s1426_s12, %s1335_s13 }
   0xf   : > { %1159 = vmatpush3.msra.mxu0 %v440_v1  ;;  %1164 = vmatprep.mubr.msk.f32.mxu0 %vm449_vm0, %v434_v4  ;;  %v1103_v11 = vld [vmem:[%s1417_s3] ss:$0 sm:$0xff]  ;;  %v630_v19 = vld [vmem:[%s1420_s6 + $0x18] sm:$0xff]  ;;  %v752_v20 = vld [vmem:[%s1422_s8 + $0x8] sm:$0xff] }
  0x10   : > { %1160 = vmatprep.subr.mxu0 %v439_v2  ;;  %1169 = vmatprep.subr.mxu1 %v535_v7  ;;  %v629_v21 = vld [vmem:[%s1420_s6 + $0x10] sm:$0xff]  ;;  %v751_v22 = vld [vmem:[%s1422_s8] sm:$0xff]  ;;  %v628_v23 = vld [vmem:[%s1420_s6 + $0x8] sm:$0xff] }
  0x11   : > { %1161 = vmatpush3.msra.mxu0 %v439_v2  ;;  %1170 = vmatpush3.msra.mxu1 %v535_v7  ;;  %v627_v24 = vld [vmem:[%s1420_s6] sm:$0xff]  ;;  %v437_v49 = vld [vmem:[%s428_s22 + $0x8] sm:$0x3] }
  0x12   : > { %1162 = vmatprep.subr.mxu0 %v438_v3  ;;  %1171 = vmatprep.subr.mxu1 %v534_v8  ;;  %v1106_v25 = vld [vmem:[%s1419_s5] ss:$0 sm:$0xff]  ;;  %v720_v51 = vmax.f32 %v437_v49, 0.0 }
  0x13   : > { %1163 = vmatpush3.msra.mxu0 %v438_v3  ;;  %1172 = vmatpush3.msra.mxu1 %v534_v8  ;;  %v1112_v32 = vld [vmem:[%s1423_s9] ss:$0 sm:$0xff] }
  0x14   : > { %1165 = vmatmul.mubr.msk.f32.vlgmr.msra.gmra.mxu0 %vm449_vm0, %v435_v5  ;;  %1173 = vmatprep.subr.mxu1 %v533_v9  ;;  %v849_v45 = vld [vmem:[%s1424_s10] sm:$0x3f]  ;;  %v722_v53 = vmin.f32 %v720_v51, 1.0 }
  0x15   : > { %1174 = vmatpush3.msra.mxu1 %v533_v9  ;;  %1178 = vmatprep.subr.mxu0 %v630_v19  ;;  %v850_v46 = vld [vmem:[%s1425_s11] sm:$0xf] }
  0x16   : > { %1189 = vmatprep.subr.mxu1 %v754_v10  ;;  %1179 = vmatpush3.msra.mxu0 %v630_v19  ;;  %v436_v50 = vld [vmem:[%s428_s22] sm:$0xff]  ;;  %v726_v55 = vsub.f32 1.0, %v722_v53  ;;  %v724_v59 = vmax.f32 %v722_v53, 0.001 }
  0x17   : > { %1180 = vmatprep.subr.mxu0 %v629_v21  ;;  %v719_v52 = vmax.f32 %v436_v50, 0.0  ;;  %v1109_v3 = vld [vmem:[%s1421_s7] ss:$0 sm:$0xff] }
  0x18   : > { %1181 = vmatpush3.msra.mxu0 %v629_v21  ;;  %v728_v57 = vmax.f32 %v726_v55, 0.001 }
  0x19   : > { %1182 = vmatprep.subr.mxu0 %v628_v23  ;;  %v721_v54 = vmin.f32 %v719_v52, 1.0 }
  0x1a   : > { %1183 = vmatpush3.msra.mxu0 %v628_v23 }
  0x1b   : > { %1184 = vmatprep.subr.mxu0 %v627_v24  ;;  %v725_v56 = vsub.f32 1.0, %v721_v54  ;;  %v723_v61 = vmax.f32 %v721_v54, 0.001 }
  0x1c   : > { %1185 = vmatpush3.msra.mxu0 %v627_v24 }
  0x1d   : > { %1200 = vmatprep.subr.msk.mxu0 %vm858_vm2, %v850_v46  ;;  %v727_v58 = vmax.f32 %v725_v56, 0.001 }
  0xd4   : > { %v1166_v12 = vpop.f32.mrf.mxu0 }
  0xd5   : > { %v528_v13 = vadd.f32 %v1166_v12, %v1103_v11 }
  0xd6   : > { %v522_v14 = vpop.f32.mrf.mxu0 }
  0xd7   : > { %v523_v15 = vadd.f32 %v1103_v11, %v522_v14  ;;  %v532_v17 = vmax.f32 %v528_v13, 0.0 }
  0xd9   : > { %v531_v16 = vmax.f32 %v523_v15, 0.0 }
  0xdb   : > { %1175 = vmatprep.mubr.msk.f32.mxu1 %vm449_vm0, %v531_v16 }
  0xdc   : > { %1176 = vmatmul.mubr.msk.f32.vlgmr.msra.gmra.mxu1 %vm449_vm0, %v532_v17 }
  0xdd   : > { %1190 = vmatpush3.msra.mxu1 %v754_v10  ;;  %1197 = vmatprep.mubr.msk.f32.mxu1 %vm449_vm0, %v434_v4 }
  0xde   : > { %1191 = vmatprep.subr.mxu1 %v753_v18 }
  0xdf   : > { %1192 = vmatpush3.msra.mxu1 %v753_v18 }
  0xe0   : > { %1193 = vmatprep.subr.mxu1 %v752_v20 }
  0xe1   : > { %1194 = vmatpush3.msra.mxu1 %v752_v20 }
  0xe2   : > { %1195 = vmatprep.subr.mxu1 %v751_v22 }
  0xe3   : > { %1196 = vmatpush3.msra.mxu1 %v751_v22 }
  0xe4   : > { %1198 = vmatmul.mubr.msk.f32.vlgmr.msra.gmra.mxu1 %vm449_vm0, %v435_v5  ;;  %1205 = vmatprep.subr.msk.mxu1 %vm944_vm1, %v849_v45 }
  0xe5   : > { %1206 = vmatpush3.msk.msra.mxu1 %vm944_vm1, %v849_v45 }
 0x19c   : > { %v1177_v26 = vpop.f32.mrf.mxu1 }
 0x19d   : > { %v622_v27 = vadd.f32 %v1177_v26, %v1106_v25 }
 0x19e   : > { %v616_v28 = vpop.f32.mrf.mxu1 }
 0x19f   : > { %v617_v29 = vadd.f32 %v1106_v25, %v616_v28  ;;  %v626_v31 = vmax.f32 %v622_v27, 0.0 }
 0x1a1   : > { %v625_v30 = vmax.f32 %v617_v29, 0.0 }
 0x1a3   : > { %1186 = vmatprep.mubr.msk.f32.mxu0 %vm449_vm0, %v625_v30 }
 0x1a4   : > { %1187 = vmatmul.mubr.msk.f32.vlgmr.msra.gmra.mxu0 %vm449_vm0, %v626_v31  ;;  %v1199_v33 = vpop.f32.mrf.mxu1 }
 0x1a5   : > { %v834_v34 = vadd.f32 %v1199_v33, %v1112_v32  ;;  %1201 = vmatpush3.msk.msra.mxu0 %vm858_vm2, %v850_v46 }
 0x1a6   : > { %v828_v35 = vpop.f32.mrf.mxu1 }
 0x1a7   : > { %v838_v36 = vsub.f32 0.0, %v834_v34  ;;  %v829_v37 = vadd.f32 %v1112_v32, %v828_v35 }
 0x1a9   : > { %v841_v38 = vmul.f32 1.442695, %v838_v36  ;;  %v837_v39 = vsub.f32 0.0, %v829_v37 }
 0x1ab   : > { %1218 = vpow2.f32 %v841_v38  ;;  %v839_v40 = vmul.f32 1.442695, %v837_v39 }
 0x1ad   : > { %1220 = vpow2.f32 %v839_v40 }
 0x1b8   : > { %v1219_v41 = vpop.eup %1218 }
 0x1b9   : > { %v844_v42 = vadd.f32 1.0, %v1219_v41 }
 0x1ba   : > { %v1221_v43 = vpop.eup %1220 }
 0x1bb   : > { %v843_v44 = vadd.f32 1.0, %v1221_v43  ;;  %1222 = vrcp.f32 %v844_v42 }
 0x1bd   : > { %1224 = vrcp.f32 %v843_v44 }
 0x1be   : > { %1226 = vrcp.f32 %v728_v57 }
 0x1bf   : > { %1228 = vrcp.f32 %v727_v58 }
 0x1c8   : > { %v1223_v47 = vpop.eup %1222 }
 0x1ca   : > { %v1225_v48 = vpop.eup %1224 }
 0x1cb   : > { %1207 = vmatprep.mubr.msk.f32.mxu1 %vm937_vm3, %v1225_v48  ;;  %v1227_v60 = vpop.eup %1226 }
 0x1cc   : > { %1208 = vmatmul.mubr.msk.f32.vlgmr.msra.gmra.mxu1 %vm937_vm3, %v1223_v47  ;;  %v1229_v62 = vpop.eup %1228  ;;  %v732_v63 = vmul.f32 %v1227_v60, %v724_v59 }
 0x1cd   : > { %v730_v0 = vmul.f32 %v1229_v62, %v723_v61 }
 0x1ce   : > { %1230 = vlog2.f32 %v732_v63 }
 0x1cf   : > { %1232 = vlog2.f32 %v730_v0 }
 0x1db   : > { %v1231_v1 = vpop.eup %1230 }
 0x1dc   : > { %v1233_v2 = vpop.eup %1232  ;;  %v736_v4 = vmul.f32 0.6931472, %v1231_v1 }
 0x1dd   : > { %v734_v7 = vmul.f32 0.6931472, %v1233_v2 }
 0x264   : > { %v1188_v5 = vpop.f32.mrf.mxu0 }
 0x265   : > { %v716_v6 = vadd.f32 %v1188_v5, %v1109_v3 }
 0x266   : > { %v710_v8 = vpop.f32.mrf.mxu0 }
 0x267   : > { %v738_v9 = vadd.f32 %v736_v4, %v716_v6  ;;  %v711_v10 = vadd.f32 %v1109_v3, %v710_v8 }
 0x269   : > { %v740_v11 = vsub.f32 0.0, %v738_v9  ;;  %v737_v12 = vadd.f32 %v734_v7, %v711_v10 }
 0x26b   : > { %v743_v13 = vmul.f32 1.442695, %v740_v11  ;;  %v739_v14 = vsub.f32 0.0, %v737_v12 }
 0x26d   : > { %1234 = vpow2.f32 %v743_v13  ;;  %v741_v15 = vmul.f32 1.442695, %v739_v14 }
 0x26f   : > { %1236 = vpow2.f32 %v741_v15 }
 0x27a   : > { %v1235_v16 = vpop.eup %1234 }
 0x27b   : > { %v746_v18 = vadd.f32 1.0, %v1235_v16 }
 0x27c   : > { %v1237_v17 = vpop.eup %1236 }
 0x27d   : > { %v745_v19 = vadd.f32 1.0, %v1237_v17 }
 0x27f   : > { %1238 = vrcp.f32 %v745_v19 }
 0x280   : > { %1240 = vrcp.f32 %v746_v18 }
 0x28c   : > { %v1239_v20 = vpop.eup %1238  ;;  %v1209_v22 = vpop.f32.mrf.mxu1 }
 0x28d   : > { %v1241_v21 = vpop.eup %1240  ;;  %1202 = vmatprep.mubr.msk.f32.mxu0 %vm851_vm4, %v1239_v20 }
 0x28e   : > { %1203 = vmatmul.mubr.msk.f32.vlgmr.msra.gmra.mxu0 %vm851_vm4, %v1241_v21  ;;  %v1014_v25 = vpop.f32.mrf.mxu1 }
 0x34e   : > { %v1204_v23 = vpop.f32.mrf.mxu0 }
 0x34f   : > { %v1020_v24 = vadd.f32 %v1209_v22, %v1204_v23 }
 0x350   : > { %v928_v26 = vpop.f32.mrf.mxu0 }
 0x351   : > { %1024 = vst [vmem:[%s433_s27 + $0x8] sm:$0x3] %v1020_v24  ;;  %v1015_v27 = vadd.f32 %v1014_v25, %v928_v26 }
 0x353   : > { %1023 = vst [vmem:[%s433_s27] sm:$0xff] %v1015_v27 }
 0x354 PF: > { %s22_s21 = sadd.s32 1, %s1248_s21  }
 0x355   : > { %p19_p4 = scmp.ge.s32.totalorder %s22_s21, 4  }
 0x357   :  { %21 = sbr.rel (!%p19_p4) target bundleno = 1 (0x1), region = 101 }

// kernel: dn_detr_forward.4
= control target key start
LH: loop header
LB: loop body
LE: loop exit
PB: predicated region body
PF: predicated region fallthrough
CT: control target
= control target key end

     0   :  { %s6663_s27 = smov 0   ;;  %s7853_s0 = inlined_call_operand.vmem [shape: f32[2,64,3], index: 0, kind: input, shape index: {}]   ;;  %s7854_s1 = inlined_call_operand.vmem [shape: f32[2,64,32], index: 1, kind: input, shape index: {}]   ;;  %s7855_s2 = inlined_call_operand.vmem [shape: f32[3,8], index: 2, kind: input, shape index: {}]   ;;  %s7856_s3 = inlined_call_operand.vmem [shape: f32[1,8], index: 3, kind: input, shape index: {}]   ;;  %s7857_s4 = inlined_call_operand.vmem [shape: f32[8,32], index: 4, kind: input, shape index: {}]   ;;  %s7858_s5 = inlined_call_operand.vmem [shape: f32[1,32], index: 5, kind: input, shape index: {}]   ;;  %s7859_s6 = inlined_call_operand.vmem [shape: f32[3,4,32,8], index: 6, kind: input, shape index: {}]   ;;  %s7860_s7 = inlined_call_operand.vmem [shape: f32[3,4,1,8], index: 7, kind: input, shape index: {}]   ;;  %s7861_s8 = inlined_call_operand.vmem [shape: f32[4,8,32], index: 8, kind: input, shape index: {}]   ;;  %s7862_s9 = inlined_call_operand.vmem [shape: f32[1,32], index: 9, kind: input, shape index: {}]   ;;  %s7863_s10 = inlined_call_operand.vmem [shape: f32[1,32], index: 10, kind: input, shape index: {}]   ;;  %s7864_s11 = inlined_call_operand.vmem [shape: f32[1,32], index: 11, kind: input, shape index: {}]   ;;  %s7865_s12 = inlined_call_operand.vmem [shape: f32[32,64], index: 12, kind: input, shape index: {}]   ;;  %s7866_s13 = inlined_call_operand.vmem [shape: f32[1,64], index: 13, kind: input, shape index: {}]   ;;  %s7867_s14 = inlined_call_operand.vmem [shape: f32[64,32], index: 14, kind: input, shape index: {}]   ;;  %s7868_s15 = inlined_call_operand.vmem [shape: f32[1,32], index: 15, kind: input, shape index: {}]   ;;  %s7869_s16 = inlined_call_operand.vmem [shape: f32[1,32], index: 16, kind: input, shape index: {}]   ;;  %s7870_s17 = inlined_call_operand.vmem [shape: f32[1,32], index: 17, kind: input, shape index: {}]   ;;  %s7871_s18 = inlined_call_operand.vmem [shape: f32[2,64,32], index: 18, kind: output, shape index: {}]  }
   0x1   :  { %7873 = sst [smem:[#allocation3_spill]] %s7853_s0 }
   0x2   :  { %7874 = sst [smem:[#allocation4_spill]] %s7854_s1 }
   0x3   :  { %7875 = sst [smem:[#allocation5_spill]] %s7855_s2 }
   0x4 LB: > { %s5090_s28 = sadd.s32 4294967295, %s6566_s27   ;;  %p5094_p0 = scmp.ge.s32.totalorder %s6566_s27, 1  ;;  %s6566_s27 = sphi %s6663_s27, %s28_s27  }
   0x5   : > { %p522_p1 = scmp.lt.s32.totalorder %s6566_s27, 3 }
   0x7   : > { %p523_p2 = pnand %p5094_p0, %p522_p1 }
   0x9   : > { %526 = sbr.rel (%p523_p2) target bundleno = 5207 (0x1457), region = 92 }
   0xe   : > { %s7876_s0 = sld [smem:[#allocation5_spill]]  ;;  %vm645_vm0 = vcmask 1042432   ;;  %p581_p3 = scmp.lt.s32.totalorder %s5090_s28, 1  ;;  %vm620_vm1 = vcmask 23552   ;;  %v762_v9 = vld [vmem:[%s7857_s4] sm:$0xff]  ;;  %v5132_v10 = vld [vmem:[%s7859_s6 + $0x98] sm:$0xff] }
   0xf   : > { %s7877_s21 = sld [smem:[#allocation3_spill]]  ;;  %5810 = vmatprep.subr.mxu1 %v762_v9  ;;  %v5101_v11 = vld [vmem:[%s7856_s3] ss:$0 sm:$0xff]  ;;  %vm770_vm2 = vcmask 64512   ;;  %v5131_v22 = vld [vmem:[%s7859_s6 + $0x90] sm:$0xff]  ;;  %v5130_v25 = vld [vmem:[%s7859_s6 + $0x88] sm:$0xff] }
  0x10   : > { %s7882_s28 = smov (!%p581_p3, %s5090_s28), 1  ;;  %5811 = vmatpush3.msra.mxu1 %v762_v9  ;;  %v911_v38 = vld [vmem:[%s7859_s6 + $0x18] sm:$0xff]  ;;  %v910_v39 = vld [vmem:[%s7859_s6 + $0x10] sm:$0xff]  ;;  %v909_v40 = vld [vmem:[%s7859_s6 + $0x8] sm:$0xff]  ;;  %s7878_s2 = sld [smem:[#allocation4_spill]]  ;;  %vm919_vm3 = vcmask 261120  }
  0x11   : > { %s6674_s19 = sshll.u32 %s7882_s28, 6  ;;  %5844 = vmatprep.subr.mxu1 %v5132_v10  ;;  %v5129_v41 = vld [vmem:[%s7859_s6 + $0x80] sm:$0xff]  ;;  %v5146_v43 = vld [vmem:[%s7859_s6 + $0x118] sm:$0xff]  ;;  %v5145_v59 = vld [vmem:[%s7859_s6 + $0x110] sm:$0xff]  ;;  %vm1470_vm4 = vcmask 523264  }
  0x12   : > { %v908_v42 = vld [vmem:[%s7859_s6] sm:$0xff]  ;;  %s7826_s1 = scalar_lea.vmem %s7871_s18, %s6674_s19 }
  0x13   : > { %v5111_v44 = vld [vmem:[%s7858_s5] ss:$0 sm:$0xff] }
  0x14   : > { %v612_v0 = vld [vmem:[%s7876_s0] sm:$0x7] }
  0x15   : > { %5796 = vmatprep.subr.msk.mxu0 %vm645_vm0, %v612_v0  ;;  %s585_s22 = scalar_lea.vmem %s7877_s21, %s6674_s19 }
  0x16   : > { %5797 = vmatpush3.msk.msra.mxu0 %vm645_vm0, %v612_v0  ;;  %v604_v1 = vld [vmem:[%s585_s22] sm:$0xff]  ;;  %v605_v2 = vld [vmem:[%s585_s22 + $0x8] sm:$0xff]  ;;  %v606_v3 = vld [vmem:[%s585_s22 + $0x10] sm:$0xff]  ;;  %s6736_s23 = scalar_lea.vmem %s7878_s2, %s6674_s19 }
  0x17   : > { %5798 = vmatprep.mubr.msk.f32.mxu0 %vm620_vm1, %v604_v1  ;;  %v607_v4 = vld [vmem:[%s585_s22 + $0x18] sm:$0xff]  ;;  %v608_v5 = vld [vmem:[%s585_s22 + $0x20] sm:$0xff]  ;;  %v609_v6 = vld [vmem:[%s585_s22 + $0x28] sm:$0xff]  ;;  %5824 = vmatprep.subr.mxu0 %v911_v38 }
  0x18   : > { %5799 = vmatmul.mubr.msk.f32.vlgmr.msra.gmra.mxu0 %vm620_vm1, %v605_v2  ;;  %v610_v7 = vld [vmem:[%s585_s22 + $0x30] sm:$0xff]  ;;  %v611_v8 = vld [vmem:[%s585_s22 + $0x38] sm:$0xff]  ;;  %v596_v47 = vld [vmem:[%s6736_s23] sm:$0xff] }
  0x19   : > { %5801 = vmatprep.mubr.msk.f32.mxu0 %vm620_vm1, %v606_v3  ;;  %5825 = vmatpush3.msra.mxu0 %v911_v38  ;;  %v597_v49 = vld [vmem:[%s6736_s23 + $0x8] sm:$0xff]  ;;  %v598_v55 = vld [vmem:[%s6736_s23 + $0x10] sm:$0xff]  ;;  %v599_v57 = vld [vmem:[%s6736_s23 + $0x18] sm:$0xff] }
  0x1a   : > { %5826 = vmatprep.subr.mxu0 %v910_v39  ;;  %v600_v0 = vld [vmem:[%s6736_s23 + $0x20] sm:$0xff]  ;;  %v601_v2 = vld [vmem:[%s6736_s23 + $0x28] sm:$0xff]  ;;  %v602_v9 = vld [vmem:[%s6736_s23 + $0x30] sm:$0xff] }
  0x1b   : > { %5827 = vmatpush3.msra.mxu0 %v910_v39 }
  0x1c   : > { %5802 = vmatmul.mubr.msk.f32.gmra.mxu0 %vm620_vm1, %v607_v4  ;;  %5828 = vmatprep.subr.mxu0 %v909_v40  ;;  %v5144_v4 = vld [vmem:[%s7859_s6 + $0x108] sm:$0xff] }
  0x1d   : > { %5804 = vmatprep.mubr.msk.f32.mxu0 %vm620_vm1, %v608_v5  ;;  %5829 = vmatpush3.msra.mxu0 %v909_v40 }
  0x1e   : > { %5830 = vmatprep.subr.mxu0 %v908_v42 }
  0x1f   : > { %5831 = vmatpush3.msra.mxu0 %v908_v42 }
  0x20   : > { %5805 = vmatmul.mubr.msk.f32.gmra.mxu0 %vm620_vm1, %v609_v6  ;;  %5864 = vmatprep.subr.mxu0 %v5146_v43 }
  0x21   : > { %5807 = vmatprep.mubr.msk.f32.mxu0 %vm620_vm1, %v610_v7 }
  0x24   : > { %5808 = vmatmul.mubr.msk.f32.gmra.mxu0 %vm620_vm1, %v611_v8 }
  0xd8   : > { %v5800_v12 = vpop.f32.mrf.mxu0 }
  0xd9   : > { %v721_v13 = vadd.f32 %v5800_v12, %v5101_v11 }
  0xda   : > { %v715_v14 = vpop.f32.mrf.mxu0 }
  0xdb   : > { %v716_v15 = vadd.f32 %v5101_v11, %v715_v14  ;;  %v755_v18 = vmax.f32 %v721_v13, 0.0  ;;  %v5143_v13 = vld [vmem:[%s7859_s6 + $0x100] sm:$0xff] }
  0xdc   : > { %v5803_v16 = vpop.f32.mrf.mxu0 }
  0xdd   : > { %v754_v17 = vmax.f32 %v716_v15, 0.0  ;;  %v731_v19 = vadd.f32 %v5803_v16, %v5101_v11 }
  0xde   : > { %v725_v20 = vpop.f32.mrf.mxu0 }
  0xdf   : > { %v726_v21 = vadd.f32 %v5101_v11, %v725_v20  ;;  %5812 = vmatprep.mubr.msk.f32.mxu1 %vm770_vm2, %v754_v17  ;;  %v757_v26 = vmax.f32 %v731_v19, 0.0 }
  0xe0   : > { %v5806_v23 = vpop.f32.mrf.mxu0  ;;  %5813 = vmatmul.mubr.msk.f32.vlgmr.msra.gmra.mxu1 %vm770_vm2, %v755_v18  ;;  %v6848_v18 = vld [vmem:[%s7860_s7] ss:$0 sm:$0xff] }
  0xe1   : > { %v756_v24 = vmax.f32 %v726_v21, 0.0  ;;  %5845 = vmatpush3.msra.mxu1 %v5132_v10  ;;  %v741_v27 = vadd.f32 %v5806_v23, %v5101_v11 }
  0xe2   : > { %v735_v28 = vpop.f32.mrf.mxu0  ;;  %5846 = vmatprep.subr.mxu1 %v5131_v22 }
  0xe3   : > { %v736_v29 = vadd.f32 %v5101_v11, %v735_v28  ;;  %5815 = vmatprep.mubr.msk.f32.mxu1 %vm770_vm2, %v756_v24  ;;  %5847 = vmatpush3.msra.mxu1 %v5131_v22  ;;  %v759_v32 = vmax.f32 %v741_v27, 0.0 }
  0xe4   : > { %v5809_v30 = vpop.f32.mrf.mxu0  ;;  %5816 = vmatmul.mubr.msk.f32.gmra.mxu1 %vm770_vm2, %v757_v26  ;;  %5848 = vmatprep.subr.mxu1 %v5130_v25 }
  0xe5   : > { %v758_v31 = vmax.f32 %v736_v29, 0.0  ;;  %5849 = vmatpush3.msra.mxu1 %v5130_v25  ;;  %v751_v33 = vadd.f32 %v5809_v30, %v5101_v11  ;;  %v5134_v30 = vld [vmem:[%s7860_s7 + $0x4] ss:$0 sm:$0xff] }
  0xe6   : > { %v745_v34 = vpop.f32.mrf.mxu0  ;;  %5850 = vmatprep.subr.mxu1 %v5129_v41 }
  0xe7   : > { %v746_v35 = vadd.f32 %v5101_v11, %v745_v34  ;;  %5818 = vmatprep.mubr.msk.f32.mxu1 %vm770_vm2, %v758_v31  ;;  %v761_v37 = vmax.f32 %v751_v33, 0.0  ;;  %5851 = vmatpush3.msra.mxu1 %v5129_v41  ;;  %v603_v11 = vld [vmem:[%s6736_s23 + $0x38] sm:$0xff] }
  0xe8   : > { %5819 = vmatmul.mubr.msk.f32.gmra.mxu1 %vm770_vm2, %v759_v32 }
  0xe9   : > { %v760_v36 = vmax.f32 %v746_v35, 0.0 }
  0xeb   : > { %5821 = vmatprep.mubr.msk.f32.mxu1 %vm770_vm2, %v760_v36 }
  0xec   : > { %5822 = vmatmul.mubr.msk.f32.gmra.mxu1 %vm770_vm2, %v761_v37 }
 0x1a0   : > { %v5814_v45 = vpop.f32.mrf.mxu1 }
 0x1a1   : > { %v6738_v46 = vadd.f32 %v5814_v45, %v5111_v44 }
 0x1a2   : > { %v861_v48 = vpop.f32.mrf.mxu1 }
 0x1a3   : > { %v6742_v50 = vadd.f32 %v5111_v44, %v861_v48  ;;  %v6748_v53 = vadd.f32 %v6738_v46, %v597_v49 }
 0x1a4   : > { %v5817_v51 = vpop.f32.mrf.mxu1 }
 0x1a5   : > { %v6745_v52 = vadd.f32 %v6742_v50, %v596_v47  ;;  %v6750_v54 = vadd.f32 %v5817_v51, %v5111_v44  ;;  %v5148_v47 = vld [vmem:[%s7860_s7 + $0x8] ss:$0 sm:$0xff] }
 0x1a6   : > { %v871_v56 = vpop.f32.mrf.mxu1 }
 0x1a7   : > { %v6754_v58 = vadd.f32 %v5111_v44, %v871_v56  ;;  %5832 = vmatprep.mubr.msk.f32.mxu0 %vm919_vm3, %v6745_v52  ;;  %5852 = vmatprep.mubr.msk.f32.mxu1 %vm919_vm3, %v6745_v52  ;;  %v6771_v62 = vadd.f32 %v6750_v54, %v599_v57 }
 0x1a8   : > { %v5820_v60 = vpop.f32.mrf.mxu1  ;;  %5833 = vmatmul.mubr.msk.f32.vlgmr.msra.gmra.mxu0 %vm919_vm3, %v6748_v53  ;;  %5853 = vmatmul.mubr.msk.f32.vlgmr.msra.gmra.mxu1 %vm919_vm3, %v6748_v53 }
 0x1a9   : > { %v6768_v61 = vadd.f32 %v6754_v58, %v598_v55  ;;  %5865 = vmatpush3.msra.mxu0 %v5146_v43  ;;  %v6773_v63 = vadd.f32 %v5820_v60, %v5111_v44 }
 0x1aa   : > { %v881_v1 = vpop.f32.mrf.mxu1  ;;  %5866 = vmatprep.subr.mxu0 %v5145_v59 }
 0x1ab   : > { %v6777_v3 = vadd.f32 %v5111_v44, %v881_v1  ;;  %5835 = vmatprep.mubr.msk.f32.mxu0 %vm919_vm3, %v6768_v61  ;;  %5855 = vmatprep.mubr.msk.f32.mxu1 %vm919_vm3, %v6768_v61  ;;  %v6794_v7 = vadd.f32 %v6773_v63, %v601_v2 }
 0x1ac   : > { %v5823_v5 = vpop.f32.mrf.mxu1  ;;  %5836 = vmatmul.mubr.msk.f32.gmra.mxu0 %vm919_vm3, %v6771_v62  ;;  %5856 = vmatmul.mubr.msk.f32.gmra.mxu1 %vm919_vm3, %v6771_v62 }
 0x1ad   : > { %v6791_v6 = vadd.f32 %v6777_v3, %v600_v0  ;;  %5867 = vmatpush3.msra.mxu0 %v5145_v59  ;;  %v6796_v8 = vadd.f32 %v5823_v5, %v5111_v44  ;;  %v5198_v5 = vld [vmem:[%s7859_s6 + $0xb8] sm:$0xff] }
 0x1ae   : > { %v891_v10 = vpop.f32.mrf.mxu1  ;;  %5868 = vmatprep.subr.mxu0 %v5144_v4 }
 0x1af   : > { %v6800_v12 = vadd.f32 %v5111_v44, %v891_v10  ;;  %5838 = vmatprep.mubr.msk.f32.mxu0 %vm919_vm3, %v6791_v6  ;;  %5858 = vmatprep.mubr.msk.f32.mxu1 %vm919_vm3, %v6791_v6  ;;  %v6817_v15 = vadd.f32 %v6796_v8, %v603_v11 }
 0x1b0   : > { %5839 = vmatmul.mubr.msk.f32.gmra.mxu0 %vm919_vm3, %v6794_v7  ;;  %5859 = vmatmul.mubr.msk.f32.gmra.mxu1 %vm919_vm3, %v6794_v7 }
 0x1b1   : > { %7879 = vst [vmem:[#allocation2_spill] sm:$0xff] %v6800_v12  ;;  %v6814_v14 = vadd.f32 %v6800_v12, %v602_v9  ;;  %5869 = vmatpush3.msra.mxu0 %v5144_v4 }
 0x1b2   : > { %5870 = vmatprep.subr.mxu0 %v5143_v13 }
 0x1b3   : > { %5841 = vmatprep.mubr.msk.f32.mxu0 %vm919_vm3, %v6814_v14  ;;  %5861 = vmatprep.mubr.msk.f32.mxu1 %vm919_vm3, %v6814_v14 }
 0x1b4   : > { %5842 = vmatmul.mubr.msk.f32.gmra.mxu0 %vm919_vm3, %v6817_v15  ;;  %5862 = vmatmul.mubr.msk.f32.gmra.mxu1 %vm919_vm3, %v6817_v15 }
 0x1b5   : > { %5872 = vmatprep.mubr.msk.f32.mxu0 %vm919_vm3, %v6742_v50  ;;  %5871 = vmatpush3.msra.mxu0 %v5143_v13  ;;  %v5197_v13 = vld [vmem:[%s7859_s6 + $0xb0] sm:$0xff] }
 0x1b8   : > { %5873 = vmatmul.mubr.msk.f32.vlgmr.msra.gmra.mxu0 %vm919_vm3, %v6738_v46 }
 0x1b9   : > { %5875 = vmatprep.mubr.msk.f32.mxu0 %vm919_vm3, %v6754_v58 }
 0x1bc   : > { %5876 = vmatmul.mubr.msk.f32.gmra.mxu0 %vm919_vm3, %v6750_v54 }
 0x1bd   : > { %5878 = vmatprep.mubr.msk.f32.mxu0 %vm919_vm3, %v6777_v3 }
 0x1c0   : > { %5879 = vmatmul.mubr.msk.f32.gmra.mxu0 %vm919_vm3, %v6773_v63 }
 0x1c1   : > { %5881 = vmatprep.mubr.msk.f32.mxu0 %vm919_vm3, %v6800_v12 }
 0x1c4   : > { %5882 = vmatmul.mubr.msk.f32.gmra.mxu0 %vm919_vm3, %v6796_v8 }
 0x268   : > { %v6843_v16 = vpop.f32.mrf.mxu0  ;;  %v5854_v17 = vpop.f32.mrf.mxu1 }
 0x269   : > { %v1134_v59 = vadd.f32 %v5854_v17, %v5134_v30  ;;  %v1016_v10 = vadd.f32 %v6843_v16, %v6848_v18  ;;  %v5196_v17 = vld [vmem:[%s7859_s6 + $0xa8] sm:$0xff] }
 0x26a   : > { %v1010_v19 = vpop.f32.mrf.mxu0  ;;  %v1128_v20 = vpop.f32.mrf.mxu1 }
 0x26b   : > { %v1011_v21 = vadd.f32 %v6848_v18, %v1010_v19  ;;  %v1129_v1 = vadd.f32 %v5134_v30, %v1128_v20  ;;  %v5195_v20 = vld [vmem:[%s7859_s6 + $0xa0] sm:$0xff] }
 0x26c   : > { %v6851_v22 = vpop.f32.mrf.mxu0  ;;  %v5857_v23 = vpop.f32.mrf.mxu1 }
 0x26d   : > { %5900 = vmatprep.mubr.msk.f32.mxu1 %vm770_vm2, %v1011_v21  ;;  %v1144_v45 = vadd.f32 %v5857_v23, %v5134_v30  ;;  %v1026_v16 = vadd.f32 %v6851_v22, %v6848_v18 }
 0x26e   : > { %v6854_v24 = vpop.f32.mrf.mxu0  ;;  %v1138_v25 = vpop.f32.mrf.mxu1 }
 0x26f   : > { %v1139_v55 = vadd.f32 %v5134_v30, %v1138_v25  ;;  %v1021_v11 = vadd.f32 %v6848_v18, %v6854_v24 }
 0x270   : > { %v6856_v26 = vpop.f32.mrf.mxu0  ;;  %v5860_v27 = vpop.f32.mrf.mxu1 }
 0x271   : > { %v1154_v39 = vadd.f32 %v5860_v27, %v5134_v30  ;;  %v1036_v21 = vadd.f32 %v6856_v26, %v6848_v18 }
 0x272   : > { %v6858_v28 = vpop.f32.mrf.mxu0  ;;  %v1148_v29 = vpop.f32.mrf.mxu1 }
 0x273   : > { %v1149_v42 = vadd.f32 %v5134_v30, %v1148_v29  ;;  %v1031_v19 = vadd.f32 %v6848_v18, %v6858_v28 }
 0x274   : > { %v6863_v31 = vpop.f32.mrf.mxu0  ;;  %v5863_v32 = vpop.f32.mrf.mxu1 }
 0x275   : > { %v1164_v33 = vadd.f32 %v5863_v32, %v5134_v30  ;;  %v1046_v23 = vadd.f32 %v6863_v31, %v6848_v18 }
 0x276   : > { %v6865_v34 = vpop.f32.mrf.mxu0  ;;  %v1158_v35 = vpop.f32.mrf.mxu1 }
 0x277   : > { %v1159_v36 = vadd.f32 %v5134_v30, %v1158_v35  ;;  %5884 = vmatprep.subr.msk.mxu1 %vm770_vm2, %v1164_v33  ;;  %v1041_v22 = vadd.f32 %v6848_v18, %v6865_v34 }
 0x278   : > { %v5874_v37 = vpop.f32.mrf.mxu0  ;;  %5885 = vmatpush3.xpose.msk.msra.mxu1 %vm770_vm2, %v1164_v33 }
 0x279   : > { %5886 = vmatprep.subr.msk.mxu1 %vm770_vm2, %v1159_v36  ;;  %v1276_v4 = vadd.f32 %v5874_v37, %v5148_v47 }
 0x27a   : > { %v1270_v38 = vpop.f32.mrf.mxu0 }
 0x27b   : > { %v1271_v9 = vadd.f32 %v5148_v47, %v1270_v38 }
 0x27c   : > { %v5877_v40 = vpop.f32.mrf.mxu0  ;;  %5887 = vmatpush3.xpose.msk.msra.mxu1 %vm770_vm2, %v1159_v36 }
 0x27d   : > { %5888 = vmatprep.subr.msk.mxu1 %vm770_vm2, %v1154_v39  ;;  %v1286_v0 = vadd.f32 %v5877_v40, %v5148_v47 }
 0x27e   : > { %v1280_v41 = vpop.f32.mrf.mxu0 }
 0x27f   : > { %v1281_v2 = vadd.f32 %v5148_v47, %v1280_v41 }
 0x280   : > { %v5880_v43 = vpop.f32.mrf.mxu0  ;;  %5889 = vmatpush3.xpose.msk.msra.mxu1 %vm770_vm2, %v1154_v39 }
 0x281   : > { %5890 = vmatprep.subr.msk.mxu1 %vm770_vm2, %v1149_v42  ;;  %v1296_v57 = vadd.f32 %v5880_v43, %v5148_v47 }
 0x282   : > { %v1290_v44 = vpop.f32.mrf.mxu0 }
 0x283   : > { %v1291_v60 = vadd.f32 %v5148_v47, %v1290_v44 }
 0x284   : > { %v5883_v48 = vpop.f32.mrf.mxu0  ;;  %5891 = vmatpush3.xpose.msk.msra.mxu1 %vm770_vm2, %v1149_v42 }
 0x285   : > { %v1306_v49 = vadd.f32 %v5883_v48, %v5148_v47  ;;  %5892 = vmatprep.subr.msk.mxu1 %vm770_vm2, %v1144_v45 }
 0x286   : > { %v1300_v51 = vpop.f32.mrf.mxu0 }
 0x287   : > { %v1301_v56 = vadd.f32 %v5148_v47, %v1300_v51  ;;  %5912 = vmatprep.subr.mxu0 %v1306_v49 }
 0x288   : > { %5893 = vmatpush3.xpose.msk.msra.mxu1 %vm770_vm2, %v1144_v45  ;;  %5913 = vmatpush3.msra.mxu0 %v1306_v49 }
 0x289   : > { %5894 = vmatprep.subr.msk.mxu1 %vm770_vm2, %v1139_v55  ;;  %5914 = vmatprep.subr.mxu0 %v1301_v56 }
 0x28a   : > { %5915 = vmatpush3.msra.mxu0 %v1301_v56 }
 0x28b   : > { %5916 = vmatprep.subr.mxu0 %v1296_v57 }
 0x28c   : > { %5895 = vmatpush3.xpose.msk.msra.mxu1 %vm770_vm2, %v1139_v55  ;;  %5917 = vmatpush3.msra.mxu0 %v1296_v57 }
 0x28d   : > { %5896 = vmatprep.subr.msk.mxu1 %vm770_vm2, %v1134_v59  ;;  %5918 = vmatprep.subr.mxu0 %v1291_v60 }
 0x28e   : > { %5919 = vmatpush3.msra.mxu0 %v1291_v60 }
 0x28f   : > { %5920 = vmatprep.subr.mxu0 %v1286_v0 }
 0x290   : > { %5897 = vmatpush3.xpose.msk.msra.mxu1 %vm770_vm2, %v1134_v59  ;;  %5921 = vmatpush3.msra.mxu0 %v1286_v0  ;;  %v5200_v59 = vld [vmem:[%s7860_s7 + $0x5] ss:$0 sm:$0xff] }
 0x291   : > { %5898 = vmatprep.subr.msk.mxu1 %vm770_vm2, %v1129_v1  ;;  %5922 = vmatprep.subr.mxu0 %v1281_v2 }
 0x292   : > { %5923 = vmatpush3.msra.mxu0 %v1281_v2 }
 0x293   : > { %5924 = vmatprep.subr.mxu0 %v1276_v4 }
 0x294   : > { %5899 = vmatpush3.xpose.msk.msra.mxu1 %vm770_vm2, %v1129_v1  ;;  %5925 = vmatpush3.msra.mxu0 %v1276_v4 }
 0x295   : > { %5926 = vmatprep.subr.mxu0 %v1271_v9  ;;  %5960 = vmatprep.subr.mxu1 %v5198_v5 }
 0x296   : > { %5927 = vmatpush3.msra.mxu0 %v1271_v9 }
 0x297   : > { %5901 = vmatmul.mubr.msk.f32.vlgmr.msra.gmra.mxu1 %vm770_vm2, %v1016_v10 }
 0x298   : > { %5903 = vmatprep.mubr.msk.f32.mxu1 %vm770_vm2, %v1021_v11  ;;  %5961 = vmatpush3.msra.mxu1 %v5198_v5 }
 0x299   : > { %5962 = vmatprep.subr.mxu1 %v5197_v13 }
 0x29a   : > { %5963 = vmatpush3.msra.mxu1 %v5197_v13 }
 0x29b   : > { %5904 = vmatmul.mubr.msk.f32.gmra.mxu1 %vm770_vm2, %v1026_v16  ;;  %5964 = vmatprep.subr.mxu1 %v5196_v17 }
 0x29c   : > { %5906 = vmatprep.mubr.msk.f32.mxu1 %vm770_vm2, %v1031_v19  ;;  %5965 = vmatpush3.msra.mxu1 %v5196_v17 }
 0x29d   : > { %5966 = vmatprep.subr.mxu1 %v5195_v20 }
 0x29e   : > { %5967 = vmatpush3.msra.mxu1 %v5195_v20 }
 0x29f   : > { %5907 = vmatmul.mubr.msk.f32.gmra.mxu1 %vm770_vm2, %v1036_v21 }
 0x2a0   : > { %5909 = vmatprep.mubr.msk.f32.mxu1 %vm770_vm2, %v1041_v22 }
 0x2a3   : > { %5910 = vmatmul.mubr.msk.f32.gmra.mxu1 %vm770_vm2, %v1046_v23 }
 0x2a4   : > { %5968 = vmatprep.mubr.msk.f32.mxu1 %vm919_vm3, %v6745_v52 }
 0x2a7   : > { %5969 = vmatmul.mubr.msk.f32.vlgmr.msra.gmra.mxu1 %vm919_vm3, %v6748_v53 }
 0x2a8   : > { %5971 = vmatprep.mubr.msk.f32.mxu1 %vm919_vm3, %v6768_v61 }
 0x2ab   : > { %5972 = vmatmul.mubr.msk.f32.gmra.mxu1 %vm919_vm3, %v6771_v62 }
 0x2ac   : > { %5974 = vmatprep.mubr.msk.f32.mxu1 %vm919_vm3, %v6791_v6 }
 0x2af   : > { %5975 = vmatmul.mubr.msk.f32.gmra.mxu1 %vm919_vm3, %v6794_v7 }
 0x2b0   : > { %5977 = vmatprep.mubr.msk.f32.mxu1 %vm919_vm3, %v6814_v14 }
 0x2b3   : > { %5978 = vmatmul.mubr.msk.f32.gmra.mxu1 %vm919_vm3, %v6817_v15 }
 0x357   : > { %v5902_v18 = vpop.f32.mrf.mxu1 }
 0x358   : > { %v6937_v27 = vmul.f32 0.35355338, %v5902_v18 }
 0x359   : > { %v1423_v24 = vpop.f32.mrf.mxu1 }
 0x35a   : > { %v6935_v25 = vmul.f32 0.35355338, %v1423_v24  ;;  %v1474_v33 = vsel %vm1470_vm4, %v6937_v27, -inf }
 0x35b   : > { %v5905_v26 = vpop.f32.mrf.mxu1 }
 0x35c   : > { %v1471_v28 = vsel %vm1470_vm4, %v6935_v25, -inf  ;;  %v6943_v32 = vmul.f32 0.35355338, %v5905_v26 }
 0x35d   : > { %1472 = vmax.xlane.f32.xlu0 %v1471_v28  ;;  %v1433_v29 = vpop.f32.mrf.mxu1 }
 0x35e   : > { %v6941_v30 = vmul.f32 0.35355338, %v1433_v29  ;;  %v1480_v39 = vsel %vm1470_vm4, %v6943_v32, -inf }
 0x35f   : > { %v5908_v31 = vpop.f32.mrf.mxu1 }
 0x360   : > { %v1477_v34 = vsel %vm1470_vm4, %v6941_v30, -inf  ;;  %v6951_v38 = vmul.f32 0.35355338, %v5908_v31 }
 0x361   : > { %1475 = vmax.xlane.f32.xlu0 %v1474_v33  ;;  %1478 = vmax.xlane.f32.xlu1 %v1477_v34  ;;  %v1443_v35 = vpop.f32.mrf.mxu1 }
 0x362   : > { %v6949_v36 = vmul.f32 0.35355338, %v1443_v35  ;;  %v1486_v45 = vsel %vm1470_vm4, %v6951_v38, -inf }
 0x363   : > { %v5911_v37 = vpop.f32.mrf.mxu1 }
 0x364   : > { %v1483_v40 = vsel %vm1470_vm4, %v6949_v36, -inf  ;;  %v6959_v44 = vmul.f32 0.35355338, %v5911_v37 }
 0x365   : > { %1481 = vmax.xlane.f32.xlu1 %v1480_v39  ;;  %1484 = vmax.xlane.f32.xlu0 %v1483_v40  ;;  %v1453_v41 = vpop.f32.mrf.mxu1 }
 0x366   : > { %v6957_v42 = vmul.f32 0.35355338, %v1453_v41  ;;  %v1492_v51 = vsel %vm1470_vm4, %v6959_v44, -inf }
 0x367   : > { %v5970_v43 = vpop.f32.mrf.mxu1 }
 0x368   : > { %v1489_v47 = vsel %vm1470_vm4, %v6957_v42, -inf  ;;  %v1892_v11 = vadd.f32 %v5970_v43, %v5200_v59 }
 0x369   : > { %1487 = vmax.xlane.f32.xlu1 %v1486_v45  ;;  %v1886_v48 = vpop.f32.mrf.mxu1  ;;  %1490 = vmax.xlane.f32.xlu0 %v1489_v47 }
 0x36a   : > { %v1887_v13 = vadd.f32 %v5200_v59, %v1886_v48 }
 0x36b   : > { %v5973_v49 = vpop.f32.mrf.mxu1 }
 0x36c   : > { %v1902_v9 = vadd.f32 %v5973_v49, %v5200_v59 }
 0x36d   : > { %1493 = vmax.xlane.f32.xlu1 %v1492_v51  ;;  %v1896_v55 = vpop.f32.mrf.mxu1 }
 0x36e   : > { %v1897_v10 = vadd.f32 %v5200_v59, %v1896_v55 }
 0x36f   : > { %v5976_v56 = vpop.f32.mrf.mxu1 }
 0x370   : > { %v1912_v4 = vadd.f32 %v5976_v56, %v5200_v59 }
 0x371   : > { %v1906_v57 = vpop.f32.mrf.mxu1 }
 0x372   : > { %v1907_v5 = vadd.f32 %v5200_v59, %v1906_v57 }
 0x373   : > { %v5979_v60 = vpop.f32.mrf.mxu1 }
 0x374   : > { %v1922_v0 = vadd.f32 %v5979_v60, %v5200_v59 }
 0x375   : > { %v1916_v1 = vpop.f32.mrf.mxu1 }
 0x376   : > { %v1917_v2 = vadd.f32 %v5200_v59, %v1916_v1  ;;  %6000 = vmatprep.subr.msk.mxu1 %vm770_vm2, %v1922_v0  ;;  %v5184_v1 = vld [vmem:[%s7859_s6 + $0x38] sm:$0xff] }
 0x377   : > { %6001 = vmatpush3.xpose.msk.msra.mxu1 %vm770_vm2, %v1922_v0  ;;  %5940 = vmatprep.subr.mxu0 %v5184_v1 }
 0x378   : > { %6002 = vmatprep.subr.msk.mxu1 %vm770_vm2, %v1917_v2 }
 0x37b   : > { %6003 = vmatpush3.xpose.msk.msra.mxu1 %vm770_vm2, %v1917_v2 }
 0x37c   : > { %6004 = vmatprep.subr.msk.mxu1 %vm770_vm2, %v1912_v4 }
 0x37f   : > { %6005 = vmatpush3.xpose.msk.msra.mxu1 %vm770_vm2, %v1912_v4 }
 0x380   : > { %6006 = vmatprep.subr.msk.mxu1 %vm770_vm2, %v1907_v5 }
 0x383   : > { %6007 = vmatpush3.xpose.msk.msra.mxu1 %vm770_vm2, %v1907_v5 }
 0x384   : > { %6008 = vmatprep.subr.msk.mxu1 %vm770_vm2, %v1902_v9 }
 0x387   : > { %6009 = vmatpush3.xpose.msk.msra.mxu1 %vm770_vm2, %v1902_v9 }
 0x388   : > { %6010 = vmatprep.subr.msk.mxu1 %vm770_vm2, %v1897_v10 }
 0x38b   : > { %6011 = vmatpush3.xpose.msk.msra.mxu1 %vm770_vm2, %v1897_v10 }
 0x38c   : > { %6012 = vmatprep.subr.msk.mxu1 %vm770_vm2, %v1892_v11 }
 0x38f   : > { %6013 = vmatpush3.xpose.msk.msra.mxu1 %vm770_vm2, %v1892_v11 }
 0x390   : > { %6014 = vmatprep.subr.msk.mxu1 %vm770_vm2, %v1887_v13 }
 0x393   : > { %6015 = vmatpush3.xpose.msk.msra.mxu1 %vm770_vm2, %v1887_v13 }
 0x3e6   : > { %v1473_v17 = vpop.xlane.xlu0 %1472 }
 0x3e7   : > { %v1495_v16 = vsub.f32 %v6935_v25, %v1473_v17 }
 0x3e9   : > { %v1503_v19 = vmul.f32 1.442695, %v1495_v16 }
 0x3ea   : > { %v1476_v20 = vpop.xlane.xlu0 %1475  ;;  %v1479_v21 = vpop.xlane.xlu1 %1478 }
 0x3eb   : > { %6400 = vpow2.f32 %v1503_v19  ;;  %v1496_v22 = vsub.f32 %v6937_v27, %v1476_v20  ;;  %v1497_v23 = vsub.f32 %v6941_v30, %v1479_v21 }
 0x3ed   : > { %v1505_v18 = vmul.f32 1.442695, %v1496_v22  ;;  %v1507_v24 = vmul.f32 1.442695, %v1497_v23 }
 0x3ee   : > { %v1482_v26 = vpop.xlane.xlu1 %1481  ;;  %v1485_v28 = vpop.xlane.xlu0 %1484 }
 0x3ef   : > { %6402 = vpow2.f32 %v1505_v18  ;;  %v1498_v29 = vsub.f32 %v6943_v32, %v1482_v26  ;;  %v1499_v31 = vsub.f32 %v6949_v36, %v1485_v28  ;;  %v5183_v18 = vld [vmem:[%s7859_s6 + $0x30] sm:$0xff]  ;;  %v5182_v26 = vld [vmem:[%s7859_s6 + $0x28] sm:$0xff] }
 0x3f0   : > { %6404 = vpow2.f32 %v1507_v24 }
 0x3f1   : > { %v1509_v33 = vmul.f32 1.442695, %v1498_v29  ;;  %v1511_v25 = vmul.f32 1.442695, %v1499_v31 }
 0x3f2   : > { %v1488_v34 = vpop.xlane.xlu1 %1487  ;;  %v1491_v35 = vpop.xlane.xlu0 %1490 }
 0x3f3   : > { %6406 = vpow2.f32 %v1509_v33  ;;  %v1500_v37 = vsub.f32 %v6951_v38, %v1488_v34  ;;  %v1501_v27 = vsub.f32 %v6957_v42, %v1491_v35  ;;  %v5181_v33 = vld [vmem:[%s7859_s6 + $0x20] sm:$0xff]  ;;  %v5212_v34 = vld [vmem:[%s7859_s6 + $0x138] sm:$0xff] }
 0x3f4   : > { %6408 = vpow2.f32 %v1511_v25 }
 0x3f5   : > { %v1513_v30 = vmul.f32 1.442695, %v1500_v37  ;;  %v1515_v39 = vmul.f32 1.442695, %v1501_v27 }
 0x3f6   : > { %v1494_v40 = vpop.xlane.xlu1 %1493 }
 0x3f7   : > { %6410 = vpow2.f32 %v1513_v30  ;;  %v1502_v41 = vsub.f32 %v6959_v44, %v1494_v40  ;;  %v5211_v40 = vld [vmem:[%s7859_s6 + $0x130] sm:$0xff] }
 0x3f8   : > { %v6401_v32 = vpop.eup %6400  ;;  %6412 = vpow2.f32 %v1515_v39 }
 0x3f9   : > { %v1517_v36 = vmul.f32 1.442695, %v1502_v41  ;;  %v1519_v43 = vsel %vm1470_vm4, %v6401_v32, 0.0  ;;  %v5210_v41 = vld [vmem:[%s7859_s6 + $0x128] sm:$0xff] }
 0x3fa   : > { %1520 = vadd.xlane.f32.xlu0 %v1519_v43 }
 0x3fb   : > { %6414 = vpow2.f32 %v1517_v36  ;;  %v1688_v36 = vld [vmem:[%s7861_s8] sm:$0xff] }
 0x3fc   : > { %v6403_v45 = vpop.eup %6402  ;;  %6070 = vmatprep.subr.mxu1 %v1688_v36 }
 0x3fd   : > { %v6405_v47 = vpop.eup %6404  ;;  %v1522_v38 = vsel %vm1470_vm4, %v6403_v45, 0.0 }
 0x3fe   : > { %1523 = vadd.xlane.f32.xlu1 %v1522_v38  ;;  %v1525_v42 = vsel %vm1470_vm4, %v6405_v47, 0.0 }
 0x3ff   : > { %1526 = vadd.xlane.f32.xlu0 %v1525_v42 }
 0x400   : > { %v6407_v48 = vpop.eup %6406 }
 0x401   : > { %v6409_v49 = vpop.eup %6408  ;;  %v1528_v51 = vsel %vm1470_vm4, %v6407_v48, 0.0 }
 0x402   : > { %1529 = vadd.xlane.f32.xlu1 %v1528_v51  ;;  %v1531_v44 = vsel %vm1470_vm4, %v6409_v49, 0.0 }
 0x403   : > { %1532 = vadd.xlane.f32.xlu0 %v1531_v44 }
 0x404   : > { %v6411_v55 = vpop.eup %6410 }
 0x405   : > { %v6413_v56 = vpop.eup %6412  ;;  %v1534_v57 = vsel %vm1470_vm4, %v6411_v55, 0.0 }
 0x406   : > { %1535 = vadd.xlane.f32.xlu1 %v1534_v57  ;;  %v1537_v59 = vsel %vm1470_vm4, %v6413_v56, 0.0 }
 0x407   : > { %1538 = vadd.xlane.f32.xlu0 %v1537_v59 }
 0x408   : > { %v6415_v60 = vpop.eup %6414 }
 0x409   : > { %v1540_v0 = vsel %vm1470_vm4, %v6415_v60, 0.0 }
 0x40a   : > { %1541 = vadd.xlane.f32.xlu1 %v1540_v0  ;;  %v5281_v0 = vld [vmem:[%s7859_s6 + $0xd8] sm:$0xff] }
 0x483   : > { %v1521_v2 = vpop.xlane.xlu0 %1520 }
 0x484   : > { %6416 = vrcp.f32 %v1521_v2 }
 0x487   : > { %v1524_v4 = vpop.xlane.xlu1 %1523 }
 0x488   : > { %6418 = vrcp.f32 %v1524_v4  ;;  %v1527_v5 = vpop.xlane.xlu0 %1526 }
 0x489   : > { %6420 = vrcp.f32 %v1527_v5 }
 0x48b   : > { %v1530_v9 = vpop.xlane.xlu1 %1529 }
 0x48c   : > { %6422 = vrcp.f32 %v1530_v9  ;;  %v1533_v10 = vpop.xlane.xlu0 %1532 }
 0x48d   : > { %6424 = vrcp.f32 %v1533_v10 }
 0x48f   : > { %v1536_v11 = vpop.xlane.xlu1 %1535 }
 0x490   : > { %6426 = vrcp.f32 %v1536_v11  ;;  %v1539_v13 = vpop.xlane.xlu0 %1538 }
 0x491   : > { %v6417_v17 = vpop.eup %6416  ;;  %6428 = vrcp.f32 %v1539_v13 }
 0x492   : > { %v1551_v16 = vmul.f32 %v6417_v17, %v6401_v32  ;;  %v5209_v32 = vld [vmem:[%s7859_s6 + $0x120] sm:$0xff] }
 0x493   : > { %v1542_v19 = vpop.xlane.xlu1 %1541 }
 0x494   : > { %6430 = vrcp.f32 %v1542_v19  ;;  %5928 = vmatprep.mubr.msk.f32.mxu0 %vm1470_vm4, %v1551_v16 }
 0x495   : > { %v6419_v20 = vpop.eup %6418 }
 0x496   : > { %v6421_v21 = vpop.eup %6420  ;;  %v1552_v22 = vmul.f32 %v6419_v20, %v6403_v45 }
 0x497   : > { %v1553_v23 = vmul.f32 %v6421_v21, %v6405_v47 }
 0x498   : > { %5929 = vmatmul.mubr.msk.f32.vlgmr.msra.gmra.mxu0 %vm1470_vm4, %v1552_v22 }
 0x499   : > { %v6423_v24 = vpop.eup %6422  ;;  %5941 = vmatpush3.msra.mxu0 %v5184_v1  ;;  %5931 = vmatprep.mubr.msk.f32.mxu0 %vm1470_vm4, %v1553_v23  ;;  %v5280_v23 = vld [vmem:[%s7859_s6 + $0xd0] sm:$0xff] }
 0x49a   : > { %v6425_v28 = vpop.eup %6424  ;;  %5942 = vmatprep.subr.mxu0 %v5183_v18  ;;  %v1554_v29 = vmul.f32 %v6423_v24, %v6407_v48  ;;  %v5279_v24 = vld [vmem:[%s7859_s6 + $0xc8] sm:$0xff] }
 0x49b   : > { %5943 = vmatpush3.msra.mxu0 %v5183_v18  ;;  %v1555_v31 = vmul.f32 %v6425_v28, %v6409_v49  ;;  %v5278_v28 = vld [vmem:[%s7859_s6 + $0xc0] sm:$0xff] }
 0x49c   : > { %5932 = vmatmul.mubr.msk.f32.gmra.mxu0 %vm1470_vm4, %v1554_v29  ;;  %5944 = vmatprep.subr.mxu0 %v5182_v26 }
 0x49d   : > { %v6427_v25 = vpop.eup %6426  ;;  %5934 = vmatprep.mubr.msk.f32.mxu0 %vm1470_vm4, %v1555_v31  ;;  %5945 = vmatpush3.msra.mxu0 %v5182_v26  ;;  %v5214_v31 = vld [vmem:[%s7860_s7 + $0x9] ss:$0 sm:$0xff] }
 0x49e   : > { %v6429_v35 = vpop.eup %6428  ;;  %v1556_v37 = vmul.f32 %v6427_v25, %v6411_v55  ;;  %5946 = vmatprep.subr.mxu0 %v5181_v33  ;;  %v5186_v55 = vld [vmem:[%s7860_s7 + $0x1] ss:$0 sm:$0xff] }
 0x49f   : > { %v1557_v27 = vmul.f32 %v6429_v35, %v6413_v56  ;;  %5947 = vmatpush3.msra.mxu0 %v5181_v33 }
 0x4a0   : > { %5935 = vmatmul.mubr.msk.f32.gmra.mxu0 %vm1470_vm4, %v1556_v37  ;;  %5980 = vmatprep.subr.mxu0 %v5212_v34 }
 0x4a1   : > { %v6431_v30 = vpop.eup %6430  ;;  %5937 = vmatprep.mubr.msk.f32.mxu0 %vm1470_vm4, %v1557_v27 }
 0x4a2   : > { %v1558_v39 = vmul.f32 %v6431_v30, %v6415_v60 }
 0x4a4   : > { %5938 = vmatmul.mubr.msk.f32.gmra.mxu0 %vm1470_vm4, %v1558_v39 }
 0x4a5   : > { %5948 = vmatprep.mubr.msk.f32.mxu0 %vm919_vm3, %v6745_v52 }
 0x4a8   : > { %5949 = vmatmul.mubr.msk.f32.vlgmr.msra.gmra.mxu0 %vm919_vm3, %v6748_v53 }
 0x4a9   : > { %5951 = vmatprep.mubr.msk.f32.mxu0 %vm919_vm3, %v6768_v61  ;;  %5981 = vmatpush3.msra.mxu0 %v5212_v34 }
 0x4aa   : > { %5982 = vmatprep.subr.mxu0 %v5211_v40 }
 0x4ab   : > { %5983 = vmatpush3.msra.mxu0 %v5211_v40 }
 0x4ac   : > { %5952 = vmatmul.mubr.msk.f32.gmra.mxu0 %vm919_vm3, %v6771_v62  ;;  %5984 = vmatprep.subr.mxu0 %v5210_v41 }
 0x4ad   : > { %5954 = vmatprep.mubr.msk.f32.mxu0 %vm919_vm3, %v6791_v6  ;;  %5985 = vmatpush3.msra.mxu0 %v5210_v41 }
 0x4ae   : > { %5986 = vmatprep.subr.mxu0 %v5209_v32 }
 0x4af   : > { %5987 = vmatpush3.msra.mxu0 %v5209_v32 }
 0x4b0   : > { %5955 = vmatmul.mubr.msk.f32.gmra.mxu0 %vm919_vm3, %v6794_v7 }
 0x4b1   : > { %5957 = vmatprep.mubr.msk.f32.mxu0 %vm919_vm3, %v6814_v14 }
 0x4b4   : > { %5958 = vmatmul.mubr.msk.f32.gmra.mxu0 %vm919_vm3, %v6817_v15 }
 0x4b5   : > { %5988 = vmatprep.mubr.msk.f32.mxu0 %vm919_vm3, %v6742_v50 }
 0x4b8   : > { %5989 = vmatmul.mubr.msk.f32.vlgmr.msra.gmra.mxu0 %vm919_vm3, %v6738_v46 }
 0x4b9   : > { %5991 = vmatprep.mubr.msk.f32.mxu0 %vm919_vm3, %v6754_v58 }
 0x4bc   : > { %5992 = vmatmul.mubr.msk.f32.gmra.mxu0 %vm919_vm3, %v6750_v54 }
 0x4bd   : > { %5994 = vmatprep.mubr.msk.f32.mxu0 %vm919_vm3, %v6777_v3 }
 0x4c0   : > { %5995 = vmatmul.mubr.msk.f32.gmra.mxu0 %vm919_vm3, %v6773_v63 }
 0x4c1   : > { %5997 = vmatprep.mubr.msk.f32.mxu0 %vm919_vm3, %v6800_v12 }
 0x4c4   : > { %5998 = vmatmul.mubr.msk.f32.gmra.mxu0 %vm919_vm3, %v6796_v8 }
 0x558   : > { %v5930_v43 = vpop.f32.mrf.mxu0 }
 0x55a   : > { %v1649_v45 = vpop.f32.mrf.mxu0 }
 0x55c   : > { %v5933_v47 = vpop.f32.mrf.mxu0 }
 0x55e   : > { %v1659_v38 = vpop.f32.mrf.mxu0 }
 0x560   : > { %v5936_v42 = vpop.f32.mrf.mxu0 }
 0x562   : > { %v1669_v48 = vpop.f32.mrf.mxu0 }
 0x564   : > { %v7069_v49 = vpop.f32.mrf.mxu0 }
 0x566   : > { %v1679_v51 = vpop.f32.mrf.mxu0 }
 0x568   : > { %v5950_v44 = vpop.f32.mrf.mxu0 }
 0x569   : > { %v1774_v59 = vadd.f32 %v5950_v44, %v5186_v55 }
 0x56a   : > { %v1768_v56 = vpop.f32.mrf.mxu0 }
 0x56b   : > { %v1769_v57 = vadd.f32 %v5186_v55, %v1768_v56 }
 0x56c   : > { %v5953_v60 = vpop.f32.mrf.mxu0 }
 0x56d   : > { %6016 = vmatprep.mubr.msk.f32.mxu1 %vm770_vm2, %v1769_v57  ;;  %v1784_v4 = vadd.f32 %v5953_v60, %v5186_v55 }
 0x56e   : > { %v1778_v1 = vpop.f32.mrf.mxu0  ;;  %6017 = vmatmul.mubr.msk.f32.vlgmr.msra.gmra.mxu1 %vm770_vm2, %v1774_v59 }
 0x56f   : > { %v1779_v2 = vadd.f32 %v5186_v55, %v1778_v1  ;;  %6071 = vmatpush3.msra.mxu1 %v1688_v36 }
 0x570   : > { %v5956_v5 = vpop.f32.mrf.mxu0  ;;  %6104 = vmatprep.subr.mxu1 %v5281_v0 }
 0x571   : > { %6019 = vmatprep.mubr.msk.f32.mxu1 %vm770_vm2, %v1779_v2  ;;  %v1794_v11 = vadd.f32 %v5956_v5, %v5186_v55 }
 0x572   : > { %v1788_v9 = vpop.f32.mrf.mxu0  ;;  %6020 = vmatmul.mubr.msk.f32.gmra.mxu1 %vm770_vm2, %v1784_v4 }
 0x573   : > { %v1789_v10 = vadd.f32 %v5186_v55, %v1788_v9 }
 0x574   : > { %v5959_v13 = vpop.f32.mrf.mxu0 }
 0x575   : > { %6022 = vmatprep.mubr.msk.f32.mxu1 %vm770_vm2, %v1789_v10  ;;  %v1804_v19 = vadd.f32 %v5959_v13, %v5186_v55 }
 0x576   : > { %v1798_v17 = vpop.f32.mrf.mxu0  ;;  %6023 = vmatmul.mubr.msk.f32.gmra.mxu1 %vm770_vm2, %v1794_v11 }
 0x577   : > { %v1799_v16 = vadd.f32 %v5186_v55, %v1798_v17 }
 0x578   : > { %v5990_v20 = vpop.f32.mrf.mxu0 }
 0x579   : > { %6025 = vmatprep.mubr.msk.f32.mxu1 %vm770_vm2, %v1799_v16  ;;  %v2010_v40 = vadd.f32 %v5990_v20, %v5214_v31 }
 0x57a   : > { %v2004_v21 = vpop.f32.mrf.mxu0  ;;  %6026 = vmatmul.mubr.msk.f32.gmra.mxu1 %vm770_vm2, %v1804_v19 }
 0x57b   : > { %6072 = vmatprep.mubr.msk.f32.mxu1 %vm770_vm2, %v1649_v45  ;;  %v2005_v41 = vadd.f32 %v5214_v31, %v2004_v21 }
 0x57c   : > { %v5993_v22 = vpop.f32.mrf.mxu0 }
 0x57d   : > { %v2020_v30 = vadd.f32 %v5993_v22, %v5214_v31 }
 0x57e   : > { %v2014_v18 = vpop.f32.mrf.mxu0  ;;  %6073 = vmatmul.mubr.msk.f32.vlgmr.msra.gmra.mxu1 %vm770_vm2, %v5930_v43 }
 0x57f   : > { %6075 = vmatprep.mubr.msk.f32.mxu1 %vm770_vm2, %v1659_v38  ;;  %6105 = vmatpush3.msra.mxu1 %v5281_v0  ;;  %v2015_v39 = vadd.f32 %v5214_v31, %v2014_v18 }
 0x580   : > { %v5996_v26 = vpop.f32.mrf.mxu0  ;;  %6106 = vmatprep.subr.mxu1 %v5280_v23 }
 0x581   : > { %6107 = vmatpush3.msra.mxu1 %v5280_v23  ;;  %v2030_v37 = vadd.f32 %v5996_v26, %v5214_v31 }
 0x582   : > { %v2024_v29 = vpop.f32.mrf.mxu0  ;;  %6076 = vmatmul.mubr.msk.f32.gmra.mxu1 %vm770_vm2, %v5933_v47  ;;  %6108 = vmatprep.subr.mxu1 %v5279_v24 }
 0x583   : > { %6078 = vmatprep.mubr.msk.f32.mxu1 %vm770_vm2, %v1669_v48  ;;  %6109 = vmatpush3.msra.mxu1 %v5279_v24  ;;  %v2025_v27 = vadd.f32 %v5214_v31, %v2024_v29 }
 0x584   : > { %v5999_v33 = vpop.f32.mrf.mxu0  ;;  %6110 = vmatprep.subr.mxu1 %v5278_v28 }
 0x585   : > { %v2040_v25 = vadd.f32 %v5999_v33, %v5214_v31  ;;  %6111 = vmatpush3.msra.mxu1 %v5278_v28  ;;  %v5283_v33 = vld [vmem:[%s7860_s7 + $0x6] ss:$0 sm:$0xff] }
 0x586   : > { %v2034_v34 = vpop.f32.mrf.mxu0  ;;  %6079 = vmatmul.mubr.msk.f32.gmra.mxu1 %vm770_vm2, %v5936_v42 }
 0x587   : > { %v2035_v35 = vadd.f32 %v5214_v31, %v2034_v34  ;;  %6028 = vmatprep.subr.mxu0 %v2040_v25  ;;  %6081 = vmatprep.mubr.msk.f32.mxu1 %vm770_vm2, %v1679_v51 }
 0x588   : > { %6029 = vmatpush3.msra.mxu0 %v2040_v25 }
 0x589   : > { %6030 = vmatprep.subr.mxu0 %v2035_v35 }
 0x58a   : > { %6031 = vmatpush3.msra.mxu0 %v2035_v35  ;;  %6082 = vmatmul.mubr.msk.f32.gmra.mxu1 %vm770_vm2, %v7069_v49 }
 0x58b   : > { %6032 = vmatprep.subr.mxu0 %v2030_v37  ;;  %6112 = vmatprep.mubr.msk.f32.mxu1 %vm919_vm3, %v6745_v52 }
 0x58c   : > { %6033 = vmatpush3.msra.mxu0 %v2030_v37 }
 0x58d   : > { %6034 = vmatprep.subr.mxu0 %v2025_v27 }
 0x58e   : > { %6035 = vmatpush3.msra.mxu0 %v2025_v27  ;;  %6113 = vmatmul.mubr.msk.f32.vlgmr.msra.gmra.mxu1 %vm919_vm3, %v6748_v53 }
 0x58f   : > { %6036 = vmatprep.subr.mxu0 %v2020_v30  ;;  %6115 = vmatprep.mubr.msk.f32.mxu1 %vm919_vm3, %v6768_v61 }
 0x590   : > { %6037 = vmatpush3.msra.mxu0 %v2020_v30 }
 0x591   : > { %6038 = vmatprep.subr.mxu0 %v2015_v39 }
 0x592   : > { %6039 = vmatpush3.msra.mxu0 %v2015_v39  ;;  %6116 = vmatmul.mubr.msk.f32.gmra.mxu1 %vm919_vm3, %v6771_v62 }
 0x593   : > { %6040 = vmatprep.subr.mxu0 %v2010_v40  ;;  %6118 = vmatprep.mubr.msk.f32.mxu1 %vm919_vm3, %v6791_v6 }
 0x594   : > { %6041 = vmatpush3.msra.mxu0 %v2010_v40 }
 0x595   : > { %6042 = vmatprep.subr.mxu0 %v2005_v41 }
 0x596   : > { %6043 = vmatpush3.msra.mxu0 %v2005_v41  ;;  %6119 = vmatmul.mubr.msk.f32.gmra.mxu1 %vm919_vm3, %v6794_v7 }
 0x597   : > { %6121 = vmatprep.mubr.msk.f32.mxu1 %vm919_vm3, %v6814_v14 }
 0x59a   : > { %6122 = vmatmul.mubr.msk.f32.gmra.mxu1 %vm919_vm3, %v6817_v15 }
 0x62e   : > { %v6018_v32 = vpop.f32.mrf.mxu1 }
 0x62f   : > { %v7122_v36 = vmul.f32 0.35355338, %v6018_v32 }
 0x630   : > { %v2157_v43 = vpop.f32.mrf.mxu1 }
 0x631   : > { %v7124_v45 = vmul.f32 0.35355338, %v2157_v43  ;;  %v2207_v47 = vsel %vm1470_vm4, %v7122_v36, -inf }
 0x632   : > { %2208 = vmax.xlane.f32.xlu1 %v2207_v47  ;;  %v6021_v38 = vpop.f32.mrf.mxu1 }
 0x633   : > { %v7128_v42 = vmul.f32 0.35355338, %v6021_v38  ;;  %v2204_v48 = vsel %vm1470_vm4, %v7124_v45, -inf }
 0x634   : > { %2205 = vmax.xlane.f32.xlu0 %v2204_v48  ;;  %v2167_v49 = vpop.f32.mrf.mxu1 }
 0x635   : > { %v7132_v51 = vmul.f32 0.35355338, %v2167_v49  ;;  %v2213_v44 = vsel %vm1470_vm4, %v7128_v42, -inf }
 0x636   : > { %2214 = vmax.xlane.f32.xlu1 %v2213_v44  ;;  %v6024_v55 = vpop.f32.mrf.mxu1 }
 0x637   : > { %v7136_v56 = vmul.f32 0.35355338, %v6024_v55  ;;  %v2210_v57 = vsel %vm1470_vm4, %v7132_v51, -inf }
 0x638   : > { %2211 = vmax.xlane.f32.xlu0 %v2210_v57  ;;  %v2177_v59 = vpop.f32.mrf.mxu1 }
 0x639   : > { %v7140_v60 = vmul.f32 0.35355338, %v2177_v59  ;;  %v2219_v0 = vsel %vm1470_vm4, %v7136_v56, -inf }
 0x63a   : > { %2220 = vmax.xlane.f32.xlu1 %v2219_v0  ;;  %v6027_v1 = vpop.f32.mrf.mxu1 }
 0x63b   : > { %v7144_v2 = vmul.f32 0.35355338, %v6027_v1  ;;  %v2216_v4 = vsel %vm1470_vm4, %v7140_v60, -inf }
 0x63c   : > { %2217 = vmax.xlane.f32.xlu0 %v2216_v4  ;;  %v2187_v5 = vpop.f32.mrf.mxu1 }
 0x63d   : > { %v7148_v9 = vmul.f32 0.35355338, %v2187_v5  ;;  %v2225_v10 = vsel %vm1470_vm4, %v7144_v2, -inf }
 0x63e   : > { %2226 = vmax.xlane.f32.xlu1 %v2225_v10  ;;  %v7152_v11 = vpop.f32.mrf.mxu1 }
 0x63f   : > { %v2222_v13 = vsel %vm1470_vm4, %v7148_v9, -inf }
 0x640   : > { %v7156_v17 = vpop.f32.mrf.mxu1  ;;  %2223 = vmax.xlane.f32.xlu0 %v2222_v13 }
 0x642   : > { %v7158_v16 = vpop.f32.mrf.mxu1 }
 0x644   : > { %v7160_v19 = vpop.f32.mrf.mxu1 }
 0x646   : > { %v7162_v20 = vpop.f32.mrf.mxu1 }
 0x648   : > { %v7164_v21 = vpop.f32.mrf.mxu1 }
 0x64a   : > { %v7166_v22 = vpop.f32.mrf.mxu1 }
 0x64c   : > { %v7168_v23 = vpop.f32.mrf.mxu1 }
 0x64e   : > { %v6114_v18 = vpop.f32.mrf.mxu1 }
 0x64f   : > { %v2884_v41 = vadd.f32 %v6114_v18, %v5283_v33 }
 0x650   : > { %v2878_v24 = vpop.f32.mrf.mxu1 }
 0x651   : > { %v2879_v32 = vadd.f32 %v5283_v33, %v2878_v24 }
 0x652   : > { %v6117_v26 = vpop.f32.mrf.mxu1 }
 0x653   : > { %v2894_v39 = vadd.f32 %v6117_v26, %v5283_v33 }
 0x654   : > { %v2888_v28 = vpop.f32.mrf.mxu1 }
 0x655   : > { %v2889_v40 = vadd.f32 %v5283_v33, %v2888_v28 }
 0x656   : > { %v6120_v29 = vpop.f32.mrf.mxu1 }
 0x657   : > { %v2904_v27 = vadd.f32 %v6120_v29, %v5283_v33 }
 0x658   : > { %v2898_v31 = vpop.f32.mrf.mxu1 }
 0x659   : > { %v2899_v30 = vadd.f32 %v5283_v33, %v2898_v31 }
 0x65a   : > { %v6123_v25 = vpop.f32.mrf.mxu1 }
 0x65b   : > { %v2914_v34 = vadd.f32 %v6123_v25, %v5283_v33 }
 0x65c   : > { %v2908_v35 = vpop.f32.mrf.mxu1 }
 0x65d   : > { %v2909_v37 = vadd.f32 %v5283_v33, %v2908_v35  ;;  %6144 = vmatprep.subr.msk.mxu1 %vm770_vm2, %v2914_v34 }
 0x65e   : > { %6145 = vmatpush3.xpose.msk.msra.mxu1 %vm770_vm2, %v2914_v34 }
 0x65f   : > { %6146 = vmatprep.subr.msk.mxu1 %vm770_vm2, %v2909_v37 }
 0x662   : > { %6147 = vmatpush3.xpose.msk.msra.mxu1 %vm770_vm2, %v2909_v37 }
 0x663   : > { %6148 = vmatprep.subr.msk.mxu1 %vm770_vm2, %v2904_v27 }
 0x666   : > { %6149 = vmatpush3.xpose.msk.msra.mxu1 %vm770_vm2, %v2904_v27 }
 0x667   : > { %6150 = vmatprep.subr.msk.mxu1 %vm770_vm2, %v2899_v30 }
 0x66a   : > { %6151 = vmatpush3.xpose.msk.msra.mxu1 %vm770_vm2, %v2899_v30 }
 0x66b   : > { %6152 = vmatprep.subr.msk.mxu1 %vm770_vm2, %v2894_v39 }
 0x66e   : > { %6153 = vmatpush3.xpose.msk.msra.mxu1 %vm770_vm2, %v2894_v39 }
 0x66f   : > { %6154 = vmatprep.subr.msk.mxu1 %vm770_vm2, %v2889_v40 }
 0x672   : > { %6155 = vmatpush3.xpose.msk.msra.mxu1 %vm770_vm2, %v2889_v40 }
 0x673   : > { %6156 = vmatprep.subr.msk.mxu1 %vm770_vm2, %v2884_v41 }
 0x676   : > { %6157 = vmatpush3.xpose.msk.msra.mxu1 %vm770_vm2, %v2884_v41 }
 0x677   : > { %6158 = vmatprep.subr.msk.mxu1 %vm770_vm2, %v2879_v32 }
 0x67a   : > { %6159 = vmatpush3.xpose.msk.msra.mxu1 %vm770_vm2, %v2879_v32 }
 0x6bb   : > { %v2209_v43 = vpop.xlane.xlu1 %2208 }
 0x6bc   : > { %v2229_v47 = vsub.f32 %v7122_v36, %v2209_v43  ;;  %v5247_v43 = vld [vmem:[%s7861_s8 + $0x8] sm:$0xff] }
 0x6bd   : > { %v2206_v38 = vpop.xlane.xlu0 %2205  ;;  %6056 = vmatprep.subr.mxu0 %v5247_v43 }
 0x6be   : > { %v2238_v48 = vmul.f32 1.442695, %v2229_v47  ;;  %v2228_v49 = vsub.f32 %v7124_v45, %v2206_v38 }
 0x6bf   : > { %v2215_v44 = vpop.xlane.xlu1 %2214 }
 0x6c0   : > { %6432 = vpow2.f32 %v2238_v48  ;;  %v2236_v55 = vmul.f32 1.442695, %v2228_v49  ;;  %v2231_v57 = vsub.f32 %v7128_v42, %v2215_v44 }
 0x6c1   : > { %v2212_v59 = vpop.xlane.xlu0 %2211 }
 0x6c2   : > { %6434 = vpow2.f32 %v2236_v55  ;;  %v2242_v0 = vmul.f32 1.442695, %v2231_v57  ;;  %v2230_v1 = vsub.f32 %v7132_v51, %v2212_v59 }
 0x6c3   : > { %v2221_v4 = vpop.xlane.xlu1 %2220 }
 0x6c4   : > { %6436 = vpow2.f32 %v2242_v0  ;;  %v2240_v5 = vmul.f32 1.442695, %v2230_v1  ;;  %v2233_v10 = vsub.f32 %v7136_v56, %v2221_v4 }
 0x6c5   : > { %v2218_v36 = vpop.xlane.xlu0 %2217 }
 0x6c6   : > { %6438 = vpow2.f32 %v2240_v5  ;;  %v2246_v13 = vmul.f32 1.442695, %v2233_v10  ;;  %v2232_v45 = vsub.f32 %v7140_v60, %v2218_v36 }
 0x6c7   : > { %v2227_v18 = vpop.xlane.xlu1 %2226 }
 0x6c8   : > { %6440 = vpow2.f32 %v2246_v13  ;;  %v2244_v24 = vmul.f32 1.442695, %v2232_v45  ;;  %v2235_v42 = vsub.f32 %v7144_v2, %v2227_v18 }
 0x6c9   : > { %v2224_v26 = vpop.xlane.xlu0 %2223 }
 0x6ca   : > { %6442 = vpow2.f32 %v2244_v24  ;;  %v2250_v28 = vmul.f32 1.442695, %v2235_v42  ;;  %v2234_v51 = vsub.f32 %v7148_v9, %v2224_v26 }
 0x6cc   : > { %6444 = vpow2.f32 %v2250_v28  ;;  %v2248_v29 = vmul.f32 1.442695, %v2234_v51 }
 0x6cd   : > { %v6433_v31 = vpop.eup %6432 }
 0x6ce   : > { %6446 = vpow2.f32 %v2248_v29  ;;  %v2255_v56 = vsel %vm1470_vm4, %v6433_v31, 0.0 }
 0x6cf   : > { %v6435_v33 = vpop.eup %6434  ;;  %2256 = vadd.xlane.f32.xlu1 %v2255_v56  ;;  %v5267_v56 = vld [vmem:[%s7859_s6 + $0x58] sm:$0xff] }
 0x6d0   : > { %v2252_v60 = vsel %vm1470_vm4, %v6435_v33, 0.0 }
 0x6d1   : > { %v6437_v25 = vpop.eup %6436  ;;  %2253 = vadd.xlane.f32.xlu0 %v2252_v60 }
 0x6d2   : > { %v2261_v34 = vsel %vm1470_vm4, %v6437_v25, 0.0 }
 0x6d3   : > { %v6439_v2 = vpop.eup %6438  ;;  %2262 = vadd.xlane.f32.xlu1 %v2261_v34 }
 0x6d4   : > { %v2258_v35 = vsel %vm1470_vm4, %v6439_v2, 0.0 }
 0x6d5   : > { %v6441_v37 = vpop.eup %6440  ;;  %2259 = vadd.xlane.f32.xlu0 %v2258_v35 }
 0x6d6   : > { %v2267_v9 = vsel %vm1470_vm4, %v6441_v37, 0.0 }
 0x6d7   : > { %v6443_v27 = vpop.eup %6442  ;;  %2268 = vadd.xlane.f32.xlu1 %v2267_v9 }
 0x6d8   : > { %v2264_v30 = vsel %vm1470_vm4, %v6443_v27, 0.0 }
 0x6d9   : > { %v6445_v39 = vpop.eup %6444  ;;  %2265 = vadd.xlane.f32.xlu0 %v2264_v30 }
 0x6da   : > { %v2273_v40 = vsel %vm1470_vm4, %v6445_v39, 0.0 }
 0x6db   : > { %v6447_v41 = vpop.eup %6446  ;;  %2274 = vadd.xlane.f32.xlu1 %v2273_v40 }
 0x6dc   : > { %v2270_v32 = vsel %vm1470_vm4, %v6447_v41, 0.0 }
 0x6dd   : > { %2271 = vadd.xlane.f32.xlu0 %v2270_v32  ;;  %v5293_v32 = vld [vmem:[%s7859_s6 + $0x148] sm:$0xff] }
 0x758   : > { %v2257_v47 = vpop.xlane.xlu1 %2256 }
 0x759   : > { %6448 = vrcp.f32 %v2257_v47  ;;  %v5342_v47 = vld [vmem:[%s7859_s6 + $0x78] sm:$0xff] }
 0x75a   : > { %v2254_v38 = vpop.xlane.xlu0 %2253  ;;  %6214 = vmatprep.subr.mxu1 %v5342_v47 }
 0x75b   : > { %6450 = vrcp.f32 %v2254_v38 }
 0x75c   : > { %v2263_v48 = vpop.xlane.xlu1 %2262 }
 0x75d   : > { %6452 = vrcp.f32 %v2263_v48 }
 0x75e   : > { %v2260_v49 = vpop.xlane.xlu0 %2259 }
 0x75f   : > { %6454 = vrcp.f32 %v2260_v49 }
 0x760   : > { %v2269_v44 = vpop.xlane.xlu1 %2268 }
 0x761   : > { %6456 = vrcp.f32 %v2269_v44 }
 0x762   : > { %v2266_v55 = vpop.xlane.xlu0 %2265 }
 0x763   : > { %6458 = vrcp.f32 %v2266_v55 }
 0x764   : > { %v2275_v57 = vpop.xlane.xlu1 %2274 }
 0x765   : > { %6460 = vrcp.f32 %v2275_v57 }
 0x766   : > { %v2272_v59 = vpop.xlane.xlu0 %2271  ;;  %v6449_v0 = vpop.eup %6448 }
 0x767   : > { %6462 = vrcp.f32 %v2272_v59  ;;  %v2285_v5 = vmul.f32 %v6449_v0, %v6433_v31 }
 0x768   : > { %v6451_v1 = vpop.eup %6450 }
 0x769   : > { %v2284_v4 = vmul.f32 %v6451_v1, %v6435_v33 }
 0x76a   : > { %v6453_v10 = vpop.eup %6452 }
 0x76b   : > { %6044 = vmatprep.mubr.msk.f32.mxu0 %vm1470_vm4, %v2284_v4  ;;  %v2287_v45 = vmul.f32 %v6453_v10, %v6437_v25  ;;  %v5266_v25 = vld [vmem:[%s7859_s6 + $0x50] sm:$0xff]  ;;  %v5269_v4 = vld [vmem:[%s7860_s7 + $0x2] ss:$0 sm:$0xff] }
 0x76c   : > { %v6455_v36 = vpop.eup %6454  ;;  %6045 = vmatmul.mubr.msk.f32.vlgmr.msra.gmra.mxu0 %vm1470_vm4, %v2285_v5 }
 0x76d   : > { %v2286_v13 = vmul.f32 %v6455_v36, %v6439_v2  ;;  %6057 = vmatpush3.msra.mxu0 %v5247_v43  ;;  %v5265_v2 = vld [vmem:[%s7859_s6 + $0x48] sm:$0xff]  ;;  %v5292_v43 = vld [vmem:[%s7859_s6 + $0x140] sm:$0xff] }
 0x76e   : > { %v6457_v18 = vpop.eup %6456  ;;  %6084 = vmatprep.subr.mxu0 %v5267_v56 }
 0x76f   : > { %6047 = vmatprep.mubr.msk.f32.mxu0 %vm1470_vm4, %v2286_v13  ;;  %v2289_v26 = vmul.f32 %v6457_v18, %v6441_v37  ;;  %v5264_v37 = vld [vmem:[%s7859_s6 + $0x40] sm:$0xff] }
 0x770   : > { %v6459_v24 = vpop.eup %6458  ;;  %6048 = vmatmul.mubr.msk.f32.gmra.mxu0 %vm1470_vm4, %v2287_v45  ;;  %v5341_v45 = vld [vmem:[%s7859_s6 + $0x70] sm:$0xff] }
 0x771   : > { %v2288_v42 = vmul.f32 %v6459_v24, %v6443_v27  ;;  %v5295_v27 = vld [vmem:[%s7859_s6 + $0x158] sm:$0xff] }
 0x772   : > { %v6461_v28 = vpop.eup %6460 }
 0x773   : > { %6050 = vmatprep.mubr.msk.f32.mxu0 %vm1470_vm4, %v2288_v42  ;;  %v2291_v31 = vmul.f32 %v6461_v28, %v6445_v39  ;;  %v5340_v42 = vld [vmem:[%s7859_s6 + $0x68] sm:$0xff] }
 0x774   : > { %v6463_v51 = vpop.eup %6462  ;;  %6051 = vmatmul.mubr.msk.f32.gmra.mxu0 %vm1470_vm4, %v2289_v26 }
 0x775   : > { %v2290_v29 = vmul.f32 %v6463_v51, %v6447_v41  ;;  %v5294_v41 = vld [vmem:[%s7859_s6 + $0x150] sm:$0xff]  ;;  %v5339_v51 = vld [vmem:[%s7859_s6 + $0x60] sm:$0xff] }
 0x777   : > { %6053 = vmatprep.mubr.msk.f32.mxu0 %vm1470_vm4, %v2290_v29 }
 0x778   : > { %6054 = vmatmul.mubr.msk.f32.gmra.mxu0 %vm1470_vm4, %v2291_v31 }
 0x82c   : > { %v6046_v33 = vpop.f32.mrf.mxu0 }
 0x82e   : > { %v2382_v60 = vpop.f32.mrf.mxu0 }
 0x82f   : > { %6058 = vmatprep.mubr.msk.f32.mxu0 %vm770_vm2, %v2382_v60 }
 0x830   : > { %v6049_v34 = vpop.f32.mrf.mxu0  ;;  %6059 = vmatmul.mubr.msk.f32.vlgmr.msra.gmra.mxu0 %vm770_vm2, %v6046_v33 }
 0x831   : > { %6085 = vmatpush3.msra.mxu0 %v5267_v56  ;;  %v5370_v56 = vld [vmem:[%s7859_s6 + $0x178] sm:$0xff] }
 0x832   : > { %v2392_v35 = vpop.f32.mrf.mxu0  ;;  %6086 = vmatprep.subr.mxu0 %v5266_v25 }
 0x833   : > { %6061 = vmatprep.mubr.msk.f32.mxu0 %vm770_vm2, %v2392_v35  ;;  %6087 = vmatpush3.msra.mxu0 %v5266_v25 }
 0x834   : > { %v6052_v9 = vpop.f32.mrf.mxu0  ;;  %6062 = vmatmul.mubr.msk.f32.gmra.mxu0 %vm770_vm2, %v6049_v34  ;;  %6088 = vmatprep.subr.mxu0 %v5265_v2 }
 0x835   : > { %6089 = vmatpush3.msra.mxu0 %v5265_v2 }
 0x836   : > { %v2402_v30 = vpop.f32.mrf.mxu0  ;;  %6090 = vmatprep.subr.mxu0 %v5264_v37 }
 0x837   : > { %6064 = vmatprep.mubr.msk.f32.mxu0 %vm770_vm2, %v2402_v30  ;;  %6091 = vmatpush3.msra.mxu0 %v5264_v37 }
 0x838   : > { %v6055_v39 = vpop.f32.mrf.mxu0  ;;  %6065 = vmatmul.mubr.msk.f32.gmra.mxu0 %vm770_vm2, %v6052_v9  ;;  %6124 = vmatprep.subr.mxu0 %v5295_v27 }
 0x83a   : > { %v2412_v40 = vpop.f32.mrf.mxu0 }
 0x83b   : > { %6067 = vmatprep.mubr.msk.f32.mxu0 %vm770_vm2, %v2412_v40 }
 0x83c   : > { %6068 = vmatmul.mubr.msk.f32.gmra.mxu0 %vm770_vm2, %v6055_v39  ;;  %v5368_v39 = vld [vmem:[%s7859_s6 + $0x168] sm:$0xff] }
 0x83d   : > { %6092 = vmatprep.mubr.msk.f32.mxu0 %vm919_vm3, %v6745_v52 }
 0x840   : > { %6093 = vmatmul.mubr.msk.f32.vlgmr.msra.gmra.mxu0 %vm919_vm3, %v6748_v53 }
 0x841   : > { %6095 = vmatprep.mubr.msk.f32.mxu0 %vm919_vm3, %v6768_v61  ;;  %6125 = vmatpush3.msra.mxu0 %v5295_v27  ;;  %v5369_v27 = vld [vmem:[%s7859_s6 + $0x170] sm:$0xff] }
 0x842   : > { %6126 = vmatprep.subr.mxu0 %v5294_v41 }
 0x843   : > { %6127 = vmatpush3.msra.mxu0 %v5294_v41  ;;  %v5367_v41 = vld [vmem:[%s7859_s6 + $0x160] sm:$0xff] }
 0x844   : > { %6096 = vmatmul.mubr.msk.f32.gmra.mxu0 %vm919_vm3, %v6771_v62  ;;  %6128 = vmatprep.subr.mxu0 %v5293_v32 }
 0x845   : > { %6098 = vmatprep.mubr.msk.f32.mxu0 %vm919_vm3, %v6791_v6  ;;  %6129 = vmatpush3.msra.mxu0 %v5293_v32 }
 0x846   : > { %6130 = vmatprep.subr.mxu0 %v5292_v43 }
 0x847   : > { %6131 = vmatpush3.msra.mxu0 %v5292_v43  ;;  %v5297_v43 = vld [vmem:[%s7860_s7 + $0xa] ss:$0 sm:$0xff] }
 0x848   : > { %6099 = vmatmul.mubr.msk.f32.gmra.mxu0 %vm919_vm3, %v6794_v7 }
 0x849   : > { %6101 = vmatprep.mubr.msk.f32.mxu0 %vm919_vm3, %v6814_v14 }
 0x84c   : > { %6102 = vmatmul.mubr.msk.f32.gmra.mxu0 %vm919_vm3, %v6817_v15 }
 0x84d   : > { %6132 = vmatprep.mubr.msk.f32.mxu0 %vm919_vm3, %v6742_v50 }
 0x850   : > { %6133 = vmatmul.mubr.msk.f32.vlgmr.msra.gmra.mxu0 %vm919_vm3, %v6738_v46 }
 0x851   : > { %6135 = vmatprep.mubr.msk.f32.mxu0 %vm919_vm3, %v6754_v58 }
 0x854   : > { %6136 = vmatmul.mubr.msk.f32.gmra.mxu0 %vm919_vm3, %v6750_v54 }
 0x855   : > { %6138 = vmatprep.mubr.msk.f32.mxu0 %vm919_vm3, %v6777_v3 }
 0x858   : > { %6139 = vmatmul.mubr.msk.f32.gmra.mxu0 %vm919_vm3, %v6773_v63 }
 0x859   : > { %6141 = vmatprep.mubr.msk.f32.mxu0 %vm919_vm3, %v6800_v12 }
 0x85c   : > { %6142 = vmatmul.mubr.msk.f32.gmra.mxu0 %vm919_vm3, %v6796_v8 }
 0x8f0   : > { %v7283_v38 = vpop.f32.mrf.mxu0 }
 0x8f2   : > { %v7285_v48 = vpop.f32.mrf.mxu0 }
 0x8f4   : > { %v7287_v49 = vpop.f32.mrf.mxu0 }
 0x8f6   : > { %v7289_v44 = vpop.f32.mrf.mxu0 }
 0x8f8   : > { %v7291_v55 = vpop.f32.mrf.mxu0 }
 0x8fa   : > { %v7293_v57 = vpop.f32.mrf.mxu0 }
 0x8fc   : > { %v7295_v59 = vpop.f32.mrf.mxu0 }
 0x8fe   : > { %v7297_v0 = vpop.f32.mrf.mxu0 }
 0x900   : > { %v6094_v1 = vpop.f32.mrf.mxu0 }
 0x901   : > { %v2766_v36 = vadd.f32 %v6094_v1, %v5269_v4 }
 0x902   : > { %v2760_v5 = vpop.f32.mrf.mxu0 }
 0x903   : > { %v2761_v10 = vadd.f32 %v5269_v4, %v2760_v5 }
 0x904   : > { %v6097_v13 = vpop.f32.mrf.mxu0 }
 0x905   : > { %6160 = vmatprep.mubr.msk.f32.mxu1 %vm770_vm2, %v2761_v10  ;;  %v2776_v26 = vadd.f32 %v6097_v13, %v5269_v4 }
 0x906   : > { %v2770_v18 = vpop.f32.mrf.mxu0  ;;  %6161 = vmatmul.mubr.msk.f32.vlgmr.msra.gmra.mxu1 %vm770_vm2, %v2766_v36 }
 0x907   : > { %v2771_v24 = vadd.f32 %v5269_v4, %v2770_v18  ;;  %6215 = vmatpush3.msra.mxu1 %v5342_v47 }
 0x908   : > { %v6100_v28 = vpop.f32.mrf.mxu0  ;;  %6216 = vmatprep.subr.mxu1 %v5341_v45 }
 0x909   : > { %6163 = vmatprep.mubr.msk.f32.mxu1 %vm770_vm2, %v2771_v24  ;;  %6217 = vmatpush3.msra.mxu1 %v5341_v45  ;;  %v2786_v33 = vadd.f32 %v6100_v28, %v5269_v4 }
 0x90a   : > { %v2780_v29 = vpop.f32.mrf.mxu0  ;;  %6164 = vmatmul.mubr.msk.f32.gmra.mxu1 %vm770_vm2, %v2776_v26  ;;  %6218 = vmatprep.subr.mxu1 %v5340_v42 }
 0x90b   : > { %v2781_v31 = vadd.f32 %v5269_v4, %v2780_v29  ;;  %6219 = vmatpush3.msra.mxu1 %v5340_v42 }
 0x90c   : > { %v6103_v60 = vpop.f32.mrf.mxu0  ;;  %6220 = vmatprep.subr.mxu1 %v5339_v51 }
 0x90d   : > { %6166 = vmatprep.mubr.msk.f32.mxu1 %vm770_vm2, %v2781_v31  ;;  %6221 = vmatpush3.msra.mxu1 %v5339_v51  ;;  %v2796_v2 = vadd.f32 %v6103_v60, %v5269_v4 }
 0x90e   : > { %v2790_v25 = vpop.f32.mrf.mxu0  ;;  %6167 = vmatmul.mubr.msk.f32.gmra.mxu1 %vm770_vm2, %v2786_v33  ;;  %6254 = vmatprep.subr.mxu1 %v5370_v56 }
 0x90f   : > { %v2791_v34 = vadd.f32 %v5269_v4, %v2790_v25 }
 0x910   : > { %v6134_v35 = vpop.f32.mrf.mxu0 }
 0x911   : > { %6169 = vmatprep.mubr.msk.f32.mxu1 %vm770_vm2, %v2791_v34  ;;  %v3002_v18 = vadd.f32 %v6134_v35, %v5297_v43 }
 0x912   : > { %v2996_v37 = vpop.f32.mrf.mxu0  ;;  %6170 = vmatmul.mubr.msk.f32.gmra.mxu1 %vm770_vm2, %v2796_v2 }
 0x913   : > { %6222 = vmatprep.mubr.msk.f32.mxu1 %vm919_vm3, %v6745_v52  ;;  %v2997_v24 = vadd.f32 %v5297_v43, %v2996_v37 }
 0x914   : > { %v6137_v9 = vpop.f32.mrf.mxu0 }
 0x915   : > { %v3012_v13 = vadd.f32 %v6137_v9, %v5297_v43 }
 0x916   : > { %v3006_v30 = vpop.f32.mrf.mxu0  ;;  %6223 = vmatmul.mubr.msk.f32.vlgmr.msra.gmra.mxu1 %vm919_vm3, %v6748_v53 }
 0x917   : > { %6225 = vmatprep.mubr.msk.f32.mxu1 %vm919_vm3, %v6768_v61  ;;  %6255 = vmatpush3.msra.mxu1 %v5370_v56  ;;  %v3007_v45 = vadd.f32 %v5297_v43, %v3006_v30 }
 0x918   : > { %v6140_v40 = vpop.f32.mrf.mxu0  ;;  %6256 = vmatprep.subr.mxu1 %v5369_v27 }
 0x919   : > { %6257 = vmatpush3.msra.mxu1 %v5369_v27  ;;  %v3022_v10 = vadd.f32 %v6140_v40, %v5297_v43 }
 0x91a   : > { %v3016_v32 = vpop.f32.mrf.mxu0  ;;  %6226 = vmatmul.mubr.msk.f32.gmra.mxu1 %vm919_vm3, %v6771_v62  ;;  %6258 = vmatprep.subr.mxu1 %v5368_v39 }
 0x91b   : > { %6228 = vmatprep.mubr.msk.f32.mxu1 %vm919_vm3, %v6791_v6  ;;  %6259 = vmatpush3.msra.mxu1 %v5368_v39  ;;  %v3017_v36 = vadd.f32 %v5297_v43, %v3016_v32 }
 0x91c   : > { %v6143_v47 = vpop.f32.mrf.mxu0  ;;  %6260 = vmatprep.subr.mxu1 %v5367_v41 }
 0x91d   : > { %v3032_v1 = vadd.f32 %v6143_v47, %v5297_v43  ;;  %6261 = vmatpush3.msra.mxu1 %v5367_v41 }
 0x91e   : > { %v3026_v4 = vpop.f32.mrf.mxu0  ;;  %6229 = vmatmul.mubr.msk.f32.gmra.mxu1 %vm919_vm3, %v6794_v7 }
 0x91f   : > { %v3027_v5 = vadd.f32 %v5297_v43, %v3026_v4  ;;  %6172 = vmatprep.subr.mxu0 %v3032_v1  ;;  %6231 = vmatprep.mubr.msk.f32.mxu1 %vm919_vm3, %v6814_v14  ;;  %v7395_v43 = vld [vmem:[%s7860_s7 + $0x3] ss:$0 sm:$0xff] }
 0x920   : > { %6173 = vmatpush3.msra.mxu0 %v3032_v1 }
 0x921   : > { %6174 = vmatprep.subr.mxu0 %v3027_v5 }
 0x922   : > { %6175 = vmatpush3.msra.mxu0 %v3027_v5  ;;  %6232 = vmatmul.mubr.msk.f32.gmra.mxu1 %vm919_vm3, %v6817_v15 }
 0x923   : > { %6176 = vmatprep.subr.mxu0 %v3022_v10  ;;  %6262 = vmatprep.mubr.msk.f32.mxu1 %vm919_vm3, %v6742_v50 }
 0x924   : > { %6177 = vmatpush3.msra.mxu0 %v3022_v10 }
 0x925   : > { %6178 = vmatprep.subr.mxu0 %v3017_v36 }
 0x926   : > { %6179 = vmatpush3.msra.mxu0 %v3017_v36  ;;  %6263 = vmatmul.mubr.msk.f32.vlgmr.msra.gmra.mxu1 %vm919_vm3, %v6738_v46 }
 0x927   : > { %6180 = vmatprep.subr.mxu0 %v3012_v13  ;;  %6265 = vmatprep.mubr.msk.f32.mxu1 %vm919_vm3, %v6754_v58 }
 0x928   : > { %6181 = vmatpush3.msra.mxu0 %v3012_v13 }
 0x929   : > { %6182 = vmatprep.subr.mxu0 %v3007_v45 }
 0x92a   : > { %6183 = vmatpush3.msra.mxu0 %v3007_v45  ;;  %6266 = vmatmul.mubr.msk.f32.gmra.mxu1 %vm919_vm3, %v6750_v54 }
 0x92b   : > { %6184 = vmatprep.subr.mxu0 %v3002_v18  ;;  %6268 = vmatprep.mubr.msk.f32.mxu1 %vm919_vm3, %v6777_v3 }
 0x92c   : > { %6185 = vmatpush3.msra.mxu0 %v3002_v18 }
 0x92d   : > { %6186 = vmatprep.subr.mxu0 %v2997_v24 }
 0x92e   : > { %6187 = vmatpush3.msra.mxu0 %v2997_v24  ;;  %6269 = vmatmul.mubr.msk.f32.gmra.mxu1 %vm919_vm3, %v6773_v63 }
 0x92f   : > { %6271 = vmatprep.mubr.msk.f32.mxu1 %vm919_vm3, %v6800_v12 }
 0x932   : > { %6272 = vmatmul.mubr.msk.f32.gmra.mxu1 %vm919_vm3, %v6796_v8 }
 0x9c6   : > { %v6162_v42 = vpop.f32.mrf.mxu1 }
 0x9c7   : > { %v7366_v26 = vmul.f32 0.35355338, %v6162_v42 }
 0x9c8   : > { %v3149_v28 = vpop.f32.mrf.mxu1 }
 0x9c9   : > { %v7368_v51 = vmul.f32 0.35355338, %v3149_v28  ;;  %v3199_v29 = vsel %vm1470_vm4, %v7366_v26, -inf }
 0x9ca   : > { %3200 = vmax.xlane.f32.xlu1 %v3199_v29  ;;  %v6165_v31 = vpop.f32.mrf.mxu1 }
 0x9cb   : > { %v7372_v56 = vmul.f32 0.35355338, %v6165_v31  ;;  %v3196_v33 = vsel %vm1470_vm4, %v7368_v51, -inf }
 0x9cc   : > { %3197 = vmax.xlane.f32.xlu0 %v3196_v33  ;;  %v3159_v60 = vpop.f32.mrf.mxu1 }
 0x9cd   : > { %v7376_v25 = vmul.f32 0.35355338, %v3159_v60  ;;  %v3205_v34 = vsel %vm1470_vm4, %v7372_v56, -inf }
 0x9ce   : > { %3206 = vmax.xlane.f32.xlu1 %v3205_v34  ;;  %v6168_v2 = vpop.f32.mrf.mxu1 }
 0x9cf   : > { %v7380_v35 = vmul.f32 0.35355338, %v6168_v2  ;;  %v3202_v37 = vsel %vm1470_vm4, %v7376_v25, -inf }
 0x9d0   : > { %3203 = vmax.xlane.f32.xlu0 %v3202_v37  ;;  %v3169_v9 = vpop.f32.mrf.mxu1 }
 0x9d1   : > { %v7384_v27 = vmul.f32 0.35355338, %v3169_v9  ;;  %v3211_v30 = vsel %vm1470_vm4, %v7380_v35, -inf }
 0x9d2   : > { %3212 = vmax.xlane.f32.xlu1 %v3211_v30  ;;  %v6171_v39 = vpop.f32.mrf.mxu1 }
 0x9d3   : > { %v7388_v40 = vmul.f32 0.35355338, %v6171_v39  ;;  %v3208_v41 = vsel %vm1470_vm4, %v7384_v27, -inf }
 0x9d4   : > { %3209 = vmax.xlane.f32.xlu0 %v3208_v41  ;;  %v3179_v32 = vpop.f32.mrf.mxu1 }
 0x9d5   : > { %v7397_v47 = vmul.f32 0.35355338, %v3179_v32  ;;  %v3217_v1 = vsel %vm1470_vm4, %v7388_v40, -inf }
 0x9d6   : > { %3218 = vmax.xlane.f32.xlu1 %v3217_v1  ;;  %v6224_v4 = vpop.f32.mrf.mxu1  ;;  %v5372_v1 = vld [vmem:[%s7860_s7 + $0xb] ss:$0 sm:$0xff] }
 0x9d7   : > { %v7402_v5 = vadd.f32 %v6224_v4, %v7395_v43  ;;  %v3214_v10 = vsel %vm1470_vm4, %v7397_v47, -inf }
 0x9d8   : > { %v7406_v36 = vpop.f32.mrf.mxu1  ;;  %3215 = vmax.xlane.f32.xlu0 %v3214_v10 }
 0x9da   : > { %v6227_v13 = vpop.f32.mrf.mxu1 }
 0x9db   : > { %v7409_v45 = vadd.f32 %v6227_v13, %v7395_v43 }
 0x9dc   : > { %v3641_v18 = vpop.f32.mrf.mxu1 }
 0x9dd   : > { %v7412_v24 = vadd.f32 %v7395_v43, %v3641_v18 }
 0x9de   : > { %v6230_v42 = vpop.f32.mrf.mxu1 }
 0x9df   : > { %v7415_v28 = vadd.f32 %v6230_v42, %v7395_v43 }
 0x9e0   : > { %v3651_v29 = vpop.f32.mrf.mxu1 }
 0x9e1   : > { %v7418_v31 = vadd.f32 %v7395_v43, %v3651_v29 }
 0x9e2   : > { %v6233_v33 = vpop.f32.mrf.mxu1 }
 0x9e3   : > { %v7421_v60 = vadd.f32 %v6233_v33, %v7395_v43 }
 0x9e4   : > { %v3661_v34 = vpop.f32.mrf.mxu1 }
 0x9e5   : > { %v7424_v2 = vadd.f32 %v7395_v43, %v3661_v34 }
 0x9e6   : > { %v6264_v37 = vpop.f32.mrf.mxu1 }
 0x9e7   : > { %v3873_v12 = vadd.f32 %v6264_v37, %v5372_v1 }
 0x9e8   : > { %v3867_v9 = vpop.f32.mrf.mxu1 }
 0x9ea   : > { %v6267_v30 = vpop.f32.mrf.mxu1 }
 0x9eb   : > { %v3883_v33 = vadd.f32 %v6267_v30, %v5372_v1 }
 0x9ec   : > { %v3877_v39 = vpop.f32.mrf.mxu1 }
 0x9ed   : > { %v3878_v34 = vadd.f32 %v5372_v1, %v3877_v39 }
 0x9ee   : > { %v6270_v41 = vpop.f32.mrf.mxu1 }
 0x9ef   : > { %v3893_v42 = vadd.f32 %v6270_v41, %v5372_v1 }
 0x9f0   : > { %v3887_v32 = vpop.f32.mrf.mxu1 }
 0x9f1   : > { %v3888_v29 = vadd.f32 %v5372_v1, %v3887_v32 }
 0x9f2   : > { %v6273_v4 = vpop.f32.mrf.mxu1 }
 0x9f3   : > { %v3903_v10 = vadd.f32 %v6273_v4, %v5372_v1  ;;  %v3868_v4 = vadd.f32 %v5372_v1, %v3867_v9 }
 0x9f4   : > { %v3897_v13 = vpop.f32.mrf.mxu1 }
 0x9f5   : > { %v3898_v18 = vadd.f32 %v5372_v1, %v3897_v13  ;;  %6302 = vmatprep.subr.mxu1 %v3903_v10 }
 0x9f6   : > { %6303 = vmatpush3.msra.mxu1 %v3903_v10 }
 0x9f7   : > { %6304 = vmatprep.subr.mxu1 %v3898_v18 }
 0x9f8   : > { %6305 = vmatpush3.msra.mxu1 %v3898_v18 }
 0x9f9   : > { %6306 = vmatprep.subr.mxu1 %v3893_v42 }
 0x9fa   : > { %6307 = vmatpush3.msra.mxu1 %v3893_v42 }
 0x9fb   : > { %6308 = vmatprep.subr.mxu1 %v3888_v29 }
 0x9fc   : > { %6309 = vmatpush3.msra.mxu1 %v3888_v29 }
 0x9fd   : > { %6310 = vmatprep.subr.mxu1 %v3883_v33 }
 0x9fe   : > { %6311 = vmatpush3.msra.mxu1 %v3883_v33 }
 0x9ff   : > { %6312 = vmatprep.subr.mxu1 %v3878_v34 }
 0xa00   : > { %6313 = vmatpush3.msra.mxu1 %v3878_v34 }
 0xa01   : > { %6314 = vmatprep.subr.mxu1 %v3873_v12 }
 0xa02   : > { %6315 = vmatpush3.msra.mxu1 %v3873_v12 }
 0xa03   : > { %6316 = vmatprep.subr.mxu1 %v3868_v4 }
 0xa04   : > { %6317 = vmatpush3.msra.mxu1 %v3868_v4 }
 0xa53   : > { %v3201_v41 = vpop.xlane.xlu1 %3200 }
 0xa54   : > { %v3221_v10 = vsub.f32 %v7366_v26, %v3201_v41 }
 0xa55   : > { %v3198_v32 = vpop.xlane.xlu0 %3197 }
 0xa56   : > { %v3230_v13 = vmul.f32 1.442695, %v3221_v10  ;;  %v3220_v30 = vsub.f32 %v7368_v51, %v3198_v32 }
 0xa57   : > { %v3207_v18 = vpop.xlane.xlu1 %3206 }
 0xa58   : > { %6464 = vpow2.f32 %v3230_v13  ;;  %v3228_v39 = vmul.f32 1.442695, %v3220_v30  ;;  %v3223_v42 = vsub.f32 %v7372_v56, %v3207_v18 }
 0xa59   : > { %v3204_v37 = vpop.xlane.xlu0 %3203 }
 0xa5a   : > { %6466 = vpow2.f32 %v3228_v39  ;;  %v3234_v29 = vmul.f32 1.442695, %v3223_v42  ;;  %v3222_v9 = vsub.f32 %v7376_v25, %v3204_v37 }
 0xa5b   : > { %v3213_v12 = vpop.xlane.xlu1 %3212 }
 0xa5c   : > { %6468 = vpow2.f32 %v3234_v29  ;;  %v3232_v1 = vmul.f32 1.442695, %v3222_v9  ;;  %v3225_v33 = vsub.f32 %v7380_v35, %v3213_v12 }
 0xa5d   : > { %v3210_v26 = vpop.xlane.xlu0 %3209 }
 0xa5e   : > { %6470 = vpow2.f32 %v3232_v1  ;;  %v3238_v34 = vmul.f32 1.442695, %v3225_v33  ;;  %v3224_v51 = vsub.f32 %v7384_v27, %v3210_v26 }
 0xa5f   : > { %v3219_v4 = vpop.xlane.xlu1 %3218 }
 0xa60   : > { %6472 = vpow2.f32 %v3238_v34  ;;  %v3236_v41 = vmul.f32 1.442695, %v3224_v51  ;;  %v3227_v56 = vsub.f32 %v7388_v40, %v3219_v4  ;;  %v5330_v51 = vld [vmem:[%s7861_s8 + $0x10] sm:$0xff] }
 0xa61   : > { %v3216_v10 = vpop.xlane.xlu0 %3215  ;;  %6200 = vmatprep.subr.mxu0 %v5330_v51 }
 0xa62   : > { %6474 = vpow2.f32 %v3236_v41  ;;  %v3242_v32 = vmul.f32 1.442695, %v3227_v56  ;;  %v3226_v25 = vsub.f32 %v7397_v47, %v3216_v10 }
 0xa64   : > { %6476 = vpow2.f32 %v3242_v32  ;;  %v3240_v13 = vmul.f32 1.442695, %v3226_v25 }
 0xa65   : > { %v6465_v30 = vpop.eup %6464 }
 0xa66   : > { %6478 = vpow2.f32 %v3240_v13  ;;  %v3247_v35 = vsel %vm1470_vm4, %v6465_v30, 0.0 }
 0xa67   : > { %v6467_v18 = vpop.eup %6466  ;;  %3248 = vadd.xlane.f32.xlu1 %v3247_v35 }
 0xa68   : > { %v3244_v27 = vsel %vm1470_vm4, %v6467_v18, 0.0 }
 0xa69   : > { %v6469_v39 = vpop.eup %6468  ;;  %3245 = vadd.xlane.f32.xlu0 %v3244_v27 }
 0xa6a   : > { %v3253_v42 = vsel %vm1470_vm4, %v6469_v39, 0.0 }
 0xa6b   : > { %v6471_v40 = vpop.eup %6470  ;;  %3254 = vadd.xlane.f32.xlu1 %v3253_v42 }
 0xa6c   : > { %v3250_v37 = vsel %vm1470_vm4, %v6471_v40, 0.0 }
 0xa6d   : > { %v6473_v29 = vpop.eup %6472  ;;  %3251 = vadd.xlane.f32.xlu0 %v3250_v37 }
 0xa6e   : > { %v3259_v47 = vsel %vm1470_vm4, %v6473_v29, 0.0 }
 0xa6f   : > { %v6475_v9 = vpop.eup %6474  ;;  %3260 = vadd.xlane.f32.xlu1 %v3259_v47 }
 0xa70   : > { %v3256_v12 = vsel %vm1470_vm4, %v6475_v9, 0.0 }
 0xa71   : > { %v6477_v1 = vpop.eup %6476  ;;  %3257 = vadd.xlane.f32.xlu0 %v3256_v12 }
 0xa72   : > { %v3265_v33 = vsel %vm1470_vm4, %v6477_v1, 0.0 }
 0xa73   : > { %v6479_v26 = vpop.eup %6478  ;;  %3266 = vadd.xlane.f32.xlu1 %v3265_v33 }
 0xa74   : > { %v3262_v34 = vsel %vm1470_vm4, %v6479_v26, 0.0 }
 0xa75   : > { %3263 = vadd.xlane.f32.xlu0 %v3262_v34 }
 0xaf0   : > { %v3249_v4 = vpop.xlane.xlu1 %3248 }
 0xaf1   : > { %6480 = vrcp.f32 %v3249_v4 }
 0xaf2   : > { %v3246_v41 = vpop.xlane.xlu0 %3245 }
 0xaf3   : > { %6482 = vrcp.f32 %v3246_v41 }
 0xaf4   : > { %v3255_v56 = vpop.xlane.xlu1 %3254 }
 0xaf5   : > { %6484 = vrcp.f32 %v3255_v56 }
 0xaf6   : > { %v3252_v10 = vpop.xlane.xlu0 %3251 }
 0xaf7   : > { %6486 = vrcp.f32 %v3252_v10 }
 0xaf8   : > { %v3261_v32 = vpop.xlane.xlu1 %3260 }
 0xaf9   : > { %6488 = vrcp.f32 %v3261_v32 }
 0xafa   : > { %v3258_v25 = vpop.xlane.xlu0 %3257 }
 0xafb   : > { %6490 = vrcp.f32 %v3258_v25 }
 0xafc   : > { %v3267_v13 = vpop.xlane.xlu1 %3266 }
 0xafd   : > { %6492 = vrcp.f32 %v3267_v13 }
 0xafe   : > { %v3264_v35 = vpop.xlane.xlu0 %3263  ;;  %v6481_v27 = vpop.eup %6480 }
 0xaff   : > { %6494 = vrcp.f32 %v3264_v35  ;;  %v3277_v47 = vmul.f32 %v6481_v27, %v6465_v30  ;;  %v5353_v35 = vld [vmem:[%s7859_s6 + $0xe0] sm:$0xff] }
 0xb00   : > { %v6483_v42 = vpop.eup %6482 }
 0xb01   : > { %v3276_v37 = vmul.f32 %v6483_v42, %v6467_v18 }
 0xb02   : > { %v6485_v12 = vpop.eup %6484 }
 0xb03   : > { %6188 = vmatprep.mubr.msk.f32.mxu0 %vm1470_vm4, %v3276_v37  ;;  %v3279_v4 = vmul.f32 %v6485_v12, %v6469_v39  ;;  %v5356_v39 = vld [vmem:[%s7859_s6 + $0xf8] sm:$0xff] }
 0xb04   : > { %v6487_v33 = vpop.eup %6486  ;;  %6189 = vmatmul.mubr.msk.f32.vlgmr.msra.gmra.mxu0 %vm1470_vm4, %v3277_v47 }
 0xb05   : > { %v3278_v34 = vmul.f32 %v6487_v33, %v6471_v40  ;;  %6201 = vmatpush3.msra.mxu0 %v5330_v51 }
 0xb06   : > { %v6489_v41 = vpop.eup %6488  ;;  %6234 = vmatprep.subr.mxu0 %v5356_v39 }
 0xb07   : > { %6191 = vmatprep.mubr.msk.f32.mxu0 %vm1470_vm4, %v3278_v34  ;;  %v3281_v32 = vmul.f32 %v6489_v41, %v6473_v29  ;;  %v5355_v29 = vld [vmem:[%s7859_s6 + $0xf0] sm:$0xff] }
 0xb08   : > { %v6491_v56 = vpop.eup %6490  ;;  %6192 = vmatmul.mubr.msk.f32.gmra.mxu0 %vm1470_vm4, %v3279_v4 }
 0xb09   : > { %v3280_v10 = vmul.f32 %v6491_v56, %v6475_v9 }
 0xb0a   : > { %v6493_v25 = vpop.eup %6492 }
 0xb0b   : > { %6194 = vmatprep.mubr.msk.f32.mxu0 %vm1470_vm4, %v3280_v10  ;;  %v3283_v13 = vmul.f32 %v6493_v25, %v6477_v1  ;;  %v5354_v1 = vld [vmem:[%s7859_s6 + $0xe8] sm:$0xff] }
 0xb0c   : > { %v6495_v30 = vpop.eup %6494  ;;  %6195 = vmatmul.mubr.msk.f32.gmra.mxu0 %vm1470_vm4, %v3281_v32 }
 0xb0d   : > { %v3282_v18 = vmul.f32 %v6495_v30, %v6479_v26 }
 0xb0f   : > { %6197 = vmatprep.mubr.msk.f32.mxu0 %vm1470_vm4, %v3282_v18 }
 0xb10   : > { %6198 = vmatmul.mubr.msk.f32.gmra.mxu0 %vm1470_vm4, %v3283_v13 }
 0xbc4   : > { %v6190_v40 = vpop.f32.mrf.mxu0 }
 0xbc6   : > { %v3374_v9 = vpop.f32.mrf.mxu0 }
 0xbc7   : > { %6202 = vmatprep.mubr.msk.f32.mxu0 %vm770_vm2, %v3374_v9 }
 0xbc8   : > { %v6193_v51 = vpop.f32.mrf.mxu0  ;;  %6203 = vmatmul.mubr.msk.f32.vlgmr.msra.gmra.mxu0 %vm770_vm2, %v6190_v40 }
 0xbc9   : > { %6235 = vmatpush3.msra.mxu0 %v5356_v39 }
 0xbca   : > { %v3384_v26 = vpop.f32.mrf.mxu0  ;;  %6236 = vmatprep.subr.mxu0 %v5355_v29 }
 0xbcb   : > { %6205 = vmatprep.mubr.msk.f32.mxu0 %vm770_vm2, %v3384_v26  ;;  %6237 = vmatpush3.msra.mxu0 %v5355_v29 }
 0xbcc   : > { %v6196_v27 = vpop.f32.mrf.mxu0  ;;  %6206 = vmatmul.mubr.msk.f32.gmra.mxu0 %vm770_vm2, %v6193_v51  ;;  %6238 = vmatprep.subr.mxu0 %v5354_v1 }
 0xbcd   : > { %6239 = vmatpush3.msra.mxu0 %v5354_v1 }
 0xbce   : > { %v3394_v42 = vpop.f32.mrf.mxu0  ;;  %6240 = vmatprep.subr.mxu0 %v5353_v35 }
 0xbcf   : > { %6208 = vmatprep.mubr.msk.f32.mxu0 %vm770_vm2, %v3394_v42  ;;  %6241 = vmatpush3.msra.mxu0 %v5353_v35 }
 0xbd0   : > { %v6199_v37 = vpop.f32.mrf.mxu0  ;;  %6209 = vmatmul.mubr.msk.f32.gmra.mxu0 %vm770_vm2, %v6196_v27 }
 0xbd2   : > { %v3404_v47 = vpop.f32.mrf.mxu0 }
 0xbd3   : > { %6211 = vmatprep.mubr.msk.f32.mxu0 %vm770_vm2, %v3404_v47 }
 0xbd4   : > { %6212 = vmatmul.mubr.msk.f32.gmra.mxu0 %vm770_vm2, %v6199_v37 }
 0xbd5   : > { %6242 = vmatprep.mubr.msk.f32.mxu0 %vm919_vm3, %v6745_v52  ;;  %v3632_v52 = vadd.f32 %v7395_v43, %v7406_v36 }
 0xbd8   : > { %6243 = vmatmul.mubr.msk.f32.vlgmr.msra.gmra.mxu0 %vm919_vm3, %v6748_v53  ;;  %v2648_v53 = vadd.f32 %v7152_v11, %v7283_v38  ;;  %v2668_v11 = vadd.f32 %v7162_v20, %v7291_v55 }
 0xbd9   : > { %6245 = vmatprep.mubr.msk.f32.mxu0 %vm919_vm3, %v6768_v61 }
 0xbdc   : > { %6246 = vmatmul.mubr.msk.f32.gmra.mxu0 %vm919_vm3, %v6771_v62  ;;  %v2643_v62 = vadd.f32 %v7156_v17, %v7285_v48  ;;  %v2663_v48 = vadd.f32 %v7164_v21, %v7293_v57 }
 0xbdd   : > { %6248 = vmatprep.mubr.msk.f32.mxu0 %vm919_vm3, %v6791_v6 }
 0xbe0   : > { %6249 = vmatmul.mubr.msk.f32.gmra.mxu0 %vm919_vm3, %v6794_v7 }
 0xbe1   : > { %6251 = vmatprep.mubr.msk.f32.mxu0 %vm919_vm3, %v6814_v14  ;;  %v2658_v14 = vadd.f32 %v7158_v16, %v7287_v49  ;;  %v2678_v49 = vadd.f32 %v7166_v22, %v7295_v59  ;;  %v5358_v22 = vld [vmem:[%s7860_s7 + $0x7] ss:$0 sm:$0xff] }
 0xbe4   : > { %6252 = vmatmul.mubr.msk.f32.gmra.mxu0 %vm919_vm3, %v6817_v15  ;;  %v2653_v15 = vadd.f32 %v7160_v19, %v7289_v44  ;;  %v2673_v44 = vadd.f32 %v7168_v23, %v7297_v0 }
 0xbe5   : > { %6290 = vmatprep.mubr.msk.f32.mxu0 %vm770_vm2, %v3632_v52 }
 0xc88   : > { %v6204_v61 = vpop.f32.mrf.mxu0 }
 0xc89   : > { %v7499_v6 = vadd.f32 %v6204_v61, %v2648_v53 }
 0xc8a   : > { %v3505_v7 = vpop.f32.mrf.mxu0 }
 0xc8b   : > { %v7503_v12 = vadd.f32 %v3505_v7, %v2643_v62 }
 0xc8c   : > { %v6207_v43 = vpop.f32.mrf.mxu0 }
 0xc8d   : > { %v7507_v36 = vadd.f32 %v6207_v43, %v2658_v14 }
 0xc8e   : > { %v3515_v33 = vpop.f32.mrf.mxu0 }
 0xc8f   : > { %v7511_v38 = vadd.f32 %v3515_v33, %v2653_v15 }
 0xc90   : > { %v6210_v17 = vpop.f32.mrf.mxu0 }
 0xc91   : > { %v7515_v34 = vadd.f32 %v6210_v17, %v2668_v11 }
 0xc92   : > { %v3525_v16 = vpop.f32.mrf.mxu0 }
 0xc93   : > { %v7519_v4 = vadd.f32 %v3525_v16, %v2663_v48 }
 0xc94   : > { %v6213_v19 = vpop.f32.mrf.mxu0 }
 0xc95   : > { %v7523_v41 = vadd.f32 %v6213_v19, %v2678_v49 }
 0xc96   : > { %v3535_v20 = vpop.f32.mrf.mxu0 }
 0xc97   : > { %v7525_v55 = vadd.f32 %v3535_v20, %v2673_v44 }
 0xc98   : > { %v6244_v56 = vpop.f32.mrf.mxu0 }
 0xc99   : > { %v3755_v9 = vadd.f32 %v6244_v56, %v5358_v22 }
 0xc9a   : > { %v3749_v10 = vpop.f32.mrf.mxu0 }
 0xc9b   : > { %v3750_v29 = vadd.f32 %v5358_v22, %v3749_v10 }
 0xc9c   : > { %v6247_v21 = vpop.f32.mrf.mxu0 }
 0xc9d   : > { %v3765_v39 = vadd.f32 %v6247_v21, %v5358_v22 }
 0xc9e   : > { %v3759_v57 = vpop.f32.mrf.mxu0 }
 0xc9f   : > { %v3760_v40 = vadd.f32 %v5358_v22, %v3759_v57 }
 0xca0   : > { %v6250_v32 = vpop.f32.mrf.mxu0 }
 0xca1   : > { %v3775_v23 = vadd.f32 %v6250_v32, %v5358_v22 }
 0xca2   : > { %v3769_v25 = vpop.f32.mrf.mxu0 }
 0xca3   : > { %v3770_v0 = vadd.f32 %v5358_v22, %v3769_v25 }
 0xca4   : > { %v6253_v59 = vpop.f32.mrf.mxu0 }
 0xca5   : > { %v3785_v30 = vadd.f32 %v6253_v59, %v5358_v22 }
 0xca6   : > { %v3779_v18 = vpop.f32.mrf.mxu0 }
 0xca7   : > { %v3780_v13 = vadd.f32 %v5358_v22, %v3779_v18  ;;  %6274 = vmatprep.subr.msk.mxu0 %vm770_vm2, %v3785_v30 }
 0xca8   : > { %6275 = vmatpush3.xpose.msk.msra.mxu0 %vm770_vm2, %v3785_v30 }
 0xca9   : > { %6276 = vmatprep.subr.msk.mxu0 %vm770_vm2, %v3780_v13 }
 0xcac   : > { %6277 = vmatpush3.xpose.msk.msra.mxu0 %vm770_vm2, %v3780_v13 }
 0xcad   : > { %6278 = vmatprep.subr.msk.mxu0 %vm770_vm2, %v3775_v23 }
 0xcb0   : > { %6279 = vmatpush3.xpose.msk.msra.mxu0 %vm770_vm2, %v3775_v23 }
 0xcb1   : > { %6280 = vmatprep.subr.msk.mxu0 %vm770_vm2, %v3770_v0 }
 0xcb4   : > { %6281 = vmatpush3.xpose.msk.msra.mxu0 %vm770_vm2, %v3770_v0 }
 0xcb5   : > { %6282 = vmatprep.subr.msk.mxu0 %vm770_vm2, %v3765_v39 }
 0xcb8   : > { %6283 = vmatpush3.xpose.msk.msra.mxu0 %vm770_vm2, %v3765_v39 }
 0xcb9   : > { %6284 = vmatprep.subr.msk.mxu0 %vm770_vm2, %v3760_v40 }
 0xcbc   : > { %6285 = vmatpush3.xpose.msk.msra.mxu0 %vm770_vm2, %v3760_v40 }
 0xcbd   : > { %6286 = vmatprep.subr.msk.mxu0 %vm770_vm2, %v3755_v9 }
 0xcc0   : > { %6287 = vmatpush3.xpose.msk.msra.mxu0 %vm770_vm2, %v3755_v9 }
 0xcc1   : > { %6288 = vmatprep.subr.msk.mxu0 %vm770_vm2, %v3750_v29 }
 0xcc4   : > { %6289 = vmatpush3.xpose.msk.msra.mxu0 %vm770_vm2, %v3750_v29 }
 0xcc7   : > { %6291 = vmatmul.mubr.msk.f32.vlgmr.msra.gmra.mxu0 %vm770_vm2, %v7402_v5 }
 0xcc8   : > { %6293 = vmatprep.mubr.msk.f32.mxu0 %vm770_vm2, %v7412_v24 }
 0xccb   : > { %6294 = vmatmul.mubr.msk.f32.gmra.mxu0 %vm770_vm2, %v7409_v45 }
 0xccc   : > { %6296 = vmatprep.mubr.msk.f32.mxu0 %vm770_vm2, %v7418_v31 }
 0xccf   : > { %6297 = vmatmul.mubr.msk.f32.gmra.mxu0 %vm770_vm2, %v7415_v28 }
 0xcd0   : > { %6299 = vmatprep.mubr.msk.f32.mxu0 %vm770_vm2, %v7424_v2 }
 0xcd3   : > { %6300 = vmatmul.mubr.msk.f32.gmra.mxu0 %vm770_vm2, %v7421_v60 }
 0xd87   : > { %v6292_v51 = vpop.f32.mrf.mxu0 }
 0xd88   : > { %v4060_v5 = vmul.f32 0.35355338, %v6292_v51 }
 0xd89   : > { %v4020_v1 = vpop.f32.mrf.mxu0 }
 0xd8a   : > { %v4059_v26 = vmul.f32 0.35355338, %v4020_v1  ;;  %v4070_v24 = vsel %vm1470_vm4, %v4060_v5, -inf }
 0xd8b   : > { %4071 = vmax.xlane.f32.xlu1 %v4070_v24  ;;  %v6295_v45 = vpop.f32.mrf.mxu0 }
 0xd8c   : > { %v4062_v35 = vmul.f32 0.35355338, %v6295_v45  ;;  %v4067_v31 = vsel %vm1470_vm4, %v4059_v26, -inf }
 0xd8d   : > { %4068 = vmax.xlane.f32.xlu0 %v4067_v31  ;;  %v4030_v27 = vpop.f32.mrf.mxu0 }
 0xd8e   : > { %v4061_v28 = vmul.f32 0.35355338, %v4030_v27  ;;  %v4076_v42 = vsel %vm1470_vm4, %v4062_v35, -inf }
 0xd8f   : > { %4077 = vmax.xlane.f32.xlu1 %v4076_v42  ;;  %v6298_v2 = vpop.f32.mrf.mxu0 }
 0xd90   : > { %v4064_v37 = vmul.f32 0.35355338, %v6298_v2  ;;  %v4073_v60 = vsel %vm1470_vm4, %v4061_v28, -inf }
 0xd91   : > { %4074 = vmax.xlane.f32.xlu0 %v4073_v60  ;;  %v4040_v47 = vpop.f32.mrf.mxu0 }
 0xd92   : > { %v4063_v52 = vmul.f32 0.35355338, %v4040_v47  ;;  %v4082_v53 = vsel %vm1470_vm4, %v4064_v37, -inf }
 0xd93   : > { %4083 = vmax.xlane.f32.xlu1 %v4082_v53  ;;  %v6301_v61 = vpop.f32.mrf.mxu0 }
 0xd94   : > { %v4066_v62 = vmul.f32 0.35355338, %v6301_v61  ;;  %v4079_v7 = vsel %vm1470_vm4, %v4063_v52, -inf }
 0xd95   : > { %4080 = vmax.xlane.f32.xlu0 %v4079_v7  ;;  %v4050_v14 = vpop.f32.mrf.mxu0 }
 0xd96   : > { %v4065_v43 = vmul.f32 0.35355338, %v4050_v14  ;;  %v4088_v15 = vsel %vm1470_vm4, %v4066_v62, -inf }
 0xd97   : > { %4089 = vmax.xlane.f32.xlu1 %v4088_v15 }
 0xd98   : > { %v4085_v33 = vsel %vm1470_vm4, %v4065_v43, -inf }
 0xd99   : > { %4086 = vmax.xlane.f32.xlu0 %v4085_v33 }
 0xe14   : > { %v4072_v11 = vpop.xlane.xlu1 %4071 }
 0xe15   : > { %v4092_v17 = vsub.f32 %v4060_v5, %v4072_v11 }
 0xe16   : > { %v4069_v48 = vpop.xlane.xlu0 %4068 }
 0xe17   : > { %v4101_v16 = vmul.f32 1.442695, %v4092_v17  ;;  %v4091_v49 = vsub.f32 %v4059_v26, %v4069_v48 }
 0xe18   : > { %v4078_v19 = vpop.xlane.xlu1 %4077 }
 0xe19   : > { %6496 = vpow2.f32 %v4101_v16  ;;  %v4099_v44 = vmul.f32 1.442695, %v4091_v49  ;;  %v4094_v20 = vsub.f32 %v4062_v35, %v4078_v19 }
 0xe1a   : > { %v4075_v56 = vpop.xlane.xlu0 %4074 }
 0xe1b   : > { %6498 = vpow2.f32 %v4099_v44  ;;  %v4105_v10 = vmul.f32 1.442695, %v4094_v20  ;;  %v4093_v21 = vsub.f32 %v4061_v28, %v4075_v56 }
 0xe1c   : > { %v4084_v57 = vpop.xlane.xlu1 %4083 }
 0xe1d   : > { %6500 = vpow2.f32 %v4105_v10  ;;  %v4103_v32 = vmul.f32 1.442695, %v4093_v21  ;;  %v4096_v25 = vsub.f32 %v4064_v37, %v4084_v57 }
 0xe1e   : > { %v4081_v22 = vpop.xlane.xlu0 %4080 }
 0xe1f   : > { %6502 = vpow2.f32 %v4103_v32  ;;  %v4109_v59 = vmul.f32 1.442695, %v4096_v25  ;;  %v4095_v30 = vsub.f32 %v4063_v52, %v4081_v22  ;;  %v5405_v52 = vld [vmem:[%s7861_s8 + $0x18] sm:$0xff] }
 0xe20   : > { %v4090_v18 = vpop.xlane.xlu1 %4089  ;;  %6330 = vmatprep.subr.mxu1 %v5405_v52 }
 0xe21   : > { %6504 = vpow2.f32 %v4109_v59  ;;  %v4107_v13 = vmul.f32 1.442695, %v4095_v30  ;;  %v4098_v23 = vsub.f32 %v4066_v62, %v4090_v18 }
 0xe22   : > { %v4087_v0 = vpop.xlane.xlu0 %4086 }
 0xe23   : > { %6506 = vpow2.f32 %v4107_v13  ;;  %v4113_v39 = vmul.f32 1.442695, %v4098_v23  ;;  %v4097_v40 = vsub.f32 %v4065_v43, %v4087_v0 }
 0xe25   : > { %6508 = vpow2.f32 %v4113_v39  ;;  %v4111_v9 = vmul.f32 1.442695, %v4097_v40 }
 0xe26   : > { %v6497_v29 = vpop.eup %6496 }
 0xe27   : > { %6510 = vpow2.f32 %v4111_v9  ;;  %v4118_v51 = vsel %vm1470_vm4, %v6497_v29, 0.0 }
 0xe28   : > { %v6499_v5 = vpop.eup %6498  ;;  %4119 = vadd.xlane.f32.xlu1 %v4118_v51  ;;  %v5414_v51 = vld [vmem:[%s7862_s9] ss:$0 sm:$0xff] }
 0xe29   : > { %v4115_v1 = vsel %vm1470_vm4, %v6499_v5, 0.0 }
 0xe2a   : > { %v6501_v26 = vpop.eup %6500  ;;  %4116 = vadd.xlane.f32.xlu0 %v4115_v1 }
 0xe2b   : > { %v4124_v24 = vsel %vm1470_vm4, %v6501_v26, 0.0 }
 0xe2c   : > { %v6503_v45 = vpop.eup %6502  ;;  %4125 = vadd.xlane.f32.xlu1 %v4124_v24 }
 0xe2d   : > { %v4121_v35 = vsel %vm1470_vm4, %v6503_v45, 0.0 }
 0xe2e   : > { %v6505_v31 = vpop.eup %6504  ;;  %4122 = vadd.xlane.f32.xlu0 %v4121_v35 }
 0xe2f   : > { %v4130_v27 = vsel %vm1470_vm4, %v6505_v31, 0.0 }
 0xe30   : > { %v6507_v28 = vpop.eup %6506  ;;  %4131 = vadd.xlane.f32.xlu1 %v4130_v27 }
 0xe31   : > { %v4127_v42 = vsel %vm1470_vm4, %v6507_v28, 0.0 }
 0xe32   : > { %v6509_v2 = vpop.eup %6508  ;;  %4128 = vadd.xlane.f32.xlu0 %v4127_v42 }
 0xe33   : > { %v4136_v37 = vsel %vm1470_vm4, %v6509_v2, 0.0 }
 0xe34   : > { %v6511_v60 = vpop.eup %6510  ;;  %4137 = vadd.xlane.f32.xlu1 %v4136_v37 }
 0xe35   : > { %v4133_v47 = vsel %vm1470_vm4, %v6511_v60, 0.0 }
 0xe36   : > { %4134 = vadd.xlane.f32.xlu0 %v4133_v47 }
 0xeb1   : > { %v4120_v53 = vpop.xlane.xlu1 %4119 }
 0xeb2   : > { %6512 = vrcp.f32 %v4120_v53 }
 0xeb3   : > { %v4117_v61 = vpop.xlane.xlu0 %4116 }
 0xeb4   : > { %6514 = vrcp.f32 %v4117_v61 }
 0xeb5   : > { %v4126_v62 = vpop.xlane.xlu1 %4125 }
 0xeb6   : > { %6516 = vrcp.f32 %v4126_v62 }
 0xeb7   : > { %v4123_v7 = vpop.xlane.xlu0 %4122 }
 0xeb8   : > { %6518 = vrcp.f32 %v4123_v7 }
 0xeb9   : > { %v4132_v14 = vpop.xlane.xlu1 %4131 }
 0xeba   : > { %6520 = vrcp.f32 %v4132_v14 }
 0xebb   : > { %v4129_v43 = vpop.xlane.xlu0 %4128 }
 0xebc   : > { %6522 = vrcp.f32 %v4129_v43 }
 0xebd   : > { %v4138_v15 = vpop.xlane.xlu1 %4137 }
 0xebe   : > { %6524 = vrcp.f32 %v4138_v15 }
 0xebf   : > { %v4135_v33 = vpop.xlane.xlu0 %4134  ;;  %v6513_v11 = vpop.eup %6512 }
 0xec0   : > { %6526 = vrcp.f32 %v4135_v33  ;;  %v4148_v16 = vmul.f32 %v6513_v11, %v6497_v29 }
 0xec1   : > { %v6515_v17 = vpop.eup %6514 }
 0xec2   : > { %v4147_v48 = vmul.f32 %v6515_v17, %v6499_v5 }
 0xec3   : > { %v6517_v49 = vpop.eup %6516 }
 0xec4   : > { %6318 = vmatprep.mubr.msk.f32.mxu1 %vm1470_vm4, %v4147_v48  ;;  %v4150_v20 = vmul.f32 %v6517_v49, %v6501_v26 }
 0xec5   : > { %v6519_v19 = vpop.eup %6518  ;;  %6319 = vmatmul.mubr.msk.f32.vlgmr.msra.gmra.mxu1 %vm1470_vm4, %v4148_v16  ;;  %v7880_v16 = vld [vmem:[#allocation2_spill] sm:$0xff] }
 0xec6   : > { %v4149_v44 = vmul.f32 %v6519_v19, %v6503_v45  ;;  %6331 = vmatpush3.msra.mxu1 %v5405_v52 }
 0xec7   : > { %v6521_v56 = vpop.eup %6520 }
 0xec8   : > { %6321 = vmatprep.mubr.msk.f32.mxu1 %vm1470_vm4, %v4149_v44  ;;  %v4152_v57 = vmul.f32 %v6521_v56, %v6505_v31 }
 0xec9   : > { %v6523_v10 = vpop.eup %6522  ;;  %6322 = vmatmul.mubr.msk.f32.gmra.mxu1 %vm1470_vm4, %v4150_v20 }
 0xeca   : > { %v4151_v21 = vmul.f32 %v6523_v10, %v6507_v28 }
 0xecb   : > { %v6525_v32 = vpop.eup %6524 }
 0xecc   : > { %6324 = vmatprep.mubr.msk.f32.mxu1 %vm1470_vm4, %v4151_v21  ;;  %v4154_v59 = vmul.f32 %v6525_v32, %v6509_v2 }
 0xecd   : > { %v6527_v25 = vpop.eup %6526  ;;  %6325 = vmatmul.mubr.msk.f32.gmra.mxu1 %vm1470_vm4, %v4152_v57 }
 0xece   : > { %v4153_v22 = vmul.f32 %v6527_v25, %v6511_v60 }
 0xed0   : > { %6327 = vmatprep.mubr.msk.f32.mxu1 %vm1470_vm4, %v4153_v22 }
 0xed1   : > { %6328 = vmatmul.mubr.msk.f32.gmra.mxu1 %vm1470_vm4, %v4154_v59 }
 0xf85   : > { %v6320_v30 = vpop.f32.mrf.mxu1 }
 0xf87   : > { %v4245_v18 = vpop.f32.mrf.mxu1 }
 0xf88   : > { %6332 = vmatprep.mubr.msk.f32.mxu1 %vm770_vm2, %v4245_v18 }
 0xf89   : > { %v6323_v13 = vpop.f32.mrf.mxu1  ;;  %6333 = vmatmul.mubr.msk.f32.vlgmr.msra.gmra.mxu1 %vm770_vm2, %v6320_v30 }
 0xf8b   : > { %v4255_v23 = vpop.f32.mrf.mxu1 }
 0xf8c   : > { %6335 = vmatprep.mubr.msk.f32.mxu1 %vm770_vm2, %v4255_v23 }
 0xf8d   : > { %v6326_v0 = vpop.f32.mrf.mxu1  ;;  %6336 = vmatmul.mubr.msk.f32.gmra.mxu1 %vm770_vm2, %v6323_v13 }
 0xf8f   : > { %v4265_v39 = vpop.f32.mrf.mxu1 }
 0xf90   : > { %6338 = vmatprep.mubr.msk.f32.mxu1 %vm770_vm2, %v4265_v39 }
 0xf91   : > { %v6329_v40 = vpop.f32.mrf.mxu1  ;;  %6339 = vmatmul.mubr.msk.f32.gmra.mxu1 %vm770_vm2, %v6326_v0 }
 0xf93   : > { %v4275_v9 = vpop.f32.mrf.mxu1 }
 0xf94   : > { %6341 = vmatprep.mubr.msk.f32.mxu1 %vm770_vm2, %v4275_v9 }
 0xf95   : > { %6342 = vmatmul.mubr.msk.f32.gmra.mxu1 %vm770_vm2, %v6329_v40 }
0x1049   : > { %v6334_v29 = vpop.f32.mrf.mxu1 }
0x104a   : > { %v4416_v5 = vadd.f32 %v6334_v29, %v7499_v6 }
0x104b   : > { %v4376_v1 = vpop.f32.mrf.mxu1 }
0x104c   : > { %v4431_v26 = vadd.f32 %v5414_v51, %v4416_v5  ;;  %v4415_v24 = vadd.f32 %v4376_v1, %v7503_v12 }
0x104d   : > { %v6337_v45 = vpop.f32.mrf.mxu1 }
0x104e   : > { %v4430_v35 = vadd.f32 %v5414_v51, %v4415_v24  ;;  %v4418_v31 = vadd.f32 %v6337_v45, %v7507_v36  ;;  %v4439_v27 = vadd.f32 %v4431_v26, %v6738_v46 }
0x104f   : > { %v4386_v28 = vpop.f32.mrf.mxu1 }
0x1050   : > { %v4433_v42 = vadd.f32 %v5414_v51, %v4418_v31  ;;  %v4417_v2 = vadd.f32 %v4386_v28, %v7511_v38  ;;  %v4451_v37 = vsel %vm919_vm3, %v4439_v27, 0.0  ;;  %v4438_v60 = vadd.f32 %v4430_v35, %v6742_v50 }
0x1051   : > { %4452 = vadd.xlane.f32.xlu1 %v4451_v37  ;;  %v6340_v6 = vpop.f32.mrf.mxu1 }
0x1052   : > { %v4432_v47 = vadd.f32 %v5414_v51, %v4417_v2  ;;  %v4420_v52 = vadd.f32 %v6340_v6, %v7515_v34  ;;  %v4448_v12 = vsel %vm919_vm3, %v4438_v60, 0.0  ;;  %v4441_v53 = vadd.f32 %v4433_v42, %v6750_v54 }
0x1053   : > { %4449 = vadd.xlane.f32.xlu0 %v4448_v12  ;;  %v4396_v36 = vpop.f32.mrf.mxu1  ;;  %v4584_v12 = vld [vmem:[%s7865_s12 + $0x18] sm:$0xff] }
0x1054   : > { %v4435_v46 = vadd.f32 %v5414_v51, %v4420_v52  ;;  %v4419_v61 = vadd.f32 %v4396_v36, %v7519_v4  ;;  %v4457_v38 = vsel %vm919_vm3, %v4441_v53, 0.0  ;;  %v4440_v62 = vadd.f32 %v4432_v47, %v6754_v58  ;;  %6344 = vmatprep.subr.mxu0 %v4584_v12  ;;  %v4582_v36 = vld [vmem:[%s7865_s12 + $0x8] sm:$0xff] }
0x1055   : > { %4458 = vadd.xlane.f32.xlu1 %v4457_v38  ;;  %v6343_v50 = vpop.f32.mrf.mxu1  ;;  %6345 = vmatpush3.msra.mxu0 %v4584_v12  ;;  %v4735_v38 = vld [vmem:[%s7867_s14 + $0x30] sm:$0xff] }
0x1056   : > { %v4434_v7 = vadd.f32 %v5414_v51, %v4419_v61  ;;  %v4422_v14 = vadd.f32 %v6343_v50, %v7523_v41  ;;  %v4454_v34 = vsel %vm919_vm3, %v4440_v62, 0.0  ;;  %v4443_v43 = vadd.f32 %v4435_v46, %v6773_v63  ;;  %v4581_v46 = vld [vmem:[%s7865_s12] sm:$0xff]  ;;  %v4736_v61 = vld [vmem:[%s7867_s14 + $0x38] sm:$0xff] }
0x1057   : > { %4455 = vadd.xlane.f32.xlu0 %v4454_v34  ;;  %v4406_v54 = vpop.f32.mrf.mxu1  ;;  %6364 = vmatprep.subr.mxu1 %v4736_v61  ;;  %v4733_v50 = vld [vmem:[%s7867_s14 + $0x20] sm:$0xff] }
0x1058   : > { %v4437_v15 = vadd.f32 %v5414_v51, %v4422_v14  ;;  %v4421_v33 = vadd.f32 %v4406_v54, %v7525_v55  ;;  %v4463_v4 = vsel %vm919_vm3, %v4443_v43, 0.0  ;;  %v4442_v11 = vadd.f32 %v4434_v7, %v6777_v3  ;;  %6365 = vmatpush3.msra.mxu1 %v4736_v61  ;;  %v4732_v7 = vld [vmem:[%s7867_s14 + $0x18] sm:$0xff]  ;;  %v4730_v61 = vld [vmem:[%s7867_s14 + $0x8] sm:$0xff] }
0x1059   : > { %4464 = vadd.xlane.f32.xlu1 %v4463_v4  ;;  %6366 = vmatprep.subr.mxu1 %v4735_v38 }
0x105a   : > { %v4436_v58 = vadd.f32 %v5414_v51, %v4421_v33  ;;  %v4460_v17 = vsel %vm919_vm3, %v4442_v11, 0.0  ;;  %v4445_v48 = vadd.f32 %v4437_v15, %v6796_v8  ;;  %6367 = vmatpush3.msra.mxu1 %v4735_v38  ;;  %v4729_v38 = vld [vmem:[%s7867_s14] sm:$0xff] }
0x105b   : > { %4461 = vadd.xlane.f32.xlu0 %v4460_v17 }
0x105c   : > { %v4469_v41 = vsel %vm919_vm3, %v4445_v48, 0.0  ;;  %v4444_v63 = vadd.f32 %v4436_v58, %v7880_v16 }
0x105d   : > { %4470 = vadd.xlane.f32.xlu1 %v4469_v41 }
0x105e   : > { %v4466_v49 = vsel %vm919_vm3, %v4444_v63, 0.0 }
0x105f   : > { %4467 = vadd.xlane.f32.xlu0 %v4466_v49 }
0x10da   : > { %v4453_v55 = vpop.xlane.xlu1 %4452 }
0x10db   : > { %v4474_v19 = vmul.f32 0.03125, %v4453_v55 }
0x10dc   : > { %v4450_v44 = vpop.xlane.xlu0 %4449 }
0x10dd   : > { %v7622_v20 = vsub.f32 %v4439_v27, %v4474_v19  ;;  %v4473_v3 = vmul.f32 0.03125, %v4450_v44 }
0x10de   : > { %v4459_v56 = vpop.xlane.xlu1 %4458 }
0x10df   : > { %v7624_v10 = vsub.f32 %v4438_v60, %v4473_v3  ;;  %v4476_v21 = vmul.f32 0.03125, %v4459_v56  ;;  %v4490_v8 = vmul.f32 %v7622_v20, %v7622_v20 }
0x10e0   : > { %v4456_v57 = vpop.xlane.xlu0 %4455 }
0x10e1   : > { %v7628_v32 = vsub.f32 %v4441_v53, %v4476_v21  ;;  %v4475_v25 = vmul.f32 0.03125, %v4456_v57  ;;  %v4500_v22 = vsel %vm919_vm3, %v4490_v8, 0.0  ;;  %v4489_v59 = vmul.f32 %v7624_v10, %v7624_v10  ;;  %v4583_v53 = vld [vmem:[%s7865_s12 + $0x10] sm:$0xff] }
0x10e2   : > { %v4465_v30 = vpop.xlane.xlu1 %4464  ;;  %4501 = vadd.xlane.f32.xlu1 %v4500_v22  ;;  %6346 = vmatprep.subr.mxu0 %v4583_v53 }
0x10e3   : > { %v7633_v18 = vsub.f32 %v4440_v62, %v4475_v25  ;;  %v4478_v13 = vmul.f32 0.03125, %v4465_v30  ;;  %v4497_v23 = vsel %vm919_vm3, %v4489_v59, 0.0  ;;  %v4492_v0 = vmul.f32 %v7628_v32, %v7628_v32  ;;  %6347 = vmatpush3.msra.mxu0 %v4583_v53  ;;  %v4734_v62 = vld [vmem:[%s7867_s14 + $0x28] sm:$0xff]  ;;  %v5415_v59 = vld [vmem:[%s7863_s10] ss:$0 sm:$0xff] }
0x10e4   : > { %v4462_v39 = vpop.xlane.xlu0 %4461  ;;  %4498 = vadd.xlane.f32.xlu0 %v4497_v23  ;;  %6348 = vmatprep.subr.mxu0 %v4582_v36 }
0x10e5   : > { %v7638_v40 = vsub.f32 %v4443_v43, %v4478_v13  ;;  %v4477_v9 = vmul.f32 0.03125, %v4462_v39  ;;  %v4506_v29 = vsel %vm919_vm3, %v4492_v0, 0.0  ;;  %v4491_v51 = vmul.f32 %v7633_v18, %v7633_v18  ;;  %6349 = vmatpush3.msra.mxu0 %v4582_v36  ;;  %6368 = vmatprep.subr.mxu1 %v4734_v62 }
0x10e6   : > { %4507 = vadd.xlane.f32.xlu1 %v4506_v29  ;;  %v4471_v5 = vpop.xlane.xlu1 %4470  ;;  %6350 = vmatprep.subr.mxu0 %v4581_v46 }
0x10e7   : > { %v7643_v1 = vsub.f32 %v4442_v11, %v4477_v9  ;;  %v4480_v26 = vmul.f32 0.03125, %v4471_v5  ;;  %v4503_v24 = vsel %vm919_vm3, %v4491_v51, 0.0  ;;  %v4494_v45 = vmul.f32 %v7638_v40, %v7638_v40  ;;  %6351 = vmatpush3.msra.mxu0 %v4581_v46  ;;  %6369 = vmatpush3.msra.mxu1 %v4734_v62  ;;  %v5416_v9 = vld [vmem:[%s7864_s11] ss:$0 sm:$0xff] }
0x10e8   : > { %4504 = vadd.xlane.f32.xlu0 %v4503_v24  ;;  %v4468_v35 = vpop.xlane.xlu0 %4467  ;;  %6370 = vmatprep.subr.mxu1 %v4733_v50  ;;  %v5417_v62 = vld [vmem:[%s7866_s13] ss:$0 sm:$0xff] }
0x10e9   : > { %v7648_v31 = vsub.f32 %v4445_v48, %v4480_v26  ;;  %v4479_v27 = vmul.f32 0.03125, %v4468_v35  ;;  %v4512_v28 = vsel %vm919_vm3, %v4494_v45, 0.0  ;;  %v4493_v42 = vmul.f32 %v7643_v1, %v7643_v1  ;;  %6371 = vmatpush3.msra.mxu1 %v4733_v50 }
0x10ea   : > { %4513 = vadd.xlane.f32.xlu1 %v4512_v28  ;;  %6372 = vmatprep.subr.mxu1 %v4732_v7 }
0x10eb   : > { %v7653_v2 = vsub.f32 %v4444_v63, %v4479_v27  ;;  %v4509_v37 = vsel %vm919_vm3, %v4493_v42, 0.0  ;;  %v4496_v60 = vmul.f32 %v7648_v31, %v7648_v31  ;;  %6373 = vmatpush3.msra.mxu1 %v4732_v7 }
0x10ec   : > { %4510 = vadd.xlane.f32.xlu0 %v4509_v37 }
0x10ed   : > { %v4518_v6 = vsel %vm919_vm3, %v4496_v60, 0.0  ;;  %v4495_v47 = vmul.f32 %v7653_v2, %v7653_v2 }
0x10ee   : > { %4519 = vadd.xlane.f32.xlu1 %v4518_v6 }
0x10ef   : > { %v4515_v52 = vsel %vm919_vm3, %v4495_v47, 0.0 }
0x10f0   : > { %4516 = vadd.xlane.f32.xlu0 %v4515_v52 }
0x116b   : > { %v4502_v14 = vpop.xlane.xlu1 %4501 }
0x116c   : > { %v4522_v34 = vmul.f32 0.03125, %v4502_v14 }
0x116d   : > { %v4499_v43 = vpop.xlane.xlu0 %4498 }
0x116e   : > { %v4530_v54 = vadd.f32 1e-05, %v4522_v34  ;;  %v4521_v15 = vmul.f32 0.03125, %v4499_v43 }
0x116f   : > { %v4508_v33 = vpop.xlane.xlu1 %4507 }
0x1170   : > { %6528 = vrsqrt.f32 %v4530_v54  ;;  %v4529_v4 = vadd.f32 1e-05, %v4521_v15  ;;  %v4524_v11 = vmul.f32 0.03125, %v4508_v33 }
0x1171   : > { %v4505_v58 = vpop.xlane.xlu0 %4504 }
0x1172   : > { %6530 = vrsqrt.f32 %v4529_v4  ;;  %v4532_v17 = vadd.f32 1e-05, %v4524_v11  ;;  %v4523_v48 = vmul.f32 0.03125, %v4505_v58 }
0x1173   : > { %v4514_v41 = vpop.xlane.xlu1 %4513 }
0x1174   : > { %6532 = vrsqrt.f32 %v4532_v17  ;;  %v4531_v16 = vadd.f32 1e-05, %v4523_v48  ;;  %v4526_v63 = vmul.f32 0.03125, %v4514_v41 }
0x1175   : > { %v4511_v49 = vpop.xlane.xlu0 %4510 }
0x1176   : > { %6534 = vrsqrt.f32 %v4531_v16  ;;  %v4534_v55 = vadd.f32 1e-05, %v4526_v63  ;;  %v4525_v19 = vmul.f32 0.03125, %v4511_v49 }
0x1177   : > { %v4520_v44 = vpop.xlane.xlu1 %4519 }
0x1178   : > { %6536 = vrsqrt.f32 %v4534_v55  ;;  %v4533_v3 = vadd.f32 1e-05, %v4525_v19  ;;  %v4528_v56 = vmul.f32 0.03125, %v4520_v44 }
0x1179   : > { %v4517_v21 = vpop.xlane.xlu0 %4516 }
0x117a   : > { %6538 = vrsqrt.f32 %v4533_v3  ;;  %v4536_v8 = vadd.f32 1e-05, %v4528_v56  ;;  %v4527_v57 = vmul.f32 0.03125, %v4517_v21 }
0x117c   : > { %6540 = vrsqrt.f32 %v4536_v8  ;;  %v4535_v25 = vadd.f32 1e-05, %v4527_v57  ;;  %v5426_v57 = vld [vmem:[%s7868_s15] ss:$0 sm:$0xff] }
0x117d   : > { %v6529_v22 = vpop.eup %6528 }
0x117e   : > { %v4546_v30 = vmul.f32 %v6529_v22, %v7622_v20  ;;  %6542 = vrsqrt.f32 %v4535_v25 }
0x117f   : > { %v6531_v13 = vpop.eup %6530 }
0x1180   : > { %v4545_v23 = vmul.f32 %v6531_v13, %v7624_v10  ;;  %v4560_v39 = vmul.f32 %v5415_v59, %v4546_v30 }
0x1181   : > { %v6533_v0 = vpop.eup %6532 }
0x1182   : > { %v4548_v29 = vmul.f32 %v6533_v0, %v7628_v32  ;;  %v4559_v51 = vmul.f32 %v5415_v59, %v4545_v23  ;;  %v7701_v20 = vadd.f32 %v5416_v9, %v4560_v39 }
0x1183   : > { %v6535_v5 = vpop.eup %6534 }
0x1184   : > { %v7698_v26 = vadd.f32 %v5416_v9, %v4559_v51  ;;  %v4547_v24 = vmul.f32 %v6535_v5, %v7633_v18  ;;  %v4562_v35 = vmul.f32 %v5415_v59, %v4548_v29 }
0x1185   : > { %v6537_v45 = vpop.eup %6536 }
0x1186   : > { %v4550_v10 = vmul.f32 %v6537_v45, %v7638_v40  ;;  %6352 = vmatprep.mubr.msk.f32.mxu0 %vm919_vm3, %v7698_v26  ;;  %v4561_v27 = vmul.f32 %v5415_v59, %v4547_v24  ;;  %v7711_v18 = vadd.f32 %v5416_v9, %v4562_v35 }
0x1187   : > { %v6539_v28 = vpop.eup %6538  ;;  %6353 = vmatmul.mubr.msk.f32.vlgmr.msra.gmra.mxu0 %vm919_vm3, %v7701_v20 }
0x1188   : > { %v7708_v32 = vadd.f32 %v5416_v9, %v4561_v27  ;;  %v4549_v42 = vmul.f32 %v6539_v28, %v7643_v1  ;;  %v4564_v60 = vmul.f32 %v5415_v59, %v4550_v10 }
0x1189   : > { %v6541_v37 = vpop.eup %6540 }
0x118a   : > { %v4552_v6 = vmul.f32 %v6541_v37, %v7648_v31  ;;  %6355 = vmatprep.mubr.msk.f32.mxu0 %vm919_vm3, %v7708_v32  ;;  %v4563_v40 = vmul.f32 %v5415_v59, %v4549_v42  ;;  %v7721_v53 = vadd.f32 %v5416_v9, %v4564_v60 }
0x118b   : > { %v6543_v47 = vpop.eup %6542  ;;  %6356 = vmatmul.mubr.msk.f32.gmra.mxu0 %vm919_vm3, %v7711_v18 }
0x118c   : > { %v7718_v52 = vadd.f32 %v5416_v9, %v4563_v40  ;;  %v4551_v12 = vmul.f32 %v6543_v47, %v7653_v2  ;;  %v4566_v1 = vmul.f32 %v5415_v59, %v4552_v6  ;;  %v4731_v2 = vld [vmem:[%s7867_s14 + $0x10] sm:$0xff] }
0x118d   : > { %6374 = vmatprep.subr.mxu1 %v4731_v2 }
0x118e   : > { %6358 = vmatprep.mubr.msk.f32.mxu0 %vm919_vm3, %v7718_v52  ;;  %v4565_v36 = vmul.f32 %v5415_v59, %v4551_v12  ;;  %v7729_v46 = vadd.f32 %v5416_v9, %v4566_v1  ;;  %6375 = vmatpush3.msra.mxu1 %v4731_v2 }
0x118f   : > { %6359 = vmatmul.mubr.msk.f32.gmra.mxu0 %vm919_vm3, %v7721_v53  ;;  %6376 = vmatprep.subr.mxu1 %v4730_v61 }
0x1190   : > { %v7727_v31 = vadd.f32 %v5416_v9, %v4565_v36  ;;  %6377 = vmatpush3.msra.mxu1 %v4730_v61 }
0x1191   : > { %6378 = vmatprep.subr.mxu1 %v4729_v38 }
0x1192   : > { %6361 = vmatprep.mubr.msk.f32.mxu0 %vm919_vm3, %v7727_v31  ;;  %6379 = vmatpush3.msra.mxu1 %v4729_v38 }
0x1193   : > { %6362 = vmatmul.mubr.msk.f32.gmra.mxu0 %vm919_vm3, %v7729_v46 }
0x1247   : > { %v6354_v50 = vpop.f32.mrf.mxu0 }
0x1248   : > { %v4688_v7 = vadd.f32 %v6354_v50, %v5417_v62 }
0x1249   : > { %v4682_v14 = vpop.f32.mrf.mxu0 }
0x124a   : > { %v4683_v34 = vadd.f32 %v5417_v62, %v4682_v14  ;;  %v4722_v15 = vmax.f32 %v4688_v7, 0.0 }
0x124b   : > { %v6357_v43 = vpop.f32.mrf.mxu0 }
0x124c   : > { %v4721_v54 = vmax.f32 %v4683_v34, 0.0  ;;  %v4698_v33 = vadd.f32 %v6357_v43, %v5417_v62 }
0x124d   : > { %v4692_v4 = vpop.f32.mrf.mxu0 }
0x124e   : > { %v4693_v11 = vadd.f32 %v5417_v62, %v4692_v4  ;;  %6380 = vmatprep.mubr.msk.f32.mxu1 %vm1470_vm4, %v4721_v54  ;;  %v4724_v48 = vmax.f32 %v4698_v33, 0.0 }
0x124f   : > { %v6360_v58 = vpop.f32.mrf.mxu0  ;;  %6381 = vmatmul.mubr.msk.f32.vlgmr.msra.gmra.mxu1 %vm1470_vm4, %v4722_v15 }
0x1250   : > { %v4723_v17 = vmax.f32 %v4693_v11, 0.0  ;;  %v4708_v41 = vadd.f32 %v6360_v58, %v5417_v62 }
0x1251   : > { %v4702_v16 = vpop.f32.mrf.mxu0 }
0x1252   : > { %v4703_v63 = vadd.f32 %v5417_v62, %v4702_v16  ;;  %6383 = vmatprep.mubr.msk.f32.mxu1 %vm1470_vm4, %v4723_v17  ;;  %v4726_v19 = vmax.f32 %v4708_v41, 0.0 }
0x1253   : > { %v6363_v49 = vpop.f32.mrf.mxu0  ;;  %6384 = vmatmul.mubr.msk.f32.gmra.mxu1 %vm1470_vm4, %v4724_v48 }
0x1254   : > { %v4725_v55 = vmax.f32 %v4703_v63, 0.0  ;;  %v4718_v44 = vadd.f32 %v6363_v49, %v5417_v62 }
0x1255   : > { %v4712_v3 = vpop.f32.mrf.mxu0 }
0x1256   : > { %v4713_v56 = vadd.f32 %v5417_v62, %v4712_v3  ;;  %6386 = vmatprep.mubr.msk.f32.mxu1 %vm1470_vm4, %v4725_v55  ;;  %v4728_v8 = vmax.f32 %v4718_v44, 0.0 }
0x1257   : > { %6387 = vmatmul.mubr.msk.f32.gmra.mxu1 %vm1470_vm4, %v4726_v19 }
0x1258   : > { %v4727_v21 = vmax.f32 %v4713_v56, 0.0 }
0x125a   : > { %6389 = vmatprep.mubr.msk.f32.mxu1 %vm1470_vm4, %v4727_v21 }
0x125b   : > { %6390 = vmatmul.mubr.msk.f32.gmra.mxu1 %vm1470_vm4, %v4728_v8 }
0x130f   : > { %v6382_v25 = vpop.f32.mrf.mxu1 }
0x1310   : > { %v4840_v22 = vadd.f32 %v6382_v25, %v5426_v57 }
0x1311   : > { %v4834_v59 = vpop.f32.mrf.mxu1 }
0x1312   : > { %v4835_v30 = vadd.f32 %v5426_v57, %v4834_v59  ;;  %v4874_v13 = vadd.f32 %v4840_v22, %v7701_v20 }
0x1313   : > { %v6385_v23 = vpop.f32.mrf.mxu1 }
0x1314   : > { %v4850_v0 = vadd.f32 %v6385_v23, %v5426_v57  ;;  %v4886_v39 = vsel %vm919_vm3, %v4874_v13, 0.0  ;;  %v4873_v9 = vadd.f32 %v4835_v30, %v7698_v26 }
0x1315   : > { %4887 = vadd.xlane.f32.xlu1 %v4886_v39  ;;  %v4844_v29 = vpop.f32.mrf.mxu1 }
0x1316   : > { %v4845_v51 = vadd.f32 %v5426_v57, %v4844_v29  ;;  %v4883_v5 = vsel %vm919_vm3, %v4873_v9, 0.0  ;;  %v4876_v24 = vadd.f32 %v4850_v0, %v7711_v18 }
0x1317   : > { %4884 = vadd.xlane.f32.xlu0 %v4883_v5  ;;  %v6388_v45 = vpop.f32.mrf.mxu1 }
0x1318   : > { %v4860_v35 = vadd.f32 %v6388_v45, %v5426_v57  ;;  %v4892_v10 = vsel %vm919_vm3, %v4876_v24, 0.0  ;;  %v4875_v20 = vadd.f32 %v4845_v51, %v7708_v32 }
0x1319   : > { %4893 = vadd.xlane.f32.xlu1 %v4892_v10  ;;  %v4854_v27 = vpop.f32.mrf.mxu1 }
0x131a   : > { %v4855_v28 = vadd.f32 %v5426_v57, %v4854_v27  ;;  %v4889_v42 = vsel %vm919_vm3, %v4875_v20, 0.0  ;;  %v4878_v26 = vadd.f32 %v4860_v35, %v7721_v53 }
0x131b   : > { %4890 = vadd.xlane.f32.xlu0 %v4889_v42  ;;  %v6391_v37 = vpop.f32.mrf.mxu1 }
0x131c   : > { %v4870_v60 = vadd.f32 %v6391_v37, %v5426_v57  ;;  %v4898_v6 = vsel %vm919_vm3, %v4878_v26, 0.0  ;;  %v4877_v18 = vadd.f32 %v4855_v28, %v7718_v52 }
0x131d   : > { %4899 = vadd.xlane.f32.xlu1 %v4898_v6  ;;  %v4864_v40 = vpop.f32.mrf.mxu1 }
0x131e   : > { %v4865_v47 = vadd.f32 %v5426_v57, %v4864_v40  ;;  %v4895_v12 = vsel %vm919_vm3, %v4877_v18, 0.0  ;;  %v4880_v32 = vadd.f32 %v4870_v60, %v7729_v46 }
0x131f   : > { %4896 = vadd.xlane.f32.xlu0 %v4895_v12 }
0x1320   : > { %v4904_v1 = vsel %vm919_vm3, %v4880_v32, 0.0  ;;  %v4879_v36 = vadd.f32 %v4865_v47, %v7727_v31 }
0x1321   : > { %4905 = vadd.xlane.f32.xlu1 %v4904_v1 }
0x1322   : > { %v4901_v53 = vsel %vm919_vm3, %v4879_v36, 0.0 }
0x1323   : > { %4902 = vadd.xlane.f32.xlu0 %v4901_v53 }
0x139e   : > { %v4888_v2 = vpop.xlane.xlu1 %4887 }
0x139f   : > { %v4908_v61 = vmul.f32 0.03125, %v4888_v2 }
0x13a0   : > { %v4885_v38 = vpop.xlane.xlu0 %4884 }
0x13a1   : > { %v7774_v52 = vsub.f32 %v4874_v13, %v4908_v61  ;;  %v4907_v62 = vmul.f32 0.03125, %v4885_v38  ;;  %v5435_v61 = vld [vmem:[%s7869_s16] ss:$0 sm:$0xff] }
0x13a2   : > { %v4894_v50 = vpop.xlane.xlu1 %4893 }
0x13a3   : > { %v7776_v7 = vsub.f32 %v4873_v9, %v4907_v62  ;;  %v4910_v14 = vmul.f32 0.03125, %v4894_v50  ;;  %v4924_v46 = vmul.f32 %v7774_v52, %v7774_v52  ;;  %v5436_v50 = vld [vmem:[%s7870_s17] ss:$0 sm:$0xff] }
0x13a4   : > { %v4891_v34 = vpop.xlane.xlu0 %4890 }
0x13a5   : > { %v7780_v43 = vsub.f32 %v4876_v24, %v4910_v14  ;;  %v4909_v31 = vmul.f32 0.03125, %v4891_v34  ;;  %v4934_v54 = vsel %vm919_vm3, %v4924_v46, 0.0  ;;  %v4923_v15 = vmul.f32 %v7776_v7, %v7776_v7 }
0x13a6   : > { %v4900_v33 = vpop.xlane.xlu1 %4899  ;;  %4935 = vadd.xlane.f32.xlu1 %v4934_v54 }
0x13a7   : > { %v7785_v4 = vsub.f32 %v4875_v20, %v4909_v31  ;;  %v4912_v11 = vmul.f32 0.03125, %v4900_v33  ;;  %v4931_v58 = vsel %vm919_vm3, %v4923_v15, 0.0  ;;  %v4926_v17 = vmul.f32 %v7780_v43, %v7780_v43 }
0x13a8   : > { %4932 = vadd.xlane.f32.xlu0 %v4931_v58  ;;  %v4897_v48 = vpop.xlane.xlu0 %4896 }
0x13a9   : > { %v7790_v41 = vsub.f32 %v4878_v26, %v4912_v11  ;;  %v4911_v16 = vmul.f32 0.03125, %v4897_v48  ;;  %v4940_v63 = vsel %vm919_vm3, %v4926_v17, 0.0  ;;  %v4925_v49 = vmul.f32 %v7785_v4, %v7785_v4 }
0x13aa   : > { %4941 = vadd.xlane.f32.xlu1 %v4940_v63  ;;  %v4906_v55 = vpop.xlane.xlu1 %4905 }
0x13ab   : > { %v7795_v19 = vsub.f32 %v4877_v18, %v4911_v16  ;;  %v4914_v44 = vmul.f32 0.03125, %v4906_v55  ;;  %v4937_v3 = vsel %vm919_vm3, %v4925_v49, 0.0  ;;  %v4928_v56 = vmul.f32 %v7790_v41, %v7790_v41 }
0x13ac   : > { %4938 = vadd.xlane.f32.xlu0 %v4937_v3  ;;  %v4903_v21 = vpop.xlane.xlu0 %4902 }
0x13ad   : > { %v7800_v8 = vsub.f32 %v4880_v32, %v4914_v44  ;;  %v4913_v57 = vmul.f32 0.03125, %v4903_v21  ;;  %v4946_v25 = vsel %vm919_vm3, %v4928_v56, 0.0  ;;  %v4927_v22 = vmul.f32 %v7795_v19, %v7795_v19 }
0x13ae   : > { %4947 = vadd.xlane.f32.xlu1 %v4946_v25 }
0x13af   : > { %v7805_v59 = vsub.f32 %v4879_v36, %v4913_v57  ;;  %v4943_v30 = vsel %vm919_vm3, %v4927_v22, 0.0  ;;  %v4930_v13 = vmul.f32 %v7800_v8, %v7800_v8 }
0x13b0   : > { %4944 = vadd.xlane.f32.xlu0 %v4943_v30 }
0x13b1   : > { %v4952_v23 = vsel %vm919_vm3, %v4930_v13, 0.0  ;;  %v4929_v0 = vmul.f32 %v7805_v59, %v7805_v59 }
0x13b2   : > { %4953 = vadd.xlane.f32.xlu1 %v4952_v23 }
0x13b3   : > { %v4949_v39 = vsel %vm919_vm3, %v4929_v0, 0.0 }
0x13b4   : > { %4950 = vadd.xlane.f32.xlu0 %v4949_v39 }
0x142f   : > { %v4936_v9 = vpop.xlane.xlu1 %4935 }
0x1430   : > { %v4956_v29 = vmul.f32 0.03125, %v4936_v9 }
0x1431   : > { %v4933_v51 = vpop.xlane.xlu0 %4932 }
0x1432   : > { %v4964_v5 = vadd.f32 1e-05, %v4956_v29  ;;  %v4955_v24 = vmul.f32 0.03125, %v4933_v51 }
0x1433   : > { %v4942_v45 = vpop.xlane.xlu1 %4941 }
0x1434   : > { %6544 = vrsqrt.f32 %v4964_v5  ;;  %v4963_v35 = vadd.f32 1e-05, %v4955_v24  ;;  %v4958_v10 = vmul.f32 0.03125, %v4942_v45 }
0x1435   : > { %v4939_v20 = vpop.xlane.xlu0 %4938 }
0x1436   : > { %6546 = vrsqrt.f32 %v4963_v35  ;;  %v4966_v27 = vadd.f32 1e-05, %v4958_v10  ;;  %v4957_v28 = vmul.f32 0.03125, %v4939_v20 }
0x1437   : > { %v4948_v42 = vpop.xlane.xlu1 %4947 }
0x1438   : > { %6548 = vrsqrt.f32 %v4966_v27  ;;  %v4965_v26 = vadd.f32 1e-05, %v4957_v28  ;;  %v4960_v37 = vmul.f32 0.03125, %v4948_v42 }
0x1439   : > { %v4945_v60 = vpop.xlane.xlu0 %4944 }
0x143a   : > { %6550 = vrsqrt.f32 %v4965_v26  ;;  %v4968_v6 = vadd.f32 1e-05, %v4960_v37  ;;  %v4959_v18 = vmul.f32 0.03125, %v4945_v60 }
0x143b   : > { %v4954_v40 = vpop.xlane.xlu1 %4953 }
0x143c   : > { %6552 = vrsqrt.f32 %v4968_v6  ;;  %v4967_v47 = vadd.f32 1e-05, %v4959_v18  ;;  %v4962_v12 = vmul.f32 0.03125, %v4954_v40 }
0x143d   : > { %v4951_v32 = vpop.xlane.xlu0 %4950 }
0x143e   : > { %6554 = vrsqrt.f32 %v4967_v47  ;;  %v4970_v1 = vadd.f32 1e-05, %v4962_v12  ;;  %v4961_v36 = vmul.f32 0.03125, %v4951_v32 }
0x1440   : > { %6556 = vrsqrt.f32 %v4970_v1  ;;  %v4969_v53 = vadd.f32 1e-05, %v4961_v36 }
0x1441   : > { %v6545_v2 = vpop.eup %6544 }
0x1442   : > { %v4980_v38 = vmul.f32 %v6545_v2, %v7774_v52  ;;  %6558 = vrsqrt.f32 %v4969_v53 }
0x1443   : > { %v6547_v62 = vpop.eup %6546 }
0x1444   : > { %v4994_v14 = vmul.f32 %v5435_v61, %v4980_v38  ;;  %v4979_v46 = vmul.f32 %v6547_v62, %v7776_v7 }
0x1445   : > { %v6549_v34 = vpop.eup %6548 }
0x1446   : > { %v5008_v31 = vadd.f32 %v5436_v50, %v4994_v14  ;;  %v4993_v52 = vmul.f32 %v5435_v61, %v4979_v46  ;;  %v4982_v54 = vmul.f32 %v6549_v34, %v7780_v43 }
0x1447   : > { %v6551_v15 = vpop.eup %6550 }
0x1448   : > { %5016 = vst.msk [vmem:[%s7826_s1 + $0x8] sm:$0xff] %vm919_vm3, %v5008_v31  ;;  %v5007_v33 = vadd.f32 %v5436_v50, %v4993_v52  ;;  %v4996_v11 = vmul.f32 %v5435_v61, %v4982_v54  ;;  %v4981_v7 = vmul.f32 %v6551_v15, %v7785_v4 }
0x1449   : > { %v6553_v58 = vpop.eup %6552 }
0x144a   : > { %5015 = vst.msk [vmem:[%s7826_s1] sm:$0xff] %vm919_vm3, %v5007_v33  ;;  %v5010_v17 = vadd.f32 %v5436_v50, %v4996_v11  ;;  %v4995_v48 = vmul.f32 %v5435_v61, %v4981_v7  ;;  %v4984_v16 = vmul.f32 %v6553_v58, %v7790_v41 }
0x144b   : > { %v6555_v63 = vpop.eup %6554 }
0x144c   : > { %5018 = vst.msk [vmem:[%s7826_s1 + $0x18] sm:$0xff] %vm919_vm3, %v5010_v17  ;;  %v5009_v43 = vadd.f32 %v5436_v50, %v4995_v48  ;;  %v4998_v49 = vmul.f32 %v5435_v61, %v4984_v16  ;;  %v4983_v55 = vmul.f32 %v6555_v63, %v7795_v19 }
0x144d   : > { %v6557_v44 = vpop.eup %6556 }
0x144e   : > { %5017 = vst.msk [vmem:[%s7826_s1 + $0x10] sm:$0xff] %vm919_vm3, %v5009_v43  ;;  %v5012_v4 = vadd.f32 %v5436_v50, %v4998_v49  ;;  %v4997_v3 = vmul.f32 %v5435_v61, %v4983_v55  ;;  %v4986_v56 = vmul.f32 %v6557_v44, %v7800_v8 }
0x144f   : > { %v6559_v21 = vpop.eup %6558 }
0x1450   : > { %5020 = vst.msk [vmem:[%s7826_s1 + $0x28] sm:$0xff] %vm919_vm3, %v5012_v4  ;;  %v5011_v41 = vadd.f32 %v5436_v50, %v4997_v3  ;;  %v5000_v57 = vmul.f32 %v5435_v61, %v4986_v56  ;;  %v4985_v25 = vmul.f32 %v6559_v21, %v7805_v59 }
0x1452   : > { %5019 = vst.msk [vmem:[%s7826_s1 + $0x20] sm:$0xff] %vm919_vm3, %v5011_v41  ;;  %v5014_v22 = vadd.f32 %v5436_v50, %v5000_v57  ;;  %v4999_v30 = vmul.f32 %v5435_v61, %v4985_v25 }
0x1454   : > { %5022 = vst.msk [vmem:[%s7826_s1 + $0x38] sm:$0xff] %vm919_vm3, %v5014_v22  ;;  %v5013_v19 = vadd.f32 %v5436_v50, %v4999_v30 }
0x1456   : > { %5021 = vst.msk [vmem:[%s7826_s1 + $0x30] sm:$0xff] %vm919_vm3, %v5013_v19 }
0x1457 PF: > { %s28_s27 = sadd.s32 1, %s6566_s27  }
0x1458   : > { %p25_p4 = scmp.ge.s32.totalorder %s28_s27, 4  }
0x145a   :  { %27 = sbr.rel (!%p25_p4) target bundleno = 4 (0x4), region = 150 }

// kernel: dn_detr_forward.5
= control target key start
LH: loop header
LB: loop body
LE: loop exit
PB: predicated region body
PF: predicated region fallthrough
CT: control target
= control target key end

     0   :  { %s8480_s6 = smov 1   ;;  %s8481_s10 = smov 2   ;;  %s9430_s0 = inlined_call_operand.smem [shape: u32[35], index: -1, kind: input, shape index: {}] }
   0x1   :  { %s8522_s5 = sld [smem:[%s9430_s0]]   ;;  %s8482_s14 = smov 3  }
   0x2   :  { %s8527_s9 = sld [smem:[%s9430_s0 + %s8480_s6]]   ;;  %s8483_s18 = smov 4  }
   0x3   :  { %s8532_s13 = sld [smem:[%s9430_s0 + %s8481_s10]]   ;;  %s8484_s22 = smov 5  }
   0x4   :  { %s8537_s17 = sld [smem:[%s9430_s0 + %s8482_s14]]   ;;  %s8485_s26 = smov 6  }
   0x5   :  { %s8542_s21 = sld [smem:[%s9430_s0 + %s8483_s18]]   ;;  %s8486_s30 = smov 7  }
   0x6   :  { %s8547_s25 = sld [smem:[%s9430_s0 + %s8484_s22]]   ;;  %s8487_s4 = smov 8  }
   0x7   :  { %s8552_s29 = sld [smem:[%s9430_s0 + %s8485_s26]]   ;;  %s8488_s10 = smov 9  }
   0x8   :  { %9436 = sst [smem:[#allocation2_spill]] %s8527_s9  ;;  %s8489_s15 = smov 10  }
   0x9   :  { %s8557_s3 = sld [smem:[%s9430_s0 + %s8486_s30]]   ;;  %s8490_s20 = smov 11  }
   0xa   :  { %s8562_s8 = sld [smem:[%s9430_s0 + %s8487_s4]]   ;;  %s8491_s26 = smov 12  }
   0xb   :  { %s8567_s14 = sld [smem:[%s9430_s0 + %s8488_s10]]   ;;  %s8492_s1 = smov 13  }
   0xc   :  { %s8572_s19 = sld [smem:[%s9430_s0 + %s8489_s15]]   ;;  %s8493_s7 = smov 14  }
   0xd   :  { %s8577_s24 = sld [smem:[%s9430_s0 + %s8490_s20]]   ;;  %s8494_s15 = smov 15  }
   0xe   :  { %s8582_s30 = sld [smem:[%s9430_s0 + %s8491_s26]]   ;;  %s8495_s22 = smov 16  }
   0xf   :  { %s8587_s6 = sld [smem:[%s9430_s0 + %s8492_s1]]   ;;  %s8496_s28 = smov 17  }
  0x10   :  { %s8592_s12 = sld [smem:[%s9430_s0 + %s8493_s7]]   ;;  %s8497_s7 = smov 18  }
  0x11   :  { %s8597_s20 = sld [smem:[%s9430_s0 + %s8494_s15]]   ;;  %s8498_s15 = smov 19  }
  0x12   :  { %s8602_s27 = sld [smem:[%s9430_s0 + %s8495_s22]]   ;;  %s8499_s22 = smov 20  }
  0x13   :  { %s8607_s4 = sld [smem:[%s9430_s0 + %s8496_s28]]   ;;  %s8500_s28 = smov 21  }
  0x14   :  { %s8612_s9 = sld [smem:[%s9430_s0 + %s8497_s7]]   ;;  %s8501_s7 = smov 22  }
  0x15   :  { %9437 = sst [smem:[#allocation3_spill]] %s8587_s6 }
  0x16   :  { %9438 = sst [smem:[#allocation4_spill]] %s8592_s12 }
  0x17   :  { %s8617_s12 = sld [smem:[%s9430_s0 + %s8498_s15]]   ;;  %s8502_s15 = smov 23  }
  0x18   :  { %s8622_s6 = sld [smem:[%s9430_s0 + %s8499_s22]]   ;;  %s8503_s22 = smov 24  }
  0x19   :  { %9439 = sst [smem:[#allocation5_spill]] %s8607_s4 }
  0x1a   :  { %9440 = sst [smem:[#allocation6_spill]] %s8612_s9 }
  0x1b   :  { %s8627_s4 = sld [smem:[%s9430_s0 + %s8500_s28]]   ;;  %s8504_s28 = smov 25  }
  0x1c   :  { %s8632_s9 = sld [smem:[%s9430_s0 + %s8501_s7]]   ;;  %s8505_s7 = smov 26  }
  0x1d   :  { %9441 = sst [smem:[#allocation7_spill]] %s8617_s12 }
  0x1e   :  { %9442 = sst [smem:[#allocation8_spill]] %s8622_s6 }
  0x1f   :  { %s8637_s12 = sld [smem:[%s9430_s0 + %s8502_s15]]   ;;  %s8506_s15 = smov 27  }
  0x20   :  { %s8642_s6 = sld [smem:[%s9430_s0 + %s8503_s22]]   ;;  %s8507_s22 = smov 28  }
  0x21   :  { %9443 = sst [smem:[#allocation9_spill]] %s8627_s4 }
  0x22   :  { %9444 = sst [smem:[#allocation10_spill]] %s8632_s9 }
  0x23   :  { %s8647_s4 = sld [smem:[%s9430_s0 + %s8504_s28]]   ;;  %s8508_s28 = smov 29  }
  0x24   :  { %s8652_s9 = sld [smem:[%s9430_s0 + %s8505_s7]]   ;;  %s8509_s7 = smov 30  }
  0x25   :  { %9445 = sst [smem:[#allocation11_spill]] %s8637_s12 }
  0x26   :  { %9446 = sst [smem:[#allocation12_spill]] %s8642_s6 }
  0x27   :  { %s8657_s12 = sld [smem:[%s9430_s0 + %s8506_s15]]   ;;  %s8510_s15 = smov 31  }
  0x28   :  { %s8662_s6 = sld [smem:[%s9430_s0 + %s8507_s22]]   ;;  %s8511_s22 = smov 32  }
  0x29   :  { %9447 = sst [smem:[#allocation13_spill]] %s8647_s4 }
  0x2a   :  { %9448 = sst [smem:[#allocation14_spill]] %s8652_s9 }
  0x2b   :  { %s8667_s4 = sld [smem:[%s9430_s0 + %s8508_s28]]   ;;  %s8512_s28 = smov 33  }
  0x2c   :  { %s8672_s9 = sld [smem:[%s9430_s0 + %s8509_s7]]   ;;  %s8513_s7 = smov 34  }
  0x2d   :  { %9449 = sst [smem:[#allocation15_spill]] %s8657_s12 }
  0x2e   :  { %9450 = sst [smem:[#allocation16_spill]] %s8662_s6 }
  0x2f   :  { %s8677_s12 = sld [smem:[%s9430_s0 + %s8510_s15]]   ;;  %s8694_s15 = smov 0  }
  0x30   :  { %s8682_s6 = sld [smem:[%s9430_s0 + %s8511_s22]]  }
  0x31   :  { %9451 = sst [smem:[#allocation17_spill]] %s8667_s4 }
  0x32   :  { %9452 = sst [smem:[#allocation18_spill]] %s8672_s9 }
  0x33   :  { %s8687_s4 = sld [smem:[%s9430_s0 + %s8512_s28]]  }
  0x34   :  { %s8692_s9 = sld [smem:[%s9430_s0 + %s8513_s7]]  }
  0x35 LB: > { %s6903_s16 = sadd.s32 4294967295, %s8478_s15   ;;  %p6907_p0 = scmp.ge.s32.totalorder %s8478_s15, 1  ;;  %s8478_s15 = sphi %s8694_s15, %s80_s15  }
  0x36   : > { %p990_p1 = scmp.lt.s32.totalorder %s8478_s15, 3 }
  0x38   : > { %p991_p2 = pnand %p6907_p0, %p990_p1 }
  0x39   : > { %p1101_p3 = scmp.lt.s32.totalorder (!%p991_p2), %s6903_s16, 1  ;;  %s9453_s1 = sld [smem:[#allocation3_spill]] (!%p991_p2) }
  0x3a   : > { %994 = sbr.rel (%p991_p2) target bundleno = 9839 (0x266f), region = 152  ;;  %s9454_s2 = sld [smem:[#allocation4_spill]] (!%p991_p2) }
  0x3b   : > { %s9455_s7 = sld [smem:[#allocation5_spill]] (!%p991_p2) }
  0x3c   : > { %s9456_s10 = sld [smem:[#allocation6_spill]] (!%p991_p2) }
  0x3d   : > { %s9457_s11 = sld [smem:[#allocation9_spill]] (!%p991_p2) }
  0x3f   : > { %v1161_v0 = vld [vmem:[%s8547_s25 + $0x18] sm:$0xff]  ;;  %v1160_v1 = vld [vmem:[%s8547_s25 + $0x10] sm:$0xff]  ;;  %v1159_v2 = vld [vmem:[%s8547_s25 + $0x8] sm:$0xff]  ;;  %s9471_s16 = smov (!%p1101_p3, %s6903_s16), 1  ;;  %vm1169_vm0 = vcmask 261120   ;;  %vm1621_vm1 = vcmask 64512  }
  0x40   : > { %7662 = vmatprep.subr.mxu0 %v1161_v0  ;;  %v1158_v3 = vld [vmem:[%s8547_s25] sm:$0xff]  ;;  %s8709_s0 = sshll.u32 %s9471_s16, 4  ;;  %v1256_v6 = vld [vmem:[%s8557_s3 + $0x18] sm:$0xff]  ;;  %v1255_v7 = vld [vmem:[%s8557_s3 + $0x10] sm:$0xff]  ;;  %vm1711_vm2 = vcmask 80896   ;;  %vm1715_vm3 = vcmask 74752  }
  0x41   : > { %7663 = vmatpush3.msra.mxu0 %v1161_v0  ;;  %s1125_s18 = scalar_lea.vmem %s8542_s21, %s8709_s0  ;;  %7673 = vmatprep.subr.mxu1 %v1256_v6  ;;  %v1254_v8 = vld [vmem:[%s8557_s3 + $0x8] sm:$0xff]  ;;  %v1253_v9 = vld [vmem:[%s8557_s3] sm:$0xff]  ;;  %v1350_v10 = vld [vmem:[%s8567_s14 + $0x18] sm:$0xff]  ;;  %s1105_s22 = scalar_lea.vmem %s8522_s5, %s8709_s0  ;;  %vm1741_vm4 = vcmask 1041408   ;;  %vm3548_vm5 = vcmask 254976   ;;  %vm4086_vm6 = vcmask 517120  }
  0x42   : > { %7664 = vmatprep.subr.mxu0 %v1160_v1  ;;  %v1156_v4 = vld [vmem:[%s1125_s18] sm:$0xff]  ;;  %v1157_v5 = vld [vmem:[%s1125_s18 + $0x8] sm:$0x3]  ;;  %7674 = vmatpush3.msra.mxu1 %v1256_v6  ;;  %v6934_v18 = vld [vmem:[%s8567_s14 + $0x98] sm:$0xff]  ;;  %s7283_s23 = sshll.u32 %s9471_s16, 6  ;;  %vm4082_vm7 = vcmask 523264  }
  0x43   : > { %7665 = vmatpush3.msra.mxu0 %v1160_v1  ;;  %7670 = vmatprep.mubr.msk.f32.mxu0 %vm1169_vm0, %v1156_v4  ;;  %v6922_v11 = vld [vmem:[%s8552_s29] ss:$0 sm:$0xff]  ;;  %v1349_v19 = vld [vmem:[%s8567_s14 + $0x10] sm:$0xff]  ;;  %v1348_v21 = vld [vmem:[%s8567_s14 + $0x8] sm:$0xff]  ;;  %s8948_s26 = scalar_lea.vmem %s8532_s13, %s7283_s23  ;;  %s8951_s28 = scalar_lea.vmem %s8537_s17, %s7283_s23  ;;  %vm6731_vm8 = vcmask 25600   ;;  %vm6729_vm9 = vcmask 31744  }
  0x44   : > { %7666 = vmatprep.subr.mxu0 %v1159_v2  ;;  %7675 = vmatprep.subr.mxu1 %v1255_v7  ;;  %v6933_v20 = vld [vmem:[%s8567_s14 + $0x90] sm:$0xff]  ;;  %v6932_v22 = vld [vmem:[%s8567_s14 + $0x88] sm:$0xff]  ;;  %v1347_v23 = vld [vmem:[%s8567_s14] sm:$0xff]  ;;  %s9458_s16 = sld [smem:[#allocation11_spill]] }
  0x45   : > { %7667 = vmatpush3.msra.mxu0 %v1159_v2  ;;  %7676 = vmatpush3.msra.mxu1 %v1255_v7  ;;  %v6931_v24 = vld [vmem:[%s8567_s14 + $0x80] sm:$0xff]  ;;  %v6942_v25 = vld [vmem:[%s8567_s14 + $0x118] sm:$0xff]  ;;  %v8738_v31 = vld [vmem:[%s1105_s22 + $0x8] sm:$0x3]  ;;  %s9459_s18 = sld [smem:[#allocation7_spill]] }
  0x46   : > { %7668 = vmatprep.subr.mxu0 %v1158_v3  ;;  %7677 = vmatprep.subr.mxu1 %v1254_v8  ;;  %v6925_v26 = vld [vmem:[%s8562_s8] ss:$0 sm:$0xff]  ;;  %v6941_v35 = vld [vmem:[%s8567_s14 + $0x110] sm:$0xff]  ;;  %v6940_v36 = vld [vmem:[%s8567_s14 + $0x108] sm:$0xff]  ;;  %s9461_s23 = sld [smem:[#allocation10_spill]] }
  0x47   : > { %7669 = vmatpush3.msra.mxu0 %v1158_v3  ;;  %7678 = vmatpush3.msra.mxu1 %v1254_v8  ;;  %v8736_v29 = vld [vmem:[%s1105_s22] sm:$0xff]  ;;  %v6965_v38 = vld [vmem:[%s8567_s14 + $0xb8] sm:$0xff]  ;;  %v6964_v39 = vld [vmem:[%s8567_s14 + $0xb0] sm:$0xff]  ;;  %s9460_s22 = sld [smem:[#allocation8_spill]] }
  0x48   : > { %7671 = vmatmul.mubr.msk.f32.vlgmr.msra.gmra.mxu0 %vm1169_vm0, %v1157_v5  ;;  %7679 = vmatprep.subr.mxu1 %v1253_v9  ;;  %v6939_v37 = vld [vmem:[%s8567_s14 + $0x100] sm:$0xff]  ;;  %v6963_v40 = vld [vmem:[%s8567_s14 + $0xa8] sm:$0xff] }
  0x49   : > { %7680 = vmatpush3.msra.mxu1 %v1253_v9  ;;  %7684 = vmatprep.subr.mxu0 %v1350_v10  ;;  %v6962_v41 = vld [vmem:[%s8567_s14 + $0xa0] sm:$0xff] }
  0x4a   : > { %7685 = vmatpush3.msra.mxu0 %v1350_v10  ;;  %7695 = vmatprep.subr.mxu1 %v6934_v18  ;;  %v6936_v42 = vld [vmem:[%s8572_s19 + $0x4] ss:$0 sm:$0xff]  ;;  %v6928_v46 = vld [vmem:[%s8572_s19] ss:$0 sm:$0xff]  ;;  %v6967_v54 = vld [vmem:[%s8572_s19 + $0x5] ss:$0 sm:$0xff] }
  0x4b   : > { %7686 = vmatprep.subr.mxu0 %v1349_v19 }
  0x4c   : > { %7687 = vmatpush3.msra.mxu0 %v1349_v19 }
  0x4d   : > { %7688 = vmatprep.subr.mxu0 %v1348_v21 }
  0x4e   : > { %7689 = vmatpush3.msra.mxu0 %v1348_v21  ;;  %v6956_v21 = vld [vmem:[%s8567_s14 + $0x30] sm:$0xff] }
  0x4f   : > { %7690 = vmatprep.subr.mxu0 %v1347_v23 }
  0x50   : > { %7691 = vmatpush3.msra.mxu0 %v1347_v23  ;;  %v6954_v23 = vld [vmem:[%s8567_s14 + $0x20] sm:$0xff] }
  0x51   : > { %7706 = vmatprep.subr.mxu0 %v6942_v25 }
 0x108   : > { %v7672_v12 = vpop.f32.mrf.mxu0 }
 0x109   : > { %v1248_v13 = vadd.f32 %v7672_v12, %v6922_v11 }
 0x10a   : > { %v1242_v14 = vpop.f32.mrf.mxu0 }
 0x10b   : > { %v1243_v15 = vadd.f32 %v6922_v11, %v1242_v14  ;;  %v1252_v17 = vmax.f32 %v1248_v13, 0.0  ;;  %v6944_v11 = vld [vmem:[%s8572_s19 + $0x8] ss:$0 sm:$0xff]  ;;  %v6957_v14 = vld [vmem:[%s8567_s14 + $0x38] sm:$0xff] }
 0x10d   : > { %v1251_v16 = vmax.f32 %v1243_v15, 0.0 }
 0x10f   : > { %7681 = vmatprep.mubr.msk.f32.mxu1 %vm1169_vm0, %v1251_v16 }
 0x110   : > { %7682 = vmatmul.mubr.msk.f32.vlgmr.msra.gmra.mxu1 %vm1169_vm0, %v1252_v17 }
 0x111   : > { %7696 = vmatpush3.msra.mxu1 %v6934_v18 }
 0x112   : > { %7697 = vmatprep.subr.mxu1 %v6933_v20 }
 0x113   : > { %7698 = vmatpush3.msra.mxu1 %v6933_v20 }
 0x114   : > { %7699 = vmatprep.subr.mxu1 %v6932_v22 }
 0x115   : > { %7700 = vmatpush3.msra.mxu1 %v6932_v22  ;;  %v6955_v22 = vld [vmem:[%s8567_s14 + $0x28] sm:$0xff] }
 0x116   : > { %7701 = vmatprep.subr.mxu1 %v6931_v24 }
 0x117   : > { %7702 = vmatpush3.msra.mxu1 %v6931_v24 }
 0x1d0   : > { %v7683_v27 = vpop.f32.mrf.mxu1 }
 0x1d1   : > { %v8734_v28 = vadd.f32 %v7683_v27, %v6925_v26  ;;  %v6959_v27 = vld [vmem:[%s8572_s19 + $0x1] ss:$0 sm:$0xff] }
 0x1d2   : > { %v1336_v30 = vpop.f32.mrf.mxu1 }
 0x1d3   : > { %v8740_v32 = vadd.f32 %v6925_v26, %v1336_v30  ;;  %v8748_v34 = vadd.f32 %v8734_v28, %v8738_v31 }
 0x1d5   : > { %v8744_v33 = vadd.f32 %v8740_v32, %v8736_v29 }
 0x1d7   : > { %7692 = vmatprep.mubr.msk.f32.mxu0 %vm1169_vm0, %v8744_v33  ;;  %7703 = vmatprep.mubr.msk.f32.mxu1 %vm1169_vm0, %v8744_v33 }
 0x1d8   : > { %7693 = vmatmul.mubr.msk.f32.vlgmr.msra.gmra.mxu0 %vm1169_vm0, %v8748_v34  ;;  %7704 = vmatmul.mubr.msk.f32.vlgmr.msra.gmra.mxu1 %vm1169_vm0, %v8748_v34 }
 0x1d9   : > { %7707 = vmatpush3.msra.mxu0 %v6942_v25  ;;  %7714 = vmatprep.mubr.msk.f32.mxu0 %vm1169_vm0, %v8736_v29 }
 0x1da   : > { %7708 = vmatprep.subr.mxu0 %v6941_v35 }
 0x1db   : > { %7709 = vmatpush3.msra.mxu0 %v6941_v35 }
 0x1dc   : > { %7710 = vmatprep.subr.mxu0 %v6940_v36 }
 0x1dd   : > { %7711 = vmatpush3.msra.mxu0 %v6940_v36 }
 0x1de   : > { %7712 = vmatprep.subr.mxu0 %v6939_v37 }
 0x1df   : > { %7713 = vmatpush3.msra.mxu0 %v6939_v37  ;;  %v6973_v37 = vld [vmem:[%s8567_s14 + $0x138] sm:$0xff] }
 0x1e0   : > { %7715 = vmatmul.mubr.msk.f32.vlgmr.msra.gmra.mxu0 %vm1169_vm0, %v8738_v31  ;;  %7742 = vmatprep.subr.mxu0 %v6965_v38 }
 0x1e1   : > { %7743 = vmatpush3.msra.mxu0 %v6965_v38  ;;  %7750 = vmatprep.mubr.msk.f32.mxu0 %vm1169_vm0, %v8744_v33  ;;  %v6972_v38 = vld [vmem:[%s8567_s14 + $0x130] sm:$0xff] }
 0x1e2   : > { %7744 = vmatprep.subr.mxu0 %v6964_v39 }
 0x1e3   : > { %7745 = vmatpush3.msra.mxu0 %v6964_v39  ;;  %v6971_v39 = vld [vmem:[%s8567_s14 + $0x128] sm:$0xff] }
 0x1e4   : > { %7746 = vmatprep.subr.mxu0 %v6963_v40 }
 0x1e5   : > { %7747 = vmatpush3.msra.mxu0 %v6963_v40  ;;  %v6970_v40 = vld [vmem:[%s8567_s14 + $0x120] sm:$0xff] }
 0x1e6   : > { %7748 = vmatprep.subr.mxu0 %v6962_v41 }
 0x1e7   : > { %7749 = vmatpush3.msra.mxu0 %v6962_v41 }
 0x1e8   : > { %7751 = vmatmul.mubr.msk.f32.vlgmr.msra.gmra.mxu0 %vm1169_vm0, %v8748_v34 }
 0x298   : > { %v7694_v43 = vpop.f32.mrf.mxu0  ;;  %v7705_v44 = vpop.f32.mrf.mxu1 }
 0x299   : > { %v1524_v45 = vadd.f32 %v7705_v44, %v6936_v42  ;;  %v1436_v52 = vadd.f32 %v7694_v43, %v6928_v46 }
 0x29a   : > { %v1430_v47 = vpop.f32.mrf.mxu0  ;;  %v1518_v48 = vpop.f32.mrf.mxu1 }
 0x29b   : > { %v1431_v49 = vadd.f32 %v6928_v46, %v1430_v47  ;;  %v1519_v50 = vadd.f32 %v6936_v42, %v1518_v48  ;;  %7717 = vmatprep.subr.msk.mxu1 %vm1621_vm1, %v1524_v45 }
 0x29c   : > { %7718 = vmatpush3.xpose.msk.msra.mxu1 %vm1621_vm1, %v1524_v45 }
 0x29d   : > { %7719 = vmatprep.subr.msk.mxu1 %vm1621_vm1, %v1519_v50  ;;  %7721 = vmatprep.mubr.msk.f32.mxu1 %vm1621_vm1, %v1431_v49 }
 0x2a0   : > { %7720 = vmatpush3.xpose.msk.msra.mxu1 %vm1621_vm1, %v1519_v50  ;;  %v7716_v51 = vpop.f32.mrf.mxu0 }
 0x2a1   : > { %v1618_v12 = vadd.f32 %v7716_v51, %v6944_v11 }
 0x2a2   : > { %v1612_v53 = vpop.f32.mrf.mxu0 }
 0x2a3   : > { %7722 = vmatmul.mubr.msk.f32.vlgmr.msra.gmra.mxu1 %vm1621_vm1, %v1436_v52  ;;  %v1613_v13 = vadd.f32 %v6944_v11, %v1612_v53  ;;  %7724 = vmatprep.subr.msk.mxu1 %vm1741_vm4, %v1618_v12 }
 0x2a4   : > { %7725 = vmatpush3.msk.msra.mxu1 %vm1741_vm4, %v1618_v12 }
 0x2a5   : > { %7726 = vmatprep.subr.mxu1 %v1613_v13 }
 0x2a6   : > { %7727 = vmatpush3.msra.mxu1 %v1613_v13  ;;  %v6992_v13 = vld [vmem:[%s8567_s14 + $0x50] sm:$0xff] }
 0x2a7   : > { %7731 = vmatprep.subr.mxu1 %v6957_v14 }
 0x2a8   : > { %v7752_v55 = vpop.f32.mrf.mxu0 }
 0x2a9   : > { %v1994_v56 = vadd.f32 %v7752_v55, %v6967_v54 }
 0x2aa   : > { %v1988_v57 = vpop.f32.mrf.mxu0 }
 0x2ab   : > { %v1989_v58 = vadd.f32 %v6967_v54, %v1988_v57  ;;  %7764 = vmatprep.subr.msk.mxu0 %vm1621_vm1, %v1994_v56 }
 0x2ac   : > { %7765 = vmatpush3.xpose.msk.msra.mxu0 %vm1621_vm1, %v1994_v56 }
 0x2ad   : > { %7766 = vmatprep.subr.msk.mxu0 %vm1621_vm1, %v1989_v58 }
 0x2b0   : > { %7767 = vmatpush3.xpose.msk.msra.mxu0 %vm1621_vm1, %v1989_v58  ;;  %v6975_v58 = vld [vmem:[%s8572_s19 + $0x9] ss:$0 sm:$0xff] }
 0x363   : > { %v7723_v59 = vpop.f32.mrf.mxu1 }
 0x364   : > { %v1710_v62 = vmul.f32 0.35355338, %v7723_v59 }
 0x365   : > { %v1700_v60 = vpop.f32.mrf.mxu1 }
 0x366   : > { %v1709_v61 = vmul.f32 0.35355338, %v1700_v60  ;;  %v1716_v0 = vsel %vm1715_vm3, %v1710_v62, -inf }
 0x368   : > { %v1712_v63 = vsel %vm1711_vm2, %v1709_v61, -inf }
 0x369   : > { %1713 = vmax.xlane.f32.xlu0 %v1712_v63  ;;  %v6985_v63 = vld [vmem:[%s8577_s24 + $0x8] sm:$0xff] }
 0x36a   : > { %7778 = vmatprep.subr.mxu0 %v6985_v63 }
 0x36d   : > { %1717 = vmax.xlane.f32.xlu0 %v1716_v0 }
 0x3f2   : > { %v1714_v1 = vpop.xlane.xlu0 %1713 }
 0x3f3   : > { %v1719_v2 = vsub.f32 %v1709_v61, %v1714_v1 }
 0x3f5   : > { %v1721_v3 = vmul.f32 1.442695, %v1719_v2 }
 0x3f6   : > { %v1718_v4 = vpop.xlane.xlu0 %1717 }
 0x3f7   : > { %8373 = vpow2.f32 %v1721_v3  ;;  %v1720_v5 = vsub.f32 %v1710_v62, %v1718_v4  ;;  %v1820_v62 = vld [vmem:[%s8577_s24] sm:$0xff] }
 0x3f9   : > { %v1723_v6 = vmul.f32 1.442695, %v1720_v5 }
 0x3fb   : > { %8375 = vpow2.f32 %v1723_v6  ;;  %v7001_v6 = vld [vmem:[%s8567_s14 + $0xd8] sm:$0xff] }
 0x404   : > { %v8374_v7 = vpop.eup %8373 }
 0x405   : > { %v1725_v8 = vsel %vm1711_vm2, %v8374_v7, 0.0 }
 0x406   : > { %1726 = vadd.xlane.f32.xlu1 %v1725_v8  ;;  %v6999_v8 = vld [vmem:[%s8567_s14 + $0xc8] sm:$0xff] }
 0x408   : > { %v8376_v9 = vpop.eup %8375 }
 0x409   : > { %v1728_v10 = vsel %vm1715_vm3, %v8376_v9, 0.0 }
 0x40a   : > { %1729 = vadd.xlane.f32.xlu1 %v1728_v10  ;;  %v6993_v10 = vld [vmem:[%s8567_s14 + $0x58] sm:$0xff] }
 0x48f   : > { %v1727_v15 = vpop.xlane.xlu1 %1726 }
 0x490   : > { %8377 = vrcp.f32 %v1727_v15 }
 0x493   : > { %v1730_v16 = vpop.xlane.xlu1 %1729 }
 0x494   : > { %8379 = vrcp.f32 %v1730_v16  ;;  %v6990_v16 = vld [vmem:[%s8567_s14 + $0x40] sm:$0xff] }
 0x49d   : > { %v8378_v17 = vpop.eup %8377 }
 0x49e   : > { %v1733_v18 = vmul.f32 %v8378_v17, %v8374_v7  ;;  %v7000_v7 = vld [vmem:[%s8567_s14 + $0xd0] sm:$0xff] }
 0x4a0   : > { %7728 = vmatprep.mubr.msk.f32.mxu1 %vm1711_vm2, %v1733_v18  ;;  %v7003_v18 = vld [vmem:[%s8572_s19 + $0x6] ss:$0 sm:$0xff] }
 0x4a1   : > { %v8380_v19 = vpop.eup %8379 }
 0x4a2   : > { %v1734_v20 = vmul.f32 %v8380_v19, %v8376_v9  ;;  %v6998_v9 = vld [vmem:[%s8567_s14 + $0xc0] sm:$0xff] }
 0x4a4   : > { %7729 = vmatmul.mubr.msk.f32.vlgmr.msra.gmra.mxu1 %vm1711_vm2, %v1734_v20 }
 0x4a5   : > { %7732 = vmatpush3.msra.mxu1 %v6957_v14  ;;  %7739 = vmatprep.mubr.msk.f32.mxu1 %vm1169_vm0, %v8744_v33  ;;  %v6991_v14 = vld [vmem:[%s8567_s14 + $0x48] sm:$0xff] }
 0x4a6   : > { %7733 = vmatprep.subr.mxu1 %v6956_v21 }
 0x4a7   : > { %7734 = vmatpush3.msra.mxu1 %v6956_v21 }
 0x4a8   : > { %7735 = vmatprep.subr.mxu1 %v6955_v22 }
 0x4a9   : > { %7736 = vmatpush3.msra.mxu1 %v6955_v22 }
 0x4aa   : > { %7737 = vmatprep.subr.mxu1 %v6954_v23 }
 0x4ab   : > { %7738 = vmatpush3.msra.mxu1 %v6954_v23 }
 0x4ac   : > { %7740 = vmatmul.mubr.msk.f32.vlgmr.msra.gmra.mxu1 %vm1169_vm0, %v8748_v34  ;;  %7753 = vmatprep.subr.mxu1 %v6973_v37 }
 0x4ad   : > { %7761 = vmatprep.mubr.msk.f32.mxu1 %vm1169_vm0, %v8736_v29  ;;  %7754 = vmatpush3.msra.mxu1 %v6973_v37  ;;  %v7008_v37 = vld [vmem:[%s8567_s14 + $0x150] sm:$0xff] }
 0x4ae   : > { %7755 = vmatprep.subr.mxu1 %v6972_v38 }
 0x4af   : > { %7756 = vmatpush3.msra.mxu1 %v6972_v38  ;;  %v7007_v38 = vld [vmem:[%s8567_s14 + $0x148] sm:$0xff] }
 0x4b0   : > { %7757 = vmatprep.subr.mxu1 %v6971_v39 }
 0x4b1   : > { %7758 = vmatpush3.msra.mxu1 %v6971_v39  ;;  %v7006_v39 = vld [vmem:[%s8567_s14 + $0x140] sm:$0xff] }
 0x4b2   : > { %7759 = vmatprep.subr.mxu1 %v6970_v40 }
 0x4b3   : > { %7760 = vmatpush3.msra.mxu1 %v6970_v40 }
 0x4b4   : > { %7762 = vmatmul.mubr.msk.f32.vlgmr.msra.gmra.mxu1 %vm1169_vm0, %v8738_v31 }
 0x564   : > { %v8805_v24 = vpop.f32.mrf.mxu1 }
 0x566   : > { %v8807_v25 = vpop.f32.mrf.mxu1 }
 0x56c   : > { %v7741_v26 = vpop.f32.mrf.mxu1 }
 0x56d   : > { %v1906_v36 = vadd.f32 %v7741_v26, %v6959_v27  ;;  %v6995_v26 = vld [vmem:[%s8572_s19 + $0x2] ss:$0 sm:$0xff] }
 0x56e   : > { %v1900_v30 = vpop.f32.mrf.mxu1 }
 0x56f   : > { %v1901_v35 = vadd.f32 %v6959_v27, %v1900_v30 }
 0x571   : > { %7768 = vmatprep.mubr.msk.f32.mxu0 %vm1621_vm1, %v1901_v35 }
 0x572   : > { %7769 = vmatmul.mubr.msk.f32.vlgmr.msra.gmra.mxu0 %vm1621_vm1, %v1906_v36  ;;  %v7009_v36 = vld [vmem:[%s8567_s14 + $0x158] sm:$0xff] }
 0x573   : > { %7779 = vmatpush3.msra.mxu0 %v6985_v63 }
 0x574   : > { %v7763_v57 = vpop.f32.mrf.mxu1  ;;  %7788 = vmatprep.subr.mxu0 %v6993_v10 }
 0x575   : > { %v2082_v59 = vadd.f32 %v7763_v57, %v6975_v58  ;;  %v7011_v57 = vld [vmem:[%s8572_s19 + $0xa] ss:$0 sm:$0xff] }
 0x576   : > { %v2076_v60 = vpop.f32.mrf.mxu1 }
 0x577   : > { %v2077_v61 = vadd.f32 %v6975_v58, %v2076_v60  ;;  %7771 = vmatprep.subr.msk.mxu1 %vm1741_vm4, %v2082_v59 }
 0x578   : > { %7772 = vmatpush3.msk.msra.mxu1 %vm1741_vm4, %v2082_v59 }
 0x579   : > { %7773 = vmatprep.subr.mxu1 %v2077_v61 }
 0x57a   : > { %7774 = vmatpush3.msra.mxu1 %v2077_v61  ;;  %v7027_v61 = vld [vmem:[%s8567_s14 + $0x78] sm:$0xff] }
 0x57b   : > { %7783 = vmatprep.subr.mxu1 %v1820_v62 }
 0x632   : > { %v7770_v41 = vpop.f32.mrf.mxu0 }
 0x633   : > { %v2173_v42 = vmul.f32 0.35355338, %v7770_v41 }
 0x634   : > { %v2163_v43 = vpop.f32.mrf.mxu0 }
 0x635   : > { %v2172_v44 = vmul.f32 0.35355338, %v2163_v43  ;;  %v2177_v45 = vsel %vm1715_vm3, %v2173_v42, -inf }
 0x636   : > { %2178 = vmax.xlane.f32.xlu1 %v2177_v45 }
 0x637   : > { %v2174_v46 = vsel %vm1711_vm2, %v2172_v44, -inf }
 0x638   : > { %2175 = vmax.xlane.f32.xlu0 %v2174_v46 }
 0x6bf   : > { %v2179_v47 = vpop.xlane.xlu1 %2178 }
 0x6c0   : > { %v2181_v48 = vsub.f32 %v2173_v42, %v2179_v47 }
 0x6c1   : > { %v2176_v49 = vpop.xlane.xlu0 %2175 }
 0x6c2   : > { %v2184_v50 = vmul.f32 1.442695, %v2181_v48  ;;  %v2180_v51 = vsub.f32 %v2172_v44, %v2176_v49 }
 0x6c4   : > { %8381 = vpow2.f32 %v2184_v50  ;;  %v2182_v52 = vmul.f32 1.442695, %v2180_v51 }
 0x6c6   : > { %8383 = vpow2.f32 %v2182_v52 }
 0x6d1   : > { %v8382_v53 = vpop.eup %8381 }
 0x6d2   : > { %v2189_v54 = vsel %vm1715_vm3, %v8382_v53, 0.0 }
 0x6d3   : > { %v8384_v55 = vpop.eup %8383  ;;  %2190 = vadd.xlane.f32.xlu1 %v2189_v54 }
 0x6d4   : > { %v2186_v56 = vsel %vm1711_vm2, %v8384_v55, 0.0 }
 0x6d5   : > { %2187 = vadd.xlane.f32.xlu0 %v2186_v56 }
 0x75c   : > { %v2191_v0 = vpop.xlane.xlu1 %2190 }
 0x75d   : > { %8385 = vrcp.f32 %v2191_v0 }
 0x75e   : > { %v2188_v1 = vpop.xlane.xlu0 %2187 }
 0x75f   : > { %8387 = vrcp.f32 %v2188_v1 }
 0x76a   : > { %v8386_v2 = vpop.eup %8385 }
 0x76b   : > { %v2195_v5 = vmul.f32 %v8386_v2, %v8382_v53 }
 0x76c   : > { %v8388_v3 = vpop.eup %8387 }
 0x76d   : > { %v2194_v4 = vmul.f32 %v8388_v3, %v8384_v55 }
 0x76f   : > { %7775 = vmatprep.mubr.msk.f32.mxu1 %vm1711_vm2, %v2194_v4 }
 0x770   : > { %7776 = vmatmul.mubr.msk.f32.vlgmr.msra.gmra.mxu1 %vm1711_vm2, %v2195_v5  ;;  %v7026_v5 = vld [vmem:[%s8567_s14 + $0x70] sm:$0xff] }
 0x771   : > { %7785 = vmatprep.mubr.msk.f32.mxu1 %vm1621_vm1, %v8807_v25  ;;  %7784 = vmatpush3.msra.mxu1 %v1820_v62  ;;  %v7021_v62 = vld [vmem:[%s8577_s24 + $0x10] sm:$0xff] }
 0x772   : > { %7799 = vmatprep.subr.mxu1 %v7001_v6 }
 0x774   : > { %7786 = vmatmul.mubr.msk.f32.vlgmr.msra.gmra.mxu1 %vm1621_vm1, %v8805_v24 }
 0x775   : > { %7800 = vmatpush3.msra.mxu1 %v7001_v6  ;;  %7807 = vmatprep.mubr.msk.f32.mxu1 %vm1169_vm0, %v8744_v33  ;;  %v7025_v6 = vld [vmem:[%s8567_s14 + $0x68] sm:$0xff] }
 0x776   : > { %7801 = vmatprep.subr.mxu1 %v7000_v7 }
 0x777   : > { %7802 = vmatpush3.msra.mxu1 %v7000_v7  ;;  %v7024_v7 = vld [vmem:[%s8567_s14 + $0x60] sm:$0xff] }
 0x778   : > { %7803 = vmatprep.subr.mxu1 %v6999_v8 }
 0x779   : > { %7804 = vmatpush3.msra.mxu1 %v6999_v8  ;;  %v7035_v8 = vld [vmem:[%s8567_s14 + $0xf8] sm:$0xff] }
 0x77a   : > { %7805 = vmatprep.subr.mxu1 %v6998_v9 }
 0x77b   : > { %7806 = vmatpush3.msra.mxu1 %v6998_v9 }
 0x77c   : > { %7808 = vmatmul.mubr.msk.f32.vlgmr.msra.gmra.mxu1 %vm1169_vm0, %v8748_v34 }
 0x830   : > { %v7777_v11 = vpop.f32.mrf.mxu1 }
 0x832   : > { %v2271_v12 = vpop.f32.mrf.mxu1 }
 0x833   : > { %7780 = vmatprep.mubr.msk.f32.mxu0 %vm1621_vm1, %v2271_v12  ;;  %v7033_v12 = vld [vmem:[%s8567_s14 + $0xe8] sm:$0xff] }
 0x834   : > { %7781 = vmatmul.mubr.msk.f32.vlgmr.msra.gmra.mxu0 %vm1621_vm1, %v7777_v11  ;;  %v8848_v15 = vpop.f32.mrf.mxu1  ;;  %v7034_v11 = vld [vmem:[%s8567_s14 + $0xf0] sm:$0xff] }
 0x835   : > { %7789 = vmatpush3.msra.mxu0 %v6993_v10  ;;  %7796 = vmatprep.mubr.msk.f32.mxu0 %vm1169_vm0, %v8744_v33 }
 0x836   : > { %7790 = vmatprep.subr.mxu0 %v6992_v13  ;;  %v8851_v17 = vpop.f32.mrf.mxu1 }
 0x837   : > { %7791 = vmatpush3.msra.mxu0 %v6992_v13  ;;  %v7029_v13 = vld [vmem:[%s8572_s19 + $0x3] ss:$0 sm:$0xff] }
 0x838   : > { %7792 = vmatprep.subr.mxu0 %v6991_v14 }
 0x839   : > { %7793 = vmatpush3.msra.mxu0 %v6991_v14  ;;  %v7032_v14 = vld [vmem:[%s8567_s14 + $0xe0] sm:$0xff] }
 0x83a   : > { %7794 = vmatprep.subr.mxu0 %v6990_v16 }
 0x83b   : > { %7795 = vmatpush3.msra.mxu0 %v6990_v16 }
 0x83c   : > { %7797 = vmatmul.mubr.msk.f32.vlgmr.msra.gmra.mxu0 %vm1169_vm0, %v8748_v34  ;;  %v7809_v19 = vpop.f32.mrf.mxu1  ;;  %7810 = vmatprep.subr.mxu0 %v7009_v36 }
 0x83d   : > { %v2617_v20 = vadd.f32 %v7809_v19, %v7003_v18  ;;  %7818 = vmatprep.mubr.msk.f32.mxu0 %vm1169_vm0, %v8736_v29  ;;  %7811 = vmatpush3.msra.mxu0 %v7009_v36 }
 0x83e   : > { %v2611_v21 = vpop.f32.mrf.mxu1  ;;  %7812 = vmatprep.subr.mxu0 %v7008_v37 }
 0x83f   : > { %v2612_v22 = vadd.f32 %v7003_v18, %v2611_v21  ;;  %7821 = vmatprep.subr.msk.mxu1 %vm1621_vm1, %v2617_v20  ;;  %7813 = vmatpush3.msra.mxu0 %v7008_v37 }
 0x840   : > { %7822 = vmatpush3.xpose.msk.msra.mxu1 %vm1621_vm1, %v2617_v20  ;;  %7814 = vmatprep.subr.mxu0 %v7007_v38 }
 0x841   : > { %7823 = vmatprep.subr.msk.mxu1 %vm1621_vm1, %v2612_v22  ;;  %7815 = vmatpush3.msra.mxu0 %v7007_v38 }
 0x842   : > { %7816 = vmatprep.subr.mxu0 %v7006_v39 }
 0x843   : > { %7817 = vmatpush3.msra.mxu0 %v7006_v39 }
 0x844   : > { %7824 = vmatpush3.xpose.msk.msra.mxu1 %vm1621_vm1, %v2612_v22  ;;  %7819 = vmatmul.mubr.msk.f32.vlgmr.msra.gmra.mxu0 %vm1169_vm0, %v8738_v31 }
 0x845   : > { %7835 = vmatprep.subr.mxu1 %v7021_v62 }
 0x8f4   : > { %v8862_v23 = vpop.f32.mrf.mxu0 }
 0x8f6   : > { %v8864_v24 = vpop.f32.mrf.mxu0 }
 0x8f7   : > { %v2436_v22 = vadd.f32 %v8851_v17, %v8864_v24  ;;  %v7042_v17 = vld [vmem:[%s8567_s14 + $0x170] sm:$0xff]  ;;  %v7040_v24 = vld [vmem:[%s8567_s14 + $0x160] sm:$0xff] }
 0x8fc   : > { %v7798_v25 = vpop.f32.mrf.mxu0 }
 0x8fd   : > { %v2529_v35 = vadd.f32 %v7798_v25, %v6995_v26 }
 0x8fe   : > { %v2523_v27 = vpop.f32.mrf.mxu0 }
 0x8ff   : > { %v2524_v30 = vadd.f32 %v6995_v26, %v2523_v27 }
 0x901   : > { %7825 = vmatprep.mubr.msk.f32.mxu1 %vm1621_vm1, %v2524_v30  ;;  %v7037_v30 = vld [vmem:[%s8572_s19 + $0x7] ss:$0 sm:$0xff] }
 0x902   : > { %7826 = vmatmul.mubr.msk.f32.vlgmr.msra.gmra.mxu1 %vm1621_vm1, %v2529_v35 }
 0x903   : > { %7836 = vmatpush3.msra.mxu1 %v7021_v62 }
 0x904   : > { %v7820_v56 = vpop.f32.mrf.mxu0  ;;  %7851 = vmatprep.subr.mxu1 %v7035_v8 }
 0x905   : > { %v2705_v58 = vadd.f32 %v7820_v56, %v7011_v57 }
 0x906   : > { %v2699_v59 = vpop.f32.mrf.mxu0 }
 0x907   : > { %v2700_v60 = vadd.f32 %v7011_v57, %v2699_v59  ;;  %7828 = vmatprep.subr.msk.mxu0 %vm1741_vm4, %v2705_v58  ;;  %v7055_v59 = vld [vmem:[%s8577_s24 + $0x18] sm:$0xff] }
 0x908   : > { %7829 = vmatpush3.msk.msra.mxu0 %vm1741_vm4, %v2705_v58 }
 0x909   : > { %7830 = vmatprep.subr.mxu0 %v2700_v60 }
 0x90a   : > { %7831 = vmatpush3.msra.mxu0 %v2700_v60 }
 0x90b   : > { %7840 = vmatprep.subr.mxu0 %v7027_v61 }
 0x9c2   : > { %v7827_v40 = vpop.f32.mrf.mxu1 }
 0x9c3   : > { %v2796_v41 = vmul.f32 0.35355338, %v7827_v40 }
 0x9c4   : > { %v2786_v42 = vpop.f32.mrf.mxu1 }
 0x9c5   : > { %v2795_v43 = vmul.f32 0.35355338, %v2786_v42  ;;  %v2800_v44 = vsel %vm1715_vm3, %v2796_v41, -inf }
 0x9c6   : > { %2801 = vmax.xlane.f32.xlu1 %v2800_v44 }
 0x9c7   : > { %v2797_v45 = vsel %vm1711_vm2, %v2795_v43, -inf }
 0x9c8   : > { %2798 = vmax.xlane.f32.xlu0 %v2797_v45 }
 0xa4f   : > { %v2802_v46 = vpop.xlane.xlu1 %2801 }
 0xa50   : > { %v2804_v47 = vsub.f32 %v2796_v41, %v2802_v46 }
 0xa51   : > { %v2799_v48 = vpop.xlane.xlu0 %2798 }
 0xa52   : > { %v2807_v49 = vmul.f32 1.442695, %v2804_v47  ;;  %v2803_v50 = vsub.f32 %v2795_v43, %v2799_v48 }
 0xa54   : > { %8389 = vpow2.f32 %v2807_v49  ;;  %v2805_v51 = vmul.f32 1.442695, %v2803_v50 }
 0xa56   : > { %8391 = vpow2.f32 %v2805_v51 }
 0xa61   : > { %v8390_v52 = vpop.eup %8389 }
 0xa62   : > { %v2812_v53 = vsel %vm1715_vm3, %v8390_v52, 0.0 }
 0xa63   : > { %v8392_v54 = vpop.eup %8391  ;;  %2813 = vadd.xlane.f32.xlu1 %v2812_v53 }
 0xa64   : > { %v2809_v55 = vsel %vm1711_vm2, %v8392_v54, 0.0 }
 0xa65   : > { %2810 = vadd.xlane.f32.xlu0 %v2809_v55  ;;  %v7045_v55 = vld [vmem:[%s8572_s19 + $0xb] ss:$0 sm:$0xff] }
 0xaec   : > { %v2814_v63 = vpop.xlane.xlu1 %2813 }
 0xaed   : > { %8393 = vrcp.f32 %v2814_v63 }
 0xaee   : > { %v2811_v0 = vpop.xlane.xlu0 %2810 }
 0xaef   : > { %8395 = vrcp.f32 %v2811_v0 }
 0xafa   : > { %v8394_v1 = vpop.eup %8393 }
 0xafb   : > { %v2818_v4 = vmul.f32 %v8394_v1, %v8390_v52 }
 0xafc   : > { %v8396_v2 = vpop.eup %8395 }
 0xafd   : > { %v2817_v3 = vmul.f32 %v8396_v2, %v8392_v54 }
 0xaff   : > { %7832 = vmatprep.mubr.msk.f32.mxu0 %vm1711_vm2, %v2817_v3 }
 0xb00   : > { %7833 = vmatmul.mubr.msk.f32.vlgmr.msra.gmra.mxu0 %vm1711_vm2, %v2818_v4 }
 0xb01   : > { %7841 = vmatpush3.msra.mxu0 %v7027_v61  ;;  %7848 = vmatprep.mubr.msk.f32.mxu0 %vm1169_vm0, %v8744_v33 }
 0xb02   : > { %7842 = vmatprep.subr.mxu0 %v7026_v5 }
 0xb03   : > { %7843 = vmatpush3.msra.mxu0 %v7026_v5  ;;  %v7058_v5 = vld [vmem:[%s8582_s30] ss:$0 sm:$0xff] }
 0xb04   : > { %7844 = vmatprep.subr.mxu0 %v7025_v6 }
 0xb05   : > { %7845 = vmatpush3.msra.mxu0 %v7025_v6 }
 0xb06   : > { %7846 = vmatprep.subr.mxu0 %v7024_v7 }
 0xb07   : > { %7847 = vmatpush3.msra.mxu0 %v7024_v7 }
 0xb08   : > { %7849 = vmatmul.mubr.msk.f32.vlgmr.msra.gmra.mxu0 %vm1169_vm0, %v8748_v34 }
 0xb09   : > { %7870 = vmatprep.mubr.msk.f32.mxu0 %vm1169_vm0, %v8736_v29 }
 0xbc0   : > { %v7834_v9 = vpop.f32.mrf.mxu0 }
 0xbc2   : > { %v2894_v10 = vpop.f32.mrf.mxu0 }
 0xbc3   : > { %7837 = vmatprep.mubr.msk.f32.mxu1 %vm1621_vm1, %v2894_v10 }
 0xbc4   : > { %7838 = vmatmul.mubr.msk.f32.vlgmr.msra.gmra.mxu1 %vm1621_vm1, %v7834_v9 }
 0xbc5   : > { %7852 = vmatpush3.msra.mxu1 %v7035_v8  ;;  %7859 = vmatprep.mubr.msk.f32.mxu1 %vm1169_vm0, %v8744_v33  ;;  %v2441_v33 = vadd.f32 %v8848_v15, %v8862_v23  ;;  %v7043_v15 = vld [vmem:[%s8567_s14 + $0x178] sm:$0xff]  ;;  %v7041_v23 = vld [vmem:[%s8567_s14 + $0x168] sm:$0xff] }
 0xbc6   : > { %7853 = vmatprep.subr.mxu1 %v7034_v11  ;;  %7862 = vmatprep.subr.mxu0 %v7043_v15 }
 0xbc7   : > { %7854 = vmatpush3.msra.mxu1 %v7034_v11  ;;  %7863 = vmatpush3.msra.mxu0 %v7043_v15 }
 0xbc8   : > { %v7850_v16 = vpop.f32.mrf.mxu0  ;;  %7855 = vmatprep.subr.mxu1 %v7033_v12  ;;  %7864 = vmatprep.subr.mxu0 %v7042_v17 }
 0xbc9   : > { %v3073_v18 = vadd.f32 %v7850_v16, %v7029_v13  ;;  %7856 = vmatpush3.msra.mxu1 %v7033_v12  ;;  %7865 = vmatpush3.msra.mxu0 %v7042_v17  ;;  %v7066_v16 = vld [vmem:[%s8597_s20 + $0x90] sm:$0xff] }
 0xbca   : > { %v3067_v19 = vpop.f32.mrf.mxu0  ;;  %7857 = vmatprep.subr.mxu1 %v7032_v14  ;;  %7866 = vmatprep.subr.mxu0 %v7041_v23 }
 0xbcb   : > { %v3068_v20 = vadd.f32 %v7029_v13, %v3067_v19  ;;  %7858 = vmatpush3.msra.mxu1 %v7032_v14  ;;  %7867 = vmatpush3.msra.mxu0 %v7041_v23  ;;  %v7065_v19 = vld [vmem:[%s8597_s20 + $0x88] sm:$0xff] }
 0xbcc   : > { %7860 = vmatmul.mubr.msk.f32.vlgmr.msra.gmra.mxu1 %vm1169_vm0, %v8748_v34  ;;  %7868 = vmatprep.subr.mxu0 %v7040_v24  ;;  %v8999_v23 = vld [vmem:[%s8948_s26 + $0x28] sm:$0xff] }
 0xbcd   : > { %7877 = vmatprep.mubr.msk.f32.mxu1 %vm1621_vm1, %v3068_v20  ;;  %7869 = vmatpush3.msra.mxu0 %v7040_v24  ;;  %v1153_v24 = vld [vmem:[%s8951_s28 + $0x28] sm:$0xff] }
 0xbce   : > { %7871 = vmatmul.mubr.msk.f32.vlgmr.msra.gmra.mxu0 %vm1169_vm0, %v8738_v31 }
 0xc84   : > { %v7839_v21 = vpop.f32.mrf.mxu1 }
 0xc85   : > { %v8911_v25 = vadd.f32 %v7839_v21, %v2441_v33  ;;  %v8964_v33 = vld [vmem:[%s8948_s26 + $0x8] sm:$0xff] }
 0xc86   : > { %v2977_v26 = vpop.f32.mrf.mxu1  ;;  %v1149_v21 = vld [vmem:[%s8951_s28 + $0x8] sm:$0xff] }
 0xc87   : > { %v8913_v27 = vadd.f32 %v2977_v26, %v2436_v22  ;;  %v8968_v22 = vld [vmem:[%s8948_s26 + $0x10] sm:$0xff]  ;;  %v7064_v26 = vld [vmem:[%s8597_s20 + $0x80] sm:$0xff] }
 0xc8c   : > { %v7861_v35 = vpop.f32.mrf.mxu1 }
 0xc8d   : > { %v3161_v34 = vadd.f32 %v7861_v35, %v7037_v30  ;;  %v8981_v35 = vld [vmem:[%s8948_s26 + $0x18] sm:$0xff] }
 0xc8e   : > { %v3155_v36 = vpop.f32.mrf.mxu1  ;;  %v7872_v54 = vpop.f32.mrf.mxu0 }
 0xc8f   : > { %v3156_v37 = vadd.f32 %v7037_v30, %v3155_v36  ;;  %7873 = vmatprep.subr.msk.mxu1 %vm1621_vm1, %v3161_v34  ;;  %v3249_v56 = vadd.f32 %v7872_v54, %v7045_v55  ;;  %v8985_v36 = vld [vmem:[%s8948_s26 + $0x20] sm:$0xff] }
 0xc90   : > { %7874 = vmatpush3.xpose.msk.msra.mxu1 %vm1621_vm1, %v3161_v34  ;;  %v3243_v57 = vpop.f32.mrf.mxu0  ;;  %v1151_v34 = vld [vmem:[%s8951_s28 + $0x18] sm:$0xff] }
 0xc91   : > { %7875 = vmatprep.subr.msk.mxu1 %vm1621_vm1, %v3156_v37  ;;  %v3244_v58 = vadd.f32 %v7045_v55, %v3243_v57  ;;  %7880 = vmatprep.subr.msk.mxu0 %vm1741_vm4, %v3249_v56  ;;  %v8991_v15 = vadd.f32 %v1151_v34, %v8981_v35  ;;  %v3602_v55 = vld [vmem:[%s8597_s20 + $0x18] sm:$0xff]  ;;  %v3600_v57 = vld [vmem:[%s8597_s20 + $0x8] sm:$0xff]  ;;  %v7060_v34 = vld [vmem:[%s9454_s2] ss:$0 sm:$0xff]  ;;  %s9465_s2 = sld [smem:[#allocation14_spill]] }
 0xc92   : > { %7881 = vmatpush3.msk.msra.mxu0 %vm1741_vm4, %v3249_v56  ;;  %v3601_v56 = vld [vmem:[%s8597_s20 + $0x10] sm:$0xff] }
 0xc93   : > { %7882 = vmatprep.subr.mxu0 %v3244_v58 }
 0xc94   : > { %7876 = vmatpush3.xpose.msk.msra.mxu1 %vm1621_vm1, %v3156_v37  ;;  %7883 = vmatpush3.msra.mxu0 %v3244_v58  ;;  %v1152_v37 = vld [vmem:[%s8951_s28 + $0x20] sm:$0xff] }
 0xc95   : > { %7887 = vmatprep.subr.mxu1 %v7055_v59  ;;  %v8996_v17 = vadd.f32 %v1152_v37, %v8985_v36  ;;  %7892 = vmatprep.subr.mxu0 %v3602_v55  ;;  %v3599_v58 = vld [vmem:[%s8597_s20] sm:$0xff] }
 0xc97   : > { %7878 = vmatmul.mubr.msk.f32.vlgmr.msra.gmra.mxu1 %vm1621_vm1, %v3073_v18  ;;  %v1148_v18 = vld [vmem:[%s8951_s28] sm:$0xff] }
 0xc98   : > { %7888 = vmatpush3.msra.mxu1 %v7055_v59 }
 0xd57   : > { %v7879_v38 = vpop.f32.mrf.mxu1 }
 0xd58   : > { %v3340_v39 = vmul.f32 0.35355338, %v7879_v38  ;;  %v9003_v38 = vld [vmem:[%s8948_s26 + $0x30] sm:$0xff] }
 0xd59   : > { %v3330_v40 = vpop.f32.mrf.mxu1 }
 0xd5a   : > { %v3339_v41 = vmul.f32 0.35355338, %v3330_v40  ;;  %v3344_v42 = vsel %vm1715_vm3, %v3340_v39, -inf  ;;  %v9009_v40 = vadd.f32 %v1153_v24, %v8999_v23 }
 0xd5b   : > { %3345 = vmax.xlane.f32.xlu1 %v3344_v42  ;;  %v9017_v42 = vld [vmem:[%s8948_s26 + $0x38] sm:$0xff] }
 0xd5c   : > { %v3341_v43 = vsel %vm1711_vm2, %v3339_v41, -inf }
 0xd5d   : > { %3342 = vmax.xlane.f32.xlu0 %v3341_v43  ;;  %v1155_v43 = vld [vmem:[%s8951_s28 + $0x38] sm:$0xff] }
 0xde4   : > { %v3346_v44 = vpop.xlane.xlu1 %3345 }
 0xde5   : > { %v3348_v45 = vsub.f32 %v3340_v39, %v3346_v44  ;;  %v1154_v39 = vld [vmem:[%s8951_s28 + $0x30] sm:$0xff]  ;;  %v9023_v44 = vadd.f32 %v1155_v43, %v9017_v42 }
 0xde6   : > { %v3343_v46 = vpop.xlane.xlu0 %3342 }
 0xde7   : > { %v3351_v47 = vmul.f32 1.442695, %v3348_v45  ;;  %v3347_v48 = vsub.f32 %v3339_v41, %v3343_v46  ;;  %v9014_v41 = vadd.f32 %v1154_v39, %v9003_v38 }
 0xde9   : > { %8397 = vpow2.f32 %v3351_v47  ;;  %v3349_v49 = vmul.f32 1.442695, %v3347_v48 }
 0xdeb   : > { %8399 = vpow2.f32 %v3349_v49 }
 0xdf6   : > { %v8398_v50 = vpop.eup %8397 }
 0xdf7   : > { %v3356_v51 = vsel %vm1715_vm3, %v8398_v50, 0.0 }
 0xdf8   : > { %v8400_v52 = vpop.eup %8399  ;;  %3357 = vadd.xlane.f32.xlu1 %v3356_v51 }
 0xdf9   : > { %v3353_v53 = vsel %vm1711_vm2, %v8400_v52, 0.0 }
 0xdfa   : > { %3354 = vadd.xlane.f32.xlu0 %v3353_v53 }
 0xe81   : > { %v3358_v60 = vpop.xlane.xlu1 %3357 }
 0xe82   : > { %8401 = vrcp.f32 %v3358_v60 }
 0xe83   : > { %v3355_v61 = vpop.xlane.xlu0 %3354 }
 0xe84   : > { %8403 = vrcp.f32 %v3355_v61 }
 0xe8f   : > { %v8402_v62 = vpop.eup %8401 }
 0xe90   : > { %v3362_v1 = vmul.f32 %v8402_v62, %v8398_v50 }
 0xe91   : > { %v8404_v63 = vpop.eup %8403 }
 0xe92   : > { %v3361_v0 = vmul.f32 %v8404_v63, %v8400_v52 }
 0xe94   : > { %7884 = vmatprep.mubr.msk.f32.mxu0 %vm1711_vm2, %v3361_v0  ;;  %v7069_v0 = vld [vmem:[%s8602_s27 + $0x4] ss:$0 sm:$0xff] }
 0xe95   : > { %7885 = vmatmul.mubr.msk.f32.vlgmr.msra.gmra.mxu0 %vm1711_vm2, %v3362_v1 }
 0xe96   : > { %7893 = vmatpush3.msra.mxu0 %v3602_v55 }
 0xe97   : > { %7894 = vmatprep.subr.mxu0 %v3601_v56 }
 0xe98   : > { %7895 = vmatpush3.msra.mxu0 %v3601_v56 }
 0xe99   : > { %7896 = vmatprep.subr.mxu0 %v3600_v57 }
 0xe9a   : > { %7897 = vmatpush3.msra.mxu0 %v3600_v57 }
 0xe9b   : > { %7898 = vmatprep.subr.mxu0 %v3599_v58 }
 0xe9c   : > { %7899 = vmatpush3.msra.mxu0 %v3599_v58 }
 0xf55   : > { %v7886_v2 = vpop.f32.mrf.mxu0 }
 0xf57   : > { %v3438_v3 = vpop.f32.mrf.mxu0 }
 0xf58   : > { %7889 = vmatprep.mubr.msk.f32.mxu1 %vm1621_vm1, %v3438_v3 }
 0xf59   : > { %7890 = vmatmul.mubr.msk.f32.vlgmr.msra.gmra.mxu1 %vm1621_vm1, %v7886_v2 }
0x1019   : > { %v7891_v4 = vpop.f32.mrf.mxu1 }
0x101a   : > { %v3531_v6 = vadd.f32 %v7891_v4, %v8911_v25  ;;  %v1150_v25 = vld [vmem:[%s8951_s28 + $0x10] sm:$0xff]  ;;  %s9463_s28 = sld [smem:[#allocation15_spill]] }
0x101b   : > { %v3521_v7 = vpop.f32.mrf.mxu1  ;;  %v8978_v30 = vadd.f32 %v1150_v25, %v8968_v22 }
0x101c   : > { %v3540_v8 = vadd.f32 %v7058_v5, %v3531_v6  ;;  %v3530_v9 = vadd.f32 %v3521_v7, %v8913_v27  ;;  %v8975_v27 = vadd.f32 %v1149_v21, %v8964_v33  ;;  %v7059_v21 = vld [vmem:[%s9453_s1] ss:$0 sm:$0xff]  ;;  %s9464_s1 = sld [smem:[#allocation13_spill]] }
0x101e   : > { %v3539_v10 = vadd.f32 %v7058_v5, %v3530_v9  ;;  %v3542_v11 = vadd.f32 %v3540_v8, %v8738_v31  ;;  %v7067_v31 = vld [vmem:[%s8597_s20 + $0x98] sm:$0xff] }
0x101f   : > { %7903 = vmatprep.subr.mxu1 %v7067_v31 }
0x1020   : > { %v3549_v12 = vsel %vm3548_vm5, %v3542_v11, 0.0  ;;  %v3541_v13 = vadd.f32 %v3539_v10, %v8736_v29  ;;  %v8956_v29 = vld [vmem:[%s8948_s26] sm:$0xff]  ;;  %7904 = vmatpush3.msra.mxu1 %v7067_v31 }
0x1021   : > { %3550 = vadd.xlane.f32.xlu1 %v3549_v12  ;;  %v8961_v20 = vadd.f32 %v1148_v18, %v8956_v29  ;;  %7905 = vmatprep.subr.mxu1 %v7066_v16 }
0x1022   : > { %v3545_v14 = vsel %vm1169_vm0, %v3541_v13, 0.0  ;;  %7906 = vmatpush3.msra.mxu1 %v7066_v16 }
0x1023   : > { %3546 = vadd.xlane.f32.xlu0 %v3545_v14  ;;  %7911 = vmatprep.mubr.msk.f32.mxu1 %vm1169_vm0, %v8961_v20 }
0x1024   : > { %7907 = vmatprep.subr.mxu1 %v7065_v19 }
0x1025   : > { %7908 = vmatpush3.msra.mxu1 %v7065_v19 }
0x1026   : > { %7909 = vmatprep.subr.mxu1 %v7064_v26 }
0x1027   : > { %7910 = vmatpush3.msra.mxu1 %v7064_v26 }
0x1028   : > { %7912 = vmatmul.mubr.msk.f32.vlgmr.msra.gmra.mxu1 %vm1169_vm0, %v8975_v27 }
0x1029   : > { %7914 = vmatprep.mubr.msk.f32.mxu1 %vm1169_vm0, %v8978_v30 }
0x102c   : > { %7915 = vmatmul.mubr.msk.f32.gmra.mxu1 %vm1169_vm0, %v8991_v15 }
0x102d   : > { %7917 = vmatprep.mubr.msk.f32.mxu1 %vm1169_vm0, %v8996_v17 }
0x1030   : > { %7918 = vmatmul.mubr.msk.f32.gmra.mxu1 %vm1169_vm0, %v9009_v40 }
0x1031   : > { %7920 = vmatprep.mubr.msk.f32.mxu1 %vm1169_vm0, %v9014_v41 }
0x1034   : > { %7921 = vmatmul.mubr.msk.f32.gmra.mxu1 %vm1169_vm0, %v9023_v44 }
0x10aa   : > { %v3551_v45 = vpop.xlane.xlu1 %3550 }
0x10ab   : > { %v3554_v46 = vmul.f32 0.03125, %v3551_v45 }
0x10ac   : > { %v3547_v47 = vpop.xlane.xlu0 %3546 }
0x10ad   : > { %v9029_v48 = vsub.f32 %v3542_v11, %v3554_v46  ;;  %v3553_v49 = vmul.f32 0.03125, %v3547_v47 }
0x10af   : > { %v9031_v50 = vsub.f32 %v3541_v13, %v3553_v49  ;;  %v3558_v51 = vmul.f32 %v9029_v48, %v9029_v48  ;;  %v7061_v49 = vld [vmem:[%s8602_s27] ss:$0 sm:$0xff] }
0x10b1   : > { %v3562_v52 = vsel %vm3548_vm5, %v3558_v51, 0.0  ;;  %v3557_v53 = vmul.f32 %v9031_v50, %v9031_v50 }
0x10b2   : > { %3563 = vadd.xlane.f32.xlu1 %v3562_v52  ;;  %v7080_v52 = vld [vmem:[%s8597_s20 + $0x110] sm:$0xff] }
0x10b3   : > { %v3559_v54 = vsel %vm1169_vm0, %v3557_v53, 0.0  ;;  %v7079_v53 = vld [vmem:[%s8597_s20 + $0x108] sm:$0xff] }
0x10b4   : > { %3560 = vadd.xlane.f32.xlu0 %v3559_v54  ;;  %v7078_v54 = vld [vmem:[%s8597_s20 + $0x100] sm:$0xff] }
0x10e8   : > { %v7913_v59 = vpop.f32.mrf.mxu1 }
0x10e9   : > { %v3800_v10 = vadd.f32 %v7913_v59, %v7069_v0 }
0x10ea   : > { %v3794_v60 = vpop.f32.mrf.mxu1 }
0x10eb   : > { %v3795_v11 = vadd.f32 %v7069_v0, %v3794_v60 }
0x10ec   : > { %v7916_v61 = vpop.f32.mrf.mxu1 }
0x10ed   : > { %v3810_v8 = vadd.f32 %v7916_v61, %v7069_v0 }
0x10ee   : > { %v3804_v62 = vpop.f32.mrf.mxu1 }
0x10ef   : > { %v3805_v9 = vadd.f32 %v7069_v0, %v3804_v62 }
0x10f0   : > { %v7919_v63 = vpop.f32.mrf.mxu1 }
0x10f1   : > { %v3820_v6 = vadd.f32 %v7919_v63, %v7069_v0 }
0x10f2   : > { %v3814_v1 = vpop.f32.mrf.mxu1 }
0x10f3   : > { %v3815_v7 = vadd.f32 %v7069_v0, %v3814_v1 }
0x10f4   : > { %v7922_v2 = vpop.f32.mrf.mxu1 }
0x10f5   : > { %v3830_v3 = vadd.f32 %v7922_v2, %v7069_v0  ;;  %v7083_v2 = vld [vmem:[%s8602_s27 + $0x8] ss:$0 sm:$0xff] }
0x10f6   : > { %v3824_v4 = vpop.f32.mrf.mxu1 }
0x10f7   : > { %7943 = vmatprep.subr.msk.mxu1 %vm1621_vm1, %v3830_v3  ;;  %v3825_v5 = vadd.f32 %v7069_v0, %v3824_v4 }
0x10f8   : > { %7944 = vmatpush3.xpose.msk.msra.mxu1 %vm1621_vm1, %v3830_v3 }
0x10f9   : > { %7945 = vmatprep.subr.msk.mxu1 %vm1621_vm1, %v3825_v5 }
0x10fc   : > { %7946 = vmatpush3.xpose.msk.msra.mxu1 %vm1621_vm1, %v3825_v5 }
0x10fd   : > { %7947 = vmatprep.subr.msk.mxu1 %vm1621_vm1, %v3820_v6 }
0x1100   : > { %7948 = vmatpush3.xpose.msk.msra.mxu1 %vm1621_vm1, %v3820_v6 }
0x1101   : > { %7949 = vmatprep.subr.msk.mxu1 %vm1621_vm1, %v3815_v7 }
0x1104   : > { %7950 = vmatpush3.xpose.msk.msra.mxu1 %vm1621_vm1, %v3815_v7 }
0x1105   : > { %7951 = vmatprep.subr.msk.mxu1 %vm1621_vm1, %v3810_v8 }
0x1108   : > { %7952 = vmatpush3.xpose.msk.msra.mxu1 %vm1621_vm1, %v3810_v8 }
0x1109   : > { %7953 = vmatprep.subr.msk.mxu1 %vm1621_vm1, %v3805_v9 }
0x110c   : > { %7954 = vmatpush3.xpose.msk.msra.mxu1 %vm1621_vm1, %v3805_v9 }
0x110d   : > { %7955 = vmatprep.subr.msk.mxu1 %vm1621_vm1, %v3800_v10 }
0x1110   : > { %7956 = vmatpush3.xpose.msk.msra.mxu1 %vm1621_vm1, %v3800_v10 }
0x1111   : > { %7957 = vmatprep.subr.msk.mxu1 %vm1621_vm1, %v3795_v11 }
0x1114   : > { %7958 = vmatpush3.xpose.msk.msra.mxu1 %vm1621_vm1, %v3795_v11 }
0x113b   : > { %v3564_v12 = vpop.xlane.xlu1 %3563 }
0x113c   : > { %v3566_v13 = vmul.f32 0.03125, %v3564_v12 }
0x113d   : > { %v3561_v14 = vpop.xlane.xlu0 %3560 }
0x113e   : > { %v3568_v31 = vadd.f32 1e-05, %v3566_v13  ;;  %v3565_v16 = vmul.f32 0.03125, %v3561_v14 }
0x1140   : > { %8405 = vrsqrt.f32 %v3568_v31  ;;  %v3567_v18 = vadd.f32 1e-05, %v3565_v16 }
0x1142   : > { %8407 = vrsqrt.f32 %v3567_v18 }
0x114d   : > { %v8406_v19 = vpop.eup %8405 }
0x114e   : > { %v3572_v25 = vmul.f32 %v8406_v19, %v9029_v48 }
0x114f   : > { %v8408_v26 = vpop.eup %8407 }
0x1150   : > { %v3571_v37 = vmul.f32 %v8408_v26, %v9031_v50  ;;  %v3580_v24 = vmul.f32 %v7059_v21, %v3572_v25 }
0x1152   : > { %v3579_v39 = vmul.f32 %v7059_v21, %v3571_v37  ;;  %v9064_v43 = vadd.f32 %v7060_v34, %v3580_v24  ;;  %v7107_v24 = vld [vmem:[%s8597_s20 + $0x38] sm:$0xff] }
0x1154   : > { %v9066_v45 = vadd.f32 %v7060_v34, %v3579_v39  ;;  %v9074_v47 = vadd.f32 %v9064_v43, %v8734_v28  ;;  %v7081_v28 = vld [vmem:[%s8597_s20 + $0x118] sm:$0xff] }
0x1155   : > { %7923 = vmatprep.subr.mxu0 %v7081_v28 }
0x1156   : > { %v9070_v46 = vadd.f32 %v9066_v45, %v8740_v32 }
0x1158   : > { %7900 = vmatprep.mubr.msk.f32.mxu0 %vm1169_vm0, %v9070_v46 }
0x1159   : > { %7901 = vmatmul.mubr.msk.f32.vlgmr.msra.gmra.mxu0 %vm1169_vm0, %v9074_v47 }
0x115a   : > { %7931 = vmatprep.mubr.msk.f32.mxu0 %vm1169_vm0, %v8956_v29  ;;  %7924 = vmatpush3.msra.mxu0 %v7081_v28  ;;  %v7106_v28 = vld [vmem:[%s8597_s20 + $0x30] sm:$0xff] }
0x115b   : > { %7925 = vmatprep.subr.mxu0 %v7080_v52 }
0x115c   : > { %7926 = vmatpush3.msra.mxu0 %v7080_v52  ;;  %v7105_v52 = vld [vmem:[%s8597_s20 + $0x28] sm:$0xff] }
0x115d   : > { %7927 = vmatprep.subr.mxu0 %v7079_v53 }
0x115e   : > { %7928 = vmatpush3.msra.mxu0 %v7079_v53  ;;  %v7104_v53 = vld [vmem:[%s8597_s20 + $0x20] sm:$0xff] }
0x115f   : > { %7929 = vmatprep.subr.mxu0 %v7078_v54 }
0x1160   : > { %7930 = vmatpush3.msra.mxu0 %v7078_v54  ;;  %v7115_v54 = vld [vmem:[%s8597_s20 + $0xb8] sm:$0xff] }
0x1161   : > { %7932 = vmatmul.mubr.msk.f32.vlgmr.msra.gmra.mxu0 %vm1169_vm0, %v8964_v33 }
0x1162   : > { %7934 = vmatprep.mubr.msk.f32.mxu0 %vm1169_vm0, %v8968_v22 }
0x1165   : > { %7935 = vmatmul.mubr.msk.f32.gmra.mxu0 %vm1169_vm0, %v8981_v35 }
0x1166   : > { %7937 = vmatprep.mubr.msk.f32.mxu0 %vm1169_vm0, %v8985_v36 }
0x1169   : > { %7938 = vmatmul.mubr.msk.f32.gmra.mxu0 %vm1169_vm0, %v8999_v23 }
0x116a   : > { %7940 = vmatprep.mubr.msk.f32.mxu0 %vm1169_vm0, %v9003_v38 }
0x116d   : > { %7941 = vmatmul.mubr.msk.f32.gmra.mxu0 %vm1169_vm0, %v9017_v42 }
0x1219   : > { %v7902_v48 = vpop.f32.mrf.mxu0 }
0x121a   : > { %v3688_v51 = vadd.f32 %v7902_v48, %v7061_v49 }
0x121b   : > { %v3682_v50 = vpop.f32.mrf.mxu0 }
0x121c   : > { %v3683_v32 = vadd.f32 %v7061_v49, %v3682_v50 }
0x121e   : > { %7959 = vmatprep.mubr.msk.f32.mxu1 %vm1621_vm1, %v3683_v32 }
0x121f   : > { %7960 = vmatmul.mubr.msk.f32.vlgmr.msra.gmra.mxu1 %vm1621_vm1, %v3688_v51 }
0x1220   : > { %8020 = vmatprep.mubr.msk.f32.mxu1 %vm1169_vm0, %v8956_v29 }
0x1221   : > { %v7933_v61 = vpop.f32.mrf.mxu0 }
0x1222   : > { %v3942_v12 = vadd.f32 %v7933_v61, %v7083_v2  ;;  %v7109_v61 = vld [vmem:[%s8602_s27 + $0x1] ss:$0 sm:$0xff] }
0x1223   : > { %v3936_v62 = vpop.f32.mrf.mxu0 }
0x1224   : > { %v3937_v13 = vadd.f32 %v7083_v2, %v3936_v62 }
0x1225   : > { %v7936_v63 = vpop.f32.mrf.mxu0 }
0x1226   : > { %v3952_v10 = vadd.f32 %v7936_v63, %v7083_v2 }
0x1227   : > { %v3946_v0 = vpop.f32.mrf.mxu0 }
0x1228   : > { %v3947_v11 = vadd.f32 %v7083_v2, %v3946_v0 }
0x1229   : > { %v7939_v1 = vpop.f32.mrf.mxu0 }
0x122a   : > { %v3962_v7 = vadd.f32 %v7939_v1, %v7083_v2 }
0x122b   : > { %v3956_v3 = vpop.f32.mrf.mxu0 }
0x122c   : > { %v3957_v9 = vadd.f32 %v7083_v2, %v3956_v3 }
0x122d   : > { %v7942_v4 = vpop.f32.mrf.mxu0 }
0x122e   : > { %v3972_v5 = vadd.f32 %v7942_v4, %v7083_v2 }
0x122f   : > { %v3966_v6 = vpop.f32.mrf.mxu0 }
0x1230   : > { %v3967_v8 = vadd.f32 %v7083_v2, %v3966_v6  ;;  %7962 = vmatprep.subr.mxu0 %v3972_v5  ;;  %v7117_v6 = vld [vmem:[%s8602_s27 + $0x5] ss:$0 sm:$0xff] }
0x1231   : > { %7963 = vmatpush3.msra.mxu0 %v3972_v5 }
0x1232   : > { %7964 = vmatprep.subr.mxu0 %v3967_v8 }
0x1233   : > { %7965 = vmatpush3.msra.mxu0 %v3967_v8 }
0x1234   : > { %7966 = vmatprep.subr.mxu0 %v3962_v7 }
0x1235   : > { %7967 = vmatpush3.msra.mxu0 %v3962_v7 }
0x1236   : > { %7968 = vmatprep.subr.mxu0 %v3957_v9 }
0x1237   : > { %7969 = vmatpush3.msra.mxu0 %v3957_v9 }
0x1238   : > { %7970 = vmatprep.subr.mxu0 %v3952_v10 }
0x1239   : > { %7971 = vmatpush3.msra.mxu0 %v3952_v10 }
0x123a   : > { %7972 = vmatprep.subr.mxu0 %v3947_v11 }
0x123b   : > { %7973 = vmatpush3.msra.mxu0 %v3947_v11 }
0x123c   : > { %7974 = vmatprep.subr.mxu0 %v3942_v12 }
0x123d   : > { %7975 = vmatpush3.msra.mxu0 %v3942_v12 }
0x123e   : > { %7976 = vmatprep.subr.mxu0 %v3937_v13 }
0x123f   : > { %7977 = vmatpush3.msra.mxu0 %v3937_v13 }
0x1240   : > { %7981 = vmatprep.subr.mxu0 %v7107_v24 }
0x12df   : > { %v7961_v55 = vpop.f32.mrf.mxu1 }
0x12e0   : > { %v4081_v56 = vmul.f32 0.35355338, %v7961_v55  ;;  %v7114_v55 = vld [vmem:[%s8597_s20 + $0xb0] sm:$0xff] }
0x12e1   : > { %v4071_v57 = vpop.f32.mrf.mxu1 }
0x12e2   : > { %v4080_v58 = vmul.f32 0.35355338, %v4071_v57  ;;  %v4087_v59 = vsel %vm4086_vm6, %v4081_v56, -inf  ;;  %v7112_v57 = vld [vmem:[%s8597_s20 + $0xa0] sm:$0xff] }
0x12e3   : > { %4088 = vmax.xlane.f32.xlu1 %v4087_v59 }
0x12e4   : > { %v4083_v60 = vsel %vm4082_vm7, %v4080_v58, -inf }
0x12e5   : > { %4084 = vmax.xlane.f32.xlu0 %v4083_v60 }
0x136c   : > { %v4089_v14 = vpop.xlane.xlu1 %4088 }
0x136d   : > { %v4091_v31 = vsub.f32 %v4081_v56, %v4089_v14  ;;  %v7113_v56 = vld [vmem:[%s8597_s20 + $0xa8] sm:$0xff] }
0x136e   : > { %v4085_v16 = vpop.xlane.xlu0 %4084 }
0x136f   : > { %v4094_v18 = vmul.f32 1.442695, %v4091_v31  ;;  %v4090_v19 = vsub.f32 %v4080_v58, %v4085_v16 }
0x1371   : > { %8409 = vpow2.f32 %v4094_v18  ;;  %v4092_v21 = vmul.f32 1.442695, %v4090_v19  ;;  %v7129_v19 = vld [vmem:[%s8597_s20 + $0x138] sm:$0xff] }
0x1372   : > { %8012 = vmatprep.subr.mxu1 %v7129_v19 }
0x1373   : > { %8411 = vpow2.f32 %v4092_v21  ;;  %v7128_v21 = vld [vmem:[%s8597_s20 + $0x130] sm:$0xff]  ;;  %8013 = vmatpush3.msra.mxu1 %v7129_v19 }
0x1374   : > { %8014 = vmatprep.subr.mxu1 %v7128_v21 }
0x1375   : > { %8015 = vmatpush3.msra.mxu1 %v7128_v21 }
0x137e   : > { %v8410_v25 = vpop.eup %8409 }
0x137f   : > { %v4099_v26 = vsel %vm4086_vm6, %v8410_v25, 0.0 }
0x1380   : > { %v8412_v34 = vpop.eup %8411  ;;  %4100 = vadd.xlane.f32.xlu1 %v4099_v26  ;;  %v7126_v26 = vld [vmem:[%s8597_s20 + $0x120] sm:$0xff] }
0x1381   : > { %v4096_v37 = vsel %vm4082_vm7, %v8412_v34, 0.0 }
0x1382   : > { %4097 = vadd.xlane.f32.xlu0 %v4096_v37 }
0x1409   : > { %v4101_v39 = vpop.xlane.xlu1 %4100 }
0x140a   : > { %8413 = vrcp.f32 %v4101_v39 }
0x140b   : > { %v4098_v48 = vpop.xlane.xlu0 %4097 }
0x140c   : > { %8415 = vrcp.f32 %v4098_v48 }
0x1417   : > { %v8414_v49 = vpop.eup %8413 }
0x1418   : > { %v4105_v51 = vmul.f32 %v8414_v49, %v8410_v25  ;;  %v7127_v25 = vld [vmem:[%s8597_s20 + $0x128] sm:$0xff] }
0x1419   : > { %v8416_v50 = vpop.eup %8415  ;;  %8016 = vmatprep.subr.mxu1 %v7127_v25 }
0x141a   : > { %v4104_v32 = vmul.f32 %v8416_v50, %v8412_v34  ;;  %8017 = vmatpush3.msra.mxu1 %v7127_v25 }
0x141b   : > { %8018 = vmatprep.subr.mxu1 %v7126_v26 }
0x141c   : > { %7978 = vmatprep.mubr.msk.f32.mxu0 %vm4082_vm7, %v4104_v32  ;;  %8019 = vmatpush3.msra.mxu1 %v7126_v26 }
0x141d   : > { %7979 = vmatmul.mubr.msk.f32.vlgmr.msra.gmra.mxu0 %vm4082_vm7, %v4105_v51  ;;  %8021 = vmatmul.mubr.msk.f32.vlgmr.msra.gmra.mxu1 %vm1169_vm0, %v8964_v33 }
0x141e   : > { %7982 = vmatpush3.msra.mxu0 %v7107_v24  ;;  %7989 = vmatprep.mubr.msk.f32.mxu0 %vm1169_vm0, %v9070_v46 }
0x141f   : > { %7983 = vmatprep.subr.mxu0 %v7106_v28  ;;  %8023 = vmatprep.mubr.msk.f32.mxu1 %vm1169_vm0, %v8968_v22 }
0x1420   : > { %7984 = vmatpush3.msra.mxu0 %v7106_v28 }
0x1421   : > { %7985 = vmatprep.subr.mxu0 %v7105_v52  ;;  %8024 = vmatmul.mubr.msk.f32.gmra.mxu1 %vm1169_vm0, %v8981_v35 }
0x1422   : > { %7986 = vmatpush3.msra.mxu0 %v7105_v52  ;;  %8026 = vmatprep.mubr.msk.f32.mxu1 %vm1169_vm0, %v8985_v36 }
0x1423   : > { %7987 = vmatprep.subr.mxu0 %v7104_v53 }
0x1424   : > { %7988 = vmatpush3.msra.mxu0 %v7104_v53  ;;  %v7131_v53 = vld [vmem:[%s8602_s27 + $0x9] ss:$0 sm:$0xff] }
0x1425   : > { %7990 = vmatmul.mubr.msk.f32.vlgmr.msra.gmra.mxu0 %vm1169_vm0, %v9074_v47  ;;  %7992 = vmatprep.subr.mxu0 %v7115_v54 }
0x1426   : > { %7993 = vmatpush3.msra.mxu0 %v7115_v54  ;;  %8000 = vmatprep.mubr.msk.f32.mxu0 %vm1169_vm0, %v8961_v20 }
0x1427   : > { %7994 = vmatprep.subr.mxu0 %v7114_v55  ;;  %8027 = vmatmul.mubr.msk.f32.gmra.mxu1 %vm1169_vm0, %v8999_v23 }
0x1428   : > { %7995 = vmatpush3.msra.mxu0 %v7114_v55  ;;  %8029 = vmatprep.mubr.msk.f32.mxu1 %vm1169_vm0, %v9003_v38 }
0x1429   : > { %7996 = vmatprep.subr.mxu0 %v7113_v56 }
0x142a   : > { %7997 = vmatpush3.msra.mxu0 %v7113_v56 }
0x142b   : > { %7998 = vmatprep.subr.mxu0 %v7112_v57  ;;  %8030 = vmatmul.mubr.msk.f32.gmra.mxu1 %vm1169_vm0, %v9017_v42 }
0x142c   : > { %7999 = vmatpush3.msra.mxu0 %v7112_v57 }
0x142d   : > { %8001 = vmatmul.mubr.msk.f32.vlgmr.msra.gmra.mxu0 %vm1169_vm0, %v8975_v27 }
0x142e   : > { %8003 = vmatprep.mubr.msk.f32.mxu0 %vm1169_vm0, %v8978_v30 }
0x1431   : > { %8004 = vmatmul.mubr.msk.f32.gmra.mxu0 %vm1169_vm0, %v8991_v15 }
0x1432   : > { %8006 = vmatprep.mubr.msk.f32.mxu0 %vm1169_vm0, %v8996_v17 }
0x1435   : > { %8007 = vmatmul.mubr.msk.f32.gmra.mxu0 %vm1169_vm0, %v9009_v40 }
0x1436   : > { %8009 = vmatprep.mubr.msk.f32.mxu0 %vm1169_vm0, %v9014_v41 }
0x1439   : > { %8010 = vmatmul.mubr.msk.f32.gmra.mxu0 %vm1169_vm0, %v9023_v44 }
0x14dd   : > { %v9140_v58 = vpop.f32.mrf.mxu0  ;;  %v8022_v50 = vpop.f32.mrf.mxu1 }
0x14df   : > { %v9142_v59 = vpop.f32.mrf.mxu0  ;;  %v4473_v32 = vpop.f32.mrf.mxu1 }
0x14e1   : > { %v8025_v51 = vpop.f32.mrf.mxu1 }
0x14e3   : > { %v4483_v28 = vpop.f32.mrf.mxu1 }
0x14e5   : > { %v7991_v60 = vpop.f32.mrf.mxu0 }
0x14e6   : > { %v4273_v18 = vadd.f32 %v7991_v60, %v7109_v61 }
0x14e7   : > { %v4267_v62 = vpop.f32.mrf.mxu0  ;;  %v8028_v52 = vpop.f32.mrf.mxu1 }
0x14e8   : > { %v4268_v63 = vadd.f32 %v7109_v61, %v4267_v62  ;;  %v4499_v60 = vadd.f32 %v8028_v52, %v7131_v53 }
0x14e9   : > { %v4493_v54 = vpop.f32.mrf.mxu1 }
0x14ea   : > { %8048 = vmatprep.mubr.msk.f32.mxu0 %vm1621_vm1, %v4268_v63  ;;  %v4494_v62 = vadd.f32 %v7131_v53, %v4493_v54  ;;  %v4489_v63 = vadd.f32 %v8025_v51, %v7131_v53  ;;  %v7170_v51 = vld [vmem:[%s8602_s27 + $0x6] ss:$0 sm:$0xff] }
0x14eb   : > { %v8031_v55 = vpop.f32.mrf.mxu1 }
0x14ec   : > { %v4509_v56 = vadd.f32 %v8031_v55, %v7131_v53 }
0x14ed   : > { %v8002_v0 = vpop.f32.mrf.mxu0  ;;  %v4503_v57 = vpop.f32.mrf.mxu1 }
0x14ee   : > { %v4361_v31 = vadd.f32 %v8002_v0, %v7117_v6  ;;  %v4504_v61 = vadd.f32 %v7131_v53, %v4503_v57  ;;  %8051 = vmatprep.subr.mxu1 %v4509_v56  ;;  %v4484_v0 = vadd.f32 %v7131_v53, %v4483_v28 }
0x14ef   : > { %v4355_v1 = vpop.f32.mrf.mxu0  ;;  %8052 = vmatpush3.msra.mxu1 %v4509_v56 }
0x14f0   : > { %v4356_v16 = vadd.f32 %v7117_v6, %v4355_v1  ;;  %8053 = vmatprep.subr.mxu1 %v4504_v61  ;;  %v4479_v1 = vadd.f32 %v8022_v50, %v7131_v53 }
0x14f1   : > { %v8005_v2 = vpop.f32.mrf.mxu0  ;;  %8054 = vmatpush3.msra.mxu1 %v4504_v61 }
0x14f2   : > { %v4371_v13 = vadd.f32 %v8005_v2, %v7117_v6  ;;  %8055 = vmatprep.subr.mxu1 %v4499_v60  ;;  %v4474_v2 = vadd.f32 %v7131_v53, %v4473_v32 }
0x14f3   : > { %v4365_v3 = vpop.f32.mrf.mxu0  ;;  %8056 = vmatpush3.msra.mxu1 %v4499_v60 }
0x14f4   : > { %v4366_v14 = vadd.f32 %v7117_v6, %v4365_v3  ;;  %8057 = vmatprep.subr.mxu1 %v4494_v62 }
0x14f5   : > { %v8008_v4 = vpop.f32.mrf.mxu0  ;;  %8058 = vmatpush3.msra.mxu1 %v4494_v62 }
0x14f6   : > { %v4381_v11 = vadd.f32 %v8008_v4, %v7117_v6  ;;  %8059 = vmatprep.subr.mxu1 %v4489_v63 }
0x14f7   : > { %v4375_v5 = vpop.f32.mrf.mxu0  ;;  %8060 = vmatpush3.msra.mxu1 %v4489_v63 }
0x14f8   : > { %v4376_v12 = vadd.f32 %v7117_v6, %v4375_v5  ;;  %8061 = vmatprep.subr.mxu1 %v4484_v0 }
0x14f9   : > { %v8011_v7 = vpop.f32.mrf.mxu0  ;;  %8062 = vmatpush3.msra.mxu1 %v4484_v0 }
0x14fa   : > { %v4391_v8 = vadd.f32 %v8011_v7, %v7117_v6  ;;  %8063 = vmatprep.subr.mxu1 %v4479_v1 }
0x14fb   : > { %v4385_v9 = vpop.f32.mrf.mxu0  ;;  %8064 = vmatpush3.msra.mxu1 %v4479_v1 }
0x14fc   : > { %v4386_v10 = vadd.f32 %v7117_v6, %v4385_v9  ;;  %8032 = vmatprep.subr.msk.mxu0 %vm1621_vm1, %v4391_v8  ;;  %8065 = vmatprep.subr.mxu1 %v4474_v2 }
0x14fd   : > { %8033 = vmatpush3.xpose.msk.msra.mxu0 %vm1621_vm1, %v4391_v8  ;;  %8066 = vmatpush3.msra.mxu1 %v4474_v2  ;;  %v7160_v2 = vld [vmem:[%s8597_s20 + $0x58] sm:$0xff] }
0x14fe   : > { %8034 = vmatprep.subr.msk.mxu0 %vm1621_vm1, %v4386_v10 }
0x1501   : > { %8035 = vmatpush3.xpose.msk.msra.mxu0 %vm1621_vm1, %v4386_v10 }
0x1502   : > { %8036 = vmatprep.subr.msk.mxu0 %vm1621_vm1, %v4381_v11 }
0x1505   : > { %8037 = vmatpush3.xpose.msk.msra.mxu0 %vm1621_vm1, %v4381_v11 }
0x1506   : > { %8038 = vmatprep.subr.msk.mxu0 %vm1621_vm1, %v4376_v12 }
0x1509   : > { %8039 = vmatpush3.xpose.msk.msra.mxu0 %vm1621_vm1, %v4376_v12 }
0x150a   : > { %8040 = vmatprep.subr.msk.mxu0 %vm1621_vm1, %v4371_v13 }
0x150d   : > { %8041 = vmatpush3.xpose.msk.msra.mxu0 %vm1621_vm1, %v4371_v13  ;;  %v7168_v13 = vld [vmem:[%s8597_s20 + $0xd8] sm:$0xff] }
0x150e   : > { %8042 = vmatprep.subr.msk.mxu0 %vm1621_vm1, %v4366_v14 }
0x1511   : > { %8043 = vmatpush3.xpose.msk.msra.mxu0 %vm1621_vm1, %v4366_v14  ;;  %v7167_v14 = vld [vmem:[%s8597_s20 + $0xd0] sm:$0xff] }
0x1512   : > { %8044 = vmatprep.subr.msk.mxu0 %vm1621_vm1, %v4361_v31 }
0x1515   : > { %8045 = vmatpush3.xpose.msk.msra.mxu0 %vm1621_vm1, %v4361_v31  ;;  %v7152_v31 = vld [vmem:[%s9455_s7 + $0x8] sm:$0xff] }
0x1516   : > { %8046 = vmatprep.subr.msk.mxu0 %vm1621_vm1, %v4356_v16  ;;  %8070 = vmatprep.subr.mxu1 %v7152_v31 }
0x1519   : > { %8047 = vmatpush3.xpose.msk.msra.mxu0 %vm1621_vm1, %v4356_v16  ;;  %v7166_v16 = vld [vmem:[%s8597_s20 + $0xc8] sm:$0xff] }
0x151a   : > { %8091 = vmatprep.subr.mxu0 %v7168_v13 }
0x151c   : > { %8049 = vmatmul.mubr.msk.f32.vlgmr.msra.gmra.mxu0 %vm1621_vm1, %v4273_v18  ;;  %v7165_v18 = vld [vmem:[%s8597_s20 + $0xc0] sm:$0xff] }
0x151d   : > { %8099 = vmatprep.mubr.msk.f32.mxu0 %vm1169_vm0, %v8961_v20  ;;  %8092 = vmatpush3.msra.mxu0 %v7168_v13 }
0x151e   : > { %8093 = vmatprep.subr.mxu0 %v7167_v14 }
0x151f   : > { %8094 = vmatpush3.msra.mxu0 %v7167_v14 }
0x1520   : > { %8095 = vmatprep.subr.mxu0 %v7166_v16 }
0x1521   : > { %8096 = vmatpush3.msra.mxu0 %v7166_v16  ;;  %v7181_v16 = vld [vmem:[%s8597_s20 + $0x150] sm:$0xff] }
0x1522   : > { %8097 = vmatprep.subr.mxu0 %v7165_v18 }
0x1523   : > { %8098 = vmatpush3.msra.mxu0 %v7165_v18  ;;  %v7180_v18 = vld [vmem:[%s8597_s20 + $0x148] sm:$0xff] }
0x1524   : > { %8100 = vmatmul.mubr.msk.f32.vlgmr.msra.gmra.mxu0 %vm1169_vm0, %v8975_v27 }
0x1525   : > { %8102 = vmatprep.mubr.msk.f32.mxu0 %vm1169_vm0, %v8978_v30 }
0x1528   : > { %8103 = vmatmul.mubr.msk.f32.gmra.mxu0 %vm1169_vm0, %v8991_v15 }
0x1529   : > { %8105 = vmatprep.mubr.msk.f32.mxu0 %vm1169_vm0, %v8996_v17 }
0x152c   : > { %8106 = vmatmul.mubr.msk.f32.gmra.mxu0 %vm1169_vm0, %v9009_v40 }
0x152d   : > { %8108 = vmatprep.mubr.msk.f32.mxu0 %vm1169_vm0, %v9014_v41 }
0x1530   : > { %8109 = vmatmul.mubr.msk.f32.gmra.mxu0 %vm1169_vm0, %v9023_v44 }
0x15dc   : > { %v8050_v34 = vpop.f32.mrf.mxu0 }
0x15dd   : > { %v4618_v37 = vmul.f32 0.35355338, %v8050_v34 }
0x15de   : > { %v4608_v24 = vpop.f32.mrf.mxu0 }
0x15df   : > { %v4617_v39 = vmul.f32 0.35355338, %v4608_v24  ;;  %v4622_v48 = vsel %vm4086_vm6, %v4618_v37, -inf  ;;  %v4187_v24 = vld [vmem:[%s9455_s7] sm:$0xff] }
0x15e0   : > { %4623 = vmax.xlane.f32.xlu1 %v4622_v48 }
0x15e1   : > { %v4619_v49 = vsel %vm4082_vm7, %v4617_v39, -inf }
0x15e2   : > { %4620 = vmax.xlane.f32.xlu0 %v4619_v49 }
0x1669   : > { %v4624_v3 = vpop.xlane.xlu1 %4623 }
0x166a   : > { %v4626_v4 = vsub.f32 %v4618_v37, %v4624_v3  ;;  %v7159_v3 = vld [vmem:[%s8597_s20 + $0x50] sm:$0xff] }
0x166b   : > { %v4621_v5 = vpop.xlane.xlu0 %4620 }
0x166c   : > { %v4629_v6 = vmul.f32 1.442695, %v4626_v4  ;;  %v4625_v7 = vsub.f32 %v4617_v39, %v4621_v5  ;;  %v8101_v39 = vpop.f32.mrf.mxu0  ;;  %v7158_v4 = vld [vmem:[%s8597_s20 + $0x48] sm:$0xff]  ;;  %v7157_v5 = vld [vmem:[%s8597_s20 + $0x40] sm:$0xff] }
0x166d   : > { %v5059_v62 = vadd.f32 %v8101_v39, %v7170_v51 }
0x166e   : > { %8417 = vpow2.f32 %v4629_v6  ;;  %v4627_v8 = vmul.f32 1.442695, %v4625_v7  ;;  %v5053_v48 = vpop.f32.mrf.mxu0 }
0x166f   : > { %v5054_v63 = vadd.f32 %v7170_v51, %v5053_v48 }
0x1670   : > { %8419 = vpow2.f32 %v4627_v8  ;;  %v8104_v49 = vpop.f32.mrf.mxu0 }
0x1671   : > { %v5069_v60 = vadd.f32 %v8104_v49, %v7170_v51 }
0x1672   : > { %v5063_v50 = vpop.f32.mrf.mxu0 }
0x1673   : > { %v5064_v61 = vadd.f32 %v7170_v51, %v5063_v50 }
0x1674   : > { %v8107_v32 = vpop.f32.mrf.mxu0 }
0x1675   : > { %v5079_v56 = vadd.f32 %v8107_v32, %v7170_v51 }
0x1676   : > { %v5073_v28 = vpop.f32.mrf.mxu0 }
0x1677   : > { %v5074_v57 = vadd.f32 %v7170_v51, %v5073_v28 }
0x1678   : > { %v8110_v52 = vpop.f32.mrf.mxu0 }
0x1679   : > { %v5089_v53 = vadd.f32 %v8110_v52, %v7170_v51 }
0x167a   : > { %v5083_v54 = vpop.f32.mrf.mxu0 }
0x167b   : > { %v8418_v9 = vpop.eup %8417  ;;  %8131 = vmatprep.subr.msk.mxu0 %vm1621_vm1, %v5089_v53  ;;  %v5084_v55 = vadd.f32 %v7170_v51, %v5083_v54 }
0x167c   : > { %v4634_v10 = vsel %vm4086_vm6, %v8418_v9, 0.0  ;;  %8132 = vmatpush3.xpose.msk.msra.mxu0 %vm1621_vm1, %v5089_v53 }
0x167d   : > { %v8420_v11 = vpop.eup %8419  ;;  %4635 = vadd.xlane.f32.xlu1 %v4634_v10  ;;  %8133 = vmatprep.subr.msk.mxu0 %vm1621_vm1, %v5084_v55 }
0x167e   : > { %v4631_v12 = vsel %vm4082_vm7, %v8420_v11, 0.0 }
0x167f   : > { %4632 = vadd.xlane.f32.xlu0 %v4631_v12 }
0x1680   : > { %8134 = vmatpush3.xpose.msk.msra.mxu0 %vm1621_vm1, %v5084_v55 }
0x1681   : > { %8135 = vmatprep.subr.msk.mxu0 %vm1621_vm1, %v5079_v56 }
0x1684   : > { %8136 = vmatpush3.xpose.msk.msra.mxu0 %vm1621_vm1, %v5079_v56 }
0x1685   : > { %8137 = vmatprep.subr.msk.mxu0 %vm1621_vm1, %v5074_v57 }
0x1688   : > { %8138 = vmatpush3.xpose.msk.msra.mxu0 %vm1621_vm1, %v5074_v57 }
0x1689   : > { %8139 = vmatprep.subr.msk.mxu0 %vm1621_vm1, %v5069_v60 }
0x168c   : > { %8140 = vmatpush3.xpose.msk.msra.mxu0 %vm1621_vm1, %v5069_v60 }
0x168d   : > { %8141 = vmatprep.subr.msk.mxu0 %vm1621_vm1, %v5064_v61 }
0x1690   : > { %8142 = vmatpush3.xpose.msk.msra.mxu0 %vm1621_vm1, %v5064_v61 }
0x1691   : > { %8143 = vmatprep.subr.msk.mxu0 %vm1621_vm1, %v5059_v62 }
0x1694   : > { %8144 = vmatpush3.xpose.msk.msra.mxu0 %vm1621_vm1, %v5059_v62 }
0x1695   : > { %8145 = vmatprep.subr.msk.mxu0 %vm1621_vm1, %v5054_v63 }
0x1698   : > { %8146 = vmatpush3.xpose.msk.msra.mxu0 %vm1621_vm1, %v5054_v63 }
0x1706   : > { %v4636_v19 = vpop.xlane.xlu1 %4635 }
0x1707   : > { %8421 = vrcp.f32 %v4636_v19  ;;  %v7179_v19 = vld [vmem:[%s8597_s20 + $0x140] sm:$0xff] }
0x1708   : > { %v4633_v21 = vpop.xlane.xlu0 %4632 }
0x1709   : > { %8423 = vrcp.f32 %v4633_v21 }
0x1714   : > { %v8422_v25 = vpop.eup %8421 }
0x1715   : > { %v4640_v37 = vmul.f32 %v8422_v25, %v8418_v9 }
0x1716   : > { %v8424_v26 = vpop.eup %8423 }
0x1717   : > { %v4639_v34 = vmul.f32 %v8424_v26, %v8420_v11  ;;  %v7162_v11 = vld [vmem:[%s8602_s27 + $0x2] ss:$0 sm:$0xff] }
0x1719   : > { %8067 = vmatprep.mubr.msk.f32.mxu1 %vm4082_vm7, %v4639_v34 }
0x171a   : > { %8068 = vmatmul.mubr.msk.f32.vlgmr.msra.gmra.mxu1 %vm4082_vm7, %v4640_v37 }
0x171b   : > { %8071 = vmatpush3.msra.mxu1 %v7152_v31  ;;  %v7182_v31 = vld [vmem:[%s8597_s20 + $0x158] sm:$0xff] }
0x171c   : > { %8075 = vmatprep.subr.mxu1 %v4187_v24 }
0x17da   : > { %v8069_v0 = vpop.f32.mrf.mxu1 }
0x17dc   : > { %v4713_v1 = vpop.f32.mrf.mxu1 }
0x17dd   : > { %8072 = vmatprep.mubr.msk.f32.mxu1 %vm1621_vm1, %v4713_v1 }
0x17de   : > { %8073 = vmatmul.mubr.msk.f32.vlgmr.msra.gmra.mxu1 %vm1621_vm1, %v8069_v0 }
0x17df   : > { %8076 = vmatpush3.msra.mxu1 %v4187_v24  ;;  %8077 = vmatprep.mubr.msk.f32.mxu1 %vm1621_vm1, %v9142_v59  ;;  %v7184_v24 = vld [vmem:[%s8602_s27 + $0xa] ss:$0 sm:$0xff] }
0x17e0   : > { %8080 = vmatprep.subr.mxu1 %v7160_v2 }
0x17e2   : > { %8078 = vmatmul.mubr.msk.f32.vlgmr.msra.gmra.mxu1 %vm1621_vm1, %v9140_v58 }
0x17e3   : > { %8081 = vmatpush3.msra.mxu1 %v7160_v2  ;;  %8088 = vmatprep.mubr.msk.f32.mxu1 %vm1169_vm0, %v9070_v46  ;;  %v7205_v2 = vld [vmem:[%s9455_s7 + $0x10] sm:$0xff] }
0x17e4   : > { %8082 = vmatprep.subr.mxu1 %v7159_v3 }
0x17e5   : > { %8083 = vmatpush3.msra.mxu1 %v7159_v3 }
0x17e6   : > { %8084 = vmatprep.subr.mxu1 %v7158_v4 }
0x17e7   : > { %8085 = vmatpush3.msra.mxu1 %v7158_v4 }
0x17e8   : > { %8086 = vmatprep.subr.mxu1 %v7157_v5 }
0x17e9   : > { %8087 = vmatpush3.msra.mxu1 %v7157_v5 }
0x17ea   : > { %8089 = vmatmul.mubr.msk.f32.vlgmr.msra.gmra.mxu1 %vm1169_vm0, %v9074_v47  ;;  %8111 = vmatprep.subr.mxu1 %v7182_v31 }
0x17eb   : > { %8119 = vmatprep.mubr.msk.f32.mxu1 %vm1169_vm0, %v8956_v29  ;;  %8112 = vmatpush3.msra.mxu1 %v7182_v31  ;;  %v7219_v31 = vld [vmem:[%s8597_s20 + $0xf8] sm:$0xff] }
0x17ec   : > { %8113 = vmatprep.subr.mxu1 %v7181_v16 }
0x17ed   : > { %8114 = vmatpush3.msra.mxu1 %v7181_v16  ;;  %v7218_v16 = vld [vmem:[%s8597_s20 + $0xf0] sm:$0xff] }
0x17ee   : > { %8115 = vmatprep.subr.mxu1 %v7180_v18 }
0x17ef   : > { %8116 = vmatpush3.msra.mxu1 %v7180_v18  ;;  %v7217_v18 = vld [vmem:[%s8597_s20 + $0xe8] sm:$0xff] }
0x17f0   : > { %8117 = vmatprep.subr.mxu1 %v7179_v19 }
0x17f1   : > { %8118 = vmatpush3.msra.mxu1 %v7179_v19 }
0x17f2   : > { %8120 = vmatmul.mubr.msk.f32.vlgmr.msra.gmra.mxu1 %vm1169_vm0, %v8964_v33 }
0x17f3   : > { %8122 = vmatprep.mubr.msk.f32.mxu1 %vm1169_vm0, %v8968_v22 }
0x17f6   : > { %8123 = vmatmul.mubr.msk.f32.gmra.mxu1 %vm1169_vm0, %v8981_v35 }
0x17f7   : > { %8125 = vmatprep.mubr.msk.f32.mxu1 %vm1169_vm0, %v8985_v36 }
0x17fa   : > { %8126 = vmatmul.mubr.msk.f32.gmra.mxu1 %vm1169_vm0, %v8999_v23 }
0x17fb   : > { %8128 = vmatprep.mubr.msk.f32.mxu1 %vm1169_vm0, %v9003_v38 }
0x17fe   : > { %8129 = vmatmul.mubr.msk.f32.gmra.mxu1 %vm1169_vm0, %v9017_v42 }
0x189e   : > { %v8074_v58 = vpop.f32.mrf.mxu1 }
0x18a0   : > { %v4796_v59 = vpop.f32.mrf.mxu1 }
0x18a2   : > { %v8079_v6 = vpop.f32.mrf.mxu1 }
0x18a3   : > { %v9244_v7 = vadd.f32 %v8079_v6, %v8074_v58 }
0x18a4   : > { %v4877_v8 = vpop.f32.mrf.mxu1 }
0x18a5   : > { %v9246_v9 = vadd.f32 %v4877_v8, %v4796_v59  ;;  %v7211_v8 = vld [vmem:[%s8597_s20 + $0x78] sm:$0xff] }
0x18aa   : > { %v8090_v10 = vpop.f32.mrf.mxu1 }
0x18ab   : > { %v4971_v14 = vadd.f32 %v8090_v10, %v7162_v11 }
0x18ac   : > { %v4965_v12 = vpop.f32.mrf.mxu1 }
0x18ad   : > { %v4966_v13 = vadd.f32 %v7162_v11, %v4965_v12  ;;  %v7210_v12 = vld [vmem:[%s8597_s20 + $0x70] sm:$0xff] }
0x18af   : > { %8147 = vmatprep.mubr.msk.f32.mxu0 %vm1621_vm1, %v4966_v13  ;;  %v7209_v13 = vld [vmem:[%s8597_s20 + $0x68] sm:$0xff] }
0x18b0   : > { %8148 = vmatmul.mubr.msk.f32.vlgmr.msra.gmra.mxu0 %vm1621_vm1, %v4971_v14  ;;  %v7208_v14 = vld [vmem:[%s8597_s20 + $0x60] sm:$0xff] }
0x18b1   : > { %8213 = vmatprep.mubr.msk.f32.mxu0 %vm1169_vm0, %v8956_v29 }
0x18b2   : > { %v8121_v36 = vpop.f32.mrf.mxu1 }
0x18b3   : > { %v5177_v52 = vadd.f32 %v8121_v36, %v7184_v24 }
0x18b4   : > { %v5171_v26 = vpop.f32.mrf.mxu1 }
0x18b5   : > { %v5172_v53 = vadd.f32 %v7184_v24, %v5171_v26 }
0x18b6   : > { %v8124_v23 = vpop.f32.mrf.mxu1 }
0x18b7   : > { %v5187_v51 = vadd.f32 %v8124_v23, %v7184_v24 }
0x18b8   : > { %v5181_v34 = vpop.f32.mrf.mxu1 }
0x18b9   : > { %v5182_v28 = vadd.f32 %v7184_v24, %v5181_v34 }
0x18ba   : > { %v8127_v37 = vpop.f32.mrf.mxu1 }
0x18bb   : > { %v5197_v49 = vadd.f32 %v8127_v37, %v7184_v24 }
0x18bc   : > { %v5191_v38 = vpop.f32.mrf.mxu1 }
0x18bd   : > { %v5192_v32 = vadd.f32 %v7184_v24, %v5191_v38 }
0x18be   : > { %v8130_v39 = vpop.f32.mrf.mxu1 }
0x18bf   : > { %v5207_v48 = vadd.f32 %v8130_v39, %v7184_v24 }
0x18c0   : > { %v5201_v42 = vpop.f32.mrf.mxu1 }
0x18c1   : > { %v5202_v50 = vadd.f32 %v7184_v24, %v5201_v42  ;;  %8150 = vmatprep.subr.mxu1 %v5207_v48  ;;  %v7232_v42 = vld [vmem:[%s8597_s20 + $0x170] sm:$0xff] }
0x18c2   : > { %8151 = vmatpush3.msra.mxu1 %v5207_v48  ;;  %v7233_v48 = vld [vmem:[%s8597_s20 + $0x178] sm:$0xff] }
0x18c3   : > { %8152 = vmatprep.subr.mxu1 %v5202_v50  ;;  %8205 = vmatprep.subr.mxu0 %v7233_v48 }
0x18c4   : > { %8153 = vmatpush3.msra.mxu1 %v5202_v50  ;;  %8206 = vmatpush3.msra.mxu0 %v7233_v48  ;;  %v7230_v50 = vld [vmem:[%s8597_s20 + $0x160] sm:$0xff] }
0x18c5   : > { %8154 = vmatprep.subr.mxu1 %v5197_v49  ;;  %8207 = vmatprep.subr.mxu0 %v7232_v42 }
0x18c6   : > { %8155 = vmatpush3.msra.mxu1 %v5197_v49  ;;  %v7231_v49 = vld [vmem:[%s8597_s20 + $0x168] sm:$0xff]  ;;  %8208 = vmatpush3.msra.mxu0 %v7232_v42 }
0x18c7   : > { %8156 = vmatprep.subr.mxu1 %v5192_v32  ;;  %8209 = vmatprep.subr.mxu0 %v7231_v49 }
0x18c8   : > { %8157 = vmatpush3.msra.mxu1 %v5192_v32  ;;  %8210 = vmatpush3.msra.mxu0 %v7231_v49  ;;  %v8465_v32 = vld [vmem:[%s8948_s26 + $0x8] sm:$0xff] }
0x18c9   : > { %8158 = vmatprep.subr.mxu1 %v5187_v51  ;;  %8211 = vmatprep.subr.mxu0 %v7230_v50 }
0x18ca   : > { %8159 = vmatpush3.msra.mxu1 %v5187_v51  ;;  %8212 = vmatpush3.msra.mxu0 %v7230_v50  ;;  %v8466_v51 = vld [vmem:[%s8948_s26 + $0x10] sm:$0xff] }
0x18cb   : > { %8160 = vmatprep.subr.mxu1 %v5182_v28  ;;  %8214 = vmatmul.mubr.msk.f32.vlgmr.msra.gmra.mxu0 %vm1169_vm0, %v8465_v32 }
0x18cc   : > { %8161 = vmatpush3.msra.mxu1 %v5182_v28  ;;  %8216 = vmatprep.mubr.msk.f32.mxu0 %vm1169_vm0, %v8466_v51  ;;  %v8467_v28 = vld [vmem:[%s8948_s26 + $0x18] sm:$0xff] }
0x18cd   : > { %8162 = vmatprep.subr.mxu1 %v5177_v52 }
0x18ce   : > { %8163 = vmatpush3.msra.mxu1 %v5177_v52  ;;  %v8468_v52 = vld [vmem:[%s8948_s26 + $0x20] sm:$0xff] }
0x18cf   : > { %8164 = vmatprep.subr.mxu1 %v5172_v53  ;;  %8217 = vmatmul.mubr.msk.f32.gmra.mxu0 %vm1169_vm0, %v8467_v28 }
0x18d0   : > { %8165 = vmatpush3.msra.mxu1 %v5172_v53  ;;  %8219 = vmatprep.mubr.msk.f32.mxu0 %vm1169_vm0, %v8468_v52  ;;  %v8469_v53 = vld [vmem:[%s8948_s26 + $0x28] sm:$0xff] }
0x18d1   : > { %8169 = vmatprep.subr.mxu1 %v7205_v2 }
0x18d3   : > { %8220 = vmatmul.mubr.msk.f32.gmra.mxu0 %vm1169_vm0, %v8469_v53 }
0x1970   : > { %v8149_v29 = vpop.f32.mrf.mxu0 }
0x1971   : > { %v5316_v33 = vmul.f32 0.35355338, %v8149_v29 }
0x1972   : > { %v5306_v21 = vpop.f32.mrf.mxu0 }
0x1973   : > { %v5315_v22 = vmul.f32 0.35355338, %v5306_v21  ;;  %v5320_v25 = vsel %vm4086_vm6, %v5316_v33, -inf }
0x1974   : > { %5321 = vmax.xlane.f32.xlu1 %v5320_v25  ;;  %v7221_v25 = vld [vmem:[%s8602_s27 + $0x7] ss:$0 sm:$0xff] }
0x1975   : > { %v5317_v35 = vsel %vm4082_vm7, %v5315_v22, -inf }
0x1976   : > { %5318 = vmax.xlane.f32.xlu0 %v5317_v35 }
0x19fd   : > { %v5322_v54 = vpop.xlane.xlu1 %5321 }
0x19fe   : > { %v5324_v55 = vsub.f32 %v5316_v33, %v5322_v54  ;;  %v8470_v54 = vld [vmem:[%s8948_s26 + $0x30] sm:$0xff] }
0x19ff   : > { %v5319_v56 = vpop.xlane.xlu0 %5318  ;;  %8222 = vmatprep.mubr.msk.f32.mxu0 %vm1169_vm0, %v8470_v54 }
0x1a00   : > { %v5327_v57 = vmul.f32 1.442695, %v5324_v55  ;;  %v5323_v60 = vsub.f32 %v5315_v22, %v5319_v56  ;;  %v8471_v55 = vld [vmem:[%s8948_s26 + $0x38] sm:$0xff]  ;;  %s9462_s26 = sld [smem:[#allocation12_spill]] }
0x1a01   : > { %8223 = vmatmul.mubr.msk.f32.gmra.mxu0 %vm1169_vm0, %v8471_v55  ;;  %v6182_v55 = vld [vmem:[%s9457_s11 + $0x18] sm:$0xff] }
0x1a02   : > { %8425 = vpow2.f32 %v5327_v57  ;;  %v5325_v61 = vmul.f32 1.442695, %v5323_v60 }
0x1a04   : > { %8427 = vpow2.f32 %v5325_v61 }
0x1a0f   : > { %v8426_v62 = vpop.eup %8425 }
0x1a10   : > { %v5332_v63 = vsel %vm4086_vm6, %v8426_v62, 0.0 }
0x1a11   : > { %v8428_v0 = vpop.eup %8427  ;;  %5333 = vadd.xlane.f32.xlu1 %v5332_v63 }
0x1a12   : > { %v5329_v1 = vsel %vm4082_vm7, %v8428_v0, 0.0 }
0x1a13   : > { %5330 = vadd.xlane.f32.xlu0 %v5329_v1 }
0x1a9a   : > { %v5334_v3 = vpop.xlane.xlu1 %5333 }
0x1a9b   : > { %8429 = vrcp.f32 %v5334_v3 }
0x1a9c   : > { %v5331_v4 = vpop.xlane.xlu0 %5330 }
0x1a9d   : > { %8431 = vrcp.f32 %v5331_v4 }
0x1aa8   : > { %v8430_v5 = vpop.eup %8429 }
0x1aa9   : > { %v5338_v6 = vmul.f32 %v8430_v5, %v8426_v62  ;;  %v7235_v5 = vld [vmem:[%s8602_s27 + $0xb] ss:$0 sm:$0xff] }
0x1aaa   : > { %v8432_v58 = vpop.eup %8431 }
0x1aab   : > { %v5337_v59 = vmul.f32 %v8432_v58, %v8428_v0  ;;  %v8215_v0 = vpop.f32.mrf.mxu0 }
0x1aad   : > { %8166 = vmatprep.mubr.msk.f32.mxu1 %vm4082_vm7, %v5337_v59  ;;  %v5790_v1 = vpop.f32.mrf.mxu0 }
0x1aae   : > { %8167 = vmatmul.mubr.msk.f32.vlgmr.msra.gmra.mxu1 %vm4082_vm7, %v5338_v6 }
0x1aaf   : > { %8170 = vmatpush3.msra.mxu1 %v7205_v2  ;;  %v8218_v2 = vpop.f32.mrf.mxu0 }
0x1ab0   : > { %8174 = vmatprep.subr.mxu1 %v7211_v8 }
0x1ab1   : > { %v5800_v3 = vpop.f32.mrf.mxu0 }
0x1ab3   : > { %v8221_v4 = vpop.f32.mrf.mxu0 }
0x1ab5   : > { %v5810_v58 = vpop.f32.mrf.mxu0 }
0x1ac1   : > { %v8224_v59 = vpop.f32.mrf.mxu0 }
0x1ac2   : > { %v5826_v6 = vadd.f32 %v8224_v59, %v7235_v5 }
0x1ac4   : > { %8244 = vmatprep.subr.mxu0 %v5826_v6 }
0x1ac5   : > { %8245 = vmatpush3.msra.mxu0 %v5826_v6 }
0x1b6e   : > { %v8168_v10 = vpop.f32.mrf.mxu1 }
0x1b70   : > { %v5411_v11 = vpop.f32.mrf.mxu1 }
0x1b71   : > { %8171 = vmatprep.mubr.msk.f32.mxu1 %vm1621_vm1, %v5411_v11 }
0x1b72   : > { %8172 = vmatmul.mubr.msk.f32.vlgmr.msra.gmra.mxu1 %vm1621_vm1, %v8168_v10  ;;  %v5816_v10 = vadd.f32 %v8221_v4, %v7235_v5 }
0x1b73   : > { %8175 = vmatpush3.msra.mxu1 %v7211_v8  ;;  %8182 = vmatprep.mubr.msk.f32.mxu1 %vm1169_vm0, %v9070_v46  ;;  %v7216_v46 = vld [vmem:[%s8597_s20 + $0xe0] sm:$0xff]  ;;  %v5820_v8 = vpop.f32.mrf.mxu0 }
0x1b74   : > { %8176 = vmatprep.subr.mxu1 %v7210_v12  ;;  %v5821_v11 = vadd.f32 %v7235_v5, %v5820_v8 }
0x1b75   : > { %8177 = vmatpush3.msra.mxu1 %v7210_v12  ;;  %v5811_v12 = vadd.f32 %v7235_v5, %v5810_v58 }
0x1b76   : > { %8178 = vmatprep.subr.mxu1 %v7209_v13  ;;  %8246 = vmatprep.subr.mxu0 %v5821_v11 }
0x1b77   : > { %8179 = vmatpush3.msra.mxu1 %v7209_v13  ;;  %8247 = vmatpush3.msra.mxu0 %v5821_v11  ;;  %v5806_v13 = vadd.f32 %v8218_v2, %v7235_v5 }
0x1b78   : > { %8180 = vmatprep.subr.mxu1 %v7208_v14  ;;  %8248 = vmatprep.subr.mxu0 %v5816_v10 }
0x1b79   : > { %8181 = vmatpush3.msra.mxu1 %v7208_v14  ;;  %8249 = vmatpush3.msra.mxu0 %v5816_v10  ;;  %v5801_v14 = vadd.f32 %v7235_v5, %v5800_v3  ;;  %v7261_v10 = vld [vmem:[%s9460_s22] ss:$0 sm:$0xff]  ;;  %s9467_s22 = sld [smem:[#allocation16_spill]] }
0x1b7a   : > { %8183 = vmatmul.mubr.msk.f32.vlgmr.msra.gmra.mxu1 %vm1169_vm0, %v9074_v47  ;;  %8185 = vmatprep.subr.mxu1 %v7219_v31 }
0x1b7b   : > { %8186 = vmatpush3.msra.mxu1 %v7219_v31  ;;  %8193 = vmatprep.mubr.msk.f32.mxu1 %vm1169_vm0, %v8961_v20  ;;  %v5796_v31 = vadd.f32 %v8215_v0, %v7235_v5 }
0x1b7c   : > { %8187 = vmatprep.subr.mxu1 %v7218_v16  ;;  %8250 = vmatprep.subr.mxu0 %v5811_v12 }
0x1b7d   : > { %8188 = vmatpush3.msra.mxu1 %v7218_v16  ;;  %8251 = vmatpush3.msra.mxu0 %v5811_v12  ;;  %v5791_v16 = vadd.f32 %v7235_v5, %v5790_v1  ;;  %v7260_v5 = vld [vmem:[%s9459_s18] ss:$0 sm:$0xff]  ;;  %s1130_s18 = scalar_lea.vmem %s8687_s4, %s8709_s0 }
0x1b7e   : > { %8189 = vmatprep.subr.mxu1 %v7217_v18  ;;  %8252 = vmatprep.subr.mxu0 %v5806_v13 }
0x1b7f   : > { %8190 = vmatpush3.msra.mxu1 %v7217_v18  ;;  %8253 = vmatpush3.msra.mxu0 %v5806_v13 }
0x1b80   : > { %8191 = vmatprep.subr.mxu1 %v7216_v46  ;;  %8254 = vmatprep.subr.mxu0 %v5801_v14 }
0x1b81   : > { %8192 = vmatpush3.msra.mxu1 %v7216_v46  ;;  %8255 = vmatpush3.msra.mxu0 %v5801_v14  ;;  %v6279_v14 = vld [vmem:[%s9458_s16 + $0x30] sm:$0xff] }
0x1b82   : > { %8194 = vmatmul.mubr.msk.f32.vlgmr.msra.gmra.mxu1 %vm1169_vm0, %v8975_v27  ;;  %8256 = vmatprep.subr.mxu0 %v5796_v31 }
0x1b83   : > { %8196 = vmatprep.mubr.msk.f32.mxu1 %vm1169_vm0, %v8978_v30  ;;  %8257 = vmatpush3.msra.mxu0 %v5796_v31  ;;  %v6278_v31 = vld [vmem:[%s9458_s16 + $0x28] sm:$0xff] }
0x1b84   : > { %8258 = vmatprep.subr.mxu0 %v5791_v16 }
0x1b85   : > { %8259 = vmatpush3.msra.mxu0 %v5791_v16  ;;  %v6277_v16 = vld [vmem:[%s9458_s16 + $0x20] sm:$0xff] }
0x1b86   : > { %8197 = vmatmul.mubr.msk.f32.gmra.mxu1 %vm1169_vm0, %v8991_v15 }
0x1b87   : > { %8199 = vmatprep.mubr.msk.f32.mxu1 %vm1169_vm0, %v8996_v17  ;;  %v7213_v17 = vld [vmem:[%s8602_s27 + $0x3] ss:$0 sm:$0xff] }
0x1b8a   : > { %8200 = vmatmul.mubr.msk.f32.gmra.mxu1 %vm1169_vm0, %v9009_v40 }
0x1b8b   : > { %8202 = vmatprep.mubr.msk.f32.mxu1 %vm1169_vm0, %v9014_v41 }
0x1b8e   : > { %8203 = vmatmul.mubr.msk.f32.gmra.mxu1 %vm1169_vm0, %v9023_v44 }
0x1c32   : > { %v8173_v20 = vpop.f32.mrf.mxu1 }
0x1c33   : > { %v9310_v27 = vadd.f32 %v8173_v20, %v9244_v7 }
0x1c34   : > { %v5494_v30 = vpop.f32.mrf.mxu1 }
0x1c35   : > { %v9313_v15 = vadd.f32 %v5494_v30, %v9246_v9 }
0x1c3a   : > { %v8184_v47 = vpop.f32.mrf.mxu1 }
0x1c3b   : > { %v5590_v39 = vadd.f32 %v8184_v47, %v7213_v17 }
0x1c3c   : > { %v5584_v19 = vpop.f32.mrf.mxu1 }
0x1c3d   : > { %v5585_v29 = vadd.f32 %v7213_v17, %v5584_v19 }
0x1c3f   : > { %8241 = vmatprep.mubr.msk.f32.mxu1 %vm1621_vm1, %v5585_v29 }
0x1c42   : > { %v8195_v40 = vpop.f32.mrf.mxu1 }
0x1c43   : > { %v5678_v24 = vadd.f32 %v8195_v40, %v7221_v25 }
0x1c44   : > { %v5672_v41 = vpop.f32.mrf.mxu1 }
0x1c45   : > { %v5673_v38 = vadd.f32 %v7221_v25, %v5672_v41 }
0x1c46   : > { %v8198_v33 = vpop.f32.mrf.mxu1 }
0x1c47   : > { %v5688_v34 = vadd.f32 %v8198_v33, %v7221_v25  ;;  %v7256_v33 = vld [vmem:[%s9455_s7 + $0x18] sm:$0xff] }
0x1c48   : > { %v5682_v21 = vpop.f32.mrf.mxu1  ;;  %8263 = vmatprep.subr.mxu0 %v7256_v33 }
0x1c49   : > { %v5683_v37 = vadd.f32 %v7221_v25, %v5682_v21 }
0x1c4a   : > { %v8201_v44 = vpop.f32.mrf.mxu1 }
0x1c4b   : > { %v5698_v9 = vadd.f32 %v8201_v44, %v7221_v25 }
0x1c4c   : > { %v5692_v22 = vpop.f32.mrf.mxu1 }
0x1c4d   : > { %v5693_v23 = vadd.f32 %v7221_v25, %v5692_v22 }
0x1c4e   : > { %v8204_v35 = vpop.f32.mrf.mxu1 }
0x1c4f   : > { %v5708_v7 = vadd.f32 %v8204_v35, %v7221_v25 }
0x1c50   : > { %v5702_v36 = vpop.f32.mrf.mxu1 }
0x1c51   : > { %v5703_v26 = vadd.f32 %v7221_v25, %v5702_v36  ;;  %8225 = vmatprep.subr.msk.mxu1 %vm1621_vm1, %v5708_v7 }
0x1c52   : > { %8226 = vmatpush3.xpose.msk.msra.mxu1 %vm1621_vm1, %v5708_v7 }
0x1c53   : > { %8227 = vmatprep.subr.msk.mxu1 %vm1621_vm1, %v5703_v26 }
0x1c56   : > { %8228 = vmatpush3.xpose.msk.msra.mxu1 %vm1621_vm1, %v5703_v26 }
0x1c57   : > { %8229 = vmatprep.subr.msk.mxu1 %vm1621_vm1, %v5698_v9 }
0x1c5a   : > { %8230 = vmatpush3.xpose.msk.msra.mxu1 %vm1621_vm1, %v5698_v9 }
0x1c5b   : > { %8231 = vmatprep.subr.msk.mxu1 %vm1621_vm1, %v5693_v23 }
0x1c5e   : > { %8232 = vmatpush3.xpose.msk.msra.mxu1 %vm1621_vm1, %v5693_v23  ;;  %v7259_v23 = vld [vmem:[%s9456_s10] ss:$0 sm:$0xff]  ;;  %s9466_s10 = sld [smem:[#allocation17_spill]] }
0x1c5f   : > { %8233 = vmatprep.subr.msk.mxu1 %vm1621_vm1, %v5688_v34 }
0x1c62   : > { %8234 = vmatpush3.xpose.msk.msra.mxu1 %vm1621_vm1, %v5688_v34 }
0x1c63   : > { %8235 = vmatprep.subr.msk.mxu1 %vm1621_vm1, %v5683_v37 }
0x1c66   : > { %8236 = vmatpush3.xpose.msk.msra.mxu1 %vm1621_vm1, %v5683_v37 }
0x1c67   : > { %8237 = vmatprep.subr.msk.mxu1 %vm1621_vm1, %v5678_v24 }
0x1c6a   : > { %8238 = vmatpush3.xpose.msk.msra.mxu1 %vm1621_vm1, %v5678_v24 }
0x1c6b   : > { %8239 = vmatprep.subr.msk.mxu1 %vm1621_vm1, %v5673_v38 }
0x1c6e   : > { %8240 = vmatpush3.xpose.msk.msra.mxu1 %vm1621_vm1, %v5673_v38 }
0x1c71   : > { %8242 = vmatmul.mubr.msk.f32.vlgmr.msra.gmra.mxu1 %vm1621_vm1, %v5590_v39 }
0x1d31   : > { %v8243_v56 = vpop.f32.mrf.mxu1 }
0x1d32   : > { %v5935_v57 = vmul.f32 0.35355338, %v8243_v56  ;;  %v6181_v56 = vld [vmem:[%s9457_s11 + $0x10] sm:$0xff] }
0x1d33   : > { %v5925_v60 = vpop.f32.mrf.mxu1 }
0x1d34   : > { %v5934_v61 = vmul.f32 0.35355338, %v5925_v60  ;;  %v5939_v62 = vsel %vm4086_vm6, %v5935_v57, -inf  ;;  %v6179_v60 = vld [vmem:[%s9457_s11] sm:$0xff] }
0x1d35   : > { %5940 = vmax.xlane.f32.xlu1 %v5939_v62 }
0x1d36   : > { %v5936_v63 = vsel %vm4082_vm7, %v5934_v61, -inf }
0x1d37   : > { %5937 = vmax.xlane.f32.xlu0 %v5936_v63 }
0x1dbe   : > { %v5941_v18 = vpop.xlane.xlu1 %5940 }
0x1dbf   : > { %v5943_v46 = vsub.f32 %v5935_v57, %v5941_v18  ;;  %v6180_v57 = vld [vmem:[%s9457_s11 + $0x8] sm:$0xff]  ;;  %v6276_v18 = vld [vmem:[%s9458_s16 + $0x18] sm:$0xff] }
0x1dc0   : > { %v5938_v20 = vpop.xlane.xlu0 %5937 }
0x1dc1   : > { %v5946_v30 = vmul.f32 1.442695, %v5943_v46  ;;  %v5942_v47 = vsub.f32 %v5934_v61, %v5938_v20  ;;  %v6280_v61 = vld [vmem:[%s9458_s16 + $0x38] sm:$0xff]  ;;  %v6275_v46 = vld [vmem:[%s9458_s16 + $0x10] sm:$0xff]  ;;  %v6274_v20 = vld [vmem:[%s9458_s16 + $0x8] sm:$0xff] }
0x1dc3   : > { %8433 = vpow2.f32 %v5946_v30  ;;  %v5944_v17 = vmul.f32 1.442695, %v5942_v47  ;;  %v6273_v30 = vld [vmem:[%s9458_s16] sm:$0xff] }
0x1dc4   : > { %v7262_v47 = vld [vmem:[%s9461_s23] ss:$0 sm:$0xff]  ;;  %s9468_s23 = sld [smem:[#allocation18_spill]] }
0x1dc5   : > { %8435 = vpow2.f32 %v5944_v17 }
0x1dd0   : > { %v8434_v19 = vpop.eup %8433 }
0x1dd1   : > { %v5951_v29 = vsel %vm4086_vm6, %v8434_v19, 0.0 }
0x1dd2   : > { %v8436_v40 = vpop.eup %8435  ;;  %5952 = vadd.xlane.f32.xlu1 %v5951_v29 }
0x1dd3   : > { %v5948_v41 = vsel %vm4082_vm7, %v8436_v40, 0.0 }
0x1dd4   : > { %5949 = vadd.xlane.f32.xlu0 %v5948_v41 }
0x1e5b   : > { %v5953_v21 = vpop.xlane.xlu1 %5952 }
0x1e5c   : > { %8437 = vrcp.f32 %v5953_v21  ;;  %v7265_v21 = vld [vmem:[%s9462_s26] ss:$0 sm:$0xff]  ;;  %s9469_s26 = sld [smem:[#allocation2_spill]] }
0x1e5d   : > { %v5950_v44 = vpop.xlane.xlu0 %5949 }
0x1e5e   : > { %8439 = vrcp.f32 %v5950_v44 }
0x1e69   : > { %v8438_v22 = vpop.eup %8437 }
0x1e6a   : > { %v5957_v7 = vmul.f32 %v8438_v22, %v8434_v19 }
0x1e6b   : > { %v8440_v25 = vpop.eup %8439 }
0x1e6c   : > { %v5956_v35 = vmul.f32 %v8440_v25, %v8436_v40 }
0x1e6e   : > { %8260 = vmatprep.mubr.msk.f32.mxu0 %vm4082_vm7, %v5956_v35 }
0x1e6f   : > { %8261 = vmatmul.mubr.msk.f32.vlgmr.msra.gmra.mxu0 %vm4082_vm7, %v5957_v7 }
0x1e70   : > { %8264 = vmatpush3.msra.mxu0 %v7256_v33 }
0x1e71   : > { %8268 = vmatprep.subr.mxu0 %v6182_v55 }
0x1f2f   : > { %v8262_v36 = vpop.f32.mrf.mxu0 }
0x1f31   : > { %v6030_v26 = vpop.f32.mrf.mxu0 }
0x1f32   : > { %8265 = vmatprep.mubr.msk.f32.mxu0 %vm1621_vm1, %v6030_v26 }
0x1f33   : > { %8266 = vmatmul.mubr.msk.f32.vlgmr.msra.gmra.mxu0 %vm1621_vm1, %v8262_v36 }
0x1f34   : > { %8269 = vmatpush3.msra.mxu0 %v6182_v55 }
0x1f35   : > { %8270 = vmatprep.subr.mxu0 %v6181_v56 }
0x1f36   : > { %8271 = vmatpush3.msra.mxu0 %v6181_v56  ;;  %v7268_v56 = vld [vmem:[%s9464_s1] ss:$0 sm:$0xff]  ;;  %s1110_s1 = scalar_lea.vmem %s9469_s26, %s8709_s0 }
0x1f37   : > { %8272 = vmatprep.subr.mxu0 %v6180_v57 }
0x1f38   : > { %8273 = vmatpush3.msra.mxu0 %v6180_v57 }
0x1f39   : > { %8274 = vmatprep.subr.mxu0 %v6179_v60 }
0x1f3a   : > { %8275 = vmatpush3.msra.mxu0 %v6179_v60 }
0x1f3b   : > { %8279 = vmatprep.subr.mxu0 %v6280_v61 }
0x1ff3   : > { %v8267_v9 = vpop.f32.mrf.mxu0 }
0x1ff4   : > { %v6123_v34 = vadd.f32 %v8267_v9, %v9310_v27 }
0x1ff5   : > { %v6113_v37 = vpop.f32.mrf.mxu0 }
0x1ff6   : > { %v6132_v24 = vadd.f32 %v7259_v23, %v6123_v34  ;;  %v6122_v38 = vadd.f32 %v6113_v37, %v9313_v15 }
0x1ff8   : > { %v6131_v39 = vadd.f32 %v7259_v23, %v6122_v38  ;;  %v6134_v48 = vadd.f32 %v6132_v24, %v9064_v43 }
0x1ffa   : > { %v6140_v42 = vsel %vm3548_vm5, %v6134_v48, 0.0  ;;  %v6133_v49 = vadd.f32 %v6131_v39, %v9066_v45 }
0x1ffb   : > { %6141 = vadd.xlane.f32.xlu1 %v6140_v42 }
0x1ffc   : > { %v6137_v50 = vsel %vm1169_vm0, %v6133_v49, 0.0 }
0x1ffd   : > { %6138 = vadd.xlane.f32.xlu0 %v6137_v50 }
0x2084   : > { %v6142_v32 = vpop.xlane.xlu1 %6141 }
0x2085   : > { %v6144_v27 = vmul.f32 0.03125, %v6142_v32  ;;  %v6418_v32 = vld [vmem:[%s9463_s28 + $0x18] sm:$0xff] }
0x2086   : > { %v6139_v51 = vpop.xlane.xlu0 %6138  ;;  %8298 = vmatprep.subr.mxu1 %v6418_v32 }
0x2087   : > { %v6146_v28 = vsub.f32 %v6134_v48, %v6144_v27  ;;  %v6143_v15 = vmul.f32 0.03125, %v6139_v51  ;;  %v6417_v27 = vld [vmem:[%s9463_s28 + $0x10] sm:$0xff]  ;;  %8299 = vmatpush3.msra.mxu1 %v6418_v32  ;;  %v6416_v51 = vld [vmem:[%s9463_s28 + $0x8] sm:$0xff] }
0x2088   : > { %8300 = vmatprep.subr.mxu1 %v6417_v27 }
0x2089   : > { %v6145_v52 = vsub.f32 %v6133_v49, %v6143_v15  ;;  %v6148_v53 = vmul.f32 %v6146_v28, %v6146_v28  ;;  %8301 = vmatpush3.msra.mxu1 %v6417_v27 }
0x208a   : > { %8302 = vmatprep.subr.mxu1 %v6416_v51 }
0x208b   : > { %v6152_v43 = vsel %vm3548_vm5, %v6148_v53, 0.0  ;;  %v6147_v54 = vmul.f32 %v6145_v52, %v6145_v52  ;;  %8303 = vmatpush3.msra.mxu1 %v6416_v51 }
0x208c   : > { %6153 = vadd.xlane.f32.xlu1 %v6152_v43 }
0x208d   : > { %v6149_v45 = vsel %vm1169_vm0, %v6147_v54, 0.0 }
0x208e   : > { %6150 = vadd.xlane.f32.xlu0 %v6149_v45 }
0x2115   : > { %v6154_v62 = vpop.xlane.xlu1 %6153 }
0x2116   : > { %v6156_v63 = vmul.f32 0.03125, %v6154_v62 }
0x2117   : > { %v6151_v0 = vpop.xlane.xlu0 %6150 }
0x2118   : > { %v6158_v1 = vadd.f32 1e-05, %v6156_v63  ;;  %v6155_v2 = vmul.f32 0.03125, %v6151_v0 }
0x211a   : > { %8441 = vrsqrt.f32 %v6158_v1  ;;  %v6157_v3 = vadd.f32 1e-05, %v6155_v2 }
0x211c   : > { %8443 = vrsqrt.f32 %v6157_v3  ;;  %v6512_v3 = vld [vmem:[%s9466_s10 + $0x18] sm:$0xff] }
0x2127   : > { %v8442_v4 = vpop.eup %8441 }
0x2128   : > { %v6162_v58 = vmul.f32 %v8442_v4, %v6146_v28  ;;  %v6415_v28 = vld [vmem:[%s9463_s28] sm:$0xff]  ;;  %v6511_v4 = vld [vmem:[%s9466_s10 + $0x10] sm:$0xff] }
0x2129   : > { %v8444_v59 = vpop.eup %8443  ;;  %8304 = vmatprep.subr.mxu1 %v6415_v28 }
0x212a   : > { %v6161_v6 = vmul.f32 %v8444_v59, %v6145_v52  ;;  %v6170_v8 = vmul.f32 %v7260_v5, %v6162_v58  ;;  %8305 = vmatpush3.msra.mxu1 %v6415_v28  ;;  %v6509_v58 = vld [vmem:[%s9466_s10] sm:$0xff] }
0x212b   : > { %8309 = vmatprep.subr.mxu1 %v6512_v3  ;;  %v7270_v59 = vld [vmem:[%s9467_s22] ss:$0 sm:$0xff] }
0x212c   : > { %v6169_v11 = vmul.f32 %v7260_v5, %v6161_v6  ;;  %v6178_v13 = vadd.f32 %v7261_v10, %v6170_v8  ;;  %v6510_v5 = vld [vmem:[%s9466_s10 + $0x8] sm:$0xff] }
0x212e   : > { %v6177_v12 = vadd.f32 %v7261_v10, %v6169_v11 }
0x2130   : > { %8276 = vmatprep.mubr.msk.f32.mxu0 %vm1169_vm0, %v6177_v12 }
0x2131   : > { %8277 = vmatmul.mubr.msk.f32.vlgmr.msra.gmra.mxu0 %vm1169_vm0, %v6178_v13 }
0x2132   : > { %8280 = vmatpush3.msra.mxu0 %v6280_v61  ;;  %v7269_v61 = vld [vmem:[%s9465_s2] ss:$0 sm:$0xff]  ;;  %s1135_s2 = scalar_lea.vmem %s8692_s9, %s8709_s0 }
0x2133   : > { %8281 = vmatprep.subr.mxu0 %v6279_v14 }
0x2134   : > { %8282 = vmatpush3.msra.mxu0 %v6279_v14  ;;  %v6606_v14 = vld [vmem:[%s8677_s12 + $0x18] sm:$0xff] }
0x2135   : > { %8283 = vmatprep.subr.mxu0 %v6278_v31 }
0x2136   : > { %8284 = vmatpush3.msra.mxu0 %v6278_v31  ;;  %v6605_v31 = vld [vmem:[%s8677_s12 + $0x10] sm:$0xff] }
0x2137   : > { %8285 = vmatprep.subr.mxu0 %v6277_v16 }
0x2138   : > { %8286 = vmatpush3.msra.mxu0 %v6277_v16  ;;  %v6604_v16 = vld [vmem:[%s8677_s12 + $0x8] sm:$0xff] }
0x2139   : > { %8287 = vmatprep.subr.mxu0 %v6276_v18 }
0x213a   : > { %8288 = vmatpush3.msra.mxu0 %v6276_v18  ;;  %v6603_v18 = vld [vmem:[%s8677_s12] sm:$0xff] }
0x213b   : > { %8289 = vmatprep.subr.mxu0 %v6275_v46 }
0x213c   : > { %8290 = vmatpush3.msra.mxu0 %v6275_v46  ;;  %v7273_v46 = vld [vmem:[%s9468_s23] ss:$0 sm:$0xff] }
0x213d   : > { %8291 = vmatprep.subr.mxu0 %v6274_v20 }
0x213e   : > { %8292 = vmatpush3.msra.mxu0 %v6274_v20 }
0x213f   : > { %8293 = vmatprep.subr.mxu0 %v6273_v30 }
0x2140   : > { %8294 = vmatpush3.msra.mxu0 %v6273_v30 }
0x2141   : > { %8320 = vmatprep.subr.mxu0 %v6606_v14 }
0x21f1   : > { %v8278_v17 = vpop.f32.mrf.mxu0 }
0x21f2   : > { %v6268_v19 = vadd.f32 %v8278_v17, %v7262_v47 }
0x21f3   : > { %v6262_v29 = vpop.f32.mrf.mxu0 }
0x21f4   : > { %v6263_v40 = vadd.f32 %v7262_v47, %v6262_v29  ;;  %v6272_v33 = vmax.f32 %v6268_v19, 0.0 }
0x21f6   : > { %v6271_v41 = vmax.f32 %v6263_v40, 0.0  ;;  %v1139_v40 = vld [vmem:[%s1110_s1 + $0x8] sm:$0x3] }
0x21f8   : > { %8295 = vmatprep.mubr.msk.f32.mxu0 %vm4082_vm7, %v6271_v41  ;;  %v1138_v41 = vld [vmem:[%s1110_s1] sm:$0xff] }
0x21f9   : > { %8296 = vmatmul.mubr.msk.f32.vlgmr.msra.gmra.mxu0 %vm4082_vm7, %v6272_v33  ;;  %v6698_v33 = vmax.f32 %v1139_v40, 0.0 }
0x21fa   : > { %8321 = vmatpush3.msra.mxu0 %v6606_v14 }
0x21fb   : > { %8322 = vmatprep.subr.mxu0 %v6605_v31 }
0x21fc   : > { %8323 = vmatpush3.msra.mxu0 %v6605_v31 }
0x21fd   : > { %8324 = vmatprep.subr.mxu0 %v6604_v16 }
0x21fe   : > { %8325 = vmatpush3.msra.mxu0 %v6604_v16 }
0x21ff   : > { %8326 = vmatprep.subr.mxu0 %v6603_v18 }
0x2200   : > { %8327 = vmatpush3.msra.mxu0 %v6603_v18 }
0x22b9   : > { %v8297_v44 = vpop.f32.mrf.mxu0 }
0x22ba   : > { %v6366_v22 = vadd.f32 %v8297_v44, %v7265_v21  ;;  %v6700_v44 = vmin.f32 %v6698_v33, 1.0 }
0x22bb   : > { %v6360_v25 = vpop.f32.mrf.mxu0 }
0x22bc   : > { %v6361_v35 = vadd.f32 %v7265_v21, %v6360_v25  ;;  %v6370_v7 = vadd.f32 %v6366_v22, %v6178_v13  ;;  %v6697_v21 = vmax.f32 %v1138_v41, 0.0  ;;  %v6704_v25 = vsub.f32 1.0, %v6700_v44 }
0x22be   : > { %v6376_v36 = vsel %vm3548_vm5, %v6370_v7, 0.0  ;;  %v6369_v26 = vadd.f32 %v6361_v35, %v6177_v12  ;;  %v6699_v22 = vmin.f32 %v6697_v21, 1.0 }
0x22bf   : > { %6377 = vadd.xlane.f32.xlu1 %v6376_v36 }
0x22c0   : > { %v6373_v9 = vsel %vm1169_vm0, %v6369_v26, 0.0  ;;  %v6703_v35 = vsub.f32 1.0, %v6699_v22 }
0x22c1   : > { %6374 = vadd.xlane.f32.xlu0 %v6373_v9 }
0x22c2   : > { %v6705_v36 = vmax.f32 %v6703_v35, 0.001 }
0x2348   : > { %v6378_v23 = vpop.xlane.xlu1 %6377 }
0x2349   : > { %v6380_v34 = vmul.f32 0.03125, %v6378_v23  ;;  %v6701_v23 = vmax.f32 %v6699_v22, 0.001 }
0x234a   : > { %v6375_v37 = vpop.xlane.xlu0 %6374 }
0x234b   : > { %v6382_v24 = vsub.f32 %v6370_v7, %v6380_v34  ;;  %v6379_v38 = vmul.f32 0.03125, %v6375_v37  ;;  %v6706_v7 = vmax.f32 %v6704_v25, 0.001 }
0x234d   : > { %v6381_v39 = vsub.f32 %v6369_v26, %v6379_v38  ;;  %v6384_v48 = vmul.f32 %v6382_v24, %v6382_v24  ;;  %v6702_v26 = vmax.f32 %v6700_v44, 0.001 }
0x234f   : > { %v6388_v42 = vsel %vm3548_vm5, %v6384_v48, 0.0  ;;  %v6383_v49 = vmul.f32 %v6381_v39, %v6381_v39  ;;  %v7276_v48 = vld [vmem:[%s8682_s6] ss:$0 sm:$0xff] }
0x2350   : > { %6389 = vadd.xlane.f32.xlu1 %v6388_v42 }
0x2351   : > { %v6385_v50 = vsel %vm1169_vm0, %v6383_v49, 0.0 }
0x2352   : > { %6386 = vadd.xlane.f32.xlu0 %v6385_v50 }
0x23d9   : > { %v6390_v15 = vpop.xlane.xlu1 %6389 }
0x23da   : > { %v6392_v52 = vmul.f32 0.03125, %v6390_v15 }
0x23db   : > { %v6387_v53 = vpop.xlane.xlu0 %6386 }
0x23dc   : > { %v6394_v43 = vadd.f32 1e-05, %v6392_v52  ;;  %v6391_v54 = vmul.f32 0.03125, %v6387_v53 }
0x23de   : > { %8445 = vrsqrt.f32 %v6394_v43  ;;  %v6393_v45 = vadd.f32 1e-05, %v6391_v54 }
0x23e0   : > { %8447 = vrsqrt.f32 %v6393_v45 }
0x23e1   : > { %8449 = vrcp.f32 %v6706_v7 }
0x23e2   : > { %8451 = vrcp.f32 %v6705_v36 }
0x23eb   : > { %v8446_v55 = vpop.eup %8445 }
0x23ec   : > { %v6398_v57 = vmul.f32 %v8446_v55, %v6382_v24 }
0x23ed   : > { %v8448_v60 = vpop.eup %8447 }
0x23ee   : > { %v6397_v62 = vmul.f32 %v8448_v60, %v6381_v39  ;;  %v6406_v63 = vmul.f32 %v7268_v56, %v6398_v57  ;;  %v8450_v9 = vpop.eup %8449 }
0x23ef   : > { %v8452_v34 = vpop.eup %8451  ;;  %v6710_v37 = vmul.f32 %v8450_v9, %v6702_v26 }
0x23f0   : > { %v6405_v0 = vmul.f32 %v7268_v56, %v6397_v62  ;;  %v6414_v1 = vadd.f32 %v7269_v61, %v6406_v63  ;;  %v6708_v24 = vmul.f32 %v8452_v34, %v6701_v23 }
0x23f1   : > { %8453 = vlog2.f32 %v6710_v37 }
0x23f2   : > { %v6413_v2 = vadd.f32 %v7269_v61, %v6405_v0  ;;  %6696 = vst.msk [vmem:[%s1130_s18 + $0x8] sm:$0x3] %vm3548_vm5, %v6414_v1  ;;  %8455 = vlog2.f32 %v6708_v24 }
0x23f4   : > { %8306 = vmatprep.mubr.msk.f32.mxu1 %vm1169_vm0, %v6413_v2  ;;  %6695 = vst.msk [vmem:[%s1130_s18] sm:$0xff] %vm1169_vm0, %v6413_v2 }
0x23f5   : > { %8307 = vmatmul.mubr.msk.f32.vlgmr.msra.gmra.mxu1 %vm1169_vm0, %v6414_v1 }
0x23f6   : > { %8310 = vmatpush3.msra.mxu1 %v6512_v3 }
0x23f7   : > { %8311 = vmatprep.subr.mxu1 %v6511_v4 }
0x23f8   : > { %8312 = vmatpush3.msra.mxu1 %v6511_v4 }
0x23f9   : > { %8313 = vmatprep.subr.mxu1 %v6510_v5 }
0x23fa   : > { %8314 = vmatpush3.msra.mxu1 %v6510_v5 }
0x23fb   : > { %8315 = vmatprep.subr.mxu1 %v6509_v58 }
0x23fc   : > { %8316 = vmatpush3.msra.mxu1 %v6509_v58 }
0x23fe   : > { %v8454_v38 = vpop.eup %8453 }
0x23ff   : > { %v8456_v39 = vpop.eup %8455  ;;  %v6714_v42 = vmul.f32 0.6931472, %v8454_v38 }
0x2400   : > { %v6712_v32 = vmul.f32 0.6931472, %v8456_v39 }
0x24b5   : > { %v8308_v6 = vpop.f32.mrf.mxu1 }
0x24b6   : > { %v6504_v8 = vadd.f32 %v8308_v6, %v7270_v59 }
0x24b7   : > { %v6498_v10 = vpop.f32.mrf.mxu1 }
0x24b8   : > { %v6499_v11 = vadd.f32 %v7270_v59, %v6498_v10  ;;  %v6508_v13 = vmax.f32 %v6504_v8, 0.0 }
0x24ba   : > { %v6507_v12 = vmax.f32 %v6499_v11, 0.0 }
0x24bc   : > { %8317 = vmatprep.mubr.msk.f32.mxu1 %vm1169_vm0, %v6507_v12 }
0x24bd   : > { %8318 = vmatmul.mubr.msk.f32.vlgmr.msra.gmra.mxu1 %vm1169_vm0, %v6508_v13 }
0x257d   : > { %v8319_v20 = vpop.f32.mrf.mxu1 }
0x257e   : > { %v6598_v30 = vadd.f32 %v8319_v20, %v7273_v46 }
0x257f   : > { %v6592_v47 = vpop.f32.mrf.mxu1 }
0x2580   : > { %v6593_v17 = vadd.f32 %v7273_v46, %v6592_v47  ;;  %v6602_v29 = vmax.f32 %v6598_v30, 0.0 }
0x2582   : > { %v6601_v19 = vmax.f32 %v6593_v17, 0.0 }
0x2584   : > { %8328 = vmatprep.mubr.msk.f32.mxu0 %vm1169_vm0, %v6601_v19 }
0x2585   : > { %8329 = vmatmul.mubr.msk.f32.vlgmr.msra.gmra.mxu0 %vm1169_vm0, %v6602_v29 }
0x2645   : > { %v8330_v49 = vpop.f32.mrf.mxu0 }
0x2646   : > { %v6692_v50 = vadd.f32 %v8330_v49, %v7276_v48 }
0x2647   : > { %v6686_v27 = vpop.f32.mrf.mxu0 }
0x2648   : > { %v6716_v51 = vadd.f32 %v6714_v42, %v6692_v50  ;;  %v6687_v28 = vadd.f32 %v7276_v48, %v6686_v27 }
0x264a   : > { %v6718_v15 = vsub.f32 0.0, %v6716_v51  ;;  %v6715_v52 = vadd.f32 %v6712_v32, %v6687_v28 }
0x264c   : > { %v6721_v53 = vmul.f32 1.442695, %v6718_v15  ;;  %v6717_v43 = vsub.f32 0.0, %v6715_v52 }
0x264e   : > { %8457 = vpow2.f32 %v6721_v53  ;;  %v6719_v54 = vmul.f32 1.442695, %v6717_v43 }
0x2650   : > { %8459 = vpow2.f32 %v6719_v54 }
0x265b   : > { %v8458_v45 = vpop.eup %8457 }
0x265c   : > { %v6724_v55 = vadd.f32 1.0, %v8458_v45 }
0x265d   : > { %v8460_v56 = vpop.eup %8459 }
0x265e   : > { %8461 = vrcp.f32 %v6724_v55  ;;  %v6723_v57 = vadd.f32 1.0, %v8460_v56 }
0x2660   : > { %8463 = vrcp.f32 %v6723_v57 }
0x266b   : > { %v8462_v60 = vpop.eup %8461 }
0x266c   : > { %6732 = vst.msk [vmem:[%s1135_s2 + $0x8] sm:$0x3] %vm6731_vm8, %v8462_v60 }
0x266d   : > { %v8464_v61 = vpop.eup %8463 }
0x266e   : > { %6730 = vst.msk [vmem:[%s1135_s2] sm:$0xff] %vm6729_vm9, %v8464_v61 }
0x266f PF: > { %s80_s15 = sadd.s32 1, %s8478_s15  }
0x2670   : > { %p77_p4 = scmp.ge.s32.totalorder %s80_s15, 4  }
0x2672   :  { %79 = sbr.rel (!%p77_p4) target bundleno = 53 (0x35), region = 290 }

</bundles_post_ra>
